<compile_context>
chip_gen: v7x
topology: tpu7x:2x2x1
jax: 0.10.0
libtpu: 0.0.40
codegen_flags: <defaults>
</compile_context>

<pallas_src>
import functools

import numpy as np

import jax
import jax.numpy as jnp
from jax.experimental import pallas as pl
from jax.experimental.pallas import tpu as pltpu

LN_EPS = 1e-5
BN_EPS = 1e-5


# ----------------------------- math helpers (traced inside kernels) -----------------------------

def _swish(x):
    return x * jax.nn.sigmoid(x)


def _selu(x):
    scale = 1.0507009873554805
    alpha = 1.6732632423543772
    return scale * jnp.where(x > 0.0, x, alpha * (jnp.exp(x) - 1.0))


def _erf(x):
    # Abramowitz & Stegun 7.1.26 rational approximation, |err| < 1.5e-7.
    # float32-exact stand-in for lax.erf so that exact nn.GELU lowers on TPU.
    p = 0.3275911
    a1, a2, a3, a4, a5 = 0.254829592, -0.284496736, 1.421413741, -1.453152027, 1.061405429
    sign = jnp.where(x >= 0.0, 1.0, -1.0)
    ax = jnp.abs(x)
    t = 1.0 / (1.0 + p * ax)
    poly = ((((a5 * t + a4) * t + a3) * t + a2) * t + a1) * t
    return sign * (1.0 - poly * jnp.exp(-ax * ax))


def _gelu_exact(x):
    return 0.5 * x * (1.0 + _erf(x * 0.7071067811865476))


# ----------------------------- Pallas kernels -----------------------------

def _frontend_kernel(x_ref, llw_ref, llb_ref, bng_ref, bnb_ref, pos_ref, cls_ref,
                     o_ref, *, B, Ns):
    # LL: Linear(1024 -> C)
    h = jnp.dot(x_ref[...], llw_ref[...], preferred_element_type=jnp.float32) + llb_ref[...]

    # BatchNorm2d(num_features=1), training-mode stats over all B*Ns*C elements.
    mu = jnp.mean(jnp.mean(h, axis=1, keepdims=True), axis=0, keepdims=True)       # (1, 1)
    var = jnp.mean(jnp.mean((h - mu) ** 2, axis=1, keepdims=True), axis=0, keepdims=True)
    h = (h - mu) * jax.lax.rsqrt(var + BN_EPS) * bng_ref[...] + bnb_ref[...]
    h = _selu(h)

    pos = pos_ref[...]                       # (Ns, C) sinusoidal positional embedding
    cls = cls_ref[...]                       # (1, C) class token (shared across batch)
    rows = []
    for b in range(B):
        rows.append(cls)
        rows.append(h[b * Ns:(b + 1) * Ns, :] + pos)
    o_ref[...] = jnp.concatenate(rows, axis=0)           # (B*(Ns+1), C)


def _conformer_block_kernel(
        # activations
        x_ref,
        # ff1
        ff1_ln_g, ff1_ln_b, ff1_w1, ff1_b1, ff1_w2, ff1_b2,
        # attention
        at_ln_g, at_ln_b, ht_w_ref, ht_b_ref, htn_g_ref, htn_b_ref, chunk_avg_ref,
        pos_ref, qkv_w_ref, proj_w_ref, proj_b_ref,
        # conv module
        cv_ln_g, cv_ln_b, pw1_w, pw1_b, dw_w_ref, dw_b, bn_g, bn_b, pw2_w, pw2_b,
        # ff2
        ff2_ln_g, ff2_ln_b, ff2_w1, ff2_b1, ff2_w2, ff2_b2,
        # post norm
        po_ln_g, po_ln_b,
        # outputs
        y_ref, attn_ref,
        *, B, N, C, H, Dh, inner, K, pad_l, pad_r, scale):

    T = N + H

    def _ln(v, g_ref, b_ref):
        mu = jnp.mean(v, axis=-1, keepdims=True)
        var = jnp.mean((v - mu) ** 2, axis=-1, keepdims=True)
        return (v - mu) * jax.lax.rsqrt(var + LN_EPS) * g_ref[...] + b_ref[...]

    def _ffn(v, g_ref, b_ref, w1_ref, b1_ref, w2_ref, b2_ref):
        h = _ln(v, g_ref, b_ref)
        h = _swish(jnp.dot(h, w1_ref[...], preferred_element_type=jnp.float32) + b1_ref[...])
        return jnp.dot(h, w2_ref[...], preferred_element_type=jnp.float32) + b2_ref[...]

    x = x_ref[...]                                          # (B*N, C)

    # ---------------- FF1 (half-step residual) ----------------
    x = x + 0.5 * _ffn(x, ff1_ln_g, ff1_ln_b, ff1_w1, ff1_b1, ff1_w2, ff1_b2)

    # ---------------- Attention (PreNorm) ----------------
    xa = _ln(x, at_ln_g, at_ln_b)                           # (B*N, C)

    # hoisted weight loads (reused across the unrolled batch/head loops)
    ht_w = ht_w_ref[...]                                    # (Dh, C)
    ht_b = ht_b_ref[...]                                    # (1, C)
    htn_g = htn_g_ref[...]                                  # (1, C)  (gamma tiled per Dh-chunk)
    htn_b = htn_b_ref[...]                                  # (1, C)
    chunk_avg = chunk_avg_ref[...]                          # (C, C)  per-Dh-chunk averaging matrix
    pos = pos_ref[...]                                      # (H, C)
    qkv_w = qkv_w_ref[...]                                  # (C, 3C) -- qkv_bias=False: no bias term
    proj_w = proj_w_ref[...]                                # (C, C)
    proj_b = proj_b_ref[...]                                # (1, C)

    att_rows = []
    for b in range(B):
        xb = xa[b * N:(b + 1) * N, :]                       # (N, C)  aligned static slice
        xm = jnp.mean(xb, axis=0, keepdims=True)            # (1, C)  per-head chunk means live here

        # head tokens: per-head Linear(Dh -> C), chunked LayerNorm(Dh), exact GELU, + pos_embed
        ht_tokens = []
        for h in range(H):
            t = jnp.dot(xm[:, h * Dh:(h + 1) * Dh], ht_w,
                        preferred_element_type=jnp.float32) + ht_b          # (1, C)
            mu = jnp.dot(t, chunk_avg, preferred_element_type=jnp.float32)  # per-chunk mean
            ct = t - mu
            var = jnp.dot(ct * ct, chunk_avg, preferred_element_type=jnp.float32)
            t = ct * jax.lax.rsqrt(var + LN_EPS) * htn_g + htn_b
            t = _gelu_exact(t)
            t = t + pos[h:h + 1, :]
            ht_tokens.append(t)

        xc = jnp.concatenate([xb] + ht_tokens, axis=0)      # (T, C)
        qkv = jnp.dot(xc, qkv_w, preferred_element_type=jnp.float32)        # (T, 3C), no bias

        o = None
        for h in range(H):
            q = qkv[:, h * Dh:(h + 1) * Dh]                                 # (T, Dh)
            kh = qkv[:, C + h * Dh:C + (h + 1) * Dh]
            vh = qkv[:, 2 * C + h * Dh:2 * C + (h + 1) * Dh]
            s = jnp.dot(q, kh.T, preferred_element_type=jnp.float32) * scale
            m = jnp.max(s, axis=-1, keepdims=True)
            e = jnp.exp(s - m)
            a = e * pl.reciprocal(jnp.sum(e, axis=-1, keepdims=True), approx=True)
            attn_ref[b, h] = a                                              # (T, T)
            oh = jnp.dot(a, vh, preferred_element_type=jnp.float32)         # (T, Dh)
            # proj applied blockwise: concat(o_h) @ W == sum_h o_h @ W[h*Dh:(h+1)*Dh, :]
            ph = jnp.dot(oh, proj_w[h * Dh:(h + 1) * Dh, :],
                         preferred_element_type=jnp.float32)                # (T, C)
            o = ph if o is None else o + ph
        o = o + proj_b                                                      # (T, C)

        cls = o[0:1, :]
        patch = o[1:N, :]
        htp = o[N:T, :]
        cls = cls + jnp.mean(htp, axis=0, keepdims=True) + jnp.mean(patch, axis=0, keepdims=True)
        att_rows.append(jnp.concatenate([cls, patch], axis=0))              # (N, C)

    x = x + jnp.concatenate(att_rows, axis=0)                               # (B*N, C)

    # ---------------- Conv module ----------------
    hc = _ln(x, cv_ln_g, cv_ln_b)
    hg = jnp.dot(hc, pw1_w[...], preferred_element_type=jnp.float32) + pw1_b[...]   # (B*N, 2*inner)
    hglu = hg[:, :inner] * jax.nn.sigmoid(hg[:, inner:])                            # GLU(dim=channels)

    wdw = dw_w_ref[...]                                     # (K, inner): tap k, channel c
    zl = jnp.zeros((pad_l, inner), jnp.float32)
    zr = jnp.zeros((pad_r, inner), jnp.float32) if pad_r > 0 else None
    conv_rows = []
    for b in range(B):
        gb = hglu[b * N:(b + 1) * N, :]                     # (N, inner)
        pieces = [zl, gb] + ([zr] if zr is not None else [])
        hp = jnp.concatenate(pieces, axis=0)                # (N + K - 1, inner)
        acc = hp[0:N, :] * wdw[0:1, :]
        for tap in range(1, K):                             # static, unrolled, VMEM-resident taps
            acc = acc + hp[tap:tap + N, :] * wdw[tap:tap + 1, :]
        conv_rows.append(acc)
    hdw = jnp.concatenate(conv_rows, axis=0) + dw_b[...]    # (B*N, inner)

    # BatchNorm1d (training-mode batch statistics over all B*N tokens) + Swish
    mu = jnp.mean(hdw, axis=0, keepdims=True)
    var = jnp.mean((hdw - mu) ** 2, axis=0, keepdims=True)
    hbn = (hdw - mu) * jax.lax.rsqrt(var + BN_EPS) * bn_g[...] + bn_b[...]
    hbn = _swish(hbn)
    x = x + jnp.dot(hbn, pw2_w[...], preferred_element_type=jnp.float32) + pw2_b[...]

    # ---------------- FF2 (half-step) + post norm ----------------
    x = x + 0.5 * _ffn(x, ff2_ln_g, ff2_ln_b, ff2_w1, ff2_b1, ff2_w2, ff2_b2)
    y_ref[...] = _ln(x, po_ln_g, po_ln_b)


def _classifier_kernel(x_ref, w_ref, b_ref, o_ref, *, B, N):
    x = x_ref[...]
    emb = jnp.concatenate([x[b * N:b * N + 1, :] for b in range(B)], axis=0)   # (B, C) cls tokens
    o_ref[...] = jnp.dot(emb, w_ref[...], preferred_element_type=jnp.float32) + b_ref[...]


# ----------------------------- pallas_call plumbing -----------------------------

def _fullspec(shape):
    nd = len(shape)
    return pl.BlockSpec(shape, lambda i, _nd=nd: (0,) * _nd)


def _run_fused(kernel, args, out_shapes):
    # All arrays are tiny relative to VMEM (weights per block ~1.7 MB fp32), so each
    # array is a single full block.  NOTE(v7x): if the model is scaled up, tile the
    # token axis instead of using whole-array blocks and set vmem_limit_bytes.
    out_shape = tuple(jax.ShapeDtypeStruct(s, jnp.float32) for s in out_shapes)
    out_specs = tuple(_fullspec(s) for s in out_shapes)
    if len(out_shape) == 1:
        out_shape, out_specs = out_shape[0], out_specs[0]
    return pl.pallas_call(
        kernel,
        out_shape=out_shape,
        grid=(1,),
        in_specs=[_fullspec(a.shape) for a in args],
        out_specs=out_specs,
        compiler_params=pltpu.CompilerParams(dimension_semantics=("arbitrary",)),
    )(*args)


def frontend_forward(x_ssl, p, *, B, Ns):
    D = x_ssl.shape[-1]
    C = p["ll_w"].shape[1]
    x2 = x_ssl.reshape(B * Ns, D)
    pos = p["pos_emb"][:Ns, :]
    args = [x2, p["ll_w"], p["ll_b"], p["bn2_g"], p["bn2_b"], pos, p["cls_tok"]]
    kernel = functools.partial(_frontend_kernel, B=B, Ns=Ns)
    return _run_fused(kernel, args, [(B * (Ns + 1), C)])


def conformer_block_forward(x2, p, *, B, N, heads, kernel_size):
    C = x2.shape[1]
    H, Dh = heads, C // heads
    inner = p["pw2_w"].shape[0]
    K = kernel_size
    pad_l = K // 2
    pad_r = pad_l - (K + 1) % 2           # calc_same_padding
    T = N + H
    scale = float(Dh) ** -0.5

    args = [
        x2,
        p["ff1_ln_g"], p["ff1_ln_b"], p["ff1_w1"], p["ff1_b1"], p["ff1_w2"], p["ff1_b2"],
        p["attn_ln_g"], p["attn_ln_b"], p["ht_w"], p["ht_b"],
        p["ht_norm_g_t"], p["ht_norm_b_t"], p["chunk_avg"], p["pos_embed"],
        p["qkv_w"], p["proj_w"], p["proj_b"],
        p["conv_ln_g"], p["conv_ln_b"], p["pw1_w"], p["pw1_b"],
        p["dw_w"], p["dw_b"], p["bn_g"], p["bn_b"], p["pw2_w"], p["pw2_b"],
        p["ff2_ln_g"], p["ff2_ln_b"], p["ff2_w1"], p["ff2_b1"], p["ff2_w2"], p["ff2_b2"],
        p["post_ln_g"], p["post_ln_b"],
    ]
    kernel = functools.partial(
        _conformer_block_kernel, B=B, N=N, C=C, H=H, Dh=Dh,
        inner=inner, K=K, pad_l=pad_l, pad_r=pad_r, scale=scale)
    y, attn = _run_fused(kernel, args, [(B * N, C), (B, H, T, T)])
    return y, attn


def classifier_forward(y2, p, *, B, N):
    kernel = functools.partial(_classifier_kernel, B=B, N=N)
    return _run_fused(kernel, [y2, p["fc5_w"], p["fc5_b"]], [(B, p["fc5_w"].shape[1])])


@functools.partial(jax.jit, static_argnames=("heads", "kernel_size"))
def tcm_add_forward(x_ssl_feat, params, *, heads, kernel_size):
    # TODO(synk): SSLModel (fairseq XLS-R wav2vec2 feature extractor) needs an external
    # checkpoint and has no Pallas equivalent; this forward consumes its output features.
    B, Ns, _ = x_ssl_feat.shape
    N = Ns + 1                                              # + class token
    x2 = frontend_forward(x_ssl_feat, params["frontend"], B=B, Ns=Ns)      # (B*N, C)
    attn_list = []
    for blk in params["blocks"]:
        x2, attn = conformer_block_forward(x2, blk, B=B, N=N,
                                           heads=heads, kernel_size=kernel_size)
        attn_list.append(attn)
    logits = classifier_forward(x2, params["head"], B=B, N=N)              # (B, 2)
    return logits, attn_list


# ------------------------------ parameters ------------------------------

def _sinusoidal_embedding(n_positions, dim):
    pos = np.arange(n_positions, dtype=np.float32)[:, None]
    i = np.arange(dim, dtype=np.float32)[None, :]
    angle = pos / np.power(10000.0, 2.0 * np.floor(i / 2.0) / dim)
    pe = np.zeros((n_positions, dim), dtype=np.float32)
    pe[:, 0::2] = np.sin(angle[:, 0::2])
    pe[:, 1::2] = np.cos(angle[:, 1::2])
    return jnp.asarray(pe)


def init_params(key, *, emb, heads, ff_mult, exp_fac, kernel_size, n_encoders,
                ssl_dim, max_pos):
    C, H = emb, heads
    Dh = C // H
    ffd = C * ff_mult
    inner = C * exp_fac
    K = kernel_size

    keys = iter(jax.random.split(key, 8 + 24 * n_encoders))
    nk = lambda: next(keys)
    nrm = lambda k, shape, s=0.05: jax.random.normal(k, shape, jnp.float32) * s
    ones = lambda *s: jnp.ones(s, jnp.float32)
    zeros = lambda *s: jnp.zeros(s, jnp.float32)

    # per-Dh-chunk averaging matrix for the head-token LayerNorm(dim_head)
    cid = np.arange(C) // Dh
    chunk_avg = jnp.asarray((cid[:, None] == cid[None, :]).astype(np.float32) / Dh)

    blocks = []
    for _ in range(n_encoders):
        ht_norm_g = ones(1, Dh)       # LayerNorm(dim_head) init: weight=1, bias=0
        ht_norm_b = zeros(1, Dh)
        blocks.append(dict(
            ff1_ln_g=ones(1, C), ff1_ln_b=zeros(1, C),
            ff1_w1=nrm(nk(), (C, ffd)), ff1_b1=nrm(nk(), (1, ffd), 0.01),
            ff1_w2=nrm(nk(), (ffd, C)), ff1_b2=nrm(nk(), (1, C), 0.01),
            attn_ln_g=ones(1, C), attn_ln_b=zeros(1, C),
            ht_w=nrm(nk(), (Dh, C)), ht_b=nrm(nk(), (1, C), 0.01),
            ht_norm_g_t=jnp.tile(ht_norm_g, (1, H)),
            ht_norm_b_t=jnp.tile(ht_norm_b, (1, H)),
            chunk_avg=chunk_avg,
            pos_embed=zeros(H, C),                      # nn.Parameter(torch.zeros(1, H, dim))
            qkv_w=nrm(nk(), (C, 3 * C)),                # qkv_bias=False
            proj_w=nrm(nk(), (C, C)), proj_b=nrm(nk(), (1, C), 0.01),
            conv_ln_g=ones(1, C), conv_ln_b=zeros(1, C),
            pw1_w=nrm(nk(), (C, 2 * inner)), pw1_b=nrm(nk(), (1, 2 * inner), 0.01),
            dw_w=nrm(nk(), (K, inner)), dw_b=nrm(nk(), (1, inner), 0.01),
            bn_g=ones(1, inner), bn_b=zeros(1, inner),
            pw2_w=nrm(nk(), (inner, C)), pw2_b=nrm(nk(), (1, C), 0.01),
            ff2_ln_g=ones(1, C), ff2_ln_b=zeros(1, C),
            ff2_w1=nrm(nk(), (C, ffd)), ff2_b1=nrm(nk(), (1, ffd), 0.01),
            ff2_w2=nrm(nk(), (ffd, C)), ff2_b2=nrm(nk(), (1, C), 0.01),
            post_ln_g=ones(1, C), post_ln_b=zeros(1, C),
        ))

    frontend = dict(
        ll_w=nrm(nk(), (ssl_dim, C)), ll_b=nrm(nk(), (1, C), 0.01),
        bn2_g=ones(1, 1), bn2_b=zeros(1, 1),
        pos_emb=_sinusoidal_embedding(max_pos, C),
        cls_tok=jax.random.uniform(nk(), (1, C), jnp.float32),    # torch.rand init
    )
    head = dict(fc5_w=nrm(nk(), (C, 2)), fc5_b=nrm(nk(), (1, 2), 0.01))
    return dict(frontend=frontend, blocks=blocks, head=head)


# --------------------------------- main ---------------------------------

if __name__ == "__main__":
    key = jax.random.PRNGKey(0)

    # MyConformer defaults: emb_size=128, heads=4, kernel_size=16, n_encoders=1.
    B, Ns, ssl_dim = 2, 7, 1024          # 7 SSL frames -> 8 tokens after the class token
    emb, heads, ksize, n_enc = 128, 4, 16, 1

    kx, kp = jax.random.split(key)
    x_ssl_feat = jax.random.normal(kx, (B, Ns, ssl_dim), jnp.float32)
    params = init_params(kp, emb=emb, heads=heads, ff_mult=4, exp_fac=2,
                         kernel_size=ksize, n_encoders=n_enc,
                         ssl_dim=ssl_dim, max_pos=Ns)

    logits, attn_list = tcm_add_forward(x_ssl_feat, params, heads=heads, kernel_size=ksize)
    jax.block_until_ready(logits)
    jax.block_until_ready(attn_list[0])

    N = Ns + 1
    T = N + heads
    assert logits.shape == (B, 2)
    assert len(attn_list) == n_enc
    assert attn_list[0].shape == (B, heads, T, T)
    assert bool(jnp.all(jnp.isfinite(logits)))
    assert bool(jnp.all(jnp.isfinite(attn_list[0])))
    print("KERNEL_OK")
</pallas_src>

<mosaic_0001>
module attributes {stable_mosaic.version = 11 : i64} {
  func.func @_frontend_kernel(%arg0: i32, %arg1: memref<14x1024xf32, #tpu.memory_space<vmem>>, %arg2: memref<1024x128xf32, #tpu.memory_space<vmem>>, %arg3: memref<1x128xf32, #tpu.memory_space<vmem>>, %arg4: memref<1x1xf32, #tpu.memory_space<vmem>>, %arg5: memref<1x1xf32, #tpu.memory_space<vmem>>, %arg6: memref<7x128xf32, #tpu.memory_space<vmem>>, %arg7: memref<1x128xf32, #tpu.memory_space<vmem>>, %arg8: memref<16x128xf32, #tpu.memory_space<vmem>>) attributes {dimension_semantics = [#tpu.dimension_semantics<arbitrary>], iteration_bounds = array<i64: 1>, scalar_prefetch = 0 : i64, scratch_operands = 0 : i64, tpu.core_type = #tpu.core_type<tc>, window_params = [{pipeline_mode = #tpu.pipeline_mode<synchronous>, transform_indices = @transform_0, window_bounds = array<i64: 14, 1024>}, {pipeline_mode = #tpu.pipeline_mode<synchronous>, transform_indices = @transform_1, window_bounds = array<i64: 1024, 128>}, {pipeline_mode = #tpu.pipeline_mode<synchronous>, transform_indices = @transform_2, window_bounds = array<i64: 1, 128>}, {pipeline_mode = #tpu.pipeline_mode<synchronous>, transform_indices = @transform_3, window_bounds = array<i64: 1, 1>}, {pipeline_mode = #tpu.pipeline_mode<synchronous>, transform_indices = @transform_4, window_bounds = array<i64: 1, 1>}, {pipeline_mode = #tpu.pipeline_mode<synchronous>, transform_indices = @transform_5, window_bounds = array<i64: 7, 128>}, {pipeline_mode = #tpu.pipeline_mode<synchronous>, transform_indices = @transform_6, window_bounds = array<i64: 1, 128>}, {pipeline_mode = #tpu.pipeline_mode<synchronous>, transform_indices = @transform_7, window_bounds = array<i64: 16, 128>}]} {
    %c0 = arith.constant 0 : index
    %c0_0 = arith.constant 0 : index
    %0 = vector.load %arg1[%c0, %c0_0] : memref<14x1024xf32, #tpu.memory_space<vmem>>, vector<14x1024xf32>
    %c0_1 = arith.constant 0 : index
    %c0_2 = arith.constant 0 : index
    %1 = vector.load %arg2[%c0_1, %c0_2] : memref<1024x128xf32, #tpu.memory_space<vmem>>, vector<1024x128xf32>
    %cst = arith.constant dense<0.000000e+00> : vector<14x128xf32>
    %2 = tpu.matmul %0, %1, %cst {dimension_numbers = #tpu.dot_dimension_numbers<[1], [0], [0], [1], [0, 0, 1, 1], [], []>} : vector<14x1024xf32>, vector<1024x128xf32>, vector<14x128xf32> -> vector<14x128xf32>
    %c0_3 = arith.constant 0 : index
    %c0_4 = arith.constant 0 : index
    %3 = vector.load %arg3[%c0_3, %c0_4] : memref<1x128xf32, #tpu.memory_space<vmem>>, vector<1x128xf32>
    %4 = vector.broadcast %3 : vector<1x128xf32> to vector<14x128xf32>
    %5 = arith.addf %2, %4 : vector<14x128xf32>
    %cst_5 = arith.constant dense<0.000000e+00> : vector<14xf32>
    %6 = vector.multi_reduction <add>, %5, %cst_5 [1] : vector<14x128xf32> to vector<14xf32>
    %7 = vector.shape_cast %6 : vector<14xf32> to vector<14x1xf32>
    %cst_6 = arith.constant 1.280000e+02 : f32
    %8 = vector.broadcast %cst_6 : f32 to vector<14x1xf32>
    %9 = arith.divf %7, %8 : vector<14x1xf32>
    %cst_7 = arith.constant dense<0.000000e+00> : vector<1xf32>
    %10 = vector.multi_reduction <add>, %9, %cst_7 [0] : vector<14x1xf32> to vector<1xf32>
    %11 = vector.shape_cast %10 : vector<1xf32> to vector<1x1xf32>
    %cst_8 = arith.constant 1.400000e+01 : f32
    %12 = vector.broadcast %cst_8 : f32 to vector<1x1xf32>
    %13 = arith.divf %11, %12 : vector<1x1xf32>
    %14 = vector.broadcast %13 : vector<1x1xf32> to vector<14x128xf32>
    %15 = arith.subf %5, %14 : vector<14x128xf32>
    %16 = arith.mulf %15, %15 : vector<14x128xf32>
    %cst_9 = arith.constant dense<0.000000e+00> : vector<14xf32>
    %17 = vector.multi_reduction <add>, %16, %cst_9 [1] : vector<14x128xf32> to vector<14xf32>
    %18 = vector.shape_cast %17 : vector<14xf32> to vector<14x1xf32>
    %cst_10 = arith.constant 1.280000e+02 : f32
    %19 = vector.broadcast %cst_10 : f32 to vector<14x1xf32>
    %20 = arith.divf %18, %19 : vector<14x1xf32>
    %cst_11 = arith.constant dense<0.000000e+00> : vector<1xf32>
    %21 = vector.multi_reduction <add>, %20, %cst_11 [0] : vector<14x1xf32> to vector<1xf32>
    %22 = vector.shape_cast %21 : vector<1xf32> to vector<1x1xf32>
    %cst_12 = arith.constant 1.400000e+01 : f32
    %23 = vector.broadcast %cst_12 : f32 to vector<1x1xf32>
    %24 = arith.divf %22, %23 : vector<1x1xf32>
    %25 = vector.broadcast %13 : vector<1x1xf32> to vector<14x128xf32>
    %26 = arith.subf %5, %25 : vector<14x128xf32>
    %cst_13 = arith.constant 9.99999974E-6 : f32
    %27 = vector.broadcast %cst_13 : f32 to vector<1x1xf32>
    %28 = arith.addf %24, %27 : vector<1x1xf32>
    %29 = math.rsqrt %28 : vector<1x1xf32>
    %30 = vector.broadcast %29 : vector<1x1xf32> to vector<14x128xf32>
    %31 = arith.mulf %26, %30 : vector<14x128xf32>
    %c0_14 = arith.constant 0 : index
    %c0_15 = arith.constant 0 : index
    %32 = vector.load %arg4[%c0_14, %c0_15] : memref<1x1xf32, #tpu.memory_space<vmem>>, vector<1x1xf32>
    %33 = vector.broadcast %32 : vector<1x1xf32> to vector<14x128xf32>
    %34 = arith.mulf %31, %33 : vector<14x128xf32>
    %c0_16 = arith.constant 0 : index
    %c0_17 = arith.constant 0 : index
    %35 = vector.load %arg5[%c0_16, %c0_17] : memref<1x1xf32, #tpu.memory_space<vmem>>, vector<1x1xf32>
    %36 = vector.broadcast %35 : vector<1x1xf32> to vector<14x128xf32>
    %37 = arith.addf %34, %36 : vector<14x128xf32>
    %cst_18 = arith.constant 0.000000e+00 : f32
    %38 = vector.broadcast %cst_18 : f32 to vector<14x128xf32>
    %39 = arith.cmpf ogt, %37, %38 : vector<14x128xf32>
    %40 = math.exp %37 : vector<14x128xf32>
    %cst_19 = arith.constant 1.000000e+00 : f32
    %41 = vector.broadcast %cst_19 : f32 to vector<14x128xf32>
    %42 = arith.subf %40, %41 : vector<14x128xf32>
    %cst_20 = arith.constant 1.67326319 : f32
    %43 = vector.broadcast %cst_20 : f32 to vector<14x128xf32>
    %44 = arith.mulf %43, %42 : vector<14x128xf32>
    %45 = arith.select %39, %37, %44 : vector<14x128xi1>, vector<14x128xf32>
    %cst_21 = arith.constant 1.05070102 : f32
    %46 = vector.broadcast %cst_21 : f32 to vector<14x128xf32>
    %47 = arith.mulf %46, %45 : vector<14x128xf32>
    %c0_22 = arith.constant 0 : index
    %c0_23 = arith.constant 0 : index
    %48 = vector.load %arg6[%c0_22, %c0_23] : memref<7x128xf32, #tpu.memory_space<vmem>>, vector<7x128xf32>
    %c0_24 = arith.constant 0 : index
    %c0_25 = arith.constant 0 : index
    %49 = vector.load %arg7[%c0_24, %c0_25] : memref<1x128xf32, #tpu.memory_space<vmem>>, vector<1x128xf32>
    %50 = vector.extract_strided_slice %47 {offsets = [0, 0], sizes = [7, 128], strides = [1, 1]} : vector<14x128xf32> to vector<7x128xf32>
    %51 = arith.addf %50, %48 : vector<7x128xf32>
    %52 = vector.extract_strided_slice %47 {offsets = [7, 0], sizes = [7, 128], strides = [1, 1]} : vector<14x128xf32> to vector<7x128xf32>
    %53 = arith.addf %52, %48 : vector<7x128xf32>
    %54 = tpu.concatenate %49, %51, %49, %53 in 0 : vector<1x128xf32>, vector<7x128xf32>, vector<1x128xf32>, vector<7x128xf32> -> vector<16x128xf32>
    %c0_26 = arith.constant 0 : index
    %c0_27 = arith.constant 0 : index
    %55 = vector.load %arg8[%c0_26, %c0_27] : memref<16x128xf32, #tpu.memory_space<vmem>>, vector<16x128xf32>
    tpu.vector_store %arg8[%c0_26, %c0_27], %54 {strides = array<i32>} : memref<16x128xf32, #tpu.memory_space<vmem>>, vector<16x128xf32>,
    return
  }
  func.func @transform_0(%arg0: i32) -> (i32, i32) {
    %c0_i32 = arith.constant 0 : i32
    %c0_i32_0 = arith.constant 0 : i32
    %c0_i32_1 = arith.constant 0 : i32
    return %c0_i32, %c0_i32_0 : i32, i32
  }
  func.func @transform_1(%arg0: i32) -> (i32, i32) {
    %c0_i32 = arith.constant 0 : i32
    %c0_i32_0 = arith.constant 0 : i32
    %c0_i32_1 = arith.constant 0 : i32
    return %c0_i32, %c0_i32_0 : i32, i32
  }
  func.func @transform_2(%arg0: i32) -> (i32, i32) {
    %c0_i32 = arith.constant 0 : i32
    %c0_i32_0 = arith.constant 0 : i32
    %c0_i32_1 = arith.constant 0 : i32
    return %c0_i32, %c0_i32_0 : i32, i32
  }
  func.func @transform_3(%arg0: i32) -> (i32, i32) {
    %c0_i32 = arith.constant 0 : i32
    %c0_i32_0 = arith.constant 0 : i32
    %c0_i32_1 = arith.constant 0 : i32
    return %c0_i32, %c0_i32_0 : i32, i32
  }
  func.func @transform_4(%arg0: i32) -> (i32, i32) {
    %c0_i32 = arith.constant 0 : i32
    %c0_i32_0 = arith.constant 0 : i32
    %c0_i32_1 = arith.constant 0 : i32
    return %c0_i32, %c0_i32_0 : i32, i32
  }
  func.func @transform_5(%arg0: i32) -> (i32, i32) {
    %c0_i32 = arith.constant 0 : i32
    %c0_i32_0 = arith.constant 0 : i32
    %c0_i32_1 = arith.constant 0 : i32
    return %c0_i32, %c0_i32_0 : i32, i32
  }
  func.func @transform_6(%arg0: i32) -> (i32, i32) {
    %c0_i32 = arith.constant 0 : i32
    %c0_i32_0 = arith.constant 0 : i32
    %c0_i32_1 = arith.constant 0 : i32
    return %c0_i32, %c0_i32_0 : i32, i32
  }
  func.func @transform_7(%arg0: i32) -> (i32, i32) {
    %c0_i32 = arith.constant 0 : i32
    %c0_i32_0 = arith.constant 0 : i32
    %c0_i32_1 = arith.constant 0 : i32
    return %c0_i32, %c0_i32_0 : i32, i32
  }
}

module attributes {stable_mosaic.version = 11 : i64} {
  func.func @_conformer_block_kernel(%arg0: i32, %arg1: memref<16x128xf32, #tpu.memory_space<vmem>>, %arg2: memref<1x128xf32, #tpu.memory_space<vmem>>, %arg3: memref<1x128xf32, #tpu.memory_space<vmem>>, %arg4: memref<128x512xf32, #tpu.memory_space<vmem>>, %arg5: memref<1x512xf32, #tpu.memory_space<vmem>>, %arg6: memref<512x128xf32, #tpu.memory_space<vmem>>, %arg7: memref<1x128xf32, #tpu.memory_space<vmem>>, %arg8: memref<1x128xf32, #tpu.memory_space<vmem>>, %arg9: memref<1x128xf32, #tpu.memory_space<vmem>>, %arg10: memref<32x128xf32, #tpu.memory_space<vmem>>, %arg11: memref<1x128xf32, #tpu.memory_space<vmem>>, %arg12: memref<1x128xf32, #tpu.memory_space<vmem>>, %arg13: memref<1x128xf32, #tpu.memory_space<vmem>>, %arg14: memref<128x128xf32, #tpu.memory_space<vmem>>, %arg15: memref<4x128xf32, #tpu.memory_space<vmem>>, %arg16: memref<128x384xf32, #tpu.memory_space<vmem>>, %arg17: memref<128x128xf32, #tpu.memory_space<vmem>>, %arg18: memref<1x128xf32, #tpu.memory_space<vmem>>, %arg19: memref<1x128xf32, #tpu.memory_space<vmem>>, %arg20: memref<1x128xf32, #tpu.memory_space<vmem>>, %arg21: memref<128x512xf32, #tpu.memory_space<vmem>>, %arg22: memref<1x512xf32, #tpu.memory_space<vmem>>, %arg23: memref<16x256xf32, #tpu.memory_space<vmem>>, %arg24: memref<1x256xf32, #tpu.memory_space<vmem>>, %arg25: memref<1x256xf32, #tpu.memory_space<vmem>>, %arg26: memref<1x256xf32, #tpu.memory_space<vmem>>, %arg27: memref<256x128xf32, #tpu.memory_space<vmem>>, %arg28: memref<1x128xf32, #tpu.memory_space<vmem>>, %arg29: memref<1x128xf32, #tpu.memory_space<vmem>>, %arg30: memref<1x128xf32, #tpu.memory_space<vmem>>, %arg31: memref<128x512xf32, #tpu.memory_space<vmem>>, %arg32: memref<1x512xf32, #tpu.memory_space<vmem>>, %arg33: memref<512x128xf32, #tpu.memory_space<vmem>>, %arg34: memref<1x128xf32, #tpu.memory_space<vmem>>, %arg35: memref<1x128xf32, #tpu.memory_space<vmem>>, %arg36: memref<1x128xf32, #tpu.memory_space<vmem>>, %arg37: memref<16x128xf32, #tpu.memory_space<vmem>>, %arg38: memref<2x4x12x12xf32, #tpu.memory_space<vmem>>) attributes {dimension_semantics = [#tpu.dimension_semantics<arbitrary>], iteration_bounds = array<i64: 1>, scalar_prefetch = 0 : i64, scratch_operands = 0 : i64, tpu.core_type = #tpu.core_type<tc>, window_params = [{pipeline_mode = #tpu.pipeline_mode<synchronous>, transform_indices = @transform_0, window_bounds = array<i64: 16, 128>}, {pipeline_mode = #tpu.pipeline_mode<synchronous>, transform_indices = @transform_1, window_bounds = array<i64: 1, 128>}, {pipeline_mode = #tpu.pipeline_mode<synchronous>, transform_indices = @transform_2, window_bounds = array<i64: 1, 128>}, {pipeline_mode = #tpu.pipeline_mode<synchronous>, transform_indices = @transform_3, window_bounds = array<i64: 128, 512>}, {pipeline_mode = #tpu.pipeline_mode<synchronous>, transform_indices = @transform_4, window_bounds = array<i64: 1, 512>}, {pipeline_mode = #tpu.pipeline_mode<synchronous>, transform_indices = @transform_5, window_bounds = array<i64: 512, 128>}, {pipeline_mode = #tpu.pipeline_mode<synchronous>, transform_indices = @transform_6, window_bounds = array<i64: 1, 128>}, {pipeline_mode = #tpu.pipeline_mode<synchronous>, transform_indices = @transform_7, window_bounds = array<i64: 1, 128>}, {pipeline_mode = #tpu.pipeline_mode<synchronous>, transform_indices = @transform_8, window_bounds = array<i64: 1, 128>}, {pipeline_mode = #tpu.pipeline_mode<synchronous>, transform_indices = @transform_9, window_bounds = array<i64: 32, 128>}, {pipeline_mode = #tpu.pipeline_mode<synchronous>, transform_indices = @transform_10, window_bounds = array<i64: 1, 128>}, {pipeline_mode = #tpu.pipeline_mode<synchronous>, transform_indices = @transform_11, window_bounds = array<i64: 1, 128>}, {pipeline_mode = #tpu.pipeline_mode<synchronous>, transform_indices = @transform_12, window_bounds = array<i64: 1, 128>}, {pipeline_mode = #tpu.pipeline_mode<synchronous>, transform_indices = @transform_13, window_bounds = array<i64: 128, 128>}, {pipeline_mode = #tpu.pipeline_mode<synchronous>, transform_indices = @transform_14, window_bounds = array<i64: 4, 128>}, {pipeline_mode = #tpu.pipeline_mode<synchronous>, transform_indices = @transform_15, window_bounds = array<i64: 128, 384>}, {pipeline_mode = #tpu.pipeline_mode<synchronous>, transform_indices = @transform_16, window_bounds = array<i64: 128, 128>}, {pipeline_mode = #tpu.pipeline_mode<synchronous>, transform_indices = @transform_17, window_bounds = array<i64: 1, 128>}, {pipeline_mode = #tpu.pipeline_mode<synchronous>, transform_indices = @transform_18, window_bounds = array<i64: 1, 128>}, {pipeline_mode = #tpu.pipeline_mode<synchronous>, transform_indices = @transform_19, window_bounds = array<i64: 1, 128>}, {pipeline_mode = #tpu.pipeline_mode<synchronous>, transform_indices = @transform_20, window_bounds = array<i64: 128, 512>}, {pipeline_mode = #tpu.pipeline_mode<synchronous>, transform_indices = @transform_21, window_bounds = array<i64: 1, 512>}, {pipeline_mode = #tpu.pipeline_mode<synchronous>, transform_indices = @transform_22, window_bounds = array<i64: 16, 256>}, {pipeline_mode = #tpu.pipeline_mode<synchronous>, transform_indices = @transform_23, window_bounds = array<i64: 1, 256>}, {pipeline_mode = #tpu.pipeline_mode<synchronous>, transform_indices = @transform_24, window_bounds = array<i64: 1, 256>}, {pipeline_mode = #tpu.pipeline_mode<synchronous>, transform_indices = @transform_25, window_bounds = array<i64: 1, 256>}, {pipeline_mode = #tpu.pipeline_mode<synchronous>, transform_indices = @transform_26, window_bounds = array<i64: 256, 128>}, {pipeline_mode = #tpu.pipeline_mode<synchronous>, transform_indices = @transform_27, window_bounds = array<i64: 1, 128>}, {pipeline_mode = #tpu.pipeline_mode<synchronous>, transform_indices = @transform_28, window_bounds = array<i64: 1, 128>}, {pipeline_mode = #tpu.pipeline_mode<synchronous>, transform_indices = @transform_29, window_bounds = array<i64: 1, 128>}, {pipeline_mode = #tpu.pipeline_mode<synchronous>, transform_indices = @transform_30, window_bounds = array<i64: 128, 512>}, {pipeline_mode = #tpu.pipeline_mode<synchronous>, transform_indices = @transform_31, window_bounds = array<i64: 1, 512>}, {pipeline_mode = #tpu.pipeline_mode<synchronous>, transform_indices = @transform_32, window_bounds = array<i64: 512, 128>}, {pipeline_mode = #tpu.pipeline_mode<synchronous>, transform_indices = @transform_33, window_bounds = array<i64: 1, 128>}, {pipeline_mode = #tpu.pipeline_mode<synchronous>, transform_indices = @transform_34, window_bounds = array<i64: 1, 128>}, {pipeline_mode = #tpu.pipeline_mode<synchronous>, transform_indices = @transform_35, window_bounds = array<i64: 1, 128>}, {pipeline_mode = #tpu.pipeline_mode<synchronous>, transform_indices = @transform_36, window_bounds = array<i64: 16, 128>}, {pipeline_mode = #tpu.pipeline_mode<synchronous>, transform_indices = @transform_37, window_bounds = array<i64: 2, 4, 12, 12>}]} {
    %c0 = arith.constant 0 : index
    %c0_0 = arith.constant 0 : index
    %0 = vector.load %arg1[%c0, %c0_0] : memref<16x128xf32, #tpu.memory_space<vmem>>, vector<16x128xf32>
    %cst = arith.constant dense<0.000000e+00> : vector<16xf32>
    %1 = vector.multi_reduction <add>, %0, %cst [1] : vector<16x128xf32> to vector<16xf32>
    %2 = vector.shape_cast %1 : vector<16xf32> to vector<16x1xf32>
    %cst_1 = arith.constant 1.280000e+02 : f32
    %3 = vector.broadcast %cst_1 : f32 to vector<16x1xf32>
    %4 = arith.divf %2, %3 : vector<16x1xf32>
    %5 = vector.broadcast %4 : vector<16x1xf32> to vector<16x128xf32>
    %6 = arith.subf %0, %5 : vector<16x128xf32>
    %7 = arith.mulf %6, %6 : vector<16x128xf32>
    %cst_2 = arith.constant dense<0.000000e+00> : vector<16xf32>
    %8 = vector.multi_reduction <add>, %7, %cst_2 [1] : vector<16x128xf32> to vector<16xf32>
    %9 = vector.shape_cast %8 : vector<16xf32> to vector<16x1xf32>
    %cst_3 = arith.constant 1.280000e+02 : f32
    %10 = vector.broadcast %cst_3 : f32 to vector<16x1xf32>
    %11 = arith.divf %9, %10 : vector<16x1xf32>
    %12 = vector.broadcast %4 : vector<16x1xf32> to vector<16x128xf32>
    %13 = arith.subf %0, %12 : vector<16x128xf32>
    %cst_4 = arith.constant 9.99999974E-6 : f32
    %14 = vector.broadcast %cst_4 : f32 to vector<16x1xf32>
    %15 = arith.addf %11, %14 : vector<16x1xf32>
    %16 = math.rsqrt %15 : vector<16x1xf32>
    %17 = vector.broadcast %16 : vector<16x1xf32> to vector<16x128xf32>
    %18 = arith.mulf %13, %17 : vector<16x128xf32>
    %c0_5 = arith.constant 0 : index
    %c0_6 = arith.constant 0 : index
    %19 = vector.load %arg2[%c0_5, %c0_6] : memref<1x128xf32, #tpu.memory_space<vmem>>, vector<1x128xf32>
    %20 = vector.broadcast %19 : vector<1x128xf32> to vector<16x128xf32>
    %21 = arith.mulf %18, %20 : vector<16x128xf32>
    %c0_7 = arith.constant 0 : index
    %c0_8 = arith.constant 0 : index
    %22 = vector.load %arg3[%c0_7, %c0_8] : memref<1x128xf32, #tpu.memory_space<vmem>>, vector<1x128xf32>
    %23 = vector.broadcast %22 : vector<1x128xf32> to vector<16x128xf32>
    %24 = arith.addf %21, %23 : vector<16x128xf32>
    %c0_9 = arith.constant 0 : index
    %c0_10 = arith.constant 0 : index
    %25 = vector.load %arg4[%c0_9, %c0_10] : memref<128x512xf32, #tpu.memory_space<vmem>>, vector<128x512xf32>
    %cst_11 = arith.constant dense<0.000000e+00> : vector<16x512xf32>
    %26 = tpu.matmul %24, %25, %cst_11 {dimension_numbers = #tpu.dot_dimension_numbers<[1], [0], [0], [1], [0, 0, 1, 1], [], []>} : vector<16x128xf32>, vector<128x512xf32>, vector<16x512xf32> -> vector<16x512xf32>
    %c0_12 = arith.constant 0 : index
    %c0_13 = arith.constant 0 : index
    %27 = vector.load %arg5[%c0_12, %c0_13] : memref<1x512xf32, #tpu.memory_space<vmem>>, vector<1x512xf32>
    %28 = vector.broadcast %27 : vector<1x512xf32> to vector<16x512xf32>
    %29 = arith.addf %26, %28 : vector<16x512xf32>
    %30 = arith.negf %29 : vector<16x512xf32>
    %31 = math.exp %30 : vector<16x512xf32>
    %cst_14 = arith.constant 1.000000e+00 : f32
    %32 = vector.broadcast %cst_14 : f32 to vector<16x512xf32>
    %33 = arith.addf %32, %31 : vector<16x512xf32>
    %34 = arith.divf %32, %33 : vector<16x512xf32>
    %35 = arith.mulf %29, %34 : vector<16x512xf32>
    %c0_15 = arith.constant 0 : index
    %c0_16 = arith.constant 0 : index
    %36 = vector.load %arg6[%c0_15, %c0_16] : memref<512x128xf32, #tpu.memory_space<vmem>>, vector<512x128xf32>
    %cst_17 = arith.constant dense<0.000000e+00> : vector<16x128xf32>
    %37 = tpu.matmul %35, %36, %cst_17 {dimension_numbers = #tpu.dot_dimension_numbers<[1], [0], [0], [1], [0, 0, 1, 1], [], []>} : vector<16x512xf32>, vector<512x128xf32>, vector<16x128xf32> -> vector<16x128xf32>
    %c0_18 = arith.constant 0 : index
    %c0_19 = arith.constant 0 : index
    %38 = vector.load %arg7[%c0_18, %c0_19] : memref<1x128xf32, #tpu.memory_space<vmem>>, vector<1x128xf32>
    %39 = vector.broadcast %38 : vector<1x128xf32> to vector<16x128xf32>
    %40 = arith.addf %37, %39 : vector<16x128xf32>
    %cst_20 = arith.constant 5.000000e-01 : f32
    %41 = vector.broadcast %cst_20 : f32 to vector<16x128xf32>
    %42 = arith.mulf %41, %40 : vector<16x128xf32>
    %43 = arith.addf %0, %42 : vector<16x128xf32>
    %cst_21 = arith.constant dense<0.000000e+00> : vector<16xf32>
    %44 = vector.multi_reduction <add>, %43, %cst_21 [1] : vector<16x128xf32> to vector<16xf32>
    %45 = vector.shape_cast %44 : vector<16xf32> to vector<16x1xf32>
    %cst_22 = arith.constant 1.280000e+02 : f32
    %46 = vector.broadcast %cst_22 : f32 to vector<16x1xf32>
    %47 = arith.divf %45, %46 : vector<16x1xf32>
    %48 = vector.broadcast %47 : vector<16x1xf32> to vector<16x128xf32>
    %49 = arith.subf %43, %48 : vector<16x128xf32>
    %50 = arith.mulf %49, %49 : vector<16x128xf32>
    %cst_23 = arith.constant dense<0.000000e+00> : vector<16xf32>
    %51 = vector.multi_reduction <add>, %50, %cst_23 [1] : vector<16x128xf32> to vector<16xf32>
    %52 = vector.shape_cast %51 : vector<16xf32> to vector<16x1xf32>
    %cst_24 = arith.constant 1.280000e+02 : f32
    %53 = vector.broadcast %cst_24 : f32 to vector<16x1xf32>
    %54 = arith.divf %52, %53 : vector<16x1xf32>
    %55 = vector.broadcast %47 : vector<16x1xf32> to vector<16x128xf32>
    %56 = arith.subf %43, %55 : vector<16x128xf32>
    %cst_25 = arith.constant 9.99999974E-6 : f32
    %57 = vector.broadcast %cst_25 : f32 to vector<16x1xf32>
    %58 = arith.addf %54, %57 : vector<16x1xf32>
    %59 = math.rsqrt %58 : vector<16x1xf32>
    %60 = vector.broadcast %59 : vector<16x1xf32> to vector<16x128xf32>
    %61 = arith.mulf %56, %60 : vector<16x128xf32>
    %c0_26 = arith.constant 0 : index
    %c0_27 = arith.constant 0 : index
    %62 = vector.load %arg8[%c0_26, %c0_27] : memref<1x128xf32, #tpu.memory_space<vmem>>, vector<1x128xf32>
    %63 = vector.broadcast %62 : vector<1x128xf32> to vector<16x128xf32>
    %64 = arith.mulf %61, %63 : vector<16x128xf32>
    %c0_28 = arith.constant 0 : index
    %c0_29 = arith.constant 0 : index
    %65 = vector.load %arg9[%c0_28, %c0_29] : memref<1x128xf32, #tpu.memory_space<vmem>>, vector<1x128xf32>
    %66 = vector.broadcast %65 : vector<1x128xf32> to vector<16x128xf32>
    %67 = arith.addf %64, %66 : vector<16x128xf32>
    %c0_30 = arith.constant 0 : index
    %c0_31 = arith.constant 0 : index
    %68 = vector.load %arg10[%c0_30, %c0_31] : memref<32x128xf32, #tpu.memory_space<vmem>>, vector<32x128xf32>
    %c0_32 = arith.constant 0 : index
    %c0_33 = arith.constant 0 : index
    %69 = vector.load %arg11[%c0_32, %c0_33] : memref<1x128xf32, #tpu.memory_space<vmem>>, vector<1x128xf32>
    %c0_34 = arith.constant 0 : index
    %c0_35 = arith.constant 0 : index
    %70 = vector.load %arg12[%c0_34, %c0_35] : memref<1x128xf32, #tpu.memory_space<vmem>>, vector<1x128xf32>
    %c0_36 = arith.constant 0 : index
    %c0_37 = arith.constant 0 : index
    %71 = vector.load %arg13[%c0_36, %c0_37] : memref<1x128xf32, #tpu.memory_space<vmem>>, vector<1x128xf32>
    %c0_38 = arith.constant 0 : index
    %c0_39 = arith.constant 0 : index
    %72 = vector.load %arg14[%c0_38, %c0_39] : memref<128x128xf32, #tpu.memory_space<vmem>>, vector<128x128xf32>
    %c0_40 = arith.constant 0 : index
    %c0_41 = arith.constant 0 : index
    %73 = vector.load %arg15[%c0_40, %c0_41] : memref<4x128xf32, #tpu.memory_space<vmem>>, vector<4x128xf32>
    %c0_42 = arith.constant 0 : index
    %c0_43 = arith.constant 0 : index
    %74 = vector.load %arg16[%c0_42, %c0_43] : memref<128x384xf32, #tpu.memory_space<vmem>>, vector<128x384xf32>
    %c0_44 = arith.constant 0 : index
    %c0_45 = arith.constant 0 : index
    %75 = vector.load %arg17[%c0_44, %c0_45] : memref<128x128xf32, #tpu.memory_space<vmem>>, vector<128x128xf32>
    %c0_46 = arith.constant 0 : index
    %c0_47 = arith.constant 0 : index
    %76 = vector.load %arg18[%c0_46, %c0_47] : memref<1x128xf32, #tpu.memory_space<vmem>>, vector<1x128xf32>
    %77 = vector.extract_strided_slice %67 {offsets = [0, 0], sizes = [8, 128], strides = [1, 1]} : vector<16x128xf32> to vector<8x128xf32>
    %cst_48 = arith.constant dense<0.000000e+00> : vector<128xf32>
    %78 = vector.multi_reduction <add>, %77, %cst_48 [0] : vector<8x128xf32> to vector<128xf32>
    %79 = vector.shape_cast %78 : vector<128xf32> to vector<1x128xf32>
    %cst_49 = arith.constant 8.000000e+00 : f32
    %80 = vector.broadcast %cst_49 : f32 to vector<1x128xf32>
    %81 = arith.divf %79, %80 : vector<1x128xf32>
    %82 = vector.extract_strided_slice %81 {offsets = [0, 0], sizes = [1, 32], strides = [1, 1]} : vector<1x128xf32> to vector<1x32xf32>
    %cst_50 = arith.constant dense<0.000000e+00> : vector<1x128xf32>
    %83 = tpu.matmul %82, %68, %cst_50 {dimension_numbers = #tpu.dot_dimension_numbers<[1], [0], [0], [1], [0, 0, 1, 1], [], []>} : vector<1x32xf32>, vector<32x128xf32>, vector<1x128xf32> -> vector<1x128xf32>
    %84 = arith.addf %83, %69 : vector<1x128xf32>
    %cst_51 = arith.constant dense<0.000000e+00> : vector<1x128xf32>
    %85 = tpu.matmul %84, %72, %cst_51 {dimension_numbers = #tpu.dot_dimension_numbers<[1], [0], [0], [1], [0, 0, 1, 1], [], []>} : vector<1x128xf32>, vector<128x128xf32>, vector<1x128xf32> -> vector<1x128xf32>
    %86 = arith.subf %84, %85 : vector<1x128xf32>
    %87 = arith.mulf %86, %86 : vector<1x128xf32>
    %cst_52 = arith.constant dense<0.000000e+00> : vector<1x128xf32>
    %88 = tpu.matmul %87, %72, %cst_52 {dimension_numbers = #tpu.dot_dimension_numbers<[1], [0], [0], [1], [0, 0, 1, 1], [], []>} : vector<1x128xf32>, vector<128x128xf32>, vector<1x128xf32> -> vector<1x128xf32>
    %cst_53 = arith.constant 9.99999974E-6 : f32
    %89 = vector.broadcast %cst_53 : f32 to vector<1x128xf32>
    %90 = arith.addf %88, %89 : vector<1x128xf32>
    %91 = math.rsqrt %90 : vector<1x128xf32>
    %92 = arith.mulf %86, %91 : vector<1x128xf32>
    %93 = arith.mulf %92, %70 : vector<1x128xf32>
    %94 = arith.addf %93, %71 : vector<1x128xf32>
    %cst_54 = arith.constant 5.000000e-01 : f32
    %95 = vector.broadcast %cst_54 : f32 to vector<1x128xf32>
    %96 = arith.mulf %95, %94 : vector<1x128xf32>
    %cst_55 = arith.constant 0.707106769 : f32
    %97 = vector.broadcast %cst_55 : f32 to vector<1x128xf32>
    %98 = arith.mulf %94, %97 : vector<1x128xf32>
    %cst_56 = arith.constant 0.000000e+00 : f32
    %99 = vector.broadcast %cst_56 : f32 to vector<1x128xf32>
    %100 = arith.cmpf oge, %98, %99 : vector<1x128xf32>
    %cst_57 = arith.constant 1.000000e+00 : f32
    %cst_58 = arith.constant -1.000000e+00 : f32
    %101 = vector.broadcast %cst_57 : f32 to vector<1x128xf32>
    %102 = vector.broadcast %cst_58 : f32 to vector<1x128xf32>
    %103 = arith.select %100, %101, %102 : vector<1x128xi1>, vector<1x128xf32>
    %104 = math.absf %98 : vector<1x128xf32>
    %cst_59 = arith.constant 0.327591091 : f32
    %105 = vector.broadcast %cst_59 : f32 to vector<1x128xf32>
    %106 = arith.mulf %105, %104 : vector<1x128xf32>
    %cst_60 = arith.constant 1.000000e+00 : f32
    %107 = vector.broadcast %cst_60 : f32 to vector<1x128xf32>
    %108 = arith.addf %107, %106 : vector<1x128xf32>
    %cst_61 = arith.constant 1.000000e+00 : f32
    %109 = vector.broadcast %cst_61 : f32 to vector<1x128xf32>
    %110 = arith.divf %109, %108 : vector<1x128xf32>
    %cst_62 = arith.constant 1.06140542 : f32
    %111 = vector.broadcast %cst_62 : f32 to vector<1x128xf32>
    %112 = arith.mulf %111, %110 : vector<1x128xf32>
    %cst_63 = arith.constant -1.45315206 : f32
    %113 = vector.broadcast %cst_63 : f32 to vector<1x128xf32>
    %114 = arith.addf %112, %113 : vector<1x128xf32>
    %115 = arith.mulf %114, %110 : vector<1x128xf32>
    %cst_64 = arith.constant 1.42141378 : f32
    %116 = vector.broadcast %cst_64 : f32 to vector<1x128xf32>
    %117 = arith.addf %115, %116 : vector<1x128xf32>
    %118 = arith.mulf %117, %110 : vector<1x128xf32>
    %cst_65 = arith.constant -0.284496725 : f32
    %119 = vector.broadcast %cst_65 : f32 to vector<1x128xf32>
    %120 = arith.addf %118, %119 : vector<1x128xf32>
    %121 = arith.mulf %120, %110 : vector<1x128xf32>
    %cst_66 = arith.constant 0.254829586 : f32
    %122 = vector.broadcast %cst_66 : f32 to vector<1x128xf32>
    %123 = arith.addf %121, %122 : vector<1x128xf32>
    %124 = arith.mulf %123, %110 : vector<1x128xf32>
    %cst_67 = arith.constant 0.000000e+00 : f32
    %125 = vector.broadcast %cst_67 : f32 to vector<1x128xf32>
    %126 = arith.subf %125, %104 : vector<1x128xf32>
    %127 = arith.mulf %126, %104 : vector<1x128xf32>
    %128 = math.exp %127 : vector<1x128xf32>
    %129 = arith.mulf %124, %128 : vector<1x128xf32>
    %cst_68 = arith.constant 1.000000e+00 : f32
    %130 = vector.broadcast %cst_68 : f32 to vector<1x128xf32>
    %131 = arith.subf %130, %129 : vector<1x128xf32>
    %132 = arith.mulf %103, %131 : vector<1x128xf32>
    %cst_69 = arith.constant 1.000000e+00 : f32
    %133 = vector.broadcast %cst_69 : f32 to vector<1x128xf32>
    %134 = arith.addf %133, %132 : vector<1x128xf32>
    %135 = arith.mulf %96, %134 : vector<1x128xf32>
    %136 = vector.extract_strided_slice %73 {offsets = [0, 0], sizes = [1, 128], strides = [1, 1]} : vector<4x128xf32> to vector<1x128xf32>
    %137 = arith.addf %135, %136 : vector<1x128xf32>
    %138 = vector.extract_strided_slice %81 {offsets = [0, 32], sizes = [1, 32], strides = [1, 1]} : vector<1x128xf32> to vector<1x32xf32>
    %cst_70 = arith.constant dense<0.000000e+00> : vector<1x128xf32>
    %139 = tpu.matmul %138, %68, %cst_70 {dimension_numbers = #tpu.dot_dimension_numbers<[1], [0], [0], [1], [0, 0, 1, 1], [], []>} : vector<1x32xf32>, vector<32x128xf32>, vector<1x128xf32> -> vector<1x128xf32>
    %140 = arith.addf %139, %69 : vector<1x128xf32>
    %cst_71 = arith.constant dense<0.000000e+00> : vector<1x128xf32>
    %141 = tpu.matmul %140, %72, %cst_71 {dimension_numbers = #tpu.dot_dimension_numbers<[1], [0], [0], [1], [0, 0, 1, 1], [], []>} : vector<1x128xf32>, vector<128x128xf32>, vector<1x128xf32> -> vector<1x128xf32>
    %142 = arith.subf %140, %141 : vector<1x128xf32>
    %143 = arith.mulf %142, %142 : vector<1x128xf32>
    %cst_72 = arith.constant dense<0.000000e+00> : vector<1x128xf32>
    %144 = tpu.matmul %143, %72, %cst_72 {dimension_numbers = #tpu.dot_dimension_numbers<[1], [0], [0], [1], [0, 0, 1, 1], [], []>} : vector<1x128xf32>, vector<128x128xf32>, vector<1x128xf32> -> vector<1x128xf32>
    %cst_73 = arith.constant 9.99999974E-6 : f32
    %145 = vector.broadcast %cst_73 : f32 to vector<1x128xf32>
    %146 = arith.addf %144, %145 : vector<1x128xf32>
    %147 = math.rsqrt %146 : vector<1x128xf32>
    %148 = arith.mulf %142, %147 : vector<1x128xf32>
    %149 = arith.mulf %148, %70 : vector<1x128xf32>
    %150 = arith.addf %149, %71 : vector<1x128xf32>
    %cst_74 = arith.constant 5.000000e-01 : f32
    %151 = vector.broadcast %cst_74 : f32 to vector<1x128xf32>
    %152 = arith.mulf %151, %150 : vector<1x128xf32>
    %cst_75 = arith.constant 0.707106769 : f32
    %153 = vector.broadcast %cst_75 : f32 to vector<1x128xf32>
    %154 = arith.mulf %150, %153 : vector<1x128xf32>
    %cst_76 = arith.constant 0.000000e+00 : f32
    %155 = vector.broadcast %cst_76 : f32 to vector<1x128xf32>
    %156 = arith.cmpf oge, %154, %155 : vector<1x128xf32>
    %cst_77 = arith.constant 1.000000e+00 : f32
    %cst_78 = arith.constant -1.000000e+00 : f32
    %157 = vector.broadcast %cst_77 : f32 to vector<1x128xf32>
    %158 = vector.broadcast %cst_78 : f32 to vector<1x128xf32>
    %159 = arith.select %156, %157, %158 : vector<1x128xi1>, vector<1x128xf32>
    %160 = math.absf %154 : vector<1x128xf32>
    %cst_79 = arith.constant 0.327591091 : f32
    %161 = vector.broadcast %cst_79 : f32 to vector<1x128xf32>
    %162 = arith.mulf %161, %160 : vector<1x128xf32>
    %cst_80 = arith.constant 1.000000e+00 : f32
    %163 = vector.broadcast %cst_80 : f32 to vector<1x128xf32>
    %164 = arith.addf %163, %162 : vector<1x128xf32>
    %cst_81 = arith.constant 1.000000e+00 : f32
    %165 = vector.broadcast %cst_81 : f32 to vector<1x128xf32>
    %166 = arith.divf %165, %164 : vector<1x128xf32>
    %cst_82 = arith.constant 1.06140542 : f32
    %167 = vector.broadcast %cst_82 : f32 to vector<1x128xf32>
    %168 = arith.mulf %167, %166 : vector<1x128xf32>
    %cst_83 = arith.constant -1.45315206 : f32
    %169 = vector.broadcast %cst_83 : f32 to vector<1x128xf32>
    %170 = arith.addf %168, %169 : vector<1x128xf32>
    %171 = arith.mulf %170, %166 : vector<1x128xf32>
    %cst_84 = arith.constant 1.42141378 : f32
    %172 = vector.broadcast %cst_84 : f32 to vector<1x128xf32>
    %173 = arith.addf %171, %172 : vector<1x128xf32>
    %174 = arith.mulf %173, %166 : vector<1x128xf32>
    %cst_85 = arith.constant -0.284496725 : f32
    %175 = vector.broadcast %cst_85 : f32 to vector<1x128xf32>
    %176 = arith.addf %174, %175 : vector<1x128xf32>
    %177 = arith.mulf %176, %166 : vector<1x128xf32>
    %cst_86 = arith.constant 0.254829586 : f32
    %178 = vector.broadcast %cst_86 : f32 to vector<1x128xf32>
    %179 = arith.addf %177, %178 : vector<1x128xf32>
    %180 = arith.mulf %179, %166 : vector<1x128xf32>
    %cst_87 = arith.constant 0.000000e+00 : f32
    %181 = vector.broadcast %cst_87 : f32 to vector<1x128xf32>
    %182 = arith.subf %181, %160 : vector<1x128xf32>
    %183 = arith.mulf %182, %160 : vector<1x128xf32>
    %184 = math.exp %183 : vector<1x128xf32>
    %185 = arith.mulf %180, %184 : vector<1x128xf32>
    %cst_88 = arith.constant 1.000000e+00 : f32
    %186 = vector.broadcast %cst_88 : f32 to vector<1x128xf32>
    %187 = arith.subf %186, %185 : vector<1x128xf32>
    %188 = arith.mulf %159, %187 : vector<1x128xf32>
    %cst_89 = arith.constant 1.000000e+00 : f32
    %189 = vector.broadcast %cst_89 : f32 to vector<1x128xf32>
    %190 = arith.addf %189, %188 : vector<1x128xf32>
    %191 = arith.mulf %152, %190 : vector<1x128xf32>
    %192 = vector.extract_strided_slice %73 {offsets = [1, 0], sizes = [1, 128], strides = [1, 1]} : vector<4x128xf32> to vector<1x128xf32>
    %193 = arith.addf %191, %192 : vector<1x128xf32>
    %194 = vector.extract_strided_slice %81 {offsets = [0, 64], sizes = [1, 32], strides = [1, 1]} : vector<1x128xf32> to vector<1x32xf32>
    %cst_90 = arith.constant dense<0.000000e+00> : vector<1x128xf32>
    %195 = tpu.matmul %194, %68, %cst_90 {dimension_numbers = #tpu.dot_dimension_numbers<[1], [0], [0], [1], [0, 0, 1, 1], [], []>} : vector<1x32xf32>, vector<32x128xf32>, vector<1x128xf32> -> vector<1x128xf32>
    %196 = arith.addf %195, %69 : vector<1x128xf32>
    %cst_91 = arith.constant dense<0.000000e+00> : vector<1x128xf32>
    %197 = tpu.matmul %196, %72, %cst_91 {dimension_numbers = #tpu.dot_dimension_numbers<[1], [0], [0], [1], [0, 0, 1, 1], [], []>} : vector<1x128xf32>, vector<128x128xf32>, vector<1x128xf32> -> vector<1x128xf32>
    %198 = arith.subf %196, %197 : vector<1x128xf32>
    %199 = arith.mulf %198, %198 : vector<1x128xf32>
    %cst_92 = arith.constant dense<0.000000e+00> : vector<1x128xf32>
    %200 = tpu.matmul %199, %72, %cst_92 {dimension_numbers = #tpu.dot_dimension_numbers<[1], [0], [0], [1], [0, 0, 1, 1], [], []>} : vector<1x128xf32>, vector<128x128xf32>, vector<1x128xf32> -> vector<1x128xf32>
    %cst_93 = arith.constant 9.99999974E-6 : f32
    %201 = vector.broadcast %cst_93 : f32 to vector<1x128xf32>
    %202 = arith.addf %200, %201 : vector<1x128xf32>
    %203 = math.rsqrt %202 : vector<1x128xf32>
    %204 = arith.mulf %198, %203 : vector<1x128xf32>
    %205 = arith.mulf %204, %70 : vector<1x128xf32>
    %206 = arith.addf %205, %71 : vector<1x128xf32>
    %cst_94 = arith.constant 5.000000e-01 : f32
    %207 = vector.broadcast %cst_94 : f32 to vector<1x128xf32>
    %208 = arith.mulf %207, %206 : vector<1x128xf32>
    %cst_95 = arith.constant 0.707106769 : f32
    %209 = vector.broadcast %cst_95 : f32 to vector<1x128xf32>
    %210 = arith.mulf %206, %209 : vector<1x128xf32>
    %cst_96 = arith.constant 0.000000e+00 : f32
    %211 = vector.broadcast %cst_96 : f32 to vector<1x128xf32>
    %212 = arith.cmpf oge, %210, %211 : vector<1x128xf32>
    %cst_97 = arith.constant 1.000000e+00 : f32
    %cst_98 = arith.constant -1.000000e+00 : f32
    %213 = vector.broadcast %cst_97 : f32 to vector<1x128xf32>
    %214 = vector.broadcast %cst_98 : f32 to vector<1x128xf32>
    %215 = arith.select %212, %213, %214 : vector<1x128xi1>, vector<1x128xf32>
    %216 = math.absf %210 : vector<1x128xf32>
    %cst_99 = arith.constant 0.327591091 : f32
    %217 = vector.broadcast %cst_99 : f32 to vector<1x128xf32>
    %218 = arith.mulf %217, %216 : vector<1x128xf32>
    %cst_100 = arith.constant 1.000000e+00 : f32
    %219 = vector.broadcast %cst_100 : f32 to vector<1x128xf32>
    %220 = arith.addf %219, %218 : vector<1x128xf32>
    %cst_101 = arith.constant 1.000000e+00 : f32
    %221 = vector.broadcast %cst_101 : f32 to vector<1x128xf32>
    %222 = arith.divf %221, %220 : vector<1x128xf32>
    %cst_102 = arith.constant 1.06140542 : f32
    %223 = vector.broadcast %cst_102 : f32 to vector<1x128xf32>
    %224 = arith.mulf %223, %222 : vector<1x128xf32>
    %cst_103 = arith.constant -1.45315206 : f32
    %225 = vector.broadcast %cst_103 : f32 to vector<1x128xf32>
    %226 = arith.addf %224, %225 : vector<1x128xf32>
    %227 = arith.mulf %226, %222 : vector<1x128xf32>
    %cst_104 = arith.constant 1.42141378 : f32
    %228 = vector.broadcast %cst_104 : f32 to vector<1x128xf32>
    %229 = arith.addf %227, %228 : vector<1x128xf32>
    %230 = arith.mulf %229, %222 : vector<1x128xf32>
    %cst_105 = arith.constant -0.284496725 : f32
    %231 = vector.broadcast %cst_105 : f32 to vector<1x128xf32>
    %232 = arith.addf %230, %231 : vector<1x128xf32>
    %233 = arith.mulf %232, %222 : vector<1x128xf32>
    %cst_106 = arith.constant 0.254829586 : f32
    %234 = vector.broadcast %cst_106 : f32 to vector<1x128xf32>
    %235 = arith.addf %233, %234 : vector<1x128xf32>
    %236 = arith.mulf %235, %222 : vector<1x128xf32>
    %cst_107 = arith.constant 0.000000e+00 : f32
    %237 = vector.broadcast %cst_107 : f32 to vector<1x128xf32>
    %238 = arith.subf %237, %216 : vector<1x128xf32>
    %239 = arith.mulf %238, %216 : vector<1x128xf32>
    %240 = math.exp %239 : vector<1x128xf32>
    %241 = arith.mulf %236, %240 : vector<1x128xf32>
    %cst_108 = arith.constant 1.000000e+00 : f32
    %242 = vector.broadcast %cst_108 : f32 to vector<1x128xf32>
    %243 = arith.subf %242, %241 : vector<1x128xf32>
    %244 = arith.mulf %215, %243 : vector<1x128xf32>
    %cst_109 = arith.constant 1.000000e+00 : f32
    %245 = vector.broadcast %cst_109 : f32 to vector<1x128xf32>
    %246 = arith.addf %245, %244 : vector<1x128xf32>
    %247 = arith.mulf %208, %246 : vector<1x128xf32>
    %248 = vector.extract_strided_slice %73 {offsets = [2, 0], sizes = [1, 128], strides = [1, 1]} : vector<4x128xf32> to vector<1x128xf32>
    %249 = arith.addf %247, %248 : vector<1x128xf32>
    %250 = vector.extract_strided_slice %81 {offsets = [0, 96], sizes = [1, 32], strides = [1, 1]} : vector<1x128xf32> to vector<1x32xf32>
    %cst_110 = arith.constant dense<0.000000e+00> : vector<1x128xf32>
    %251 = tpu.matmul %250, %68, %cst_110 {dimension_numbers = #tpu.dot_dimension_numbers<[1], [0], [0], [1], [0, 0, 1, 1], [], []>} : vector<1x32xf32>, vector<32x128xf32>, vector<1x128xf32> -> vector<1x128xf32>
    %252 = arith.addf %251, %69 : vector<1x128xf32>
    %cst_111 = arith.constant dense<0.000000e+00> : vector<1x128xf32>
    %253 = tpu.matmul %252, %72, %cst_111 {dimension_numbers = #tpu.dot_dimension_numbers<[1], [0], [0], [1], [0, 0, 1, 1], [], []>} : vector<1x128xf32>, vector<128x128xf32>, vector<1x128xf32> -> vector<1x128xf32>
    %254 = arith.subf %252, %253 : vector<1x128xf32>
    %255 = arith.mulf %254, %254 : vector<1x128xf32>
    %cst_112 = arith.constant dense<0.000000e+00> : vector<1x128xf32>
    %256 = tpu.matmul %255, %72, %cst_112 {dimension_numbers = #tpu.dot_dimension_numbers<[1], [0], [0], [1], [0, 0, 1, 1], [], []>} : vector<1x128xf32>, vector<128x128xf32>, vector<1x128xf32> -> vector<1x128xf32>
    %cst_113 = arith.constant 9.99999974E-6 : f32
    %257 = vector.broadcast %cst_113 : f32 to vector<1x128xf32>
    %258 = arith.addf %256, %257 : vector<1x128xf32>
    %259 = math.rsqrt %258 : vector<1x128xf32>
    %260 = arith.mulf %254, %259 : vector<1x128xf32>
    %261 = arith.mulf %260, %70 : vector<1x128xf32>
    %262 = arith.addf %261, %71 : vector<1x128xf32>
    %cst_114 = arith.constant 5.000000e-01 : f32
    %263 = vector.broadcast %cst_114 : f32 to vector<1x128xf32>
    %264 = arith.mulf %263, %262 : vector<1x128xf32>
    %cst_115 = arith.constant 0.707106769 : f32
    %265 = vector.broadcast %cst_115 : f32 to vector<1x128xf32>
    %266 = arith.mulf %262, %265 : vector<1x128xf32>
    %cst_116 = arith.constant 0.000000e+00 : f32
    %267 = vector.broadcast %cst_116 : f32 to vector<1x128xf32>
    %268 = arith.cmpf oge, %266, %267 : vector<1x128xf32>
    %cst_117 = arith.constant 1.000000e+00 : f32
    %cst_118 = arith.constant -1.000000e+00 : f32
    %269 = vector.broadcast %cst_117 : f32 to vector<1x128xf32>
    %270 = vector.broadcast %cst_118 : f32 to vector<1x128xf32>
    %271 = arith.select %268, %269, %270 : vector<1x128xi1>, vector<1x128xf32>
    %272 = math.absf %266 : vector<1x128xf32>
    %cst_119 = arith.constant 0.327591091 : f32
    %273 = vector.broadcast %cst_119 : f32 to vector<1x128xf32>
    %274 = arith.mulf %273, %272 : vector<1x128xf32>
    %cst_120 = arith.constant 1.000000e+00 : f32
    %275 = vector.broadcast %cst_120 : f32 to vector<1x128xf32>
    %276 = arith.addf %275, %274 : vector<1x128xf32>
    %cst_121 = arith.constant 1.000000e+00 : f32
    %277 = vector.broadcast %cst_121 : f32 to vector<1x128xf32>
    %278 = arith.divf %277, %276 : vector<1x128xf32>
    %cst_122 = arith.constant 1.06140542 : f32
    %279 = vector.broadcast %cst_122 : f32 to vector<1x128xf32>
    %280 = arith.mulf %279, %278 : vector<1x128xf32>
    %cst_123 = arith.constant -1.45315206 : f32
    %281 = vector.broadcast %cst_123 : f32 to vector<1x128xf32>
    %282 = arith.addf %280, %281 : vector<1x128xf32>
    %283 = arith.mulf %282, %278 : vector<1x128xf32>
    %cst_124 = arith.constant 1.42141378 : f32
    %284 = vector.broadcast %cst_124 : f32 to vector<1x128xf32>
    %285 = arith.addf %283, %284 : vector<1x128xf32>
    %286 = arith.mulf %285, %278 : vector<1x128xf32>
    %cst_125 = arith.constant -0.284496725 : f32
    %287 = vector.broadcast %cst_125 : f32 to vector<1x128xf32>
    %288 = arith.addf %286, %287 : vector<1x128xf32>
    %289 = arith.mulf %288, %278 : vector<1x128xf32>
    %cst_126 = arith.constant 0.254829586 : f32
    %290 = vector.broadcast %cst_126 : f32 to vector<1x128xf32>
    %291 = arith.addf %289, %290 : vector<1x128xf32>
    %292 = arith.mulf %291, %278 : vector<1x128xf32>
    %cst_127 = arith.constant 0.000000e+00 : f32
    %293 = vector.broadcast %cst_127 : f32 to vector<1x128xf32>
    %294 = arith.subf %293, %272 : vector<1x128xf32>
    %295 = arith.mulf %294, %272 : vector<1x128xf32>
    %296 = math.exp %295 : vector<1x128xf32>
    %297 = arith.mulf %292, %296 : vector<1x128xf32>
    %cst_128 = arith.constant 1.000000e+00 : f32
    %298 = vector.broadcast %cst_128 : f32 to vector<1x128xf32>
    %299 = arith.subf %298, %297 : vector<1x128xf32>
    %300 = arith.mulf %271, %299 : vector<1x128xf32>
    %cst_129 = arith.constant 1.000000e+00 : f32
    %301 = vector.broadcast %cst_129 : f32 to vector<1x128xf32>
    %302 = arith.addf %301, %300 : vector<1x128xf32>
    %303 = arith.mulf %264, %302 : vector<1x128xf32>
    %304 = vector.extract_strided_slice %73 {offsets = [3, 0], sizes = [1, 128], strides = [1, 1]} : vector<4x128xf32> to vector<1x128xf32>
    %305 = arith.addf %303, %304 : vector<1x128xf32>
    %306 = tpu.concatenate %77, %137, %193, %249, %305 in 0 : vector<8x128xf32>, vector<1x128xf32>, vector<1x128xf32>, vector<1x128xf32>, vector<1x128xf32> -> vector<12x128xf32>
    %cst_130 = arith.constant dense<0.000000e+00> : vector<12x384xf32>
    %307 = tpu.matmul %306, %74, %cst_130 {dimension_numbers = #tpu.dot_dimension_numbers<[1], [0], [0], [1], [0, 0, 1, 1], [], []>} : vector<12x128xf32>, vector<128x384xf32>, vector<12x384xf32> -> vector<12x384xf32>
    %308 = vector.extract_strided_slice %307 {offsets = [0, 0], sizes = [12, 32], strides = [1, 1]} : vector<12x384xf32> to vector<12x32xf32>
    %309 = vector.extract_strided_slice %307 {offsets = [0, 128], sizes = [12, 32], strides = [1, 1]} : vector<12x384xf32> to vector<12x32xf32>
    %310 = vector.extract_strided_slice %307 {offsets = [0, 256], sizes = [12, 32], strides = [1, 1]} : vector<12x384xf32> to vector<12x32xf32>
    %311 = tpu.transpose %309, [1, 0] : vector<12x32xf32> -> vector<32x12xf32>
    %cst_131 = arith.constant dense<0.000000e+00> : vector<12x12xf32>
    %312 = tpu.matmul %308, %311, %cst_131 {dimension_numbers = #tpu.dot_dimension_numbers<[1], [0], [0], [1], [0, 0, 1, 1], [], []>} : vector<12x32xf32>, vector<32x12xf32>, vector<12x12xf32> -> vector<12x12xf32>
    %cst_132 = arith.constant 0.176776692 : f32
    %313 = vector.broadcast %cst_132 : f32 to vector<12x12xf32>
    %314 = arith.mulf %312, %313 : vector<12x12xf32>
    %cst_133 = arith.constant dense<0xFF800000> : vector<12xf32>
    %315 = vector.multi_reduction <maximumf>, %314, %cst_133 [1] : vector<12x12xf32> to vector<12xf32>
    %316 = vector.shape_cast %315 : vector<12xf32> to vector<12x1xf32>
    %317 = vector.broadcast %316 : vector<12x1xf32> to vector<12x12xf32>
    %318 = arith.subf %314, %317 : vector<12x12xf32>
    %319 = math.exp %318 : vector<12x12xf32>
    %cst_134 = arith.constant dense<0.000000e+00> : vector<12xf32>
    %320 = vector.multi_reduction <add>, %319, %cst_134 [1] : vector<12x12xf32> to vector<12xf32>
    %321 = vector.shape_cast %320 : vector<12xf32> to vector<12x1xf32>
    %322 = tpu.reciprocal %321 {approx = true} : vector<12x1xf32> -> vector<12x1xf32>
    %323 = vector.broadcast %322 : vector<12x1xf32> to vector<12x12xf32>
    %324 = arith.mulf %319, %323 : vector<12x12xf32>
    %c0_135 = arith.constant 0 : index
    %c0_136 = arith.constant 0 : index
    %c0_137 = arith.constant 0 : index
    %c0_138 = arith.constant 0 : index
    %325 = vector.load %arg38[%c0_135, %c0_136, %c0_137, %c0_138] : memref<2x4x12x12xf32, #tpu.memory_space<vmem>>, vector<1x1x12x12xf32>
    %326 = vector.shape_cast %325 : vector<1x1x12x12xf32> to vector<12x12xf32>
    %327 = vector.shape_cast %324 : vector<12x12xf32> to vector<1x1x12x12xf32>
    tpu.vector_store %arg38[%c0_135, %c0_136, %c0_137, %c0_138], %327 {strides = array<i32>} : memref<2x4x12x12xf32, #tpu.memory_space<vmem>>, vector<1x1x12x12xf32>,
    %cst_139 = arith.constant dense<0.000000e+00> : vector<12x32xf32>
    %328 = tpu.matmul %324, %310, %cst_139 {dimension_numbers = #tpu.dot_dimension_numbers<[1], [0], [0], [1], [0, 0, 1, 1], [], []>} : vector<12x12xf32>, vector<12x32xf32>, vector<12x32xf32> -> vector<12x32xf32>
    %329 = vector.extract_strided_slice %75 {offsets = [0, 0], sizes = [32, 128], strides = [1, 1]} : vector<128x128xf32> to vector<32x128xf32>
    %cst_140 = arith.constant dense<0.000000e+00> : vector<12x128xf32>
    %330 = tpu.matmul %328, %329, %cst_140 {dimension_numbers = #tpu.dot_dimension_numbers<[1], [0], [0], [1], [0, 0, 1, 1], [], []>} : vector<12x32xf32>, vector<32x128xf32>, vector<12x128xf32> -> vector<12x128xf32>
    %331 = vector.extract_strided_slice %307 {offsets = [0, 32], sizes = [12, 32], strides = [1, 1]} : vector<12x384xf32> to vector<12x32xf32>
    %332 = vector.extract_strided_slice %307 {offsets = [0, 160], sizes = [12, 32], strides = [1, 1]} : vector<12x384xf32> to vector<12x32xf32>
    %333 = vector.extract_strided_slice %307 {offsets = [0, 288], sizes = [12, 32], strides = [1, 1]} : vector<12x384xf32> to vector<12x32xf32>
    %334 = tpu.transpose %332, [1, 0] : vector<12x32xf32> -> vector<32x12xf32>
    %cst_141 = arith.constant dense<0.000000e+00> : vector<12x12xf32>
    %335 = tpu.matmul %331, %334, %cst_141 {dimension_numbers = #tpu.dot_dimension_numbers<[1], [0], [0], [1], [0, 0, 1, 1], [], []>} : vector<12x32xf32>, vector<32x12xf32>, vector<12x12xf32> -> vector<12x12xf32>
    %cst_142 = arith.constant 0.176776692 : f32
    %336 = vector.broadcast %cst_142 : f32 to vector<12x12xf32>
    %337 = arith.mulf %335, %336 : vector<12x12xf32>
    %cst_143 = arith.constant dense<0xFF800000> : vector<12xf32>
    %338 = vector.multi_reduction <maximumf>, %337, %cst_143 [1] : vector<12x12xf32> to vector<12xf32>
    %339 = vector.shape_cast %338 : vector<12xf32> to vector<12x1xf32>
    %340 = vector.broadcast %339 : vector<12x1xf32> to vector<12x12xf32>
    %341 = arith.subf %337, %340 : vector<12x12xf32>
    %342 = math.exp %341 : vector<12x12xf32>
    %cst_144 = arith.constant dense<0.000000e+00> : vector<12xf32>
    %343 = vector.multi_reduction <add>, %342, %cst_144 [1] : vector<12x12xf32> to vector<12xf32>
    %344 = vector.shape_cast %343 : vector<12xf32> to vector<12x1xf32>
    %345 = tpu.reciprocal %344 {approx = true} : vector<12x1xf32> -> vector<12x1xf32>
    %346 = vector.broadcast %345 : vector<12x1xf32> to vector<12x12xf32>
    %347 = arith.mulf %342, %346 : vector<12x12xf32>
    %c0_145 = arith.constant 0 : index
    %c1 = arith.constant 1 : index
    %c0_146 = arith.constant 0 : index
    %c0_147 = arith.constant 0 : index
    %348 = vector.load %arg38[%c0_145, %c1, %c0_146, %c0_147] : memref<2x4x12x12xf32, #tpu.memory_space<vmem>>, vector<1x1x12x12xf32>
    %349 = vector.shape_cast %348 : vector<1x1x12x12xf32> to vector<12x12xf32>
    %350 = vector.shape_cast %347 : vector<12x12xf32> to vector<1x1x12x12xf32>
    tpu.vector_store %arg38[%c0_145, %c1, %c0_146, %c0_147], %350 {strides = array<i32>} : memref<2x4x12x12xf32, #tpu.memory_space<vmem>>, vector<1x1x12x12xf32>,
    %cst_148 = arith.constant dense<0.000000e+00> : vector<12x32xf32>
    %351 = tpu.matmul %347, %333, %cst_148 {dimension_numbers = #tpu.dot_dimension_numbers<[1], [0], [0], [1], [0, 0, 1, 1], [], []>} : vector<12x12xf32>, vector<12x32xf32>, vector<12x32xf32> -> vector<12x32xf32>
    %352 = vector.extract_strided_slice %75 {offsets = [32, 0], sizes = [32, 128], strides = [1, 1]} : vector<128x128xf32> to vector<32x128xf32>
    %cst_149 = arith.constant dense<0.000000e+00> : vector<12x128xf32>
    %353 = tpu.matmul %351, %352, %cst_149 {dimension_numbers = #tpu.dot_dimension_numbers<[1], [0], [0], [1], [0, 0, 1, 1], [], []>} : vector<12x32xf32>, vector<32x128xf32>, vector<12x128xf32> -> vector<12x128xf32>
    %354 = arith.addf %330, %353 : vector<12x128xf32>
    %355 = vector.extract_strided_slice %307 {offsets = [0, 64], sizes = [12, 32], strides = [1, 1]} : vector<12x384xf32> to vector<12x32xf32>
    %356 = vector.extract_strided_slice %307 {offsets = [0, 192], sizes = [12, 32], strides = [1, 1]} : vector<12x384xf32> to vector<12x32xf32>
    %357 = vector.extract_strided_slice %307 {offsets = [0, 320], sizes = [12, 32], strides = [1, 1]} : vector<12x384xf32> to vector<12x32xf32>
    %358 = tpu.transpose %356, [1, 0] : vector<12x32xf32> -> vector<32x12xf32>
    %cst_150 = arith.constant dense<0.000000e+00> : vector<12x12xf32>
    %359 = tpu.matmul %355, %358, %cst_150 {dimension_numbers = #tpu.dot_dimension_numbers<[1], [0], [0], [1], [0, 0, 1, 1], [], []>} : vector<12x32xf32>, vector<32x12xf32>, vector<12x12xf32> -> vector<12x12xf32>
    %cst_151 = arith.constant 0.176776692 : f32
    %360 = vector.broadcast %cst_151 : f32 to vector<12x12xf32>
    %361 = arith.mulf %359, %360 : vector<12x12xf32>
    %cst_152 = arith.constant dense<0xFF800000> : vector<12xf32>
    %362 = vector.multi_reduction <maximumf>, %361, %cst_152 [1] : vector<12x12xf32> to vector<12xf32>
    %363 = vector.shape_cast %362 : vector<12xf32> to vector<12x1xf32>
    %364 = vector.broadcast %363 : vector<12x1xf32> to vector<12x12xf32>
    %365 = arith.subf %361, %364 : vector<12x12xf32>
    %366 = math.exp %365 : vector<12x12xf32>
    %cst_153 = arith.constant dense<0.000000e+00> : vector<12xf32>
    %367 = vector.multi_reduction <add>, %366, %cst_153 [1] : vector<12x12xf32> to vector<12xf32>
    %368 = vector.shape_cast %367 : vector<12xf32> to vector<12x1xf32>
    %369 = tpu.reciprocal %368 {approx = true} : vector<12x1xf32> -> vector<12x1xf32>
    %370 = vector.broadcast %369 : vector<12x1xf32> to vector<12x12xf32>
    %371 = arith.mulf %366, %370 : vector<12x12xf32>
    %c0_154 = arith.constant 0 : index
    %c2 = arith.constant 2 : index
    %c0_155 = arith.constant 0 : index
    %c0_156 = arith.constant 0 : index
    %372 = vector.load %arg38[%c0_154, %c2, %c0_155, %c0_156] : memref<2x4x12x12xf32, #tpu.memory_space<vmem>>, vector<1x1x12x12xf32>
    %373 = vector.shape_cast %372 : vector<1x1x12x12xf32> to vector<12x12xf32>
    %374 = vector.shape_cast %371 : vector<12x12xf32> to vector<1x1x12x12xf32>
    tpu.vector_store %arg38[%c0_154, %c2, %c0_155, %c0_156], %374 {strides = array<i32>} : memref<2x4x12x12xf32, #tpu.memory_space<vmem>>, vector<1x1x12x12xf32>,
    %cst_157 = arith.constant dense<0.000000e+00> : vector<12x32xf32>
    %375 = tpu.matmul %371, %357, %cst_157 {dimension_numbers = #tpu.dot_dimension_numbers<[1], [0], [0], [1], [0, 0, 1, 1], [], []>} : vector<12x12xf32>, vector<12x32xf32>, vector<12x32xf32> -> vector<12x32xf32>
    %376 = vector.extract_strided_slice %75 {offsets = [64, 0], sizes = [32, 128], strides = [1, 1]} : vector<128x128xf32> to vector<32x128xf32>
    %cst_158 = arith.constant dense<0.000000e+00> : vector<12x128xf32>
    %377 = tpu.matmul %375, %376, %cst_158 {dimension_numbers = #tpu.dot_dimension_numbers<[1], [0], [0], [1], [0, 0, 1, 1], [], []>} : vector<12x32xf32>, vector<32x128xf32>, vector<12x128xf32> -> vector<12x128xf32>
    %378 = arith.addf %354, %377 : vector<12x128xf32>
    %379 = vector.extract_strided_slice %307 {offsets = [0, 96], sizes = [12, 32], strides = [1, 1]} : vector<12x384xf32> to vector<12x32xf32>
    %380 = vector.extract_strided_slice %307 {offsets = [0, 224], sizes = [12, 32], strides = [1, 1]} : vector<12x384xf32> to vector<12x32xf32>
    %381 = vector.extract_strided_slice %307 {offsets = [0, 352], sizes = [12, 32], strides = [1, 1]} : vector<12x384xf32> to vector<12x32xf32>
    %382 = tpu.transpose %380, [1, 0] : vector<12x32xf32> -> vector<32x12xf32>
    %cst_159 = arith.constant dense<0.000000e+00> : vector<12x12xf32>
    %383 = tpu.matmul %379, %382, %cst_159 {dimension_numbers = #tpu.dot_dimension_numbers<[1], [0], [0], [1], [0, 0, 1, 1], [], []>} : vector<12x32xf32>, vector<32x12xf32>, vector<12x12xf32> -> vector<12x12xf32>
    %cst_160 = arith.constant 0.176776692 : f32
    %384 = vector.broadcast %cst_160 : f32 to vector<12x12xf32>
    %385 = arith.mulf %383, %384 : vector<12x12xf32>
    %cst_161 = arith.constant dense<0xFF800000> : vector<12xf32>
    %386 = vector.multi_reduction <maximumf>, %385, %cst_161 [1] : vector<12x12xf32> to vector<12xf32>
    %387 = vector.shape_cast %386 : vector<12xf32> to vector<12x1xf32>
    %388 = vector.broadcast %387 : vector<12x1xf32> to vector<12x12xf32>
    %389 = arith.subf %385, %388 : vector<12x12xf32>
    %390 = math.exp %389 : vector<12x12xf32>
    %cst_162 = arith.constant dense<0.000000e+00> : vector<12xf32>
    %391 = vector.multi_reduction <add>, %390, %cst_162 [1] : vector<12x12xf32> to vector<12xf32>
    %392 = vector.shape_cast %391 : vector<12xf32> to vector<12x1xf32>
    %393 = tpu.reciprocal %392 {approx = true} : vector<12x1xf32> -> vector<12x1xf32>
    %394 = vector.broadcast %393 : vector<12x1xf32> to vector<12x12xf32>
    %395 = arith.mulf %390, %394 : vector<12x12xf32>
    %c0_163 = arith.constant 0 : index
    %c3 = arith.constant 3 : index
    %c0_164 = arith.constant 0 : index
    %c0_165 = arith.constant 0 : index
    %396 = vector.load %arg38[%c0_163, %c3, %c0_164, %c0_165] : memref<2x4x12x12xf32, #tpu.memory_space<vmem>>, vector<1x1x12x12xf32>
    %397 = vector.shape_cast %396 : vector<1x1x12x12xf32> to vector<12x12xf32>
    %398 = vector.shape_cast %395 : vector<12x12xf32> to vector<1x1x12x12xf32>
    tpu.vector_store %arg38[%c0_163, %c3, %c0_164, %c0_165], %398 {strides = array<i32>} : memref<2x4x12x12xf32, #tpu.memory_space<vmem>>, vector<1x1x12x12xf32>,
    %cst_166 = arith.constant dense<0.000000e+00> : vector<12x32xf32>
    %399 = tpu.matmul %395, %381, %cst_166 {dimension_numbers = #tpu.dot_dimension_numbers<[1], [0], [0], [1], [0, 0, 1, 1], [], []>} : vector<12x12xf32>, vector<12x32xf32>, vector<12x32xf32> -> vector<12x32xf32>
    %400 = vector.extract_strided_slice %75 {offsets = [96, 0], sizes = [32, 128], strides = [1, 1]} : vector<128x128xf32> to vector<32x128xf32>
    %cst_167 = arith.constant dense<0.000000e+00> : vector<12x128xf32>
    %401 = tpu.matmul %399, %400, %cst_167 {dimension_numbers = #tpu.dot_dimension_numbers<[1], [0], [0], [1], [0, 0, 1, 1], [], []>} : vector<12x32xf32>, vector<32x128xf32>, vector<12x128xf32> -> vector<12x128xf32>
    %402 = arith.addf %378, %401 : vector<12x128xf32>
    %403 = vector.broadcast %76 : vector<1x128xf32> to vector<12x128xf32>
    %404 = arith.addf %402, %403 : vector<12x128xf32>
    %405 = vector.extract_strided_slice %404 {offsets = [0, 0], sizes = [1, 128], strides = [1, 1]} : vector<12x128xf32> to vector<1x128xf32>
    %406 = vector.extract_strided_slice %404 {offsets = [1, 0], sizes = [7, 128], strides = [1, 1]} : vector<12x128xf32> to vector<7x128xf32>
    %407 = vector.extract_strided_slice %404 {offsets = [8, 0], sizes = [4, 128], strides = [1, 1]} : vector<12x128xf32> to vector<4x128xf32>
    %cst_168 = arith.constant dense<0.000000e+00> : vector<128xf32>
    %408 = vector.multi_reduction <add>, %407, %cst_168 [0] : vector<4x128xf32> to vector<128xf32>
    %409 = vector.shape_cast %408 : vector<128xf32> to vector<1x128xf32>
    %cst_169 = arith.constant 4.000000e+00 : f32
    %410 = vector.broadcast %cst_169 : f32 to vector<1x128xf32>
    %411 = arith.divf %409, %410 : vector<1x128xf32>
    %412 = arith.addf %405, %411 : vector<1x128xf32>
    %cst_170 = arith.constant dense<0.000000e+00> : vector<128xf32>
    %413 = vector.multi_reduction <add>, %406, %cst_170 [0] : vector<7x128xf32> to vector<128xf32>
    %414 = vector.shape_cast %413 : vector<128xf32> to vector<1x128xf32>
    %cst_171 = arith.constant 7.000000e+00 : f32
    %415 = vector.broadcast %cst_171 : f32 to vector<1x128xf32>
    %416 = arith.divf %414, %415 : vector<1x128xf32>
    %417 = arith.addf %412, %416 : vector<1x128xf32>
    %418 = tpu.concatenate %417, %406 in 0 : vector<1x128xf32>, vector<7x128xf32> -> vector<8x128xf32>
    %419 = vector.extract_strided_slice %67 {offsets = [8, 0], sizes = [8, 128], strides = [1, 1]} : vector<16x128xf32> to vector<8x128xf32>
    %cst_172 = arith.constant dense<0.000000e+00> : vector<128xf32>
    %420 = vector.multi_reduction <add>, %419, %cst_172 [0] : vector<8x128xf32> to vector<128xf32>
    %421 = vector.shape_cast %420 : vector<128xf32> to vector<1x128xf32>
    %cst_173 = arith.constant 8.000000e+00 : f32
    %422 = vector.broadcast %cst_173 : f32 to vector<1x128xf32>
    %423 = arith.divf %421, %422 : vector<1x128xf32>
    %424 = vector.extract_strided_slice %423 {offsets = [0, 0], sizes = [1, 32], strides = [1, 1]} : vector<1x128xf32> to vector<1x32xf32>
    %cst_174 = arith.constant dense<0.000000e+00> : vector<1x128xf32>
    %425 = tpu.matmul %424, %68, %cst_174 {dimension_numbers = #tpu.dot_dimension_numbers<[1], [0], [0], [1], [0, 0, 1, 1], [], []>} : vector<1x32xf32>, vector<32x128xf32>, vector<1x128xf32> -> vector<1x128xf32>
    %426 = arith.addf %425, %69 : vector<1x128xf32>
    %cst_175 = arith.constant dense<0.000000e+00> : vector<1x128xf32>
    %427 = tpu.matmul %426, %72, %cst_175 {dimension_numbers = #tpu.dot_dimension_numbers<[1], [0], [0], [1], [0, 0, 1, 1], [], []>} : vector<1x128xf32>, vector<128x128xf32>, vector<1x128xf32> -> vector<1x128xf32>
    %428 = arith.subf %426, %427 : vector<1x128xf32>
    %429 = arith.mulf %428, %428 : vector<1x128xf32>
    %cst_176 = arith.constant dense<0.000000e+00> : vector<1x128xf32>
    %430 = tpu.matmul %429, %72, %cst_176 {dimension_numbers = #tpu.dot_dimension_numbers<[1], [0], [0], [1], [0, 0, 1, 1], [], []>} : vector<1x128xf32>, vector<128x128xf32>, vector<1x128xf32> -> vector<1x128xf32>
    %cst_177 = arith.constant 9.99999974E-6 : f32
    %431 = vector.broadcast %cst_177 : f32 to vector<1x128xf32>
    %432 = arith.addf %430, %431 : vector<1x128xf32>
    %433 = math.rsqrt %432 : vector<1x128xf32>
    %434 = arith.mulf %428, %433 : vector<1x128xf32>
    %435 = arith.mulf %434, %70 : vector<1x128xf32>
    %436 = arith.addf %435, %71 : vector<1x128xf32>
    %cst_178 = arith.constant 5.000000e-01 : f32
    %437 = vector.broadcast %cst_178 : f32 to vector<1x128xf32>
    %438 = arith.mulf %437, %436 : vector<1x128xf32>
    %cst_179 = arith.constant 0.707106769 : f32
    %439 = vector.broadcast %cst_179 : f32 to vector<1x128xf32>
    %440 = arith.mulf %436, %439 : vector<1x128xf32>
    %cst_180 = arith.constant 0.000000e+00 : f32
    %441 = vector.broadcast %cst_180 : f32 to vector<1x128xf32>
    %442 = arith.cmpf oge, %440, %441 : vector<1x128xf32>
    %cst_181 = arith.constant 1.000000e+00 : f32
    %cst_182 = arith.constant -1.000000e+00 : f32
    %443 = vector.broadcast %cst_181 : f32 to vector<1x128xf32>
    %444 = vector.broadcast %cst_182 : f32 to vector<1x128xf32>
    %445 = arith.select %442, %443, %444 : vector<1x128xi1>, vector<1x128xf32>
    %446 = math.absf %440 : vector<1x128xf32>
    %cst_183 = arith.constant 0.327591091 : f32
    %447 = vector.broadcast %cst_183 : f32 to vector<1x128xf32>
    %448 = arith.mulf %447, %446 : vector<1x128xf32>
    %cst_184 = arith.constant 1.000000e+00 : f32
    %449 = vector.broadcast %cst_184 : f32 to vector<1x128xf32>
    %450 = arith.addf %449, %448 : vector<1x128xf32>
    %cst_185 = arith.constant 1.000000e+00 : f32
    %451 = vector.broadcast %cst_185 : f32 to vector<1x128xf32>
    %452 = arith.divf %451, %450 : vector<1x128xf32>
    %cst_186 = arith.constant 1.06140542 : f32
    %453 = vector.broadcast %cst_186 : f32 to vector<1x128xf32>
    %454 = arith.mulf %453, %452 : vector<1x128xf32>
    %cst_187 = arith.constant -1.45315206 : f32
    %455 = vector.broadcast %cst_187 : f32 to vector<1x128xf32>
    %456 = arith.addf %454, %455 : vector<1x128xf32>
    %457 = arith.mulf %456, %452 : vector<1x128xf32>
    %cst_188 = arith.constant 1.42141378 : f32
    %458 = vector.broadcast %cst_188 : f32 to vector<1x128xf32>
    %459 = arith.addf %457, %458 : vector<1x128xf32>
    %460 = arith.mulf %459, %452 : vector<1x128xf32>
    %cst_189 = arith.constant -0.284496725 : f32
    %461 = vector.broadcast %cst_189 : f32 to vector<1x128xf32>
    %462 = arith.addf %460, %461 : vector<1x128xf32>
    %463 = arith.mulf %462, %452 : vector<1x128xf32>
    %cst_190 = arith.constant 0.254829586 : f32
    %464 = vector.broadcast %cst_190 : f32 to vector<1x128xf32>
    %465 = arith.addf %463, %464 : vector<1x128xf32>
    %466 = arith.mulf %465, %452 : vector<1x128xf32>
    %cst_191 = arith.constant 0.000000e+00 : f32
    %467 = vector.broadcast %cst_191 : f32 to vector<1x128xf32>
    %468 = arith.subf %467, %446 : vector<1x128xf32>
    %469 = arith.mulf %468, %446 : vector<1x128xf32>
    %470 = math.exp %469 : vector<1x128xf32>
    %471 = arith.mulf %466, %470 : vector<1x128xf32>
    %cst_192 = arith.constant 1.000000e+00 : f32
    %472 = vector.broadcast %cst_192 : f32 to vector<1x128xf32>
    %473 = arith.subf %472, %471 : vector<1x128xf32>
    %474 = arith.mulf %445, %473 : vector<1x128xf32>
    %cst_193 = arith.constant 1.000000e+00 : f32
    %475 = vector.broadcast %cst_193 : f32 to vector<1x128xf32>
    %476 = arith.addf %475, %474 : vector<1x128xf32>
    %477 = arith.mulf %438, %476 : vector<1x128xf32>
    %478 = vector.extract_strided_slice %73 {offsets = [0, 0], sizes = [1, 128], strides = [1, 1]} : vector<4x128xf32> to vector<1x128xf32>
    %479 = arith.addf %477, %478 : vector<1x128xf32>
    %480 = vector.extract_strided_slice %423 {offsets = [0, 32], sizes = [1, 32], strides = [1, 1]} : vector<1x128xf32> to vector<1x32xf32>
    %cst_194 = arith.constant dense<0.000000e+00> : vector<1x128xf32>
    %481 = tpu.matmul %480, %68, %cst_194 {dimension_numbers = #tpu.dot_dimension_numbers<[1], [0], [0], [1], [0, 0, 1, 1], [], []>} : vector<1x32xf32>, vector<32x128xf32>, vector<1x128xf32> -> vector<1x128xf32>
    %482 = arith.addf %481, %69 : vector<1x128xf32>
    %cst_195 = arith.constant dense<0.000000e+00> : vector<1x128xf32>
    %483 = tpu.matmul %482, %72, %cst_195 {dimension_numbers = #tpu.dot_dimension_numbers<[1], [0], [0], [1], [0, 0, 1, 1], [], []>} : vector<1x128xf32>, vector<128x128xf32>, vector<1x128xf32> -> vector<1x128xf32>
    %484 = arith.subf %482, %483 : vector<1x128xf32>
    %485 = arith.mulf %484, %484 : vector<1x128xf32>
    %cst_196 = arith.constant dense<0.000000e+00> : vector<1x128xf32>
    %486 = tpu.matmul %485, %72, %cst_196 {dimension_numbers = #tpu.dot_dimension_numbers<[1], [0], [0], [1], [0, 0, 1, 1], [], []>} : vector<1x128xf32>, vector<128x128xf32>, vector<1x128xf32> -> vector<1x128xf32>
    %cst_197 = arith.constant 9.99999974E-6 : f32
    %487 = vector.broadcast %cst_197 : f32 to vector<1x128xf32>
    %488 = arith.addf %486, %487 : vector<1x128xf32>
    %489 = math.rsqrt %488 : vector<1x128xf32>
    %490 = arith.mulf %484, %489 : vector<1x128xf32>
    %491 = arith.mulf %490, %70 : vector<1x128xf32>
    %492 = arith.addf %491, %71 : vector<1x128xf32>
    %cst_198 = arith.constant 5.000000e-01 : f32
    %493 = vector.broadcast %cst_198 : f32 to vector<1x128xf32>
    %494 = arith.mulf %493, %492 : vector<1x128xf32>
    %cst_199 = arith.constant 0.707106769 : f32
    %495 = vector.broadcast %cst_199 : f32 to vector<1x128xf32>
    %496 = arith.mulf %492, %495 : vector<1x128xf32>
    %cst_200 = arith.constant 0.000000e+00 : f32
    %497 = vector.broadcast %cst_200 : f32 to vector<1x128xf32>
    %498 = arith.cmpf oge, %496, %497 : vector<1x128xf32>
    %cst_201 = arith.constant 1.000000e+00 : f32
    %cst_202 = arith.constant -1.000000e+00 : f32
    %499 = vector.broadcast %cst_201 : f32 to vector<1x128xf32>
    %500 = vector.broadcast %cst_202 : f32 to vector<1x128xf32>
    %501 = arith.select %498, %499, %500 : vector<1x128xi1>, vector<1x128xf32>
    %502 = math.absf %496 : vector<1x128xf32>
    %cst_203 = arith.constant 0.327591091 : f32
    %503 = vector.broadcast %cst_203 : f32 to vector<1x128xf32>
    %504 = arith.mulf %503, %502 : vector<1x128xf32>
    %cst_204 = arith.constant 1.000000e+00 : f32
    %505 = vector.broadcast %cst_204 : f32 to vector<1x128xf32>
    %506 = arith.addf %505, %504 : vector<1x128xf32>
    %cst_205 = arith.constant 1.000000e+00 : f32
    %507 = vector.broadcast %cst_205 : f32 to vector<1x128xf32>
    %508 = arith.divf %507, %506 : vector<1x128xf32>
    %cst_206 = arith.constant 1.06140542 : f32
    %509 = vector.broadcast %cst_206 : f32 to vector<1x128xf32>
    %510 = arith.mulf %509, %508 : vector<1x128xf32>
    %cst_207 = arith.constant -1.45315206 : f32
    %511 = vector.broadcast %cst_207 : f32 to vector<1x128xf32>
    %512 = arith.addf %510, %511 : vector<1x128xf32>
    %513 = arith.mulf %512, %508 : vector<1x128xf32>
    %cst_208 = arith.constant 1.42141378 : f32
    %514 = vector.broadcast %cst_208 : f32 to vector<1x128xf32>
    %515 = arith.addf %513, %514 : vector<1x128xf32>
    %516 = arith.mulf %515, %508 : vector<1x128xf32>
    %cst_209 = arith.constant -0.284496725 : f32
    %517 = vector.broadcast %cst_209 : f32 to vector<1x128xf32>
    %518 = arith.addf %516, %517 : vector<1x128xf32>
    %519 = arith.mulf %518, %508 : vector<1x128xf32>
    %cst_210 = arith.constant 0.254829586 : f32
    %520 = vector.broadcast %cst_210 : f32 to vector<1x128xf32>
    %521 = arith.addf %519, %520 : vector<1x128xf32>
    %522 = arith.mulf %521, %508 : vector<1x128xf32>
    %cst_211 = arith.constant 0.000000e+00 : f32
    %523 = vector.broadcast %cst_211 : f32 to vector<1x128xf32>
    %524 = arith.subf %523, %502 : vector<1x128xf32>
    %525 = arith.mulf %524, %502 : vector<1x128xf32>
    %526 = math.exp %525 : vector<1x128xf32>
    %527 = arith.mulf %522, %526 : vector<1x128xf32>
    %cst_212 = arith.constant 1.000000e+00 : f32
    %528 = vector.broadcast %cst_212 : f32 to vector<1x128xf32>
    %529 = arith.subf %528, %527 : vector<1x128xf32>
    %530 = arith.mulf %501, %529 : vector<1x128xf32>
    %cst_213 = arith.constant 1.000000e+00 : f32
    %531 = vector.broadcast %cst_213 : f32 to vector<1x128xf32>
    %532 = arith.addf %531, %530 : vector<1x128xf32>
    %533 = arith.mulf %494, %532 : vector<1x128xf32>
    %534 = vector.extract_strided_slice %73 {offsets = [1, 0], sizes = [1, 128], strides = [1, 1]} : vector<4x128xf32> to vector<1x128xf32>
    %535 = arith.addf %533, %534 : vector<1x128xf32>
    %536 = vector.extract_strided_slice %423 {offsets = [0, 64], sizes = [1, 32], strides = [1, 1]} : vector<1x128xf32> to vector<1x32xf32>
    %cst_214 = arith.constant dense<0.000000e+00> : vector<1x128xf32>
    %537 = tpu.matmul %536, %68, %cst_214 {dimension_numbers = #tpu.dot_dimension_numbers<[1], [0], [0], [1], [0, 0, 1, 1], [], []>} : vector<1x32xf32>, vector<32x128xf32>, vector<1x128xf32> -> vector<1x128xf32>
    %538 = arith.addf %537, %69 : vector<1x128xf32>
    %cst_215 = arith.constant dense<0.000000e+00> : vector<1x128xf32>
    %539 = tpu.matmul %538, %72, %cst_215 {dimension_numbers = #tpu.dot_dimension_numbers<[1], [0], [0], [1], [0, 0, 1, 1], [], []>} : vector<1x128xf32>, vector<128x128xf32>, vector<1x128xf32> -> vector<1x128xf32>
    %540 = arith.subf %538, %539 : vector<1x128xf32>
    %541 = arith.mulf %540, %540 : vector<1x128xf32>
    %cst_216 = arith.constant dense<0.000000e+00> : vector<1x128xf32>
    %542 = tpu.matmul %541, %72, %cst_216 {dimension_numbers = #tpu.dot_dimension_numbers<[1], [0], [0], [1], [0, 0, 1, 1], [], []>} : vector<1x128xf32>, vector<128x128xf32>, vector<1x128xf32> -> vector<1x128xf32>
    %cst_217 = arith.constant 9.99999974E-6 : f32
    %543 = vector.broadcast %cst_217 : f32 to vector<1x128xf32>
    %544 = arith.addf %542, %543 : vector<1x128xf32>
    %545 = math.rsqrt %544 : vector<1x128xf32>
    %546 = arith.mulf %540, %545 : vector<1x128xf32>
    %547 = arith.mulf %546, %70 : vector<1x128xf32>
    %548 = arith.addf %547, %71 : vector<1x128xf32>
    %cst_218 = arith.constant 5.000000e-01 : f32
    %549 = vector.broadcast %cst_218 : f32 to vector<1x128xf32>
    %550 = arith.mulf %549, %548 : vector<1x128xf32>
    %cst_219 = arith.constant 0.707106769 : f32
    %551 = vector.broadcast %cst_219 : f32 to vector<1x128xf32>
    %552 = arith.mulf %548, %551 : vector<1x128xf32>
    %cst_220 = arith.constant 0.000000e+00 : f32
    %553 = vector.broadcast %cst_220 : f32 to vector<1x128xf32>
    %554 = arith.cmpf oge, %552, %553 : vector<1x128xf32>
    %cst_221 = arith.constant 1.000000e+00 : f32
    %cst_222 = arith.constant -1.000000e+00 : f32
    %555 = vector.broadcast %cst_221 : f32 to vector<1x128xf32>
    %556 = vector.broadcast %cst_222 : f32 to vector<1x128xf32>
    %557 = arith.select %554, %555, %556 : vector<1x128xi1>, vector<1x128xf32>
    %558 = math.absf %552 : vector<1x128xf32>
    %cst_223 = arith.constant 0.327591091 : f32
    %559 = vector.broadcast %cst_223 : f32 to vector<1x128xf32>
    %560 = arith.mulf %559, %558 : vector<1x128xf32>
    %cst_224 = arith.constant 1.000000e+00 : f32
    %561 = vector.broadcast %cst_224 : f32 to vector<1x128xf32>
    %562 = arith.addf %561, %560 : vector<1x128xf32>
    %cst_225 = arith.constant 1.000000e+00 : f32
    %563 = vector.broadcast %cst_225 : f32 to vector<1x128xf32>
    %564 = arith.divf %563, %562 : vector<1x128xf32>
    %cst_226 = arith.constant 1.06140542 : f32
    %565 = vector.broadcast %cst_226 : f32 to vector<1x128xf32>
    %566 = arith.mulf %565, %564 : vector<1x128xf32>
    %cst_227 = arith.constant -1.45315206 : f32
    %567 = vector.broadcast %cst_227 : f32 to vector<1x128xf32>
    %568 = arith.addf %566, %567 : vector<1x128xf32>
    %569 = arith.mulf %568, %564 : vector<1x128xf32>
    %cst_228 = arith.constant 1.42141378 : f32
    %570 = vector.broadcast %cst_228 : f32 to vector<1x128xf32>
    %571 = arith.addf %569, %570 : vector<1x128xf32>
    %572 = arith.mulf %571, %564 : vector<1x128xf32>
    %cst_229 = arith.constant -0.284496725 : f32
    %573 = vector.broadcast %cst_229 : f32 to vector<1x128xf32>
    %574 = arith.addf %572, %573 : vector<1x128xf32>
    %575 = arith.mulf %574, %564 : vector<1x128xf32>
    %cst_230 = arith.constant 0.254829586 : f32
    %576 = vector.broadcast %cst_230 : f32 to vector<1x128xf32>
    %577 = arith.addf %575, %576 : vector<1x128xf32>
    %578 = arith.mulf %577, %564 : vector<1x128xf32>
    %cst_231 = arith.constant 0.000000e+00 : f32
    %579 = vector.broadcast %cst_231 : f32 to vector<1x128xf32>
    %580 = arith.subf %579, %558 : vector<1x128xf32>
    %581 = arith.mulf %580, %558 : vector<1x128xf32>
    %582 = math.exp %581 : vector<1x128xf32>
    %583 = arith.mulf %578, %582 : vector<1x128xf32>
    %cst_232 = arith.constant 1.000000e+00 : f32
    %584 = vector.broadcast %cst_232 : f32 to vector<1x128xf32>
    %585 = arith.subf %584, %583 : vector<1x128xf32>
    %586 = arith.mulf %557, %585 : vector<1x128xf32>
    %cst_233 = arith.constant 1.000000e+00 : f32
    %587 = vector.broadcast %cst_233 : f32 to vector<1x128xf32>
    %588 = arith.addf %587, %586 : vector<1x128xf32>
    %589 = arith.mulf %550, %588 : vector<1x128xf32>
    %590 = vector.extract_strided_slice %73 {offsets = [2, 0], sizes = [1, 128], strides = [1, 1]} : vector<4x128xf32> to vector<1x128xf32>
    %591 = arith.addf %589, %590 : vector<1x128xf32>
    %592 = vector.extract_strided_slice %423 {offsets = [0, 96], sizes = [1, 32], strides = [1, 1]} : vector<1x128xf32> to vector<1x32xf32>
    %cst_234 = arith.constant dense<0.000000e+00> : vector<1x128xf32>
    %593 = tpu.matmul %592, %68, %cst_234 {dimension_numbers = #tpu.dot_dimension_numbers<[1], [0], [0], [1], [0, 0, 1, 1], [], []>} : vector<1x32xf32>, vector<32x128xf32>, vector<1x128xf32> -> vector<1x128xf32>
    %594 = arith.addf %593, %69 : vector<1x128xf32>
    %cst_235 = arith.constant dense<0.000000e+00> : vector<1x128xf32>
    %595 = tpu.matmul %594, %72, %cst_235 {dimension_numbers = #tpu.dot_dimension_numbers<[1], [0], [0], [1], [0, 0, 1, 1], [], []>} : vector<1x128xf32>, vector<128x128xf32>, vector<1x128xf32> -> vector<1x128xf32>
    %596 = arith.subf %594, %595 : vector<1x128xf32>
    %597 = arith.mulf %596, %596 : vector<1x128xf32>
    %cst_236 = arith.constant dense<0.000000e+00> : vector<1x128xf32>
    %598 = tpu.matmul %597, %72, %cst_236 {dimension_numbers = #tpu.dot_dimension_numbers<[1], [0], [0], [1], [0, 0, 1, 1], [], []>} : vector<1x128xf32>, vector<128x128xf32>, vector<1x128xf32> -> vector<1x128xf32>
    %cst_237 = arith.constant 9.99999974E-6 : f32
    %599 = vector.broadcast %cst_237 : f32 to vector<1x128xf32>
    %600 = arith.addf %598, %599 : vector<1x128xf32>
    %601 = math.rsqrt %600 : vector<1x128xf32>
    %602 = arith.mulf %596, %601 : vector<1x128xf32>
    %603 = arith.mulf %602, %70 : vector<1x128xf32>
    %604 = arith.addf %603, %71 : vector<1x128xf32>
    %cst_238 = arith.constant 5.000000e-01 : f32
    %605 = vector.broadcast %cst_238 : f32 to vector<1x128xf32>
    %606 = arith.mulf %605, %604 : vector<1x128xf32>
    %cst_239 = arith.constant 0.707106769 : f32
    %607 = vector.broadcast %cst_239 : f32 to vector<1x128xf32>
    %608 = arith.mulf %604, %607 : vector<1x128xf32>
    %cst_240 = arith.constant 0.000000e+00 : f32
    %609 = vector.broadcast %cst_240 : f32 to vector<1x128xf32>
    %610 = arith.cmpf oge, %608, %609 : vector<1x128xf32>
    %cst_241 = arith.constant 1.000000e+00 : f32
    %cst_242 = arith.constant -1.000000e+00 : f32
    %611 = vector.broadcast %cst_241 : f32 to vector<1x128xf32>
    %612 = vector.broadcast %cst_242 : f32 to vector<1x128xf32>
    %613 = arith.select %610, %611, %612 : vector<1x128xi1>, vector<1x128xf32>
    %614 = math.absf %608 : vector<1x128xf32>
    %cst_243 = arith.constant 0.327591091 : f32
    %615 = vector.broadcast %cst_243 : f32 to vector<1x128xf32>
    %616 = arith.mulf %615, %614 : vector<1x128xf32>
    %cst_244 = arith.constant 1.000000e+00 : f32
    %617 = vector.broadcast %cst_244 : f32 to vector<1x128xf32>
    %618 = arith.addf %617, %616 : vector<1x128xf32>
    %cst_245 = arith.constant 1.000000e+00 : f32
    %619 = vector.broadcast %cst_245 : f32 to vector<1x128xf32>
    %620 = arith.divf %619, %618 : vector<1x128xf32>
    %cst_246 = arith.constant 1.06140542 : f32
    %621 = vector.broadcast %cst_246 : f32 to vector<1x128xf32>
    %622 = arith.mulf %621, %620 : vector<1x128xf32>
    %cst_247 = arith.constant -1.45315206 : f32
    %623 = vector.broadcast %cst_247 : f32 to vector<1x128xf32>
    %624 = arith.addf %622, %623 : vector<1x128xf32>
    %625 = arith.mulf %624, %620 : vector<1x128xf32>
    %cst_248 = arith.constant 1.42141378 : f32
    %626 = vector.broadcast %cst_248 : f32 to vector<1x128xf32>
    %627 = arith.addf %625, %626 : vector<1x128xf32>
    %628 = arith.mulf %627, %620 : vector<1x128xf32>
    %cst_249 = arith.constant -0.284496725 : f32
    %629 = vector.broadcast %cst_249 : f32 to vector<1x128xf32>
    %630 = arith.addf %628, %629 : vector<1x128xf32>
    %631 = arith.mulf %630, %620 : vector<1x128xf32>
    %cst_250 = arith.constant 0.254829586 : f32
    %632 = vector.broadcast %cst_250 : f32 to vector<1x128xf32>
    %633 = arith.addf %631, %632 : vector<1x128xf32>
    %634 = arith.mulf %633, %620 : vector<1x128xf32>
    %cst_251 = arith.constant 0.000000e+00 : f32
    %635 = vector.broadcast %cst_251 : f32 to vector<1x128xf32>
    %636 = arith.subf %635, %614 : vector<1x128xf32>
    %637 = arith.mulf %636, %614 : vector<1x128xf32>
    %638 = math.exp %637 : vector<1x128xf32>
    %639 = arith.mulf %634, %638 : vector<1x128xf32>
    %cst_252 = arith.constant 1.000000e+00 : f32
    %640 = vector.broadcast %cst_252 : f32 to vector<1x128xf32>
    %641 = arith.subf %640, %639 : vector<1x128xf32>
    %642 = arith.mulf %613, %641 : vector<1x128xf32>
    %cst_253 = arith.constant 1.000000e+00 : f32
    %643 = vector.broadcast %cst_253 : f32 to vector<1x128xf32>
    %644 = arith.addf %643, %642 : vector<1x128xf32>
    %645 = arith.mulf %606, %644 : vector<1x128xf32>
    %646 = vector.extract_strided_slice %73 {offsets = [3, 0], sizes = [1, 128], strides = [1, 1]} : vector<4x128xf32> to vector<1x128xf32>
    %647 = arith.addf %645, %646 : vector<1x128xf32>
    %648 = tpu.concatenate %419, %479, %535, %591, %647 in 0 : vector<8x128xf32>, vector<1x128xf32>, vector<1x128xf32>, vector<1x128xf32>, vector<1x128xf32> -> vector<12x128xf32>
    %cst_254 = arith.constant dense<0.000000e+00> : vector<12x384xf32>
    %649 = tpu.matmul %648, %74, %cst_254 {dimension_numbers = #tpu.dot_dimension_numbers<[1], [0], [0], [1], [0, 0, 1, 1], [], []>} : vector<12x128xf32>, vector<128x384xf32>, vector<12x384xf32> -> vector<12x384xf32>
    %650 = vector.extract_strided_slice %649 {offsets = [0, 0], sizes = [12, 32], strides = [1, 1]} : vector<12x384xf32> to vector<12x32xf32>
    %651 = vector.extract_strided_slice %649 {offsets = [0, 128], sizes = [12, 32], strides = [1, 1]} : vector<12x384xf32> to vector<12x32xf32>
    %652 = vector.extract_strided_slice %649 {offsets = [0, 256], sizes = [12, 32], strides = [1, 1]} : vector<12x384xf32> to vector<12x32xf32>
    %653 = tpu.transpose %651, [1, 0] : vector<12x32xf32> -> vector<32x12xf32>
    %cst_255 = arith.constant dense<0.000000e+00> : vector<12x12xf32>
    %654 = tpu.matmul %650, %653, %cst_255 {dimension_numbers = #tpu.dot_dimension_numbers<[1], [0], [0], [1], [0, 0, 1, 1], [], []>} : vector<12x32xf32>, vector<32x12xf32>, vector<12x12xf32> -> vector<12x12xf32>
    %cst_256 = arith.constant 0.176776692 : f32
    %655 = vector.broadcast %cst_256 : f32 to vector<12x12xf32>
    %656 = arith.mulf %654, %655 : vector<12x12xf32>
    %cst_257 = arith.constant dense<0xFF800000> : vector<12xf32>
    %657 = vector.multi_reduction <maximumf>, %656, %cst_257 [1] : vector<12x12xf32> to vector<12xf32>
    %658 = vector.shape_cast %657 : vector<12xf32> to vector<12x1xf32>
    %659 = vector.broadcast %658 : vector<12x1xf32> to vector<12x12xf32>
    %660 = arith.subf %656, %659 : vector<12x12xf32>
    %661 = math.exp %660 : vector<12x12xf32>
    %cst_258 = arith.constant dense<0.000000e+00> : vector<12xf32>
    %662 = vector.multi_reduction <add>, %661, %cst_258 [1] : vector<12x12xf32> to vector<12xf32>
    %663 = vector.shape_cast %662 : vector<12xf32> to vector<12x1xf32>
    %664 = tpu.reciprocal %663 {approx = true} : vector<12x1xf32> -> vector<12x1xf32>
    %665 = vector.broadcast %664 : vector<12x1xf32> to vector<12x12xf32>
    %666 = arith.mulf %661, %665 : vector<12x12xf32>
    %c1_259 = arith.constant 1 : index
    %c0_260 = arith.constant 0 : index
    %c0_261 = arith.constant 0 : index
    %c0_262 = arith.constant 0 : index
    %667 = vector.load %arg38[%c1_259, %c0_260, %c0_261, %c0_262] : memref<2x4x12x12xf32, #tpu.memory_space<vmem>>, vector<1x1x12x12xf32>
    %668 = vector.shape_cast %667 : vector<1x1x12x12xf32> to vector<12x12xf32>
    %669 = vector.shape_cast %666 : vector<12x12xf32> to vector<1x1x12x12xf32>
    tpu.vector_store %arg38[%c1_259, %c0_260, %c0_261, %c0_262], %669 {strides = array<i32>} : memref<2x4x12x12xf32, #tpu.memory_space<vmem>>, vector<1x1x12x12xf32>,
    %cst_263 = arith.constant dense<0.000000e+00> : vector<12x32xf32>
    %670 = tpu.matmul %666, %652, %cst_263 {dimension_numbers = #tpu.dot_dimension_numbers<[1], [0], [0], [1], [0, 0, 1, 1], [], []>} : vector<12x12xf32>, vector<12x32xf32>, vector<12x32xf32> -> vector<12x32xf32>
    %671 = vector.extract_strided_slice %75 {offsets = [0, 0], sizes = [32, 128], strides = [1, 1]} : vector<128x128xf32> to vector<32x128xf32>
    %cst_264 = arith.constant dense<0.000000e+00> : vector<12x128xf32>
    %672 = tpu.matmul %670, %671, %cst_264 {dimension_numbers = #tpu.dot_dimension_numbers<[1], [0], [0], [1], [0, 0, 1, 1], [], []>} : vector<12x32xf32>, vector<32x128xf32>, vector<12x128xf32> -> vector<12x128xf32>
    %673 = vector.extract_strided_slice %649 {offsets = [0, 32], sizes = [12, 32], strides = [1, 1]} : vector<12x384xf32> to vector<12x32xf32>
    %674 = vector.extract_strided_slice %649 {offsets = [0, 160], sizes = [12, 32], strides = [1, 1]} : vector<12x384xf32> to vector<12x32xf32>
    %675 = vector.extract_strided_slice %649 {offsets = [0, 288], sizes = [12, 32], strides = [1, 1]} : vector<12x384xf32> to vector<12x32xf32>
    %676 = tpu.transpose %674, [1, 0] : vector<12x32xf32> -> vector<32x12xf32>
    %cst_265 = arith.constant dense<0.000000e+00> : vector<12x12xf32>
    %677 = tpu.matmul %673, %676, %cst_265 {dimension_numbers = #tpu.dot_dimension_numbers<[1], [0], [0], [1], [0, 0, 1, 1], [], []>} : vector<12x32xf32>, vector<32x12xf32>, vector<12x12xf32> -> vector<12x12xf32>
    %cst_266 = arith.constant 0.176776692 : f32
    %678 = vector.broadcast %cst_266 : f32 to vector<12x12xf32>
    %679 = arith.mulf %677, %678 : vector<12x12xf32>
    %cst_267 = arith.constant dense<0xFF800000> : vector<12xf32>
    %680 = vector.multi_reduction <maximumf>, %679, %cst_267 [1] : vector<12x12xf32> to vector<12xf32>
    %681 = vector.shape_cast %680 : vector<12xf32> to vector<12x1xf32>
    %682 = vector.broadcast %681 : vector<12x1xf32> to vector<12x12xf32>
    %683 = arith.subf %679, %682 : vector<12x12xf32>
    %684 = math.exp %683 : vector<12x12xf32>
    %cst_268 = arith.constant dense<0.000000e+00> : vector<12xf32>
    %685 = vector.multi_reduction <add>, %684, %cst_268 [1] : vector<12x12xf32> to vector<12xf32>
    %686 = vector.shape_cast %685 : vector<12xf32> to vector<12x1xf32>
    %687 = tpu.reciprocal %686 {approx = true} : vector<12x1xf32> -> vector<12x1xf32>
    %688 = vector.broadcast %687 : vector<12x1xf32> to vector<12x12xf32>
    %689 = arith.mulf %684, %688 : vector<12x12xf32>
    %c1_269 = arith.constant 1 : index
    %c1_270 = arith.constant 1 : index
    %c0_271 = arith.constant 0 : index
    %c0_272 = arith.constant 0 : index
    %690 = vector.load %arg38[%c1_269, %c1_270, %c0_271, %c0_272] : memref<2x4x12x12xf32, #tpu.memory_space<vmem>>, vector<1x1x12x12xf32>
    %691 = vector.shape_cast %690 : vector<1x1x12x12xf32> to vector<12x12xf32>
    %692 = vector.shape_cast %689 : vector<12x12xf32> to vector<1x1x12x12xf32>
    tpu.vector_store %arg38[%c1_269, %c1_270, %c0_271, %c0_272], %692 {strides = array<i32>} : memref<2x4x12x12xf32, #tpu.memory_space<vmem>>, vector<1x1x12x12xf32>,
    %cst_273 = arith.constant dense<0.000000e+00> : vector<12x32xf32>
    %693 = tpu.matmul %689, %675, %cst_273 {dimension_numbers = #tpu.dot_dimension_numbers<[1], [0], [0], [1], [0, 0, 1, 1], [], []>} : vector<12x12xf32>, vector<12x32xf32>, vector<12x32xf32> -> vector<12x32xf32>
    %694 = vector.extract_strided_slice %75 {offsets = [32, 0], sizes = [32, 128], strides = [1, 1]} : vector<128x128xf32> to vector<32x128xf32>
    %cst_274 = arith.constant dense<0.000000e+00> : vector<12x128xf32>
    %695 = tpu.matmul %693, %694, %cst_274 {dimension_numbers = #tpu.dot_dimension_numbers<[1], [0], [0], [1], [0, 0, 1, 1], [], []>} : vector<12x32xf32>, vector<32x128xf32>, vector<12x128xf32> -> vector<12x128xf32>
    %696 = arith.addf %672, %695 : vector<12x128xf32>
    %697 = vector.extract_strided_slice %649 {offsets = [0, 64], sizes = [12, 32], strides = [1, 1]} : vector<12x384xf32> to vector<12x32xf32>
    %698 = vector.extract_strided_slice %649 {offsets = [0, 192], sizes = [12, 32], strides = [1, 1]} : vector<12x384xf32> to vector<12x32xf32>
    %699 = vector.extract_strided_slice %649 {offsets = [0, 320], sizes = [12, 32], strides = [1, 1]} : vector<12x384xf32> to vector<12x32xf32>
    %700 = tpu.transpose %698, [1, 0] : vector<12x32xf32> -> vector<32x12xf32>
    %cst_275 = arith.constant dense<0.000000e+00> : vector<12x12xf32>
    %701 = tpu.matmul %697, %700, %cst_275 {dimension_numbers = #tpu.dot_dimension_numbers<[1], [0], [0], [1], [0, 0, 1, 1], [], []>} : vector<12x32xf32>, vector<32x12xf32>, vector<12x12xf32> -> vector<12x12xf32>
    %cst_276 = arith.constant 0.176776692 : f32
    %702 = vector.broadcast %cst_276 : f32 to vector<12x12xf32>
    %703 = arith.mulf %701, %702 : vector<12x12xf32>
    %cst_277 = arith.constant dense<0xFF800000> : vector<12xf32>
    %704 = vector.multi_reduction <maximumf>, %703, %cst_277 [1] : vector<12x12xf32> to vector<12xf32>
    %705 = vector.shape_cast %704 : vector<12xf32> to vector<12x1xf32>
    %706 = vector.broadcast %705 : vector<12x1xf32> to vector<12x12xf32>
    %707 = arith.subf %703, %706 : vector<12x12xf32>
    %708 = math.exp %707 : vector<12x12xf32>
    %cst_278 = arith.constant dense<0.000000e+00> : vector<12xf32>
    %709 = vector.multi_reduction <add>, %708, %cst_278 [1] : vector<12x12xf32> to vector<12xf32>
    %710 = vector.shape_cast %709 : vector<12xf32> to vector<12x1xf32>
    %711 = tpu.reciprocal %710 {approx = true} : vector<12x1xf32> -> vector<12x1xf32>
    %712 = vector.broadcast %711 : vector<12x1xf32> to vector<12x12xf32>
    %713 = arith.mulf %708, %712 : vector<12x12xf32>
    %c1_279 = arith.constant 1 : index
    %c2_280 = arith.constant 2 : index
    %c0_281 = arith.constant 0 : index
    %c0_282 = arith.constant 0 : index
    %714 = vector.load %arg38[%c1_279, %c2_280, %c0_281, %c0_282] : memref<2x4x12x12xf32, #tpu.memory_space<vmem>>, vector<1x1x12x12xf32>
    %715 = vector.shape_cast %714 : vector<1x1x12x12xf32> to vector<12x12xf32>
    %716 = vector.shape_cast %713 : vector<12x12xf32> to vector<1x1x12x12xf32>
    tpu.vector_store %arg38[%c1_279, %c2_280, %c0_281, %c0_282], %716 {strides = array<i32>} : memref<2x4x12x12xf32, #tpu.memory_space<vmem>>, vector<1x1x12x12xf32>,
    %cst_283 = arith.constant dense<0.000000e+00> : vector<12x32xf32>
    %717 = tpu.matmul %713, %699, %cst_283 {dimension_numbers = #tpu.dot_dimension_numbers<[1], [0], [0], [1], [0, 0, 1, 1], [], []>} : vector<12x12xf32>, vector<12x32xf32>, vector<12x32xf32> -> vector<12x32xf32>
    %718 = vector.extract_strided_slice %75 {offsets = [64, 0], sizes = [32, 128], strides = [1, 1]} : vector<128x128xf32> to vector<32x128xf32>
    %cst_284 = arith.constant dense<0.000000e+00> : vector<12x128xf32>
    %719 = tpu.matmul %717, %718, %cst_284 {dimension_numbers = #tpu.dot_dimension_numbers<[1], [0], [0], [1], [0, 0, 1, 1], [], []>} : vector<12x32xf32>, vector<32x128xf32>, vector<12x128xf32> -> vector<12x128xf32>
    %720 = arith.addf %696, %719 : vector<12x128xf32>
    %721 = vector.extract_strided_slice %649 {offsets = [0, 96], sizes = [12, 32], strides = [1, 1]} : vector<12x384xf32> to vector<12x32xf32>
    %722 = vector.extract_strided_slice %649 {offsets = [0, 224], sizes = [12, 32], strides = [1, 1]} : vector<12x384xf32> to vector<12x32xf32>
    %723 = vector.extract_strided_slice %649 {offsets = [0, 352], sizes = [12, 32], strides = [1, 1]} : vector<12x384xf32> to vector<12x32xf32>
    %724 = tpu.transpose %722, [1, 0] : vector<12x32xf32> -> vector<32x12xf32>
    %cst_285 = arith.constant dense<0.000000e+00> : vector<12x12xf32>
    %725 = tpu.matmul %721, %724, %cst_285 {dimension_numbers = #tpu.dot_dimension_numbers<[1], [0], [0], [1], [0, 0, 1, 1], [], []>} : vector<12x32xf32>, vector<32x12xf32>, vector<12x12xf32> -> vector<12x12xf32>
    %cst_286 = arith.constant 0.176776692 : f32
    %726 = vector.broadcast %cst_286 : f32 to vector<12x12xf32>
    %727 = arith.mulf %725, %726 : vector<12x12xf32>
    %cst_287 = arith.constant dense<0xFF800000> : vector<12xf32>
    %728 = vector.multi_reduction <maximumf>, %727, %cst_287 [1] : vector<12x12xf32> to vector<12xf32>
    %729 = vector.shape_cast %728 : vector<12xf32> to vector<12x1xf32>
    %730 = vector.broadcast %729 : vector<12x1xf32> to vector<12x12xf32>
    %731 = arith.subf %727, %730 : vector<12x12xf32>
    %732 = math.exp %731 : vector<12x12xf32>
    %cst_288 = arith.constant dense<0.000000e+00> : vector<12xf32>
    %733 = vector.multi_reduction <add>, %732, %cst_288 [1] : vector<12x12xf32> to vector<12xf32>
    %734 = vector.shape_cast %733 : vector<12xf32> to vector<12x1xf32>
    %735 = tpu.reciprocal %734 {approx = true} : vector<12x1xf32> -> vector<12x1xf32>
    %736 = vector.broadcast %735 : vector<12x1xf32> to vector<12x12xf32>
    %737 = arith.mulf %732, %736 : vector<12x12xf32>
    %c1_289 = arith.constant 1 : index
    %c3_290 = arith.constant 3 : index
    %c0_291 = arith.constant 0 : index
    %c0_292 = arith.constant 0 : index
    %738 = vector.load %arg38[%c1_289, %c3_290, %c0_291, %c0_292] : memref<2x4x12x12xf32, #tpu.memory_space<vmem>>, vector<1x1x12x12xf32>
    %739 = vector.shape_cast %738 : vector<1x1x12x12xf32> to vector<12x12xf32>
    %740 = vector.shape_cast %737 : vector<12x12xf32> to vector<1x1x12x12xf32>
    tpu.vector_store %arg38[%c1_289, %c3_290, %c0_291, %c0_292], %740 {strides = array<i32>} : memref<2x4x12x12xf32, #tpu.memory_space<vmem>>, vector<1x1x12x12xf32>,
    %cst_293 = arith.constant dense<0.000000e+00> : vector<12x32xf32>
    %741 = tpu.matmul %737, %723, %cst_293 {dimension_numbers = #tpu.dot_dimension_numbers<[1], [0], [0], [1], [0, 0, 1, 1], [], []>} : vector<12x12xf32>, vector<12x32xf32>, vector<12x32xf32> -> vector<12x32xf32>
    %742 = vector.extract_strided_slice %75 {offsets = [96, 0], sizes = [32, 128], strides = [1, 1]} : vector<128x128xf32> to vector<32x128xf32>
    %cst_294 = arith.constant dense<0.000000e+00> : vector<12x128xf32>
    %743 = tpu.matmul %741, %742, %cst_294 {dimension_numbers = #tpu.dot_dimension_numbers<[1], [0], [0], [1], [0, 0, 1, 1], [], []>} : vector<12x32xf32>, vector<32x128xf32>, vector<12x128xf32> -> vector<12x128xf32>
    %744 = arith.addf %720, %743 : vector<12x128xf32>
    %745 = vector.broadcast %76 : vector<1x128xf32> to vector<12x128xf32>
    %746 = arith.addf %744, %745 : vector<12x128xf32>
    %747 = vector.extract_strided_slice %746 {offsets = [0, 0], sizes = [1, 128], strides = [1, 1]} : vector<12x128xf32> to vector<1x128xf32>
    %748 = vector.extract_strided_slice %746 {offsets = [1, 0], sizes = [7, 128], strides = [1, 1]} : vector<12x128xf32> to vector<7x128xf32>
    %749 = vector.extract_strided_slice %746 {offsets = [8, 0], sizes = [4, 128], strides = [1, 1]} : vector<12x128xf32> to vector<4x128xf32>
    %cst_295 = arith.constant dense<0.000000e+00> : vector<128xf32>
    %750 = vector.multi_reduction <add>, %749, %cst_295 [0] : vector<4x128xf32> to vector<128xf32>
    %751 = vector.shape_cast %750 : vector<128xf32> to vector<1x128xf32>
    %cst_296 = arith.constant 4.000000e+00 : f32
    %752 = vector.broadcast %cst_296 : f32 to vector<1x128xf32>
    %753 = arith.divf %751, %752 : vector<1x128xf32>
    %754 = arith.addf %747, %753 : vector<1x128xf32>
    %cst_297 = arith.constant dense<0.000000e+00> : vector<128xf32>
    %755 = vector.multi_reduction <add>, %748, %cst_297 [0] : vector<7x128xf32> to vector<128xf32>
    %756 = vector.shape_cast %755 : vector<128xf32> to vector<1x128xf32>
    %cst_298 = arith.constant 7.000000e+00 : f32
    %757 = vector.broadcast %cst_298 : f32 to vector<1x128xf32>
    %758 = arith.divf %756, %757 : vector<1x128xf32>
    %759 = arith.addf %754, %758 : vector<1x128xf32>
    %760 = tpu.concatenate %759, %748 in 0 : vector<1x128xf32>, vector<7x128xf32> -> vector<8x128xf32>
    %761 = tpu.concatenate %418, %760 in 0 : vector<8x128xf32>, vector<8x128xf32> -> vector<16x128xf32>
    %762 = arith.addf %43, %761 : vector<16x128xf32>
    %cst_299 = arith.constant dense<0.000000e+00> : vector<16xf32>
    %763 = vector.multi_reduction <add>, %762, %cst_299 [1] : vector<16x128xf32> to vector<16xf32>
    %764 = vector.shape_cast %763 : vector<16xf32> to vector<16x1xf32>
    %cst_300 = arith.constant 1.280000e+02 : f32
    %765 = vector.broadcast %cst_300 : f32 to vector<16x1xf32>
    %766 = arith.divf %764, %765 : vector<16x1xf32>
    %767 = vector.broadcast %766 : vector<16x1xf32> to vector<16x128xf32>
    %768 = arith.subf %762, %767 : vector<16x128xf32>
    %769 = arith.mulf %768, %768 : vector<16x128xf32>
    %cst_301 = arith.constant dense<0.000000e+00> : vector<16xf32>
    %770 = vector.multi_reduction <add>, %769, %cst_301 [1] : vector<16x128xf32> to vector<16xf32>
    %771 = vector.shape_cast %770 : vector<16xf32> to vector<16x1xf32>
    %cst_302 = arith.constant 1.280000e+02 : f32
    %772 = vector.broadcast %cst_302 : f32 to vector<16x1xf32>
    %773 = arith.divf %771, %772 : vector<16x1xf32>
    %774 = vector.broadcast %766 : vector<16x1xf32> to vector<16x128xf32>
    %775 = arith.subf %762, %774 : vector<16x128xf32>
    %cst_303 = arith.constant 9.99999974E-6 : f32
    %776 = vector.broadcast %cst_303 : f32 to vector<16x1xf32>
    %777 = arith.addf %773, %776 : vector<16x1xf32>
    %778 = math.rsqrt %777 : vector<16x1xf32>
    %779 = vector.broadcast %778 : vector<16x1xf32> to vector<16x128xf32>
    %780 = arith.mulf %775, %779 : vector<16x128xf32>
    %c0_304 = arith.constant 0 : index
    %c0_305 = arith.constant 0 : index
    %781 = vector.load %arg19[%c0_304, %c0_305] : memref<1x128xf32, #tpu.memory_space<vmem>>, vector<1x128xf32>
    %782 = vector.broadcast %781 : vector<1x128xf32> to vector<16x128xf32>
    %783 = arith.mulf %780, %782 : vector<16x128xf32>
    %c0_306 = arith.constant 0 : index
    %c0_307 = arith.constant 0 : index
    %784 = vector.load %arg20[%c0_306, %c0_307] : memref<1x128xf32, #tpu.memory_space<vmem>>, vector<1x128xf32>
    %785 = vector.broadcast %784 : vector<1x128xf32> to vector<16x128xf32>
    %786 = arith.addf %783, %785 : vector<16x128xf32>
    %c0_308 = arith.constant 0 : index
    %c0_309 = arith.constant 0 : index
    %787 = vector.load %arg21[%c0_308, %c0_309] : memref<128x512xf32, #tpu.memory_space<vmem>>, vector<128x512xf32>
    %cst_310 = arith.constant dense<0.000000e+00> : vector<16x512xf32>
    %788 = tpu.matmul %786, %787, %cst_310 {dimension_numbers = #tpu.dot_dimension_numbers<[1], [0], [0], [1], [0, 0, 1, 1], [], []>} : vector<16x128xf32>, vector<128x512xf32>, vector<16x512xf32> -> vector<16x512xf32>
    %c0_311 = arith.constant 0 : index
    %c0_312 = arith.constant 0 : index
    %789 = vector.load %arg22[%c0_311, %c0_312] : memref<1x512xf32, #tpu.memory_space<vmem>>, vector<1x512xf32>
    %790 = vector.broadcast %789 : vector<1x512xf32> to vector<16x512xf32>
    %791 = arith.addf %788, %790 : vector<16x512xf32>
    %792 = vector.extract_strided_slice %791 {offsets = [0, 0], sizes = [16, 256], strides = [1, 1]} : vector<16x512xf32> to vector<16x256xf32>
    %793 = vector.extract_strided_slice %791 {offsets = [0, 256], sizes = [16, 256], strides = [1, 1]} : vector<16x512xf32> to vector<16x256xf32>
    %794 = arith.negf %793 : vector<16x256xf32>
    %795 = math.exp %794 : vector<16x256xf32>
    %cst_313 = arith.constant 1.000000e+00 : f32
    %796 = vector.broadcast %cst_313 : f32 to vector<16x256xf32>
    %797 = arith.addf %796, %795 : vector<16x256xf32>
    %798 = arith.divf %796, %797 : vector<16x256xf32>
    %799 = arith.mulf %792, %798 : vector<16x256xf32>
    %c0_314 = arith.constant 0 : index
    %c0_315 = arith.constant 0 : index
    %800 = vector.load %arg23[%c0_314, %c0_315] : memref<16x256xf32, #tpu.memory_space<vmem>>, vector<16x256xf32>
    %cst_316 = arith.constant 0.000000e+00 : f32
    %801 = vector.broadcast %cst_316 : f32 to vector<8x256xf32>
    %cst_317 = arith.constant 0.000000e+00 : f32
    %802 = vector.broadcast %cst_317 : f32 to vector<7x256xf32>
    %803 = vector.extract_strided_slice %799 {offsets = [0, 0], sizes = [8, 256], strides = [1, 1]} : vector<16x256xf32> to vector<8x256xf32>
    %804 = tpu.concatenate %801, %803, %802 in 0 : vector<8x256xf32>, vector<8x256xf32>, vector<7x256xf32> -> vector<23x256xf32>
    %805 = vector.extract_strided_slice %804 {offsets = [0, 0], sizes = [8, 256], strides = [1, 1]} : vector<23x256xf32> to vector<8x256xf32>
    %806 = vector.extract_strided_slice %800 {offsets = [0, 0], sizes = [1, 256], strides = [1, 1]} : vector<16x256xf32> to vector<1x256xf32>
    %807 = vector.broadcast %806 : vector<1x256xf32> to vector<8x256xf32>
    %808 = arith.mulf %805, %807 : vector<8x256xf32>
    %809 = vector.extract_strided_slice %804 {offsets = [1, 0], sizes = [8, 256], strides = [1, 1]} : vector<23x256xf32> to vector<8x256xf32>
    %810 = vector.extract_strided_slice %800 {offsets = [1, 0], sizes = [1, 256], strides = [1, 1]} : vector<16x256xf32> to vector<1x256xf32>
    %811 = vector.broadcast %810 : vector<1x256xf32> to vector<8x256xf32>
    %812 = arith.mulf %809, %811 : vector<8x256xf32>
    %813 = arith.addf %808, %812 : vector<8x256xf32>
    %814 = vector.extract_strided_slice %804 {offsets = [2, 0], sizes = [8, 256], strides = [1, 1]} : vector<23x256xf32> to vector<8x256xf32>
    %815 = vector.extract_strided_slice %800 {offsets = [2, 0], sizes = [1, 256], strides = [1, 1]} : vector<16x256xf32> to vector<1x256xf32>
    %816 = vector.broadcast %815 : vector<1x256xf32> to vector<8x256xf32>
    %817 = arith.mulf %814, %816 : vector<8x256xf32>
    %818 = arith.addf %813, %817 : vector<8x256xf32>
    %819 = vector.extract_strided_slice %804 {offsets = [3, 0], sizes = [8, 256], strides = [1, 1]} : vector<23x256xf32> to vector<8x256xf32>
    %820 = vector.extract_strided_slice %800 {offsets = [3, 0], sizes = [1, 256], strides = [1, 1]} : vector<16x256xf32> to vector<1x256xf32>
    %821 = vector.broadcast %820 : vector<1x256xf32> to vector<8x256xf32>
    %822 = arith.mulf %819, %821 : vector<8x256xf32>
    %823 = arith.addf %818, %822 : vector<8x256xf32>
    %824 = vector.extract_strided_slice %804 {offsets = [4, 0], sizes = [8, 256], strides = [1, 1]} : vector<23x256xf32> to vector<8x256xf32>
    %825 = vector.extract_strided_slice %800 {offsets = [4, 0], sizes = [1, 256], strides = [1, 1]} : vector<16x256xf32> to vector<1x256xf32>
    %826 = vector.broadcast %825 : vector<1x256xf32> to vector<8x256xf32>
    %827 = arith.mulf %824, %826 : vector<8x256xf32>
    %828 = arith.addf %823, %827 : vector<8x256xf32>
    %829 = vector.extract_strided_slice %804 {offsets = [5, 0], sizes = [8, 256], strides = [1, 1]} : vector<23x256xf32> to vector<8x256xf32>
    %830 = vector.extract_strided_slice %800 {offsets = [5, 0], sizes = [1, 256], strides = [1, 1]} : vector<16x256xf32> to vector<1x256xf32>
    %831 = vector.broadcast %830 : vector<1x256xf32> to vector<8x256xf32>
    %832 = arith.mulf %829, %831 : vector<8x256xf32>
    %833 = arith.addf %828, %832 : vector<8x256xf32>
    %834 = vector.extract_strided_slice %804 {offsets = [6, 0], sizes = [8, 256], strides = [1, 1]} : vector<23x256xf32> to vector<8x256xf32>
    %835 = vector.extract_strided_slice %800 {offsets = [6, 0], sizes = [1, 256], strides = [1, 1]} : vector<16x256xf32> to vector<1x256xf32>
    %836 = vector.broadcast %835 : vector<1x256xf32> to vector<8x256xf32>
    %837 = arith.mulf %834, %836 : vector<8x256xf32>
    %838 = arith.addf %833, %837 : vector<8x256xf32>
    %839 = vector.extract_strided_slice %804 {offsets = [7, 0], sizes = [8, 256], strides = [1, 1]} : vector<23x256xf32> to vector<8x256xf32>
    %840 = vector.extract_strided_slice %800 {offsets = [7, 0], sizes = [1, 256], strides = [1, 1]} : vector<16x256xf32> to vector<1x256xf32>
    %841 = vector.broadcast %840 : vector<1x256xf32> to vector<8x256xf32>
    %842 = arith.mulf %839, %841 : vector<8x256xf32>
    %843 = arith.addf %838, %842 : vector<8x256xf32>
    %844 = vector.extract_strided_slice %804 {offsets = [8, 0], sizes = [8, 256], strides = [1, 1]} : vector<23x256xf32> to vector<8x256xf32>
    %845 = vector.extract_strided_slice %800 {offsets = [8, 0], sizes = [1, 256], strides = [1, 1]} : vector<16x256xf32> to vector<1x256xf32>
    %846 = vector.broadcast %845 : vector<1x256xf32> to vector<8x256xf32>
    %847 = arith.mulf %844, %846 : vector<8x256xf32>
    %848 = arith.addf %843, %847 : vector<8x256xf32>
    %849 = vector.extract_strided_slice %804 {offsets = [9, 0], sizes = [8, 256], strides = [1, 1]} : vector<23x256xf32> to vector<8x256xf32>
    %850 = vector.extract_strided_slice %800 {offsets = [9, 0], sizes = [1, 256], strides = [1, 1]} : vector<16x256xf32> to vector<1x256xf32>
    %851 = vector.broadcast %850 : vector<1x256xf32> to vector<8x256xf32>
    %852 = arith.mulf %849, %851 : vector<8x256xf32>
    %853 = arith.addf %848, %852 : vector<8x256xf32>
    %854 = vector.extract_strided_slice %804 {offsets = [10, 0], sizes = [8, 256], strides = [1, 1]} : vector<23x256xf32> to vector<8x256xf32>
    %855 = vector.extract_strided_slice %800 {offsets = [10, 0], sizes = [1, 256], strides = [1, 1]} : vector<16x256xf32> to vector<1x256xf32>
    %856 = vector.broadcast %855 : vector<1x256xf32> to vector<8x256xf32>
    %857 = arith.mulf %854, %856 : vector<8x256xf32>
    %858 = arith.addf %853, %857 : vector<8x256xf32>
    %859 = vector.extract_strided_slice %804 {offsets = [11, 0], sizes = [8, 256], strides = [1, 1]} : vector<23x256xf32> to vector<8x256xf32>
    %860 = vector.extract_strided_slice %800 {offsets = [11, 0], sizes = [1, 256], strides = [1, 1]} : vector<16x256xf32> to vector<1x256xf32>
    %861 = vector.broadcast %860 : vector<1x256xf32> to vector<8x256xf32>
    %862 = arith.mulf %859, %861 : vector<8x256xf32>
    %863 = arith.addf %858, %862 : vector<8x256xf32>
    %864 = vector.extract_strided_slice %804 {offsets = [12, 0], sizes = [8, 256], strides = [1, 1]} : vector<23x256xf32> to vector<8x256xf32>
    %865 = vector.extract_strided_slice %800 {offsets = [12, 0], sizes = [1, 256], strides = [1, 1]} : vector<16x256xf32> to vector<1x256xf32>
    %866 = vector.broadcast %865 : vector<1x256xf32> to vector<8x256xf32>
    %867 = arith.mulf %864, %866 : vector<8x256xf32>
    %868 = arith.addf %863, %867 : vector<8x256xf32>
    %869 = vector.extract_strided_slice %804 {offsets = [13, 0], sizes = [8, 256], strides = [1, 1]} : vector<23x256xf32> to vector<8x256xf32>
    %870 = vector.extract_strided_slice %800 {offsets = [13, 0], sizes = [1, 256], strides = [1, 1]} : vector<16x256xf32> to vector<1x256xf32>
    %871 = vector.broadcast %870 : vector<1x256xf32> to vector<8x256xf32>
    %872 = arith.mulf %869, %871 : vector<8x256xf32>
    %873 = arith.addf %868, %872 : vector<8x256xf32>
    %874 = vector.extract_strided_slice %804 {offsets = [14, 0], sizes = [8, 256], strides = [1, 1]} : vector<23x256xf32> to vector<8x256xf32>
    %875 = vector.extract_strided_slice %800 {offsets = [14, 0], sizes = [1, 256], strides = [1, 1]} : vector<16x256xf32> to vector<1x256xf32>
    %876 = vector.broadcast %875 : vector<1x256xf32> to vector<8x256xf32>
    %877 = arith.mulf %874, %876 : vector<8x256xf32>
    %878 = arith.addf %873, %877 : vector<8x256xf32>
    %879 = vector.extract_strided_slice %804 {offsets = [15, 0], sizes = [8, 256], strides = [1, 1]} : vector<23x256xf32> to vector<8x256xf32>
    %880 = vector.extract_strided_slice %800 {offsets = [15, 0], sizes = [1, 256], strides = [1, 1]} : vector<16x256xf32> to vector<1x256xf32>
    %881 = vector.broadcast %880 : vector<1x256xf32> to vector<8x256xf32>
    %882 = arith.mulf %879, %881 : vector<8x256xf32>
    %883 = arith.addf %878, %882 : vector<8x256xf32>
    %884 = vector.extract_strided_slice %799 {offsets = [8, 0], sizes = [8, 256], strides = [1, 1]} : vector<16x256xf32> to vector<8x256xf32>
    %885 = tpu.concatenate %801, %884, %802 in 0 : vector<8x256xf32>, vector<8x256xf32>, vector<7x256xf32> -> vector<23x256xf32>
    %886 = vector.extract_strided_slice %885 {offsets = [0, 0], sizes = [8, 256], strides = [1, 1]} : vector<23x256xf32> to vector<8x256xf32>
    %887 = vector.extract_strided_slice %800 {offsets = [0, 0], sizes = [1, 256], strides = [1, 1]} : vector<16x256xf32> to vector<1x256xf32>
    %888 = vector.broadcast %887 : vector<1x256xf32> to vector<8x256xf32>
    %889 = arith.mulf %886, %888 : vector<8x256xf32>
    %890 = vector.extract_strided_slice %885 {offsets = [1, 0], sizes = [8, 256], strides = [1, 1]} : vector<23x256xf32> to vector<8x256xf32>
    %891 = vector.extract_strided_slice %800 {offsets = [1, 0], sizes = [1, 256], strides = [1, 1]} : vector<16x256xf32> to vector<1x256xf32>
    %892 = vector.broadcast %891 : vector<1x256xf32> to vector<8x256xf32>
    %893 = arith.mulf %890, %892 : vector<8x256xf32>
    %894 = arith.addf %889, %893 : vector<8x256xf32>
    %895 = vector.extract_strided_slice %885 {offsets = [2, 0], sizes = [8, 256], strides = [1, 1]} : vector<23x256xf32> to vector<8x256xf32>
    %896 = vector.extract_strided_slice %800 {offsets = [2, 0], sizes = [1, 256], strides = [1, 1]} : vector<16x256xf32> to vector<1x256xf32>
    %897 = vector.broadcast %896 : vector<1x256xf32> to vector<8x256xf32>
    %898 = arith.mulf %895, %897 : vector<8x256xf32>
    %899 = arith.addf %894, %898 : vector<8x256xf32>
    %900 = vector.extract_strided_slice %885 {offsets = [3, 0], sizes = [8, 256], strides = [1, 1]} : vector<23x256xf32> to vector<8x256xf32>
    %901 = vector.extract_strided_slice %800 {offsets = [3, 0], sizes = [1, 256], strides = [1, 1]} : vector<16x256xf32> to vector<1x256xf32>
    %902 = vector.broadcast %901 : vector<1x256xf32> to vector<8x256xf32>
    %903 = arith.mulf %900, %902 : vector<8x256xf32>
    %904 = arith.addf %899, %903 : vector<8x256xf32>
    %905 = vector.extract_strided_slice %885 {offsets = [4, 0], sizes = [8, 256], strides = [1, 1]} : vector<23x256xf32> to vector<8x256xf32>
    %906 = vector.extract_strided_slice %800 {offsets = [4, 0], sizes = [1, 256], strides = [1, 1]} : vector<16x256xf32> to vector<1x256xf32>
    %907 = vector.broadcast %906 : vector<1x256xf32> to vector<8x256xf32>
    %908 = arith.mulf %905, %907 : vector<8x256xf32>
    %909 = arith.addf %904, %908 : vector<8x256xf32>
    %910 = vector.extract_strided_slice %885 {offsets = [5, 0], sizes = [8, 256], strides = [1, 1]} : vector<23x256xf32> to vector<8x256xf32>
    %911 = vector.extract_strided_slice %800 {offsets = [5, 0], sizes = [1, 256], strides = [1, 1]} : vector<16x256xf32> to vector<1x256xf32>
    %912 = vector.broadcast %911 : vector<1x256xf32> to vector<8x256xf32>
    %913 = arith.mulf %910, %912 : vector<8x256xf32>
    %914 = arith.addf %909, %913 : vector<8x256xf32>
    %915 = vector.extract_strided_slice %885 {offsets = [6, 0], sizes = [8, 256], strides = [1, 1]} : vector<23x256xf32> to vector<8x256xf32>
    %916 = vector.extract_strided_slice %800 {offsets = [6, 0], sizes = [1, 256], strides = [1, 1]} : vector<16x256xf32> to vector<1x256xf32>
    %917 = vector.broadcast %916 : vector<1x256xf32> to vector<8x256xf32>
    %918 = arith.mulf %915, %917 : vector<8x256xf32>
    %919 = arith.addf %914, %918 : vector<8x256xf32>
    %920 = vector.extract_strided_slice %885 {offsets = [7, 0], sizes = [8, 256], strides = [1, 1]} : vector<23x256xf32> to vector<8x256xf32>
    %921 = vector.extract_strided_slice %800 {offsets = [7, 0], sizes = [1, 256], strides = [1, 1]} : vector<16x256xf32> to vector<1x256xf32>
    %922 = vector.broadcast %921 : vector<1x256xf32> to vector<8x256xf32>
    %923 = arith.mulf %920, %922 : vector<8x256xf32>
    %924 = arith.addf %919, %923 : vector<8x256xf32>
    %925 = vector.extract_strided_slice %885 {offsets = [8, 0], sizes = [8, 256], strides = [1, 1]} : vector<23x256xf32> to vector<8x256xf32>
    %926 = vector.extract_strided_slice %800 {offsets = [8, 0], sizes = [1, 256], strides = [1, 1]} : vector<16x256xf32> to vector<1x256xf32>
    %927 = vector.broadcast %926 : vector<1x256xf32> to vector<8x256xf32>
    %928 = arith.mulf %925, %927 : vector<8x256xf32>
    %929 = arith.addf %924, %928 : vector<8x256xf32>
    %930 = vector.extract_strided_slice %885 {offsets = [9, 0], sizes = [8, 256], strides = [1, 1]} : vector<23x256xf32> to vector<8x256xf32>
    %931 = vector.extract_strided_slice %800 {offsets = [9, 0], sizes = [1, 256], strides = [1, 1]} : vector<16x256xf32> to vector<1x256xf32>
    %932 = vector.broadcast %931 : vector<1x256xf32> to vector<8x256xf32>
    %933 = arith.mulf %930, %932 : vector<8x256xf32>
    %934 = arith.addf %929, %933 : vector<8x256xf32>
    %935 = vector.extract_strided_slice %885 {offsets = [10, 0], sizes = [8, 256], strides = [1, 1]} : vector<23x256xf32> to vector<8x256xf32>
    %936 = vector.extract_strided_slice %800 {offsets = [10, 0], sizes = [1, 256], strides = [1, 1]} : vector<16x256xf32> to vector<1x256xf32>
    %937 = vector.broadcast %936 : vector<1x256xf32> to vector<8x256xf32>
    %938 = arith.mulf %935, %937 : vector<8x256xf32>
    %939 = arith.addf %934, %938 : vector<8x256xf32>
    %940 = vector.extract_strided_slice %885 {offsets = [11, 0], sizes = [8, 256], strides = [1, 1]} : vector<23x256xf32> to vector<8x256xf32>
    %941 = vector.extract_strided_slice %800 {offsets = [11, 0], sizes = [1, 256], strides = [1, 1]} : vector<16x256xf32> to vector<1x256xf32>
    %942 = vector.broadcast %941 : vector<1x256xf32> to vector<8x256xf32>
    %943 = arith.mulf %940, %942 : vector<8x256xf32>
    %944 = arith.addf %939, %943 : vector<8x256xf32>
    %945 = vector.extract_strided_slice %885 {offsets = [12, 0], sizes = [8, 256], strides = [1, 1]} : vector<23x256xf32> to vector<8x256xf32>
    %946 = vector.extract_strided_slice %800 {offsets = [12, 0], sizes = [1, 256], strides = [1, 1]} : vector<16x256xf32> to vector<1x256xf32>
    %947 = vector.broadcast %946 : vector<1x256xf32> to vector<8x256xf32>
    %948 = arith.mulf %945, %947 : vector<8x256xf32>
    %949 = arith.addf %944, %948 : vector<8x256xf32>
    %950 = vector.extract_strided_slice %885 {offsets = [13, 0], sizes = [8, 256], strides = [1, 1]} : vector<23x256xf32> to vector<8x256xf32>
    %951 = vector.extract_strided_slice %800 {offsets = [13, 0], sizes = [1, 256], strides = [1, 1]} : vector<16x256xf32> to vector<1x256xf32>
    %952 = vector.broadcast %951 : vector<1x256xf32> to vector<8x256xf32>
    %953 = arith.mulf %950, %952 : vector<8x256xf32>
    %954 = arith.addf %949, %953 : vector<8x256xf32>
    %955 = vector.extract_strided_slice %885 {offsets = [14, 0], sizes = [8, 256], strides = [1, 1]} : vector<23x256xf32> to vector<8x256xf32>
    %956 = vector.extract_strided_slice %800 {offsets = [14, 0], sizes = [1, 256], strides = [1, 1]} : vector<16x256xf32> to vector<1x256xf32>
    %957 = vector.broadcast %956 : vector<1x256xf32> to vector<8x256xf32>
    %958 = arith.mulf %955, %957 : vector<8x256xf32>
    %959 = arith.addf %954, %958 : vector<8x256xf32>
    %960 = vector.extract_strided_slice %885 {offsets = [15, 0], sizes = [8, 256], strides = [1, 1]} : vector<23x256xf32> to vector<8x256xf32>
    %961 = vector.extract_strided_slice %800 {offsets = [15, 0], sizes = [1, 256], strides = [1, 1]} : vector<16x256xf32> to vector<1x256xf32>
    %962 = vector.broadcast %961 : vector<1x256xf32> to vector<8x256xf32>
    %963 = arith.mulf %960, %962 : vector<8x256xf32>
    %964 = arith.addf %959, %963 : vector<8x256xf32>
    %965 = tpu.concatenate %883, %964 in 0 : vector<8x256xf32>, vector<8x256xf32> -> vector<16x256xf32>
    %c0_318 = arith.constant 0 : index
    %c0_319 = arith.constant 0 : index
    %966 = vector.load %arg24[%c0_318, %c0_319] : memref<1x256xf32, #tpu.memory_space<vmem>>, vector<1x256xf32>
    %967 = vector.broadcast %966 : vector<1x256xf32> to vector<16x256xf32>
    %968 = arith.addf %965, %967 : vector<16x256xf32>
    %cst_320 = arith.constant dense<0.000000e+00> : vector<256xf32>
    %969 = vector.multi_reduction <add>, %968, %cst_320 [0] : vector<16x256xf32> to vector<256xf32>
    %970 = vector.shape_cast %969 : vector<256xf32> to vector<1x256xf32>
    %cst_321 = arith.constant 1.600000e+01 : f32
    %971 = vector.broadcast %cst_321 : f32 to vector<1x256xf32>
    %972 = arith.divf %970, %971 : vector<1x256xf32>
    %973 = vector.broadcast %972 : vector<1x256xf32> to vector<16x256xf32>
    %974 = arith.subf %968, %973 : vector<16x256xf32>
    %975 = arith.mulf %974, %974 : vector<16x256xf32>
    %cst_322 = arith.constant dense<0.000000e+00> : vector<256xf32>
    %976 = vector.multi_reduction <add>, %975, %cst_322 [0] : vector<16x256xf32> to vector<256xf32>
    %977 = vector.shape_cast %976 : vector<256xf32> to vector<1x256xf32>
    %cst_323 = arith.constant 1.600000e+01 : f32
    %978 = vector.broadcast %cst_323 : f32 to vector<1x256xf32>
    %979 = arith.divf %977, %978 : vector<1x256xf32>
    %980 = vector.broadcast %972 : vector<1x256xf32> to vector<16x256xf32>
    %981 = arith.subf %968, %980 : vector<16x256xf32>
    %cst_324 = arith.constant 9.99999974E-6 : f32
    %982 = vector.broadcast %cst_324 : f32 to vector<1x256xf32>
    %983 = arith.addf %979, %982 : vector<1x256xf32>
    %984 = math.rsqrt %983 : vector<1x256xf32>
    %985 = vector.broadcast %984 : vector<1x256xf32> to vector<16x256xf32>
    %986 = arith.mulf %981, %985 : vector<16x256xf32>
    %c0_325 = arith.constant 0 : index
    %c0_326 = arith.constant 0 : index
    %987 = vector.load %arg25[%c0_325, %c0_326] : memref<1x256xf32, #tpu.memory_space<vmem>>, vector<1x256xf32>
    %988 = vector.broadcast %987 : vector<1x256xf32> to vector<16x256xf32>
    %989 = arith.mulf %986, %988 : vector<16x256xf32>
    %c0_327 = arith.constant 0 : index
    %c0_328 = arith.constant 0 : index
    %990 = vector.load %arg26[%c0_327, %c0_328] : memref<1x256xf32, #tpu.memory_space<vmem>>, vector<1x256xf32>
    %991 = vector.broadcast %990 : vector<1x256xf32> to vector<16x256xf32>
    %992 = arith.addf %989, %991 : vector<16x256xf32>
    %993 = arith.negf %992 : vector<16x256xf32>
    %994 = math.exp %993 : vector<16x256xf32>
    %cst_329 = arith.constant 1.000000e+00 : f32
    %995 = vector.broadcast %cst_329 : f32 to vector<16x256xf32>
    %996 = arith.addf %995, %994 : vector<16x256xf32>
    %997 = arith.divf %995, %996 : vector<16x256xf32>
    %998 = arith.mulf %992, %997 : vector<16x256xf32>
    %c0_330 = arith.constant 0 : index
    %c0_331 = arith.constant 0 : index
    %999 = vector.load %arg27[%c0_330, %c0_331] : memref<256x128xf32, #tpu.memory_space<vmem>>, vector<256x128xf32>
    %cst_332 = arith.constant dense<0.000000e+00> : vector<16x128xf32>
    %1000 = tpu.matmul %998, %999, %cst_332 {dimension_numbers = #tpu.dot_dimension_numbers<[1], [0], [0], [1], [0, 0, 1, 1], [], []>} : vector<16x256xf32>, vector<256x128xf32>, vector<16x128xf32> -> vector<16x128xf32>
    %1001 = arith.addf %762, %1000 : vector<16x128xf32>
    %c0_333 = arith.constant 0 : index
    %c0_334 = arith.constant 0 : index
    %1002 = vector.load %arg28[%c0_333, %c0_334] : memref<1x128xf32, #tpu.memory_space<vmem>>, vector<1x128xf32>
    %1003 = vector.broadcast %1002 : vector<1x128xf32> to vector<16x128xf32>
    %1004 = arith.addf %1001, %1003 : vector<16x128xf32>
    %cst_335 = arith.constant dense<0.000000e+00> : vector<16xf32>
    %1005 = vector.multi_reduction <add>, %1004, %cst_335 [1] : vector<16x128xf32> to vector<16xf32>
    %1006 = vector.shape_cast %1005 : vector<16xf32> to vector<16x1xf32>
    %cst_336 = arith.constant 1.280000e+02 : f32
    %1007 = vector.broadcast %cst_336 : f32 to vector<16x1xf32>
    %1008 = arith.divf %1006, %1007 : vector<16x1xf32>
    %1009 = vector.broadcast %1008 : vector<16x1xf32> to vector<16x128xf32>
    %1010 = arith.subf %1004, %1009 : vector<16x128xf32>
    %1011 = arith.mulf %1010, %1010 : vector<16x128xf32>
    %cst_337 = arith.constant dense<0.000000e+00> : vector<16xf32>
    %1012 = vector.multi_reduction <add>, %1011, %cst_337 [1] : vector<16x128xf32> to vector<16xf32>
    %1013 = vector.shape_cast %1012 : vector<16xf32> to vector<16x1xf32>
    %cst_338 = arith.constant 1.280000e+02 : f32
    %1014 = vector.broadcast %cst_338 : f32 to vector<16x1xf32>
    %1015 = arith.divf %1013, %1014 : vector<16x1xf32>
    %1016 = vector.broadcast %1008 : vector<16x1xf32> to vector<16x128xf32>
    %1017 = arith.subf %1004, %1016 : vector<16x128xf32>
    %cst_339 = arith.constant 9.99999974E-6 : f32
    %1018 = vector.broadcast %cst_339 : f32 to vector<16x1xf32>
    %1019 = arith.addf %1015, %1018 : vector<16x1xf32>
    %1020 = math.rsqrt %1019 : vector<16x1xf32>
    %1021 = vector.broadcast %1020 : vector<16x1xf32> to vector<16x128xf32>
    %1022 = arith.mulf %1017, %1021 : vector<16x128xf32>
    %c0_340 = arith.constant 0 : index
    %c0_341 = arith.constant 0 : index
    %1023 = vector.load %arg29[%c0_340, %c0_341] : memref<1x128xf32, #tpu.memory_space<vmem>>, vector<1x128xf32>
    %1024 = vector.broadcast %1023 : vector<1x128xf32> to vector<16x128xf32>
    %1025 = arith.mulf %1022, %1024 : vector<16x128xf32>
    %c0_342 = arith.constant 0 : index
    %c0_343 = arith.constant 0 : index
    %1026 = vector.load %arg30[%c0_342, %c0_343] : memref<1x128xf32, #tpu.memory_space<vmem>>, vector<1x128xf32>
    %1027 = vector.broadcast %1026 : vector<1x128xf32> to vector<16x128xf32>
    %1028 = arith.addf %1025, %1027 : vector<16x128xf32>
    %c0_344 = arith.constant 0 : index
    %c0_345 = arith.constant 0 : index
    %1029 = vector.load %arg31[%c0_344, %c0_345] : memref<128x512xf32, #tpu.memory_space<vmem>>, vector<128x512xf32>
    %cst_346 = arith.constant dense<0.000000e+00> : vector<16x512xf32>
    %1030 = tpu.matmul %1028, %1029, %cst_346 {dimension_numbers = #tpu.dot_dimension_numbers<[1], [0], [0], [1], [0, 0, 1, 1], [], []>} : vector<16x128xf32>, vector<128x512xf32>, vector<16x512xf32> -> vector<16x512xf32>
    %c0_347 = arith.constant 0 : index
    %c0_348 = arith.constant 0 : index
    %1031 = vector.load %arg32[%c0_347, %c0_348] : memref<1x512xf32, #tpu.memory_space<vmem>>, vector<1x512xf32>
    %1032 = vector.broadcast %1031 : vector<1x512xf32> to vector<16x512xf32>
    %1033 = arith.addf %1030, %1032 : vector<16x512xf32>
    %1034 = arith.negf %1033 : vector<16x512xf32>
    %1035 = math.exp %1034 : vector<16x512xf32>
    %cst_349 = arith.constant 1.000000e+00 : f32
    %1036 = vector.broadcast %cst_349 : f32 to vector<16x512xf32>
    %1037 = arith.addf %1036, %1035 : vector<16x512xf32>
    %1038 = arith.divf %1036, %1037 : vector<16x512xf32>
    %1039 = arith.mulf %1033, %1038 : vector<16x512xf32>
    %c0_350 = arith.constant 0 : index
    %c0_351 = arith.constant 0 : index
    %1040 = vector.load %arg33[%c0_350, %c0_351] : memref<512x128xf32, #tpu.memory_space<vmem>>, vector<512x128xf32>
    %cst_352 = arith.constant dense<0.000000e+00> : vector<16x128xf32>
    %1041 = tpu.matmul %1039, %1040, %cst_352 {dimension_numbers = #tpu.dot_dimension_numbers<[1], [0], [0], [1], [0, 0, 1, 1], [], []>} : vector<16x512xf32>, vector<512x128xf32>, vector<16x128xf32> -> vector<16x128xf32>
    %c0_353 = arith.constant 0 : index
    %c0_354 = arith.constant 0 : index
    %1042 = vector.load %arg34[%c0_353, %c0_354] : memref<1x128xf32, #tpu.memory_space<vmem>>, vector<1x128xf32>
    %1043 = vector.broadcast %1042 : vector<1x128xf32> to vector<16x128xf32>
    %1044 = arith.addf %1041, %1043 : vector<16x128xf32>
    %cst_355 = arith.constant 5.000000e-01 : f32
    %1045 = vector.broadcast %cst_355 : f32 to vector<16x128xf32>
    %1046 = arith.mulf %1045, %1044 : vector<16x128xf32>
    %1047 = arith.addf %1004, %1046 : vector<16x128xf32>
    %cst_356 = arith.constant dense<0.000000e+00> : vector<16xf32>
    %1048 = vector.multi_reduction <add>, %1047, %cst_356 [1] : vector<16x128xf32> to vector<16xf32>
    %1049 = vector.shape_cast %1048 : vector<16xf32> to vector<16x1xf32>
    %cst_357 = arith.constant 1.280000e+02 : f32
    %1050 = vector.broadcast %cst_357 : f32 to vector<16x1xf32>
    %1051 = arith.divf %1049, %1050 : vector<16x1xf32>
    %1052 = vector.broadcast %1051 : vector<16x1xf32> to vector<16x128xf32>
    %1053 = arith.subf %1047, %1052 : vector<16x128xf32>
    %1054 = arith.mulf %1053, %1053 : vector<16x128xf32>
    %cst_358 = arith.constant dense<0.000000e+00> : vector<16xf32>
    %1055 = vector.multi_reduction <add>, %1054, %cst_358 [1] : vector<16x128xf32> to vector<16xf32>
    %1056 = vector.shape_cast %1055 : vector<16xf32> to vector<16x1xf32>
    %cst_359 = arith.constant 1.280000e+02 : f32
    %1057 = vector.broadcast %cst_359 : f32 to vector<16x1xf32>
    %1058 = arith.divf %1056, %1057 : vector<16x1xf32>
    %1059 = vector.broadcast %1051 : vector<16x1xf32> to vector<16x128xf32>
    %1060 = arith.subf %1047, %1059 : vector<16x128xf32>
    %cst_360 = arith.constant 9.99999974E-6 : f32
    %1061 = vector.broadcast %cst_360 : f32 to vector<16x1xf32>
    %1062 = arith.addf %1058, %1061 : vector<16x1xf32>
    %1063 = math.rsqrt %1062 : vector<16x1xf32>
    %1064 = vector.broadcast %1063 : vector<16x1xf32> to vector<16x128xf32>
    %1065 = arith.mulf %1060, %1064 : vector<16x128xf32>
    %c0_361 = arith.constant 0 : index
    %c0_362 = arith.constant 0 : index
    %1066 = vector.load %arg35[%c0_361, %c0_362] : memref<1x128xf32, #tpu.memory_space<vmem>>, vector<1x128xf32>
    %1067 = vector.broadcast %1066 : vector<1x128xf32> to vector<16x128xf32>
    %1068 = arith.mulf %1065, %1067 : vector<16x128xf32>
    %c0_363 = arith.constant 0 : index
    %c0_364 = arith.constant 0 : index
    %1069 = vector.load %arg36[%c0_363, %c0_364] : memref<1x128xf32, #tpu.memory_space<vmem>>, vector<1x128xf32>
    %1070 = vector.broadcast %1069 : vector<1x128xf32> to vector<16x128xf32>
    %1071 = arith.addf %1068, %1070 : vector<16x128xf32>
    %c0_365 = arith.constant 0 : index
    %c0_366 = arith.constant 0 : index
    %1072 = vector.load %arg37[%c0_365, %c0_366] : memref<16x128xf32, #tpu.memory_space<vmem>>, vector<16x128xf32>
    tpu.vector_store %arg37[%c0_365, %c0_366], %1071 {strides = array<i32>} : memref<16x128xf32, #tpu.memory_space<vmem>>, vector<16x128xf32>,
    return
  }
  func.func @transform_0(%arg0: i32) -> (i32, i32) {
    %c0_i32 = arith.constant 0 : i32
    %c0_i32_0 = arith.constant 0 : i32
    %c0_i32_1 = arith.constant 0 : i32
    return %c0_i32, %c0_i32_0 : i32, i32
  }
  func.func @transform_1(%arg0: i32) -> (i32, i32) {
    %c0_i32 = arith.constant 0 : i32
    %c0_i32_0 = arith.constant 0 : i32
    %c0_i32_1 = arith.constant 0 : i32
    return %c0_i32, %c0_i32_0 : i32, i32
  }
  func.func @transform_2(%arg0: i32) -> (i32, i32) {
    %c0_i32 = arith.constant 0 : i32
    %c0_i32_0 = arith.constant 0 : i32
    %c0_i32_1 = arith.constant 0 : i32
    return %c0_i32, %c0_i32_0 : i32, i32
  }
  func.func @transform_3(%arg0: i32) -> (i32, i32) {
    %c0_i32 = arith.constant 0 : i32
    %c0_i32_0 = arith.constant 0 : i32
    %c0_i32_1 = arith.constant 0 : i32
    return %c0_i32, %c0_i32_0 : i32, i32
  }
  func.func @transform_4(%arg0: i32) -> (i32, i32) {
    %c0_i32 = arith.constant 0 : i32
    %c0_i32_0 = arith.constant 0 : i32
    %c0_i32_1 = arith.constant 0 : i32
    return %c0_i32, %c0_i32_0 : i32, i32
  }
  func.func @transform_5(%arg0: i32) -> (i32, i32) {
    %c0_i32 = arith.constant 0 : i32
    %c0_i32_0 = arith.constant 0 : i32
    %c0_i32_1 = arith.constant 0 : i32
    return %c0_i32, %c0_i32_0 : i32, i32
  }
  func.func @transform_6(%arg0: i32) -> (i32, i32) {
    %c0_i32 = arith.constant 0 : i32
    %c0_i32_0 = arith.constant 0 : i32
    %c0_i32_1 = arith.constant 0 : i32
    return %c0_i32, %c0_i32_0 : i32, i32
  }
  func.func @transform_7(%arg0: i32) -> (i32, i32) {
    %c0_i32 = arith.constant 0 : i32
    %c0_i32_0 = arith.constant 0 : i32
    %c0_i32_1 = arith.constant 0 : i32
    return %c0_i32, %c0_i32_0 : i32, i32
  }
  func.func @transform_8(%arg0: i32) -> (i32, i32) {
    %c0_i32 = arith.constant 0 : i32
    %c0_i32_0 = arith.constant 0 : i32
    %c0_i32_1 = arith.constant 0 : i32
    return %c0_i32, %c0_i32_0 : i32, i32
  }
  func.func @transform_9(%arg0: i32) -> (i32, i32) {
    %c0_i32 = arith.constant 0 : i32
    %c0_i32_0 = arith.constant 0 : i32
    %c0_i32_1 = arith.constant 0 : i32
    return %c0_i32, %c0_i32_0 : i32, i32
  }
  func.func @transform_10(%arg0: i32) -> (i32, i32) {
    %c0_i32 = arith.constant 0 : i32
    %c0_i32_0 = arith.constant 0 : i32
    %c0_i32_1 = arith.constant 0 : i32
    return %c0_i32, %c0_i32_0 : i32, i32
  }
  func.func @transform_11(%arg0: i32) -> (i32, i32) {
    %c0_i32 = arith.constant 0 : i32
    %c0_i32_0 = arith.constant 0 : i32
    %c0_i32_1 = arith.constant 0 : i32
    return %c0_i32, %c0_i32_0 : i32, i32
  }
  func.func @transform_12(%arg0: i32) -> (i32, i32) {
    %c0_i32 = arith.constant 0 : i32
    %c0_i32_0 = arith.constant 0 : i32
    %c0_i32_1 = arith.constant 0 : i32
    return %c0_i32, %c0_i32_0 : i32, i32
  }
  func.func @transform_13(%arg0: i32) -> (i32, i32) {
    %c0_i32 = arith.constant 0 : i32
    %c0_i32_0 = arith.constant 0 : i32
    %c0_i32_1 = arith.constant 0 : i32
    return %c0_i32, %c0_i32_0 : i32, i32
  }
  func.func @transform_14(%arg0: i32) -> (i32, i32) {
    %c0_i32 = arith.constant 0 : i32
    %c0_i32_0 = arith.constant 0 : i32
    %c0_i32_1 = arith.constant 0 : i32
    return %c0_i32, %c0_i32_0 : i32, i32
  }
  func.func @transform_15(%arg0: i32) -> (i32, i32) {
    %c0_i32 = arith.constant 0 : i32
    %c0_i32_0 = arith.constant 0 : i32
    %c0_i32_1 = arith.constant 0 : i32
    return %c0_i32, %c0_i32_0 : i32, i32
  }
  func.func @transform_16(%arg0: i32) -> (i32, i32) {
    %c0_i32 = arith.constant 0 : i32
    %c0_i32_0 = arith.constant 0 : i32
    %c0_i32_1 = arith.constant 0 : i32
    return %c0_i32, %c0_i32_0 : i32, i32
  }
  func.func @transform_17(%arg0: i32) -> (i32, i32) {
    %c0_i32 = arith.constant 0 : i32
    %c0_i32_0 = arith.constant 0 : i32
    %c0_i32_1 = arith.constant 0 : i32
    return %c0_i32, %c0_i32_0 : i32, i32
  }
  func.func @transform_18(%arg0: i32) -> (i32, i32) {
    %c0_i32 = arith.constant 0 : i32
    %c0_i32_0 = arith.constant 0 : i32
    %c0_i32_1 = arith.constant 0 : i32
    return %c0_i32, %c0_i32_0 : i32, i32
  }
  func.func @transform_19(%arg0: i32) -> (i32, i32) {
    %c0_i32 = arith.constant 0 : i32
    %c0_i32_0 = arith.constant 0 : i32
    %c0_i32_1 = arith.constant 0 : i32
    return %c0_i32, %c0_i32_0 : i32, i32
  }
  func.func @transform_20(%arg0: i32) -> (i32, i32) {
    %c0_i32 = arith.constant 0 : i32
    %c0_i32_0 = arith.constant 0 : i32
    %c0_i32_1 = arith.constant 0 : i32
    return %c0_i32, %c0_i32_0 : i32, i32
  }
  func.func @transform_21(%arg0: i32) -> (i32, i32) {
    %c0_i32 = arith.constant 0 : i32
    %c0_i32_0 = arith.constant 0 : i32
    %c0_i32_1 = arith.constant 0 : i32
    return %c0_i32, %c0_i32_0 : i32, i32
  }
  func.func @transform_22(%arg0: i32) -> (i32, i32) {
    %c0_i32 = arith.constant 0 : i32
    %c0_i32_0 = arith.constant 0 : i32
    %c0_i32_1 = arith.constant 0 : i32
    return %c0_i32, %c0_i32_0 : i32, i32
  }
  func.func @transform_23(%arg0: i32) -> (i32, i32) {
    %c0_i32 = arith.constant 0 : i32
    %c0_i32_0 = arith.constant 0 : i32
    %c0_i32_1 = arith.constant 0 : i32
    return %c0_i32, %c0_i32_0 : i32, i32
  }
  func.func @transform_24(%arg0: i32) -> (i32, i32) {
    %c0_i32 = arith.constant 0 : i32
    %c0_i32_0 = arith.constant 0 : i32
    %c0_i32_1 = arith.constant 0 : i32
    return %c0_i32, %c0_i32_0 : i32, i32
  }
  func.func @transform_25(%arg0: i32) -> (i32, i32) {
    %c0_i32 = arith.constant 0 : i32
    %c0_i32_0 = arith.constant 0 : i32
    %c0_i32_1 = arith.constant 0 : i32
    return %c0_i32, %c0_i32_0 : i32, i32
  }
  func.func @transform_26(%arg0: i32) -> (i32, i32) {
    %c0_i32 = arith.constant 0 : i32
    %c0_i32_0 = arith.constant 0 : i32
    %c0_i32_1 = arith.constant 0 : i32
    return %c0_i32, %c0_i32_0 : i32, i32
  }
  func.func @transform_27(%arg0: i32) -> (i32, i32) {
    %c0_i32 = arith.constant 0 : i32
    %c0_i32_0 = arith.constant 0 : i32
    %c0_i32_1 = arith.constant 0 : i32
    return %c0_i32, %c0_i32_0 : i32, i32
  }
  func.func @transform_28(%arg0: i32) -> (i32, i32) {
    %c0_i32 = arith.constant 0 : i32
    %c0_i32_0 = arith.constant 0 : i32
    %c0_i32_1 = arith.constant 0 : i32
    return %c0_i32, %c0_i32_0 : i32, i32
  }
  func.func @transform_29(%arg0: i32) -> (i32, i32) {
    %c0_i32 = arith.constant 0 : i32
    %c0_i32_0 = arith.constant 0 : i32
    %c0_i32_1 = arith.constant 0 : i32
    return %c0_i32, %c0_i32_0 : i32, i32
  }
  func.func @transform_30(%arg0: i32) -> (i32, i32) {
    %c0_i32 = arith.constant 0 : i32
    %c0_i32_0 = arith.constant 0 : i32
    %c0_i32_1 = arith.constant 0 : i32
    return %c0_i32, %c0_i32_0 : i32, i32
  }
  func.func @transform_31(%arg0: i32) -> (i32, i32) {
    %c0_i32 = arith.constant 0 : i32
    %c0_i32_0 = arith.constant 0 : i32
    %c0_i32_1 = arith.constant 0 : i32
    return %c0_i32, %c0_i32_0 : i32, i32
  }
  func.func @transform_32(%arg0: i32) -> (i32, i32) {
    %c0_i32 = arith.constant 0 : i32
    %c0_i32_0 = arith.constant 0 : i32
    %c0_i32_1 = arith.constant 0 : i32
    return %c0_i32, %c0_i32_0 : i32, i32
  }
  func.func @transform_33(%arg0: i32) -> (i32, i32) {
    %c0_i32 = arith.constant 0 : i32
    %c0_i32_0 = arith.constant 0 : i32
    %c0_i32_1 = arith.constant 0 : i32
    return %c0_i32, %c0_i32_0 : i32, i32
  }
  func.func @transform_34(%arg0: i32) -> (i32, i32) {
    %c0_i32 = arith.constant 0 : i32
    %c0_i32_0 = arith.constant 0 : i32
    %c0_i32_1 = arith.constant 0 : i32
    return %c0_i32, %c0_i32_0 : i32, i32
  }
  func.func @transform_35(%arg0: i32) -> (i32, i32) {
    %c0_i32 = arith.constant 0 : i32
    %c0_i32_0 = arith.constant 0 : i32
    %c0_i32_1 = arith.constant 0 : i32
    return %c0_i32, %c0_i32_0 : i32, i32
  }
  func.func @transform_36(%arg0: i32) -> (i32, i32) {
    %c0_i32 = arith.constant 0 : i32
    %c0_i32_0 = arith.constant 0 : i32
    %c0_i32_1 = arith.constant 0 : i32
    return %c0_i32, %c0_i32_0 : i32, i32
  }
  func.func @transform_37(%arg0: i32) -> (i32, i32, i32, i32) {
    %c0_i32 = arith.constant 0 : i32
    %c0_i32_0 = arith.constant 0 : i32
    %c0_i32_1 = arith.constant 0 : i32
    %c0_i32_2 = arith.constant 0 : i32
    %c0_i32_3 = arith.constant 0 : i32
    return %c0_i32, %c0_i32_0, %c0_i32_1, %c0_i32_2 : i32, i32, i32, i32
  }
}

module attributes {stable_mosaic.version = 11 : i64} {
  func.func @_classifier_kernel(%arg0: i32, %arg1: memref<16x128xf32, #tpu.memory_space<vmem>>, %arg2: memref<128x2xf32, #tpu.memory_space<vmem>>, %arg3: memref<1x2xf32, #tpu.memory_space<vmem>>, %arg4: memref<2x2xf32, #tpu.memory_space<vmem>>) attributes {dimension_semantics = [#tpu.dimension_semantics<arbitrary>], iteration_bounds = array<i64: 1>, scalar_prefetch = 0 : i64, scratch_operands = 0 : i64, tpu.core_type = #tpu.core_type<tc>, window_params = [{pipeline_mode = #tpu.pipeline_mode<synchronous>, transform_indices = @transform_0, window_bounds = array<i64: 16, 128>}, {pipeline_mode = #tpu.pipeline_mode<synchronous>, transform_indices = @transform_1, window_bounds = array<i64: 128, 2>}, {pipeline_mode = #tpu.pipeline_mode<synchronous>, transform_indices = @transform_2, window_bounds = array<i64: 1, 2>}, {pipeline_mode = #tpu.pipeline_mode<synchronous>, transform_indices = @transform_3, window_bounds = array<i64: 2, 2>}]} {
    %c0 = arith.constant 0 : index
    %c0_0 = arith.constant 0 : index
    %0 = vector.load %arg1[%c0, %c0_0] : memref<16x128xf32, #tpu.memory_space<vmem>>, vector<16x128xf32>
    %1 = vector.extract_strided_slice %0 {offsets = [0, 0], sizes = [1, 128], strides = [1, 1]} : vector<16x128xf32> to vector<1x128xf32>
    %2 = vector.extract_strided_slice %0 {offsets = [8, 0], sizes = [1, 128], strides = [1, 1]} : vector<16x128xf32> to vector<1x128xf32>
    %3 = tpu.concatenate %1, %2 in 0 : vector<1x128xf32>, vector<1x128xf32> -> vector<2x128xf32>
    %c0_1 = arith.constant 0 : index
    %c0_2 = arith.constant 0 : index
    %4 = vector.load %arg2[%c0_1, %c0_2] : memref<128x2xf32, #tpu.memory_space<vmem>>, vector<128x2xf32>
    %cst = arith.constant dense<0.000000e+00> : vector<2x2xf32>
    %5 = tpu.matmul %3, %4, %cst {dimension_numbers = #tpu.dot_dimension_numbers<[1], [0], [0], [1], [0, 0, 1, 1], [], []>} : vector<2x128xf32>, vector<128x2xf32>, vector<2x2xf32> -> vector<2x2xf32>
    %c0_3 = arith.constant 0 : index
    %c0_4 = arith.constant 0 : index
    %6 = vector.load %arg3[%c0_3, %c0_4] : memref<1x2xf32, #tpu.memory_space<vmem>>, vector<1x2xf32>
    %7 = vector.broadcast %6 : vector<1x2xf32> to vector<2x2xf32>
    %8 = arith.addf %5, %7 : vector<2x2xf32>
    %c0_5 = arith.constant 0 : index
    %c0_6 = arith.constant 0 : index
    %9 = vector.load %arg4[%c0_5, %c0_6] : memref<2x2xf32, #tpu.memory_space<vmem>>, vector<2x2xf32>
    tpu.vector_store %arg4[%c0_5, %c0_6], %8 {strides = array<i32>} : memref<2x2xf32, #tpu.memory_space<vmem>>, vector<2x2xf32>,
    return
  }
  func.func @transform_0(%arg0: i32) -> (i32, i32) {
    %c0_i32 = arith.constant 0 : i32
    %c0_i32_0 = arith.constant 0 : i32
    %c0_i32_1 = arith.constant 0 : i32
    return %c0_i32, %c0_i32_0 : i32, i32
  }
  func.func @transform_1(%arg0: i32) -> (i32, i32) {
    %c0_i32 = arith.constant 0 : i32
    %c0_i32_0 = arith.constant 0 : i32
    %c0_i32_1 = arith.constant 0 : i32
    return %c0_i32, %c0_i32_0 : i32, i32
  }
  func.func @transform_2(%arg0: i32) -> (i32, i32) {
    %c0_i32 = arith.constant 0 : i32
    %c0_i32_0 = arith.constant 0 : i32
    %c0_i32_1 = arith.constant 0 : i32
    return %c0_i32, %c0_i32_0 : i32, i32
  }
  func.func @transform_3(%arg0: i32) -> (i32, i32) {
    %c0_i32 = arith.constant 0 : i32
    %c0_i32_0 = arith.constant 0 : i32
    %c0_i32_1 = arith.constant 0 : i32
    return %c0_i32, %c0_i32_0 : i32, i32
  }
}

</mosaic_0001>

<bundles_post_ra>
// kernel: tcm_add_forward.5
= control target key start
LH: loop header
LB: loop body
LE: loop exit
PB: predicated region body
PF: predicated region fallthrough
CT: control target
= control target key end

     0   :  { %v236_v3 = vmov 0.0|0.0   ;;  %vm237_vm0 = vmmov 0   ;;  %v238_v6 = vmov 0.0   ;;  %s329_s0 = inlined_call_operand.vmem [shape: f32[16,128], index: 0, kind: input, shape index: {}]   ;;  %s330_s1 = inlined_call_operand.vmem [shape: f32[128,2], index: 1, kind: input, shape index: {}]   ;;  %s331_s2 = inlined_call_operand.vmem [shape: f32[1,2], index: 2, kind: input, shape index: {}]   ;;  %s332_s3 = inlined_call_operand.hbm [shape: f32[2,2], index: 3, kind: output, shape index: {}]  }
   0x1   :  { %v22_v0 = vld [vmem:[%s330_s1] sm:$0xff]  ;;  %v23_v1 = vld [vmem:[%s330_s1 + $0x8] sm:$0xff]  ;;  %v24_v2 = vld [vmem:[%s330_s1 + $0x10] sm:$0xff]  ;;  %184 = vmatprep.subr.bf16.mxu0 %v236_v3  ;;  %181 = vmatprep.mubr.msk.f32.mxu0 %vm237_vm0, %v238_v6 }
   0x2   :  { %v185_v4 = vpack.c.bf16 %v23_v1, %v22_v0  ;;  %v25_v5 = vld [vmem:[%s330_s1 + $0x18] sm:$0xff]  ;;  %v26_v8 = vld [vmem:[%s330_s1 + $0x20] sm:$0xff]  ;;  %v27_v9 = vld [vmem:[%s330_s1 + $0x28] sm:$0xff] }
   0x3   :  { %v188_v7 = vpack.c.bf16 %v25_v5, %v24_v2 }
   0x4   :  { %186 = vmatpush3.bf16.msra.mxu0 %v185_v4 }
   0x5   :  { %187 = vmatprep.subr.bf16.mxu0 %v236_v3 }
   0x6   :  { %8 = vsyncpa [#allocation3], 0  ;;  %v191_v10 = vpack.c.bf16 %v27_v9, %v26_v8  ;;  %v28_v11 = vld [vmem:[%s330_s1 + $0x30] sm:$0xff]  ;;  %v29_v12 = vld [vmem:[%s330_s1 + $0x38] sm:$0xff]  ;;  %vm20_vm1 = vcmask 1040384   ;;  %vm115_vm2 = vcmask 9216  }
   0x7   :  { %v194_v13 = vpack.c.bf16 %v29_v12, %v28_v11  ;;  %v30_v14 = vld [vmem:[%s330_s1 + $0x40] sm:$0xff]  ;;  %v31_v15 = vld [vmem:[%s330_s1 + $0x48] sm:$0xff]  ;;  %v32_v17 = vld [vmem:[%s330_s1 + $0x50] sm:$0xff] }
   0x8   :  { %189 = vmatpush3.bf16.msra.mxu0 %v188_v7  ;;  %v197_v16 = vpack.c.bf16 %v31_v15, %v30_v14  ;;  %v33_v18 = vld [vmem:[%s330_s1 + $0x58] sm:$0xff]  ;;  %v34_v20 = vld [vmem:[%s330_s1 + $0x60] sm:$0xff]  ;;  %v35_v21 = vld [vmem:[%s330_s1 + $0x68] sm:$0xff] }
   0x9   :  { %190 = vmatprep.subr.bf16.mxu0 %v236_v3  ;;  %v200_v19 = vpack.c.bf16 %v33_v18, %v32_v17  ;;  %v203_v22 = vpack.c.bf16 %v35_v21, %v34_v20  ;;  %v36_v23 = vld [vmem:[%s330_s1 + $0x70] sm:$0xff]  ;;  %v37_v24 = vld [vmem:[%s330_s1 + $0x78] sm:$0xff]  ;;  %v16_v25 = vld [vmem:[%s329_s0 + $0x8] sm:$0xff]  ;;  %s239_s1 = smov [#allocation2]  }
   0xa   :  { %v206_v26 = vpack.c.bf16 %v37_v24, %v36_v23  ;;  %v18_v27 = vrot.slane %v16_v25, 7  ;;  %v15_v28 = vld [vmem:[%s329_s0] sm:$0xff]  ;;  %s123_s23 = sshll.u32 %s239_s1, 4  ;;  %s124_s23 = int_to_ptr.vmem [resolvable:$true] %s123_s23 }
   0xb   :  { %v131_v30 = vld [vmem:[%s331_s2] ss:$0 sm:$0xff]  ;;  %s212_s24 = scalar_lea.vmem %s124_s23, 32  ;;  %p217_p1 = scmp.lt.s32.totalorder %s124_s23, %s124_s23 }
   0xc   :  { %192 = vmatpush3.bf16.msra.mxu0 %v191_v10  ;;  %v21_v29 = vsel %vm20_vm1, %v15_v28, %v18_v27  ;;  %p213_p0 = scmp.ne.s32.totalorder %s124_s23, %s212_s24  ;;  %p218_p2 = scmp.lt.s32.totalorder %s212_s24, %s212_s24 }
   0xd   :  { %193 = vmatprep.subr.bf16.mxu0 %v236_v3 }
   0xe   :  { %p219_p3 = por %p218_p2, %p217_p1 }
  0x10   :  { %195 = vmatpush3.bf16.msra.mxu0 %v194_v13  ;;  %p220_p4 = pnand %p219_p3, %p213_p0 }
  0x11   :  { %196 = vmatprep.subr.bf16.mxu0 %v236_v3 }
  0x14   :  { %198 = vmatpush3.bf16.msra.mxu0 %v197_v16 }
  0x15   :  { %199 = vmatprep.subr.bf16.mxu0 %v236_v3 }
  0x18   :  { %201 = vmatpush3.bf16.msra.mxu0 %v200_v19 }
  0x19   :  { %202 = vmatprep.subr.bf16.mxu0 %v236_v3 }
  0x1c   :  { %204 = vmatpush3.bf16.msra.mxu0 %v203_v22 }
  0x1d   :  { %205 = vmatprep.subr.bf16.mxu0 %v236_v3 }
  0x20   :  { %207 = vmatpush3.bf16.msra.mxu0 %v206_v26 }
  0x23   :  { %182 = vmatmul.mubr.f32.vlgmr.msra.gmra.mrb[0].mxu0 %v21_v29 }
  0xf6   :  { %v111_v31 = vpop.f32.mrb[0].mxu0 }
  0xf7   :  { %v112_v32 = vadd.f32 %v131_v30, %v111_v31  ;;  %v183_v33 = vpop.f32.mrb[1].mxu0 }
  0xf9   :  { %116 = vst.msk [vmem:[#allocation2] sm:$0x3] %vm115_vm2, %v112_v32 }
  0xfa   :  { %223 = shalt.err (!%p220_p4)
}
  0xfb   :  { %s224_s26 = scalar_lea.hbm %s332_s3, 32 }
  0xfc   :  { %p225_p5 = scmp.ne.s32.totalorder %s332_s3, %s224_s26  ;;  %p228_p6 = scmp.lt.u32.totalorder %s224_s26, %s332_s3 }
  0xfe   :  { %p230_p7 = pnand %p228_p6, %p225_p5 }
 0x100   :  { %233 = shalt.err (!%p230_p7)
}
 0x101   :  { %126 = dma.vmem_to_hbm [thread:$0]  %s124_s23, 32, %s332_s3, [#allocation3]  }
 0x102   :  { %234 = dma.done.wait [#allocation3], 32  }
 0x103   :  { %235 = vsyncadd [#allocation3], 4294967264 }
 0x104   :  { %130 = vsyncpa [#allocation3], 1 }

// kernel: tcm_add_forward.3
= control target key start
LH: loop header
LB: loop body
LE: loop exit
PB: predicated region body
PF: predicated region fallthrough
CT: control target
= control target key end

     0   :  { %s1201_s0 = inlined_call_operand.vmem [shape: f32[14,1024], index: 0, kind: input, shape index: {}]   ;;  %s1202_s1 = inlined_call_operand.hbm [shape: f32[1024,128], index: 1, kind: input, shape index: {}]   ;;  %s1203_s2 = inlined_call_operand.hbm [shape: f32[1,128], index: 2, kind: input, shape index: {}]   ;;  %s1204_s3 = inlined_call_operand.<no memory space> [shape: f32[1,1], index: 3, kind: input, shape index: {}]   ;;  %s1205_s5 = inlined_call_operand.hbm [shape: f32[7,128], index: 5, kind: input, shape index: {}]   ;;  %s1206_s6 = inlined_call_operand.hbm [shape: f32[1,128], index: 6, kind: input, shape index: {}]   ;;  %s1207_s7 = inlined_call_operand.vmem [shape: f32[16,128], index: 7, kind: output, shape index: {}]   ;;  %s1208_s4 = inlined_call_operand.<no memory space> [shape: f32[1,1], index: 4, kind: input, shape index: {}]  }
   0x1   :  { %v12_v0 = vstv %s1204_s3  ;;  %v14_v1 = vstv %s1208_s4 }
   0x2   :  { %13 = vst [vmem:[#allocation2] sm:$0x1] %v12_v0  ;;  %15 = vst [vmem:[#allocation3] sm:$0x1] %v14_v1 }
   0x3   :  { %16 = vsyncpa [#allocation5], 0 }
   0x4   :  { %17 = vsyncpa [#allocation7], 0 }
   0x5   :  { %18 = vsyncpa [#allocation10], 0  ;;  %s1035_s28 = smov [#allocation6]   ;;  %s1036_s30 = smov [#allocation4]  }
   0x6   :  { %s39_s29 = sshll.u32 %s1035_s28, 4  ;;  %s26_s8 = sshll.u32 %s1036_s30, 4  ;;  %s40_s29 = int_to_ptr.vmem [resolvable:$true] %s39_s29  ;;  %s1088_s8 = int_to_ptr.vmem [resolvable:$true] %s26_s8 }
   0x7   :  { %s941_s3 = scalar_lea.hbm %s1203_s2, 16 }
   0x8   :  { %p942_p0 = scmp.ne.s32.totalorder %s1203_s2, %s941_s3  ;;  %p945_p1 = scmp.lt.u32.totalorder %s941_s3, %s1203_s2 }
   0xa   :  { %p947_p2 = pnand %p945_p1, %p942_p0 }
   0xc   :  { %950 = shalt.err (!%p947_p2)
}
   0xd   :  { %s951_s14 = scalar_lea.vmem %s40_s29, 16  ;;  %s955_s15 = scalar_lea.vmem %s40_s29, 32 }
   0xe   :  { %p952_p3 = scmp.ne.s32.totalorder %s40_s29, %s951_s14  ;;  %p956_p4 = scmp.lt.s32.totalorder %s40_s29, %s40_s29 }
   0xf   :  { %p957_p5 = scmp.lt.s32.totalorder %s955_s15, %s951_s14 }
  0x11   :  { %p958_p6 = por %p957_p5, %p956_p4 }
  0x13   :  { %p959_p7 = pnand %p958_p6, %p952_p3 }
  0x15   :  { %962 = shalt.err (!%p959_p7)
}
  0x16   :  { %42 = dma.hbm_to_vmem [thread:$0]  %s1203_s2, 16, %s40_s29, [#allocation7]  }
  0x17   :  { %s963_s20 = scalar_lea.hbm %s1202_s1, 16384 }
  0x18   :  { %p964_p8 = scmp.ne.s32.totalorder %s1202_s1, %s963_s20  ;;  %p967_p9 = scmp.lt.u32.totalorder %s963_s20, %s1202_s1 }
  0x1a   :  { %p969_p10 = pnand %p967_p9, %p964_p8 }
  0x1c   :  { %972 = shalt.err (!%p969_p10)
}
  0x1d   :  { %s973_s25 = scalar_lea.vmem %s1088_s8, 16384  ;;  %p978_p12 = scmp.lt.s32.totalorder %s1088_s8, %s1088_s8 }
  0x1e   :  { %p974_p11 = scmp.ne.s32.totalorder %s1088_s8, %s973_s25  ;;  %p979_p13 = scmp.lt.s32.totalorder %s973_s25, %s973_s25 }
  0x20   :  { %p980_p0 = por %p979_p13, %p978_p12 }
  0x22   :  { %p981_p1 = pnand %p980_p0, %p974_p11 }
  0x24   :  { %984 = shalt.err (!%p981_p1)
}
  0x25   :  { %s1037_s2 = smov 128   ;;  %s1038_s26 = smov 8  }
  0x26   :  { %32 = dma.hbm_to_vmem [thread:$0]  %s1202_s1, 16384, %s1088_s8, [#allocation5], %s1037_s2, %s1037_s2, %s1038_s26  }
  0x27   :  { %s1039_s29 = smov [#allocation8]   ;;  %s1040_s9 = smov [#allocation9]  }
  0x28   :  { %s53_s30 = sshll.u32 %s1039_s29, 4  ;;  %s63_s10 = sshll.u32 %s1040_s9, 4  ;;  %s54_s30 = int_to_ptr.vmem [resolvable:$true] %s53_s30  ;;  %s64_s10 = int_to_ptr.vmem [resolvable:$true] %s63_s10 }
  0x29   :  { %s985_s12 = scalar_lea.hbm %s1205_s5, 128 }
  0x2a   :  { %p986_p2 = scmp.ne.s32.totalorder %s1205_s5, %s985_s12  ;;  %p989_p3 = scmp.lt.u32.totalorder %s985_s12, %s1205_s5 }
  0x2c   :  { %p991_p4 = pnand %p989_p3, %p986_p2 }
  0x2e   :  { %994 = shalt.err (!%p991_p4)
}
  0x2f   :  { %s995_s1 = scalar_lea.vmem %s54_s30, 128  ;;  %p1000_p6 = scmp.lt.s32.totalorder %s54_s30, %s54_s30 }
  0x30   :  { %p996_p5 = scmp.ne.s32.totalorder %s54_s30, %s995_s1  ;;  %p1001_p7 = scmp.lt.s32.totalorder %s995_s1, %s995_s1 }
  0x32   :  { %p1002_p8 = por %p1001_p7, %p1000_p6 }
  0x34   :  { %p1003_p9 = pnand %p1002_p8, %p996_p5 }
  0x36   :  { %1006 = shalt.err (!%p1003_p9)
}
  0x37   :  { %56 = dma.hbm_to_vmem [thread:$0]  %s1205_s5, 128, %s54_s30, [#allocation7]  }
  0x38   :  { %s1007_s19 = scalar_lea.hbm %s1206_s6, 16 }
  0x39   :  { %p1008_p10 = scmp.ne.s32.totalorder %s1206_s6, %s1007_s19  ;;  %p1011_p11 = scmp.lt.u32.totalorder %s1007_s19, %s1206_s6 }
  0x3b   :  { %p1013_p12 = pnand %p1011_p11, %p1008_p10 }
  0x3d   :  { %1016 = shalt.err (!%p1013_p12)
}
  0x3e   :  { %s1017_s24 = scalar_lea.vmem %s64_s10, 16  ;;  %s1021_s25 = scalar_lea.vmem %s64_s10, 32 }
  0x3f   :  { %p1018_p13 = scmp.ne.s32.totalorder %s64_s10, %s1017_s24  ;;  %p1022_p0 = scmp.lt.s32.totalorder %s64_s10, %s64_s10 }
  0x40   :  { %p1023_p1 = scmp.lt.s32.totalorder %s1021_s25, %s1017_s24 }
  0x42   :  { %p1024_p2 = por %p1023_p1, %p1022_p0 }
  0x44   :  { %p1025_p3 = pnand %p1024_p2, %p1018_p13 }
  0x46   :  { %1028 = shalt.err (!%p1025_p3)
}
  0x47   :  { %66 = dma.hbm_to_vmem [thread:$0]  %s1206_s6, 16, %s64_s10, [#allocation10]  }
  0x48   :  { %1029 = dma.done.wait [#allocation5], 16384  }
  0x49   :  { %1030 = vsyncadd [#allocation5], 4294950912 }
  0x4a   :  { %1031 = dma.done.wait [#allocation7], 144  }
  0x4b   :  { %1032 = vsyncadd [#allocation7], 4294967152 }
  0x4c   :  { %1033 = dma.done.wait [#allocation10], 16  }
  0x4d   :  { %1034 = vsyncadd [#allocation10], 4294967280  ;;  %v111_v2 = vld [vmem:[#allocation4 + $0x80] sm:$0xff]  ;;  %v112_v3 = vld [vmem:[#allocation4 + $0x88] sm:$0xff]  ;;  %vm532_vm0 = vcmask 1045504   ;;  %vm629_vm3 = vcmask 1040384  }
  0x4e   :  { %v95_v4 = vld [vmem:[#allocation4] sm:$0xff]  ;;  %v798_v5 = vpack.c.bf16 %v112_v3, %v111_v2  ;;  %v96_v6 = vld [vmem:[#allocation4 + $0x8] sm:$0xff]  ;;  %v113_v13 = vld [vmem:[#allocation4 + $0x90] sm:$0xff]  ;;  %vm624_vm4 = vcmask 1041408  }
  0x4f   :  { %v143_v7 = vld [vmem:[#allocation4 + $0x180] sm:$0xff]  ;;  %v144_v8 = vld [vmem:[#allocation4 + $0x188] sm:$0xff]  ;;  %v800_v9 = vpack.c.bf16 %v96_v6, %v95_v4  ;;  %v114_v15 = vld [vmem:[#allocation4 + $0x98] sm:$0xff] }
  0x50   :  { %v830_v10 = vpack.c.bf16 %v144_v8, %v143_v7  ;;  %v127_v11 = vld [vmem:[#allocation4 + $0x100] sm:$0xff]  ;;  %v128_v12 = vld [vmem:[#allocation4 + $0x108] sm:$0xff]  ;;  %799 = vmatprep.subr.bf16.mxu0 %v798_v5  ;;  %v97_v16 = vld [vmem:[#allocation4 + $0x10] sm:$0xff]  ;;  %v802_v18 = vpack.c.bf16 %v114_v15, %v113_v13 }
  0x51   :  { %v832_v14 = vpack.c.bf16 %v128_v12, %v127_v11  ;;  %v98_v17 = vld [vmem:[#allocation4 + $0x18] sm:$0xff]  ;;  %801 = vmatpush3.bf16.msra.mxu0 %v800_v9  ;;  %v145_v20 = vld [vmem:[#allocation4 + $0x190] sm:$0xff]  ;;  %v115_v25 = vld [vmem:[#allocation4 + $0xa0] sm:$0xff] }
  0x52   :  { %831 = vmatprep.subr.bf16.mxu1 %v830_v10  ;;  %v804_v19 = vpack.c.bf16 %v98_v17, %v97_v16  ;;  %v146_v21 = vld [vmem:[#allocation4 + $0x198] sm:$0xff]  ;;  %v129_v22 = vld [vmem:[#allocation4 + $0x110] sm:$0xff]  ;;  %v116_v26 = vld [vmem:[#allocation4 + $0xa8] sm:$0xff]  ;;  %803 = vmatprep.subr.bf16.mxu0 %v802_v18 }
  0x53   :  { %833 = vmatpush3.bf16.msra.mxu1 %v832_v14  ;;  %v834_v23 = vpack.c.bf16 %v146_v21, %v145_v20  ;;  %v130_v24 = vld [vmem:[#allocation4 + $0x118] sm:$0xff]  ;;  %v806_v28 = vpack.c.bf16 %v116_v26, %v115_v25  ;;  %v99_v29 = vld [vmem:[#allocation4 + $0x20] sm:$0xff]  ;;  %v100_v30 = vld [vmem:[#allocation4 + $0x28] sm:$0xff] }
  0x54   :  { %v836_v27 = vpack.c.bf16 %v130_v24, %v129_v22  ;;  %v147_v31 = vld [vmem:[#allocation4 + $0x1a0] sm:$0xff]  ;;  %v148_v32 = vld [vmem:[#allocation4 + $0x1a8] sm:$0xff]  ;;  %v808_v35 = vpack.c.bf16 %v100_v30, %v99_v29  ;;  %v117_v37 = vld [vmem:[#allocation4 + $0xb0] sm:$0xff] }
  0x55   :  { %835 = vmatprep.subr.bf16.mxu1 %v834_v23  ;;  %v131_v33 = vld [vmem:[#allocation4 + $0x120] sm:$0xff]  ;;  %v132_v34 = vld [vmem:[#allocation4 + $0x128] sm:$0xff]  ;;  %805 = vmatpush3.bf16.msra.mxu0 %v804_v19  ;;  %v838_v36 = vpack.c.bf16 %v148_v32, %v147_v31  ;;  %v118_v38 = vld [vmem:[#allocation4 + $0xb8] sm:$0xff] }
  0x56   :  { %v101_v39 = vld [vmem:[#allocation4 + $0x30] sm:$0xff]  ;;  %807 = vmatprep.subr.bf16.mxu0 %v806_v28  ;;  %v840_v40 = vpack.c.bf16 %v132_v34, %v131_v33  ;;  %v810_v41 = vpack.c.bf16 %v118_v38, %v117_v37  ;;  %v102_v42 = vld [vmem:[#allocation4 + $0x38] sm:$0xff]  ;;  %v119_v48 = vld [vmem:[#allocation4 + $0xc0] sm:$0xff] }
  0x57   :  { %837 = vmatpush3.bf16.msra.mxu1 %v836_v27  ;;  %v149_v43 = vld [vmem:[#allocation4 + $0x1b0] sm:$0xff]  ;;  %v150_v44 = vld [vmem:[#allocation4 + $0x1b8] sm:$0xff]  ;;  %v120_v49 = vld [vmem:[#allocation4 + $0xc8] sm:$0xff]  ;;  %v812_v50 = vpack.c.bf16 %v102_v42, %v101_v39 }
  0x58   :  { %839 = vmatprep.subr.bf16.mxu1 %v838_v36  ;;  %v842_v45 = vpack.c.bf16 %v150_v44, %v149_v43  ;;  %v133_v46 = vld [vmem:[#allocation4 + $0x130] sm:$0xff]  ;;  %v134_v47 = vld [vmem:[#allocation4 + $0x138] sm:$0xff]  ;;  %v151_v51 = vld [vmem:[#allocation4 + $0x1c0] sm:$0xff]  ;;  %v814_v54 = vpack.c.bf16 %v120_v49, %v119_v48 }
  0x59   :  { %809 = vmatpush3.bf16.msra.mxu0 %v808_v35  ;;  %v152_v52 = vld [vmem:[#allocation4 + $0x1c8] sm:$0xff]  ;;  %v844_v53 = vpack.c.bf16 %v134_v47, %v133_v46  ;;  %v103_v55 = vld [vmem:[#allocation4 + $0x40] sm:$0xff]  ;;  %v121_v60 = vld [vmem:[#allocation4 + $0xd0] sm:$0xff] }
  0x5a   :  { %811 = vmatprep.subr.bf16.mxu0 %v810_v41  ;;  %v104_v56 = vld [vmem:[#allocation4 + $0x48] sm:$0xff]  ;;  %v135_v57 = vld [vmem:[#allocation4 + $0x140] sm:$0xff]  ;;  %v846_v58 = vpack.c.bf16 %v152_v52, %v151_v51  ;;  %v122_v61 = vld [vmem:[#allocation4 + $0xd8] sm:$0xff] }
  0x5b   :  { %841 = vmatpush3.bf16.msra.mxu1 %v840_v40  ;;  %v136_v59 = vld [vmem:[#allocation4 + $0x148] sm:$0xff]  ;;  %v153_v62 = vld [vmem:[#allocation4 + $0x1d0] sm:$0xff]  ;;  %v154_v63 = vld [vmem:[#allocation4 + $0x1d8] sm:$0xff]  ;;  %v816_v0 = vpack.c.bf16 %v104_v56, %v103_v55  ;;  %v818_v2 = vpack.c.bf16 %v122_v61, %v121_v60 }
  0x5c   :  { %843 = vmatprep.subr.bf16.mxu1 %v842_v45  ;;  %v848_v1 = vpack.c.bf16 %v136_v59, %v135_v57  ;;  %v105_v3 = vld [vmem:[#allocation4 + $0x50] sm:$0xff]  ;;  %v106_v4 = vld [vmem:[#allocation4 + $0x58] sm:$0xff]  ;;  %v850_v6 = vpack.c.bf16 %v154_v63, %v153_v62  ;;  %v123_v8 = vld [vmem:[#allocation4 + $0xe0] sm:$0xff] }
  0x5d   :  { %813 = vmatpush3.bf16.msra.mxu0 %v812_v50  ;;  %v137_v5 = vld [vmem:[#allocation4 + $0x150] sm:$0xff]  ;;  %v138_v7 = vld [vmem:[#allocation4 + $0x158] sm:$0xff]  ;;  %v124_v9 = vld [vmem:[#allocation4 + $0xe8] sm:$0xff]  ;;  %v820_v12 = vpack.c.bf16 %v106_v4, %v105_v3 }
  0x5e   :  { %815 = vmatprep.subr.bf16.mxu0 %v814_v54  ;;  %v155_v10 = vld [vmem:[#allocation4 + $0x1e0] sm:$0xff]  ;;  %v156_v11 = vld [vmem:[#allocation4 + $0x1e8] sm:$0xff]  ;;  %v852_v15 = vpack.c.bf16 %v138_v7, %v137_v5  ;;  %v822_v16 = vpack.c.bf16 %v124_v9, %v123_v8  ;;  %v125_v21 = vld [vmem:[#allocation4 + $0xf0] sm:$0xff] }
  0x5f   :  { %845 = vmatpush3.bf16.msra.mxu1 %v844_v53  ;;  %v107_v13 = vld [vmem:[#allocation4 + $0x60] sm:$0xff]  ;;  %v108_v14 = vld [vmem:[#allocation4 + $0x68] sm:$0xff]  ;;  %v854_v20 = vpack.c.bf16 %v156_v11, %v155_v10  ;;  %v126_v22 = vld [vmem:[#allocation4 + $0xf8] sm:$0xff] }
  0x60   :  { %847 = vmatprep.subr.bf16.mxu1 %v846_v58  ;;  %v139_v17 = vld [vmem:[#allocation4 + $0x160] sm:$0xff]  ;;  %v140_v18 = vld [vmem:[#allocation4 + $0x168] sm:$0xff]  ;;  %v82_v23 = vld [vmem:[%s1201_s0 + $0x18] sm:$0xff]  ;;  %v824_v26 = vpack.c.bf16 %v108_v14, %v107_v13  ;;  %v826_v28 = vpack.c.bf16 %v126_v22, %v125_v21 }
  0x61   :  { %817 = vmatpush3.bf16.msra.mxu0 %v816_v0  ;;  %v80_v19 = vld [vmem:[%s1201_s0 + $0x8] sm:$0xff]  ;;  %v157_v24 = vld [vmem:[#allocation4 + $0x1f0] sm:$0xff]  ;;  %v158_v25 = vld [vmem:[#allocation4 + $0x1f8] sm:$0xff]  ;;  %369 = vmatprep.mubr.f32.mxu1 %v82_v23  ;;  %v856_v27 = vpack.c.bf16 %v140_v18, %v139_v17 }
  0x62   :  { %819 = vmatprep.subr.bf16.mxu0 %v818_v2  ;;  %294 = vmatprep.mubr.f32.mxu0 %v80_v19  ;;  %v109_v29 = vld [vmem:[#allocation4 + $0x70] sm:$0xff]  ;;  %v110_v30 = vld [vmem:[#allocation4 + $0x78] sm:$0xff]  ;;  %v858_v32 = vpack.c.bf16 %v158_v25, %v157_v24  ;;  %v175_v34 = vld [vmem:[#allocation4 + $0x280] sm:$0xff] }
  0x63   :  { %849 = vmatpush3.bf16.msra.mxu1 %v848_v1  ;;  %v141_v31 = vld [vmem:[#allocation4 + $0x170] sm:$0xff]  ;;  %v142_v33 = vld [vmem:[#allocation4 + $0x178] sm:$0xff]  ;;  %v176_v35 = vld [vmem:[#allocation4 + $0x288] sm:$0xff]  ;;  %v828_v38 = vpack.c.bf16 %v110_v30, %v109_v29 }
  0x64   :  { %851 = vmatprep.subr.bf16.mxu1 %v850_v6  ;;  %v207_v36 = vld [vmem:[#allocation4 + $0x380] sm:$0xff]  ;;  %v208_v37 = vld [vmem:[#allocation4 + $0x388] sm:$0xff]  ;;  %v860_v39 = vpack.c.bf16 %v142_v33, %v141_v31  ;;  %v862_v40 = vpack.c.bf16 %v176_v35, %v175_v34  ;;  %v177_v46 = vld [vmem:[#allocation4 + $0x290] sm:$0xff] }
  0x65   :  { %821 = vmatpush3.bf16.msra.mxu0 %v820_v12  ;;  %v159_v41 = vld [vmem:[#allocation4 + $0x200] sm:$0xff]  ;;  %v160_v42 = vld [vmem:[#allocation4 + $0x208] sm:$0xff]  ;;  %v894_v44 = vpack.c.bf16 %v208_v37, %v207_v36  ;;  %v178_v47 = vld [vmem:[#allocation4 + $0x298] sm:$0xff] }
  0x66   :  { %823 = vmatprep.subr.bf16.mxu0 %v822_v16  ;;  %v191_v43 = vld [vmem:[#allocation4 + $0x300] sm:$0xff]  ;;  %v192_v45 = vld [vmem:[#allocation4 + $0x308] sm:$0xff]  ;;  %v209_v48 = vld [vmem:[#allocation4 + $0x390] sm:$0xff]  ;;  %v864_v51 = vpack.c.bf16 %v160_v42, %v159_v41  ;;  %v866_v54 = vpack.c.bf16 %v178_v47, %v177_v46 }
  0x67   :  { %853 = vmatpush3.bf16.msra.mxu1 %v852_v15  ;;  %v210_v49 = vld [vmem:[#allocation4 + $0x398] sm:$0xff]  ;;  %v81_v52 = vld [vmem:[%s1201_s0 + $0x10] sm:$0xff]  ;;  %v896_v53 = vpack.c.bf16 %v192_v45, %v191_v43  ;;  %v179_v60 = vld [vmem:[#allocation4 + $0x2a0] sm:$0xff] }
  0x68   :  { %855 = vmatprep.subr.bf16.mxu1 %v854_v20  ;;  %v79_v50 = vld [vmem:[%s1201_s0] sm:$0xff]  ;;  %v161_v55 = vld [vmem:[#allocation4 + $0x210] sm:$0xff]  ;;  %v898_v58 = vpack.c.bf16 %v210_v49, %v209_v48  ;;  %v180_v61 = vld [vmem:[#allocation4 + $0x2a8] sm:$0xff] }
  0x69   :  { %825 = vmatpush3.bf16.msra.mxu0 %v824_v26  ;;  %v162_v56 = vld [vmem:[#allocation4 + $0x218] sm:$0xff]  ;;  %v193_v57 = vld [vmem:[#allocation4 + $0x310] sm:$0xff]  ;;  %v211_v62 = vld [vmem:[#allocation4 + $0x3a0] sm:$0xff]  ;;  %v870_v2 = vpack.c.bf16 %v180_v61, %v179_v60 }
  0x6a   :  { %827 = vmatprep.subr.bf16.mxu0 %v826_v28  ;;  %v194_v59 = vld [vmem:[#allocation4 + $0x318] sm:$0xff]  ;;  %v212_v63 = vld [vmem:[#allocation4 + $0x3a8] sm:$0xff]  ;;  %v868_v0 = vpack.c.bf16 %v162_v56, %v161_v55  ;;  %v163_v3 = vld [vmem:[#allocation4 + $0x220] sm:$0xff] }
  0x6b   :  { %857 = vmatpush3.bf16.msra.mxu1 %v856_v27  ;;  %v900_v1 = vpack.c.bf16 %v194_v59, %v193_v57  ;;  %v164_v4 = vld [vmem:[#allocation4 + $0x228] sm:$0xff]  ;;  %v195_v5 = vld [vmem:[#allocation4 + $0x320] sm:$0xff]  ;;  %v902_v6 = vpack.c.bf16 %v212_v63, %v211_v62  ;;  %v181_v8 = vld [vmem:[#allocation4 + $0x2b0] sm:$0xff] }
  0x6c   :  { %859 = vmatprep.subr.bf16.mxu1 %v858_v32  ;;  %v196_v7 = vld [vmem:[#allocation4 + $0x328] sm:$0xff]  ;;  %v182_v9 = vld [vmem:[#allocation4 + $0x2b8] sm:$0xff]  ;;  %v213_v10 = vld [vmem:[#allocation4 + $0x3b0] sm:$0xff]  ;;  %v872_v12 = vpack.c.bf16 %v164_v4, %v163_v3 }
  0x6d   :  { %829 = vmatpush3.bf16.msra.mxu0 %v828_v38  ;;  %v214_v11 = vld [vmem:[#allocation4 + $0x3b8] sm:$0xff]  ;;  %v165_v13 = vld [vmem:[#allocation4 + $0x230] sm:$0xff]  ;;  %v88_v15 = vld [vmem:[%s1201_s0 + $0x48] sm:$0x3f]  ;;  %v904_v16 = vpack.c.bf16 %v196_v7, %v195_v5  ;;  %v874_v17 = vpack.c.bf16 %v182_v9, %v181_v8 }
  0x6e   :  { %863 = vmatprep.subr.bf16.mxu0 %v862_v40  ;;  %v166_v14 = vld [vmem:[#allocation4 + $0x238] sm:$0xff]  ;;  %v197_v18 = vld [vmem:[#allocation4 + $0x330] sm:$0xff]  ;;  %v906_v21 = vpack.c.bf16 %v214_v11, %v213_v10  ;;  %v183_v22 = vld [vmem:[#allocation4 + $0x2c0] sm:$0xff] }
  0x6f   :  { %861 = vmatpush3.bf16.msra.mxu1 %v860_v39  ;;  %v198_v19 = vld [vmem:[#allocation4 + $0x338] sm:$0xff]  ;;  %v184_v23 = vld [vmem:[#allocation4 + $0x2c8] sm:$0xff]  ;;  %v215_v25 = vld [vmem:[#allocation4 + $0x3c0] sm:$0xff]  ;;  %v876_v28 = vpack.c.bf16 %v166_v14, %v165_v13 }
  0x70   :  { %895 = vmatprep.subr.bf16.mxu1 %v894_v44  ;;  %295 = vmatmul.mubr.f32.vlgmr.msra.gmra.mrb[0].mxu0 %v79_v50  ;;  %v87_v20 = vld [vmem:[%s1201_s0 + $0x40] sm:$0x3f]  ;;  %v90_v24 = vld [vmem:[%s1201_s0 + $0x58] sm:$0x3f]  ;;  %v216_v26 = vld [vmem:[#allocation4 + $0x3c8] sm:$0xff]  ;;  %v908_v31 = vpack.c.bf16 %v198_v19, %v197_v18  ;;  %v878_v32 = vpack.c.bf16 %v184_v23, %v183_v22 }
  0x71   :  { %865 = vmatpush3.bf16.msra.mxu0 %v864_v51  ;;  %299 = vmatprep.mubr.f32.mxu0 %v88_v15  ;;  %v89_v27 = vld [vmem:[%s1201_s0 + $0x50] sm:$0x3f]  ;;  %v167_v29 = vld [vmem:[#allocation4 + $0x240] sm:$0xff]  ;;  %v910_v36 = vpack.c.bf16 %v216_v26, %v215_v25  ;;  %v186_v38 = vld [vmem:[#allocation4 + $0x2d8] sm:$0xff] }
  0x72   :  { %370 = vmatmul.mubr.f32.vlgmr.msra.gmra.mrb[0].mxu1 %v81_v52  ;;  %867 = vmatprep.subr.bf16.mxu0 %v866_v54  ;;  %v168_v30 = vld [vmem:[#allocation4 + $0x248] sm:$0xff]  ;;  %v199_v33 = vld [vmem:[#allocation4 + $0x340] sm:$0xff]  ;;  %v185_v37 = vld [vmem:[#allocation4 + $0x2d0] sm:$0xff] }
  0x73   :  { %897 = vmatpush3.bf16.msra.mxu1 %v896_v53  ;;  %374 = vmatprep.mubr.f32.mxu1 %v90_v24  ;;  %v200_v34 = vld [vmem:[#allocation4 + $0x348] sm:$0xff]  ;;  %v86_v39 = vld [vmem:[%s1201_s0 + $0x38] sm:$0xff]  ;;  %v880_v42 = vpack.c.bf16 %v168_v30, %v167_v29  ;;  %v882_v44 = vpack.c.bf16 %v186_v38, %v185_v37  ;;  %v187_v50 = vld [vmem:[#allocation4 + $0x2e0] sm:$0xff] }
  0x74   :  { %899 = vmatprep.subr.bf16.mxu1 %v898_v58  ;;  %300 = vmatmul.mubr.f32.gmra.mrb[2].mxu0 %v87_v20  ;;  %v84_v35 = vld [vmem:[%s1201_s0 + $0x28] sm:$0xff]  ;;  %v217_v40 = vld [vmem:[#allocation4 + $0x3d0] sm:$0xff]  ;;  %v218_v41 = vld [vmem:[#allocation4 + $0x3d8] sm:$0xff]  ;;  %v912_v43 = vpack.c.bf16 %v200_v34, %v199_v33 }
  0x75   :  { %869 = vmatpush3.bf16.msra.mxu0 %v868_v0  ;;  %444 = vmatprep.mubr.f32.mxu0 %v84_v35  ;;  %v169_v45 = vld [vmem:[#allocation4 + $0x250] sm:$0xff]  ;;  %v170_v46 = vld [vmem:[#allocation4 + $0x258] sm:$0xff]  ;;  %v914_v48 = vpack.c.bf16 %v218_v41, %v217_v40  ;;  %v188_v51 = vld [vmem:[#allocation4 + $0x2e8] sm:$0xff] }
  0x76   :  { %871 = vmatprep.subr.bf16.mxu0 %v870_v2  ;;  %375 = vmatmul.mubr.f32.gmra.mrb[2].mxu1 %v89_v27  ;;  %v201_v47 = vld [vmem:[#allocation4 + $0x350] sm:$0xff]  ;;  %v202_v49 = vld [vmem:[#allocation4 + $0x358] sm:$0xff]  ;;  %v219_v52 = vld [vmem:[#allocation4 + $0x3e0] sm:$0xff]  ;;  %v884_v54 = vpack.c.bf16 %v170_v46, %v169_v45  ;;  %v886_v56 = vpack.c.bf16 %v188_v51, %v187_v50 }
  0x77   :  { %901 = vmatpush3.bf16.msra.mxu1 %v900_v1  ;;  %519 = vmatprep.mubr.f32.mxu1 %v86_v39  ;;  %v220_v53 = vld [vmem:[#allocation4 + $0x3e8] sm:$0xff]  ;;  %v916_v55 = vpack.c.bf16 %v202_v49, %v201_v47  ;;  %v171_v57 = vld [vmem:[#allocation4 + $0x260] sm:$0xff]  ;;  %v189_v62 = vld [vmem:[#allocation4 + $0x2f0] sm:$0xff] }
  0x78   :  { %903 = vmatprep.subr.bf16.mxu1 %v902_v6  ;;  %v172_v58 = vld [vmem:[#allocation4 + $0x268] sm:$0xff]  ;;  %v203_v59 = vld [vmem:[#allocation4 + $0x360] sm:$0xff]  ;;  %v918_v60 = vpack.c.bf16 %v220_v53, %v219_v52  ;;  %v190_v63 = vld [vmem:[#allocation4 + $0x2f8] sm:$0xff]  ;;  %v1041_v53 = vmov 0  }
  0x79   :  { %873 = vmatpush3.bf16.msra.mxu0 %v872_v12  ;;  %v204_v61 = vld [vmem:[#allocation4 + $0x368] sm:$0xff]  ;;  %v221_v0 = vld [vmem:[#allocation4 + $0x3f0] sm:$0xff]  ;;  %v222_v1 = vld [vmem:[#allocation4 + $0x3f8] sm:$0xff]  ;;  %v888_v2 = vpack.c.bf16 %v172_v58, %v171_v57  ;;  %v890_v4 = vpack.c.bf16 %v190_v63, %v189_v62  ;;  %933 = vset.pattern.permute.xlu0 %v1041_v53 }
  0x7a   :  { %875 = vmatprep.subr.bf16.mxu0 %v874_v17  ;;  %v920_v3 = vpack.c.bf16 %v204_v61, %v203_v59  ;;  %v173_v5 = vld [vmem:[#allocation4 + $0x270] sm:$0xff]  ;;  %v174_v6 = vld [vmem:[#allocation4 + $0x278] sm:$0xff]  ;;  %v922_v7 = vpack.c.bf16 %v222_v1, %v221_v0  ;;  %v92_v14 = vld [vmem:[%s1201_s0 + $0x68] sm:$0x3f]  ;;  %934 = vset.pattern.permute.xlu1 %v1041_v53 }
  0x7b   :  { %905 = vmatpush3.bf16.msra.mxu1 %v904_v16  ;;  %v205_v8 = vld [vmem:[#allocation4 + $0x370] sm:$0xff]  ;;  %v206_v9 = vld [vmem:[#allocation4 + $0x378] sm:$0xff]  ;;  %v892_v10 = vpack.c.bf16 %v174_v6, %v173_v5  ;;  %v641_v19 = vld [vmem:[#allocation6] ss:$0 sm:$0xff] }
  0x7c   :  { %907 = vmatprep.subr.bf16.mxu1 %v906_v21  ;;  %v924_v11 = vpack.c.bf16 %v206_v9, %v205_v8  ;;  %v83_v12 = vld [vmem:[%s1201_s0 + $0x20] sm:$0xff]  ;;  %v85_v13 = vld [vmem:[%s1201_s0 + $0x30] sm:$0xff]  ;;  %v94_v15 = vld [vmem:[%s1201_s0 + $0x78] sm:$0x3f] }
  0x7d   :  { %877 = vmatpush3.bf16.msra.mxu0 %v876_v28  ;;  %v91_v16 = vld [vmem:[%s1201_s0 + $0x60] sm:$0x3f]  ;;  %v93_v17 = vld [vmem:[%s1201_s0 + $0x70] sm:$0x3f] }
  0x7e   :  { %879 = vmatprep.subr.bf16.mxu0 %v878_v32  ;;  %v642_v52 = vld [vmem:[#allocation2] ss:$0 sm:$0xff]  ;;  %v643_v8 = vld [vmem:[#allocation3] ss:$0 sm:$0xff] }
  0x7f   :  { %909 = vmatpush3.bf16.msra.mxu1 %v908_v31 }
  0x80   :  { %911 = vmatprep.subr.bf16.mxu1 %v910_v36 }
  0x81   :  { %881 = vmatpush3.bf16.msra.mxu0 %v880_v42 }
  0x82   :  { %883 = vmatprep.subr.bf16.mxu0 %v882_v44 }
  0x83   :  { %913 = vmatpush3.bf16.msra.mxu1 %v912_v43 }
  0x84   :  { %915 = vmatprep.subr.bf16.mxu1 %v914_v48 }
  0x85   :  { %885 = vmatpush3.bf16.msra.mxu0 %v884_v54 }
  0x86   :  { %887 = vmatprep.subr.bf16.mxu0 %v886_v56 }
  0x87   :  { %917 = vmatpush3.bf16.msra.mxu1 %v916_v55 }
  0x88   :  { %919 = vmatprep.subr.bf16.mxu1 %v918_v60 }
  0x89   :  { %889 = vmatpush3.bf16.msra.mxu0 %v888_v2 }
  0x8a   :  { %891 = vmatprep.subr.bf16.mxu0 %v890_v4 }
  0x8b   :  { %921 = vmatpush3.bf16.msra.mxu1 %v920_v3 }
  0x8c   :  { %923 = vmatprep.subr.bf16.mxu1 %v922_v7 }
  0x8d   :  { %893 = vmatpush3.bf16.msra.mxu0 %v892_v10 }
  0x8f   :  { %925 = vmatpush3.bf16.msra.mxu1 %v924_v11 }
  0x90   :  { %445 = vmatmul.mubr.f32.vlgmr.msra.gmra.mrb[4].mxu0 %v83_v12 }
  0x91   :  { %449 = vmatprep.mubr.f32.mxu0 %v92_v14 }
  0x92   :  { %520 = vmatmul.mubr.f32.vlgmr.msra.gmra.mrb[4].mxu1 %v85_v13 }
  0x93   :  { %524 = vmatprep.mubr.f32.mxu1 %v94_v15 }
  0x94   :  { %450 = vmatmul.mubr.f32.gmra.mrb[6].mxu0 %v91_v16 }
  0x96   :  { %525 = vmatmul.mubr.f32.gmra.mrb[6].mxu1 %v93_v17 }
 0x143   :  { %v678_v18 = vpop.f32.mrb[0].mxu0 }
 0x144   :  { %v679_v20 = vpop.f32.mrb[1].mxu0 }
 0x145   :  { %v716_v21 = vpop.f32.mrb[0].mxu1  ;;  %v680_v22 = vadd.f32 %v679_v20, %v678_v18 }
 0x146   :  { %v717_v23 = vpop.f32.mrb[1].mxu1 }
 0x147   :  { %v718_v24 = vadd.f32 %v717_v23, %v716_v21  ;;  %v297_v25 = vadd.f32 %v680_v22, %v641_v19  ;;  %v681_v27 = vpop.f32.mrb[2].mxu0 }
 0x148   :  { %v682_v28 = vpop.f32.mrb[3].mxu0 }
 0x149   :  { %v372_v26 = vadd.f32 %v718_v24, %v297_v25  ;;  %v719_v29 = vpop.f32.mrb[2].mxu1  ;;  %v683_v30 = vadd.f32 %v682_v28, %v681_v27 }
 0x14a   :  { %v720_v31 = vpop.f32.mrb[3].mxu1 }
 0x14b   :  { %v721_v32 = vadd.f32 %v720_v31, %v719_v29  ;;  %v302_v33 = vadd.f32 %v683_v30, %v641_v19 }
 0x14d   :  { %v377_v34 = vadd.f32 %v721_v32, %v302_v33 }
 0x163   :  { %v754_v35 = vpop.f32.mrb[4].mxu0 }
 0x164   :  { %v755_v36 = vpop.f32.mrb[5].mxu0 }
 0x165   :  { %v792_v37 = vpop.f32.mrb[4].mxu1  ;;  %v756_v38 = vadd.f32 %v755_v36, %v754_v35  ;;  %v611_v36 = vld [vmem:[#allocation8] sm:$0x7f] }
 0x166   :  { %v793_v39 = vpop.f32.mrb[5].mxu1 }
 0x167   :  { %v794_v40 = vadd.f32 %v793_v39, %v792_v37  ;;  %v447_v41 = vadd.f32 %v756_v38, %v372_v26  ;;  %v757_v42 = vpop.f32.mrb[6].mxu0 }
 0x168   :  { %v758_v43 = vpop.f32.mrb[7].mxu0 }
 0x169   :  { %v795_v44 = vpop.f32.mrb[6].mxu1  ;;  %v759_v45 = vadd.f32 %v758_v43, %v757_v42  ;;  %v522_v47 = vadd.f32 %v794_v40, %v447_v41  ;;  %v615_v40 = vrot.slane %v611_v36, 1 }
 0x16a   :  { %v796_v46 = vpop.f32.mrb[7].mxu1 }
 0x16b   :  { %v797_v48 = vadd.f32 %v796_v46, %v795_v44  ;;  %v452_v49 = vadd.f32 %v759_v45, %v377_v34 }
 0x16d   :  { %v527_v50 = vadd.f32 %v797_v48, %v452_v49  ;;  %v612_v48 = vld [vmem:[#allocation9] sm:$0x1] }
 0x16f   :  { %v533_v51 = vsel %vm532_vm0, %v527_v50, 0.0 }
 0x170   :  { %534 = vadd.xlane.f32.xlu0 %v533_v51 }
 0x174   :  { %530 = vadd.xlane.f32.xlu0 %v522_v47 }
 0x18a   :  { %580 = vperm.xlu0 %933, %v642_v52  }
 0x1fd   :  { %v535_v54 = vpop.xlane.xlu0 %534 }
 0x1fe   :  { %v538_v55 = vmul.f32 0.0078125, %v535_v54 }
 0x200   :  { %v539_v58 = vsel %vm532_vm0, %v538_v55, 0.0 }
 0x201   :  { %v531_v56 = vpop.xlane.xlu0 %530 }
 0x202   :  { %v537_v57 = vmul.f32 0.0078125, %v531_v56 }
 0x204   :  { %v540_v59 = vadd.f32 %v539_v58, %v537_v57 }
 0x206   :  { %v541_v60 = vrot.slane %v540_v59, 4 }
 0x208   :  { %v542_v61 = vadd.f32 %v541_v60, %v540_v59 }
 0x209   :  { %v581_v24 = vpop.permute.xlu0 %580 }
 0x20a   :  { %v543_v62 = vrot.slane %v542_v61, 2 }
 0x20c   :  { %v544_v63 = vadd.f32 %v543_v62, %v542_v61 }
 0x20e   :  { %v545_v0 = vrot.slane %v544_v63, 1 }
 0x210   :  { %v546_v1 = vadd.f32 %v545_v0, %v544_v63 }
 0x212   :  { %v548_v2 = vmul.f32 0.071428575, %v546_v1 }
 0x214   :  { %v550_v3 = vsub.f32 %v527_v50, %v548_v2  ;;  %v549_v5 = vsub.f32 %v522_v47, %v548_v2 }
 0x216   :  { %v552_v4 = vmul.f32 %v550_v3, %v550_v3  ;;  %v551_v7 = vmul.f32 %v549_v5, %v549_v5 }
 0x218   :  { %v555_v6 = vsel %vm532_vm0, %v552_v4, 0.0 }
 0x219   :  { %556 = vadd.xlane.f32.xlu1 %v555_v6 }
 0x21d   :  { %553 = vadd.xlane.f32.xlu1 %v551_v7 }
 0x22e   :  { %592 = vperm.xlu1 %934, %v643_v8  }
 0x2a6   :  { %v557_v9 = vpop.xlane.xlu1 %556 }
 0x2a7   :  { %v559_v10 = vmul.f32 0.0078125, %v557_v9 }
 0x2a9   :  { %v560_v13 = vsel %vm532_vm0, %v559_v10, 0.0 }
 0x2aa   :  { %v554_v11 = vpop.xlane.xlu1 %553 }
 0x2ab   :  { %v558_v12 = vmul.f32 0.0078125, %v554_v11 }
 0x2ad   :  { %v561_v14 = vadd.f32 %v560_v13, %v558_v12 }
 0x2ae   :  { %v593_v27 = vpop.permute.xlu1 %592 }
 0x2af   :  { %v562_v15 = vrot.slane %v561_v14, 4 }
 0x2b1   :  { %v563_v16 = vadd.f32 %v562_v15, %v561_v14 }
 0x2b3   :  { %v564_v17 = vrot.slane %v563_v16, 2 }
 0x2b5   :  { %v565_v18 = vadd.f32 %v564_v17, %v563_v16 }
 0x2b7   :  { %v566_v19 = vrot.slane %v565_v18, 1 }
 0x2b9   :  { %v567_v20 = vadd.f32 %v566_v19, %v565_v18 }
 0x2bb   :  { %v568_v21 = vmul.f32 0.071428575, %v567_v20 }
 0x2bd   :  { %v569_v22 = vadd.f32 1e-05, %v568_v21 }
 0x2bf   :  { %935 = vrsqrt.f32 %v569_v22 }
 0x2c9   :  { %v936_v23 = vpop.eup %935 }
 0x2ca   :  { %v571_v25 = vmul.f32 %v936_v23, %v549_v5  ;;  %v572_v26 = vmul.f32 %v936_v23, %v550_v3 }
 0x2cc   :  { %v583_v28 = vmul.f32 %v581_v24, %v571_v25  ;;  %v584_v29 = vmul.f32 %v581_v24, %v572_v26 }
 0x2ce   :  { %v595_v30 = vadd.f32 %v593_v27, %v583_v28  ;;  %v596_v31 = vadd.f32 %v593_v27, %v584_v29 }
 0x2d0   :  { %v599_v32 = vmul.f32 1.442695, %v595_v30  ;;  %v601_v33 = vmul.f32 1.442695, %v596_v31  ;;  %vm597_vm1 = vcmp.gt.f32.partialorder %v595_v30, 0.0  ;;  %vm598_vm2 = vcmp.gt.f32.partialorder %v596_v31, 0.0 }
 0x2d2   :  { %937 = vpow2.f32 %v599_v32 }
 0x2d3   :  { %939 = vpow2.f32 %v601_v33 }
 0x2dc   :  { %v938_v34 = vpop.eup %937 }
 0x2dd   :  { %v940_v35 = vpop.eup %939  ;;  %v644_v37 = vadd.f32 -1.0, %v938_v34 }
 0x2de   :  { %v645_v38 = vadd.f32 -1.0, %v940_v35 }
 0x2df   :  { %v605_v39 = vmul.f32 1.6732632, %v644_v37 }
 0x2e0   :  { %v606_v41 = vmul.f32 1.6732632, %v645_v38 }
 0x2e1   :  { %v607_v42 = vsel %vm597_vm1, %v595_v30, %v605_v39 }
 0x2e2   :  { %v608_v43 = vsel %vm598_vm2, %v596_v31, %v606_v41  ;;  %v609_v44 = vmul.f32 1.050701, %v607_v42 }
 0x2e3   :  { %v610_v45 = vmul.f32 1.050701, %v608_v43 }
 0x2e4   :  { %v613_v46 = vadd.f32 %v611_v36, %v609_v44  ;;  %v617_v47 = vadd.f32 %v615_v40, %v609_v44 }
 0x2e5   :  { %v618_v49 = vadd.f32 %v615_v40, %v610_v45 }
 0x2e6   :  { %v620_v50 = vrot.slane %v613_v46, 7  ;;  %v625_v51 = vrot.slane %v617_v47, 6 }
 0x2e7   :  { %v626_v52 = vrot.slane %v618_v49, 6 }
 0x2e8   :  { %v630_v53 = vsel %vm629_vm3, %v612_v48, %v620_v50 }
 0x2e9   :  { %v627_v54 = vsel %vm624_vm4, %v625_v51, %v626_v52  ;;  %632 = vst [vmem:[%s1207_s7] sm:$0xff] %v630_v53 }
 0x2ea   :  { %v631_v55 = vsel %vm629_vm3, %v612_v48, %v627_v54 }
 0x2eb   :  { %633 = vst [vmem:[%s1207_s7 + $0x8] sm:$0xff] %v631_v55 }
 0x2ec   :  { %638 = vsyncpa [#allocation5], 1 }
 0x2ed   :  { %639 = vsyncpa [#allocation7], 1 }
 0x2ee   :  { %640 = vsyncpa [#allocation10], 1 }

// kernel: tcm_add_forward.4
= control target key start
LH: loop header
LB: loop body
LE: loop exit
PB: predicated region body
PF: predicated region fallthrough
CT: control target
= control target key end

     0   :  { %s11414_s6 = smov 1   ;;  %s11415_s10 = smov 2   ;;  %s13701_s0 = inlined_call_operand.smem [shape: u32[38], index: -1, kind: input, shape index: {}] }
   0x1   :  { %s11499_s5 = sld [smem:[%s13701_s0]]   ;;  %s11416_s14 = smov 3  }
   0x2   :  { %s11504_s9 = sld [smem:[%s13701_s0 + %s11414_s6]]   ;;  %s11417_s18 = smov 4  }
   0x3   :  { %s11509_s13 = sld [smem:[%s13701_s0 + %s11415_s10]]   ;;  %s11418_s22 = smov 5  }
   0x4   :  { %s11514_s17 = sld [smem:[%s13701_s0 + %s11416_s14]]   ;;  %s11419_s26 = smov 6  }
   0x5   :  { %s11519_s21 = sld [smem:[%s13701_s0 + %s11417_s18]]   ;;  %s11420_s30 = smov 7  }
   0x6   :  { %s11524_s25 = sld [smem:[%s13701_s0 + %s11418_s22]]   ;;  %s11421_s4 = smov 8  }
   0x7   :  { %13804 = sst [smem:[#allocation57_spill]] %s11499_s5  ;;  %s11422_s10 = smov 9  }
   0x8   :  { %s11529_s29 = sld [smem:[%s13701_s0 + %s11419_s26]]   ;;  %s11423_s15 = smov 10  }
   0x9   :  { %s11534_s3 = sld [smem:[%s13701_s0 + %s11420_s30]]   ;;  %s11424_s20 = smov 11  }
   0xa   :  { %13805 = sst [smem:[#allocation58_spill]] %s11514_s17  ;;  %s11425_s26 = smov 12  }
   0xb   :  { %13806 = sst [smem:[#allocation59_spill]] %s11519_s21  ;;  %s11426_s1 = smov 13  }
   0xc   :  { %13807 = sst [smem:[#allocation60_spill]] %s11524_s25  ;;  %s11427_s7 = smov 14  }
   0xd   :  { %s11539_s8 = sld [smem:[%s13701_s0 + %s11421_s4]]   ;;  %s11429_s22 = smov 16  }
   0xe   :  { %s11544_s14 = sld [smem:[%s13701_s0 + %s11422_s10]]   ;;  %s11430_s28 = smov 17  }
   0xf   :  { %s11549_s19 = sld [smem:[%s13701_s0 + %s11423_s15]]   ;;  %s11428_s15 = smov 15  }
  0x10   :  { %s11554_s24 = sld [smem:[%s13701_s0 + %s11424_s20]]  }
  0x11   :  { %s11559_s30 = sld [smem:[%s13701_s0 + %s11425_s26]]  }
  0x12   :  { %s11564_s6 = sld [smem:[%s13701_s0 + %s11426_s1]]  }
  0x13   :  { %13808 = sst [smem:[#allocation61_spill]] %s11539_s8 }
  0x14   :  { %13809 = sst [smem:[#allocation62_spill]] %s11544_s14 }
  0x15   :  { %s11569_s12 = sld [smem:[%s13701_s0 + %s11427_s7]]   ;;  %s11431_s7 = smov 18  }
  0x16   :  { %13810 = sst [smem:[#allocation63_spill]] %s11554_s24 }
  0x17   :  { %s11574_s20 = sld [smem:[%s13701_s0 + %s11428_s15]]   ;;  %s11432_s15 = smov 19  }
  0x18   :  { %13811 = sst [smem:[#allocation64_spill]] %s11564_s6 }
  0x19   :  { %s11579_s27 = sld [smem:[%s13701_s0 + %s11429_s22]]   ;;  %s11433_s22 = smov 20  }
  0x1a   :  { %s11584_s4 = sld [smem:[%s13701_s0 + %s11430_s28]]   ;;  %s11434_s28 = smov 21  }
  0x1b   :  { %13812 = sst [smem:[#allocation65_spill]] %s11569_s12 }
  0x1c   :  { %s11589_s6 = sld [smem:[%s13701_s0 + %s11431_s7]]   ;;  %s11435_s7 = smov 22  }
  0x1d   :  { %s11594_s14 = sld [smem:[%s13701_s0 + %s11432_s15]]   ;;  %s11436_s15 = smov 23  }
  0x1e   :  { %s11599_s21 = sld [smem:[%s13701_s0 + %s11433_s22]]   ;;  %s11437_s22 = smov 24  }
  0x1f   :  { %13813 = sst [smem:[#allocation66_spill]] %s11579_s27 }
  0x20   :  { %s11604_s25 = sld [smem:[%s13701_s0 + %s11434_s28]]   ;;  %s11438_s28 = smov 25  }
  0x21   :  { %s11609_s17 = sld [smem:[%s13701_s0 + %s11435_s7]]   ;;  %s11439_s7 = smov 26  }
  0x22   :  { %13814 = sst [smem:[#allocation67_spill]] %s11589_s6 }
  0x23   :  { %s11614_s5 = sld [smem:[%s13701_s0 + %s11436_s15]]   ;;  %s11440_s15 = smov 27  }
  0x24   :  { %13815 = sst [smem:[#allocation68_spill]] %s11599_s21 }
  0x25   :  { %s11619_s21 = sld [smem:[%s13701_s0 + %s11437_s22]]   ;;  %s11441_s22 = smov 28  }
  0x26   :  { %13816 = sst [smem:[#allocation69_spill]] %s11604_s25 }
  0x27   :  { %13817 = sst [smem:[#allocation70_spill]] %s11609_s17 }
  0x28   :  { %s11624_s25 = sld [smem:[%s13701_s0 + %s11438_s28]]   ;;  %s11442_s28 = smov 29  }
  0x29   :  { %13818 = sst [smem:[#allocation71_spill]] %s11614_s5 }
  0x2a   :  { %s11629_s17 = sld [smem:[%s13701_s0 + %s11439_s7]]   ;;  %s11443_s7 = smov 30  }
  0x2b   :  { %s11634_s5 = sld [smem:[%s13701_s0 + %s11440_s15]]   ;;  %s11444_s15 = smov 31  }
  0x2c   :  { %s11639_s6 = sld [smem:[%s13701_s0 + %s11441_s22]]   ;;  %s11445_s22 = smov 32  }
  0x2d   :  { %s11649_s27 = sld [smem:[%s13701_s0 + %s11443_s7]]   ;;  %s11447_s7 = smov 34  }
  0x2e   :  { %13819 = sst [smem:[#allocation72_spill]] %s11624_s25 }
  0x2f   :  { %s11644_s25 = sld [smem:[%s13701_s0 + %s11442_s28]]   ;;  %s11446_s28 = smov 33  }
  0x30   :  { %s11659_s12 = sld [smem:[%s13701_s0 + %s11445_s22]]   ;;  %s11449_s22 = smov 36  }
  0x31   :  { %13820 = sst [smem:[#allocation73_spill]] %s11634_s5 }
  0x32   :  { %s11654_s5 = sld [smem:[%s13701_s0 + %s11444_s15]]   ;;  %s11448_s15 = smov 35  }
  0x33   :  { %s11669_s24 = sld [smem:[%s13701_s0 + %s11447_s7]]  }
  0x34   :  { %s11679_s8 = sld [smem:[%s13701_s0 + %s11449_s22]]  }
  0x35   :  { %13821 = sst [smem:[#allocation74_spill]] %s11644_s25 }
  0x36   :  { %s11664_s25 = sld [smem:[%s13701_s0 + %s11446_s28]]   ;;  %s11450_s28 = smov 37  }
  0x38   :  { %13822 = sst [smem:[#allocation75_spill]] %s11654_s5 }
  0x39   :  { %s11674_s5 = sld [smem:[%s13701_s0 + %s11448_s15]]  }
  0x3c   :  { %13823 = sst [smem:[#allocation76_spill]] %s11664_s25 }
  0x3d   :  { %s11684_s25 = sld [smem:[%s13701_s0 + %s11450_s28]]  }
  0x3e   :  { %81 = vsyncpa [#allocation3], 0 }
  0x3f   :  { %82 = vsyncpa [#allocation5], 0 }
  0x40   :  { %83 = vsyncpa [#allocation8], 0 }
  0x41   :  { %84 = vsyncpa [#allocation11], 0 }
  0x42   :  { %85 = vsyncpa [#allocation14], 0 }
  0x43   :  { %86 = vsyncpa [#allocation17], 0 }
  0x44   :  { %87 = vsyncpa [#allocation20], 0 }
  0x45   :  { %88 = vsyncpa [#allocation23], 0 }
  0x46   :  { %89 = vsyncpa [#allocation26], 0 }
  0x47   :  { %90 = vsyncpa [#allocation29], 0 }
  0x48   :  { %91 = vsyncpa [#allocation32], 0 }
  0x49   :  { %92 = vsyncpa [#allocation35], 0 }
  0x4a   :  { %93 = vsyncpa [#allocation38], 0 }
  0x4b   :  { %94 = vsyncpa [#allocation41], 0  ;;  %s11451_s7 = smov [#allocation4]   ;;  %s11452_s10 = smov [#allocation7]  }
  0x4c   :  { %s113_s0 = sshll.u32 %s11451_s7, 4  ;;  %s139_s11 = sshll.u32 %s11452_s10, 4  ;;  %s114_s0 = int_to_ptr.vmem [resolvable:$true] %s113_s0  ;;  %s140_s11 = int_to_ptr.vmem [resolvable:$true] %s139_s11 }
  0x4d   :  { %s10792_s15 = scalar_lea.hbm %s11509_s13, 16 }
  0x4e   :  { %p10793_p0 = scmp.ne.s32.totalorder %s11509_s13, %s10792_s15  ;;  %p10796_p1 = scmp.lt.u32.totalorder %s10792_s15, %s11509_s13 }
  0x50   :  { %p10798_p2 = pnand %p10796_p1, %p10793_p0 }
  0x52   :  { %10801 = shalt.err (!%p10798_p2)
}
  0x53   :  { %s10802_s16 = scalar_lea.vmem %s114_s0, 16  ;;  %s10806_s18 = scalar_lea.vmem %s114_s0, 32 }
  0x54   :  { %p10803_p3 = scmp.ne.s32.totalorder %s114_s0, %s10802_s16  ;;  %p10807_p4 = scmp.lt.s32.totalorder %s114_s0, %s114_s0 }
  0x55   :  { %p10808_p5 = scmp.lt.s32.totalorder %s10806_s18, %s10802_s16 }
  0x57   :  { %p10809_p6 = por %p10808_p5, %p10807_p4 }
  0x59   :  { %p10810_p7 = pnand %p10809_p6, %p10803_p3 }
  0x5b   :  { %10813 = shalt.err (!%p10810_p7)
}
  0x5c   :  { %116 = dma.hbm_to_vmem [thread:$0]  %s11509_s13, 16, %s114_s0, [#allocation5]  }
  0x5d   :  { %s10814_s22 = scalar_lea.hbm %s11534_s3, 16 }
  0x5e   :  { %p10815_p8 = scmp.ne.s32.totalorder %s11534_s3, %s10814_s22  ;;  %p10818_p9 = scmp.lt.u32.totalorder %s10814_s22, %s11534_s3 }
  0x60   :  { %p10820_p10 = pnand %p10818_p9, %p10815_p8 }
  0x62   :  { %10823 = shalt.err (!%p10820_p10)
}
  0x63   :  { %s10824_s23 = scalar_lea.vmem %s140_s11, 16  ;;  %s10828_s26 = scalar_lea.vmem %s140_s11, 32 }
  0x64   :  { %p10825_p11 = scmp.ne.s32.totalorder %s140_s11, %s10824_s23  ;;  %p10829_p12 = scmp.lt.s32.totalorder %s140_s11, %s140_s11 }
  0x65   :  { %p10830_p13 = scmp.lt.s32.totalorder %s10828_s26, %s10824_s23 }
  0x67   :  { %p10831_p0 = por %p10830_p13, %p10829_p12 }
  0x69   :  { %p10832_p1 = pnand %p10831_p0, %p10825_p11 }
  0x6b   :  { %10835 = shalt.err (!%p10832_p1)
}
  0x6c   :  { %142 = dma.hbm_to_vmem [thread:$0]  %s11534_s3, 16, %s140_s11, [#allocation8]  }
  0x6d   :  { %s11453_s28 = smov [#allocation10]   ;;  %s11454_s1 = smov [#allocation13]  }
  0x6e   :  { %s161_s13 = sshll.u32 %s11453_s28, 4  ;;  %s181_s2 = sshll.u32 %s11454_s1, 4  ;;  %s162_s13 = int_to_ptr.vmem [resolvable:$true] %s161_s13  ;;  %s182_s2 = int_to_ptr.vmem [resolvable:$true] %s181_s2 }
  0x6f   :  { %s10836_s7 = scalar_lea.hbm %s11549_s19, 16 }
  0x70   :  { %p10837_p2 = scmp.ne.s32.totalorder %s11549_s19, %s10836_s7  ;;  %p10840_p3 = scmp.lt.u32.totalorder %s10836_s7, %s11549_s19 }
  0x72   :  { %p10842_p4 = pnand %p10840_p3, %p10837_p2 }
  0x74   :  { %10845 = shalt.err (!%p10842_p4)
}
  0x75   :  { %s10846_s0 = scalar_lea.vmem %s162_s13, 16  ;;  %s10850_s10 = scalar_lea.vmem %s162_s13, 32 }
  0x76   :  { %p10847_p5 = scmp.ne.s32.totalorder %s162_s13, %s10846_s0  ;;  %p10851_p6 = scmp.lt.s32.totalorder %s162_s13, %s162_s13 }
  0x77   :  { %p10852_p7 = scmp.lt.s32.totalorder %s10850_s10, %s10846_s0 }
  0x79   :  { %p10853_p8 = por %p10852_p7, %p10851_p6 }
  0x7b   :  { %p10854_p9 = pnand %p10853_p8, %p10847_p5 }
  0x7d   :  { %10857 = shalt.err (!%p10854_p9)
}
  0x7e   :  { %164 = dma.hbm_to_vmem [thread:$0]  %s11549_s19, 16, %s162_s13, [#allocation11]  }
  0x7f   :  { %s10858_s3 = scalar_lea.hbm %s11559_s30, 16 }
  0x80   :  { %p10859_p10 = scmp.ne.s32.totalorder %s11559_s30, %s10858_s3  ;;  %p10862_p11 = scmp.lt.u32.totalorder %s10858_s3, %s11559_s30 }
  0x82   :  { %p10864_p12 = pnand %p10862_p11, %p10859_p10 }
  0x84   :  { %10867 = shalt.err (!%p10864_p12)
}
  0x85   :  { %s10868_s11 = scalar_lea.vmem %s182_s2, 16  ;;  %s10872_s15 = scalar_lea.vmem %s182_s2, 32 }
  0x86   :  { %p10869_p13 = scmp.ne.s32.totalorder %s182_s2, %s10868_s11  ;;  %p10873_p0 = scmp.lt.s32.totalorder %s182_s2, %s182_s2 }
  0x87   :  { %p10874_p1 = scmp.lt.s32.totalorder %s10872_s15, %s10868_s11 }
  0x89   :  { %p10875_p2 = por %p10874_p1, %p10873_p0 }
  0x8b   :  { %p10876_p3 = pnand %p10875_p2, %p10869_p13 }
  0x8d   :  { %10879 = shalt.err (!%p10876_p3)
}
  0x8e   :  { %184 = dma.hbm_to_vmem [thread:$0]  %s11559_s30, 16, %s182_s2, [#allocation14]  }
  0x8f   :  { %s11455_s16 = smov [#allocation16]   ;;  %s10880_s18 = scalar_lea.hbm %s11574_s20, 6144 }
  0x90   :  { %s202_s19 = sshll.u32 %s11455_s16, 4  ;;  %p10881_p4 = scmp.ne.s32.totalorder %s11574_s20, %s10880_s18  ;;  %s203_s19 = int_to_ptr.vmem [resolvable:$true] %s202_s19 }
  0x91   :  { %p10884_p5 = scmp.lt.u32.totalorder %s10880_s18, %s11574_s20 }
  0x93   :  { %p10886_p6 = pnand %p10884_p5, %p10881_p4 }
  0x95   :  { %10889 = shalt.err (!%p10886_p6)
}
  0x96   :  { %s10890_s22 = scalar_lea.vmem %s203_s19, 6144  ;;  %p10895_p8 = scmp.lt.s32.totalorder %s203_s19, %s203_s19 }
  0x97   :  { %p10891_p7 = scmp.ne.s32.totalorder %s203_s19, %s10890_s22  ;;  %p10896_p9 = scmp.lt.s32.totalorder %s10890_s22, %s10890_s22 }
  0x99   :  { %p10897_p10 = por %p10896_p9, %p10895_p8 }
  0x9b   :  { %p10898_p11 = pnand %p10897_p10, %p10891_p7 }
  0x9d   :  { %10901 = shalt.err (!%p10898_p11)
}
  0x9e   :  { %s11456_s23 = smov 384   ;;  %s11457_s30 = smov 24  }
  0x9f   :  { %208 = dma.hbm_to_vmem [thread:$0]  %s11574_s20, 6144, %s203_s19, [#allocation17], %s11456_s23, %s11456_s23, %s11457_s30  }
  0xa0   :  { %s11458_s26 = smov [#allocation19]   ;;  %s11459_s13 = smov [#allocation22]  }
  0xa1   :  { %s227_s28 = sshll.u32 %s11458_s26, 4  ;;  %s247_s1 = sshll.u32 %s11459_s13, 4  ;;  %s228_s28 = int_to_ptr.vmem [resolvable:$true] %s227_s28  ;;  %s248_s1 = int_to_ptr.vmem [resolvable:$true] %s247_s1 }
  0xa2   :  { %s10902_s2 = scalar_lea.hbm %s11584_s4, 16 }
  0xa3   :  { %p10903_p12 = scmp.ne.s32.totalorder %s11584_s4, %s10902_s2  ;;  %p10906_p13 = scmp.lt.u32.totalorder %s10902_s2, %s11584_s4 }
  0xa5   :  { %p10908_p0 = pnand %p10906_p13, %p10903_p12 }
  0xa7   :  { %10911 = shalt.err (!%p10908_p0)
}
  0xa8   :  { %s10912_s7 = scalar_lea.vmem %s228_s28, 16  ;;  %s10916_s0 = scalar_lea.vmem %s228_s28, 32 }
  0xa9   :  { %p10913_p1 = scmp.ne.s32.totalorder %s228_s28, %s10912_s7  ;;  %p10917_p2 = scmp.lt.s32.totalorder %s228_s28, %s228_s28 }
  0xaa   :  { %p10918_p3 = scmp.lt.s32.totalorder %s10916_s0, %s10912_s7 }
  0xac   :  { %p10919_p4 = por %p10918_p3, %p10917_p2 }
  0xae   :  { %p10920_p5 = pnand %p10919_p4, %p10913_p1 }
  0xb0   :  { %10923 = shalt.err (!%p10920_p5)
}
  0xb1   :  { %230 = dma.hbm_to_vmem [thread:$0]  %s11584_s4, 16, %s228_s28, [#allocation20]  }
  0xb2   :  { %s10924_s20 = scalar_lea.hbm %s11594_s14, 16 }
  0xb3   :  { %p10925_p6 = scmp.ne.s32.totalorder %s11594_s14, %s10924_s20  ;;  %p10928_p7 = scmp.lt.u32.totalorder %s10924_s20, %s11594_s14 }
  0xb5   :  { %p10930_p8 = pnand %p10928_p7, %p10925_p6 }
  0xb7   :  { %10933 = shalt.err (!%p10930_p8)
}
  0xb8   :  { %s10934_s10 = scalar_lea.vmem %s248_s1, 16  ;;  %s10938_s3 = scalar_lea.vmem %s248_s1, 32 }
  0xb9   :  { %p10935_p9 = scmp.ne.s32.totalorder %s248_s1, %s10934_s10  ;;  %p10939_p10 = scmp.lt.s32.totalorder %s248_s1, %s248_s1 }
  0xba   :  { %p10940_p11 = scmp.lt.s32.totalorder %s10938_s3, %s10934_s10 }
  0xbc   :  { %p10941_p12 = por %p10940_p11, %p10939_p10 }
  0xbe   :  { %p10942_p13 = pnand %p10941_p12, %p10935_p9 }
  0xc0   :  { %10945 = shalt.err (!%p10942_p13)
}
  0xc1   :  { %250 = dma.hbm_to_vmem [thread:$0]  %s11594_s14, 16, %s248_s1, [#allocation23]  }
  0xc2   :  { %s11460_s4 = smov [#allocation25]   ;;  %s10946_s15 = scalar_lea.hbm %s11619_s21, 32 }
  0xc3   :  { %s273_s11 = sshll.u32 %s11460_s4, 4  ;;  %p10947_p0 = scmp.ne.s32.totalorder %s11619_s21, %s10946_s15  ;;  %s274_s11 = int_to_ptr.vmem [resolvable:$true] %s273_s11 }
  0xc4   :  { %p10950_p1 = scmp.lt.u32.totalorder %s10946_s15, %s11619_s21 }
  0xc6   :  { %p10952_p2 = pnand %p10950_p1, %p10947_p0 }
  0xc8   :  { %10955 = shalt.err (!%p10952_p2)
}
  0xc9   :  { %s10956_s16 = scalar_lea.vmem %s274_s11, 32  ;;  %p10961_p4 = scmp.lt.s32.totalorder %s274_s11, %s274_s11 }
  0xca   :  { %p10957_p3 = scmp.ne.s32.totalorder %s274_s11, %s10956_s16  ;;  %p10962_p5 = scmp.lt.s32.totalorder %s10956_s16, %s10956_s16 }
  0xcc   :  { %p10963_p6 = por %p10962_p5, %p10961_p4 }
  0xce   :  { %p10964_p7 = pnand %p10963_p6, %p10957_p3 }
  0xd0   :  { %10967 = shalt.err (!%p10964_p7)
}
  0xd1   :  { %276 = dma.hbm_to_vmem [thread:$0]  %s11619_s21, 32, %s274_s11, [#allocation26]  }
  0xd2   :  { %s11461_s14 = smov [#allocation28]   ;;  %s11462_s18 = smov [#allocation31]  }
  0xd3   :  { %s292_s19 = sshll.u32 %s11461_s14, 4  ;;  %s315_s22 = sshll.u32 %s11462_s18, 4  ;;  %s293_s19 = int_to_ptr.vmem [resolvable:$true] %s292_s19  ;;  %s11718_s22 = int_to_ptr.vmem [resolvable:$true] %s315_s22 }
  0xd4   :  { %s10968_s23 = scalar_lea.hbm %s11629_s17, 4096 }
  0xd5   :  { %p10969_p8 = scmp.ne.s32.totalorder %s11629_s17, %s10968_s23  ;;  %p10972_p9 = scmp.lt.u32.totalorder %s10968_s23, %s11629_s17 }
  0xd7   :  { %p10974_p10 = pnand %p10972_p9, %p10969_p8 }
  0xd9   :  { %10977 = shalt.err (!%p10974_p10)
}
  0xda   :  { %s10978_s30 = scalar_lea.vmem %s293_s19, 4096  ;;  %p10983_p12 = scmp.lt.s32.totalorder %s293_s19, %s293_s19 }
  0xdb   :  { %p10979_p11 = scmp.ne.s32.totalorder %s293_s19, %s10978_s30  ;;  %p10984_p13 = scmp.lt.s32.totalorder %s10978_s30, %s10978_s30 }
  0xdd   :  { %p10985_p0 = por %p10984_p13, %p10983_p12 }
  0xdf   :  { %p10986_p1 = pnand %p10985_p0, %p10979_p11 }
  0xe1   :  { %10989 = shalt.err (!%p10986_p1)
}
  0xe2   :  { %s11463_s21 = smov 128   ;;  %s11464_s26 = smov 8  }
  0xe3   :  { %298 = dma.hbm_to_vmem [thread:$0]  %s11629_s17, 4096, %s293_s19, [#allocation29], %s11463_s21, %s11463_s21, %s11464_s26  }
  0xe4   :  { %s10990_s28 = scalar_lea.hbm %s11639_s6, 16 }
  0xe5   :  { %p10991_p2 = scmp.ne.s32.totalorder %s11639_s6, %s10990_s28  ;;  %p10994_p3 = scmp.lt.u32.totalorder %s10990_s28, %s11639_s6 }
  0xe7   :  { %p10996_p4 = pnand %p10994_p3, %p10991_p2 }
  0xe9   :  { %10999 = shalt.err (!%p10996_p4)
}
  0xea   :  { %s11000_s13 = scalar_lea.vmem %s11718_s22, 16  ;;  %s11004_s1 = scalar_lea.vmem %s11718_s22, 32 }
  0xeb   :  { %p11001_p5 = scmp.ne.s32.totalorder %s11718_s22, %s11000_s13  ;;  %p11005_p6 = scmp.lt.s32.totalorder %s11718_s22, %s11718_s22 }
  0xec   :  { %p11006_p7 = scmp.lt.s32.totalorder %s11004_s1, %s11000_s13 }
  0xee   :  { %p11007_p8 = por %p11006_p7, %p11005_p6 }
  0xf0   :  { %p11008_p9 = pnand %p11007_p8, %p11001_p5 }
  0xf2   :  { %11011 = shalt.err (!%p11008_p9)
}
  0xf3   :  { %318 = dma.hbm_to_vmem [thread:$0]  %s11639_s6, 16, %s11718_s22, [#allocation32]  }
  0xf4   :  { %s11465_s17 = smov [#allocation34]   ;;  %s11012_s7 = scalar_lea.hbm %s11649_s27, 8192 }
  0xf5   :  { %s334_s2 = sshll.u32 %s11465_s17, 4  ;;  %p11013_p10 = scmp.ne.s32.totalorder %s11649_s27, %s11012_s7  ;;  %s335_s2 = int_to_ptr.vmem [resolvable:$true] %s334_s2 }
  0xf6   :  { %p11016_p11 = scmp.lt.u32.totalorder %s11012_s7, %s11649_s27 }
  0xf8   :  { %p11018_p12 = pnand %p11016_p11, %p11013_p10 }
  0xfa   :  { %11021 = shalt.err (!%p11018_p12)
}
  0xfb   :  { %s11022_s0 = scalar_lea.vmem %s335_s2, 8192  ;;  %p11027_p0 = scmp.lt.s32.totalorder %s335_s2, %s335_s2 }
  0xfc   :  { %p11023_p13 = scmp.ne.s32.totalorder %s335_s2, %s11022_s0  ;;  %p11028_p1 = scmp.lt.s32.totalorder %s11022_s0, %s11022_s0 }
  0xfe   :  { %p11029_p2 = por %p11028_p1, %p11027_p0 }
 0x100   :  { %p11030_p3 = pnand %p11029_p2, %p11023_p13 }
 0x102   :  { %11033 = shalt.err (!%p11030_p3)
}
 0x103   :  { %s11466_s20 = smov 512   ;;  %s11467_s6 = smov 32  }
 0x104   :  { %340 = dma.hbm_to_vmem [thread:$0]  %s11649_s27, 8192, %s335_s2, [#allocation35], %s11466_s20, %s11466_s20, %s11467_s6  }
 0x105   :  { %s11468_s10 = smov [#allocation37]   ;;  %s11469_s4 = smov [#allocation40]  }
 0x106   :  { %s356_s3 = sshll.u32 %s11468_s10, 4  ;;  %s379_s11 = sshll.u32 %s11469_s4, 4  ;;  %s357_s3 = int_to_ptr.vmem [resolvable:$true] %s356_s3  ;;  %s380_s11 = int_to_ptr.vmem [resolvable:$true] %s379_s11 }
 0x107   :  { %s11034_s15 = scalar_lea.hbm %s11659_s12, 8192 }
 0x108   :  { %p11035_p4 = scmp.ne.s32.totalorder %s11659_s12, %s11034_s15  ;;  %p11038_p5 = scmp.lt.u32.totalorder %s11034_s15, %s11659_s12 }
 0x10a   :  { %p11040_p6 = pnand %p11038_p5, %p11035_p4 }
 0x10c   :  { %11043 = shalt.err (!%p11040_p6)
}
 0x10d   :  { %s11044_s16 = scalar_lea.vmem %s357_s3, 8192  ;;  %p11049_p8 = scmp.lt.s32.totalorder %s357_s3, %s357_s3 }
 0x10e   :  { %p11045_p7 = scmp.ne.s32.totalorder %s357_s3, %s11044_s16  ;;  %p11050_p9 = scmp.lt.s32.totalorder %s11044_s16, %s11044_s16 }
 0x110   :  { %p11051_p10 = por %p11050_p9, %p11049_p8 }
 0x112   :  { %p11052_p11 = pnand %p11051_p10, %p11045_p7 }
 0x114   :  { %11055 = shalt.err (!%p11052_p11)
}
 0x115   :  { %362 = dma.hbm_to_vmem [thread:$0]  %s11659_s12, 8192, %s357_s3, [#allocation38], %s11463_s21, %s11463_s21, %s11464_s26  }
 0x116   :  { %s11056_s27 = scalar_lea.hbm %s11669_s24, 16 }
 0x117   :  { %p11057_p12 = scmp.ne.s32.totalorder %s11669_s24, %s11056_s27  ;;  %p11060_p13 = scmp.lt.u32.totalorder %s11056_s27, %s11669_s24 }
 0x119   :  { %p11062_p0 = pnand %p11060_p13, %p11057_p12 }
 0x11b   :  { %11065 = shalt.err (!%p11062_p0)
}
 0x11c   :  { %s11066_s14 = scalar_lea.vmem %s380_s11, 16  ;;  %s11070_s19 = scalar_lea.vmem %s380_s11, 32 }
 0x11d   :  { %p11067_p1 = scmp.ne.s32.totalorder %s380_s11, %s11066_s14  ;;  %p11071_p2 = scmp.lt.s32.totalorder %s380_s11, %s380_s11 }
 0x11e   :  { %p11072_p3 = scmp.lt.s32.totalorder %s11070_s19, %s11066_s14 }
 0x120   :  { %p11073_p4 = por %p11072_p3, %p11071_p2 }
 0x122   :  { %p11074_p5 = pnand %p11073_p4, %p11067_p1 }
 0x124   :  { %11077 = shalt.err (!%p11074_p5)
}
 0x125   :  { %382 = dma.hbm_to_vmem [thread:$0]  %s11669_s24, 16, %s380_s11, [#allocation41]  }
 0x126   :  { %s11470_s12 = smov [#allocation2]   ;;  %s11471_s22 = smov [#allocation6]  }
 0x127   :  { %s103_s18 = sshll.u32 %s11470_s12, 4  ;;  %s129_s23 = sshll.u32 %s11471_s22, 4  ;;  %s104_s18 = int_to_ptr.vmem [resolvable:$true] %s103_s18  ;;  %s130_s23 = int_to_ptr.vmem [resolvable:$true] %s129_s23 }
 0x128   :  { %s11078_s30 = scalar_lea.hbm %s11504_s9, 16 }
 0x129   :  { %p11079_p6 = scmp.ne.s32.totalorder %s11504_s9, %s11078_s30  ;;  %p11082_p7 = scmp.lt.u32.totalorder %s11078_s30, %s11504_s9 }
 0x12b   :  { %p11084_p8 = pnand %p11082_p7, %p11079_p6 }
 0x12d   :  { %11087 = shalt.err (!%p11084_p8)
}
 0x12e   :  { %s11088_s28 = scalar_lea.vmem %s104_s18, 16  ;;  %s11092_s13 = scalar_lea.vmem %s104_s18, 32 }
 0x12f   :  { %p11089_p9 = scmp.ne.s32.totalorder %s104_s18, %s11088_s28  ;;  %p11093_p10 = scmp.lt.s32.totalorder %s104_s18, %s104_s18 }
 0x130   :  { %p11094_p11 = scmp.lt.s32.totalorder %s11092_s13, %s11088_s28 }
 0x132   :  { %p11095_p12 = por %p11094_p11, %p11093_p10 }
 0x134   :  { %p11096_p13 = pnand %p11095_p12, %p11089_p9 }
 0x136   :  { %11099 = shalt.err (!%p11096_p13)
}
 0x137   :  { %106 = dma.hbm_to_vmem [thread:$0]  %s11504_s9, 16, %s104_s18, [#allocation3]  }
 0x138   :  { %s11100_s24 = scalar_lea.hbm %s11529_s29, 16 }
 0x139   :  { %p11101_p0 = scmp.ne.s32.totalorder %s11529_s29, %s11100_s24  ;;  %p11104_p1 = scmp.lt.u32.totalorder %s11100_s24, %s11529_s29 }
 0x13b   :  { %p11106_p2 = pnand %p11104_p1, %p11101_p0 }
 0x13d   :  { %11109 = shalt.err (!%p11106_p2)
}
 0x13e   :  { %s11110_s1 = scalar_lea.vmem %s130_s23, 16  ;;  %s11114_s17 = scalar_lea.vmem %s130_s23, 32 }
 0x13f   :  { %p11111_p3 = scmp.ne.s32.totalorder %s130_s23, %s11110_s1  ;;  %p11115_p4 = scmp.lt.s32.totalorder %s130_s23, %s130_s23 }
 0x140   :  { %p11116_p5 = scmp.lt.s32.totalorder %s11114_s17, %s11110_s1 }
 0x142   :  { %p11117_p6 = por %p11116_p5, %p11115_p4 }
 0x144   :  { %p11118_p7 = pnand %p11117_p6, %p11111_p3 }
 0x146   :  { %11121 = shalt.err (!%p11118_p7)
}
 0x147   :  { %s13824_s2 = sld [smem:[#allocation61_spill]]  ;;  %s11472_s9 = smov [#allocation9]  }
 0x148   :  { %132 = dma.hbm_to_vmem [thread:$0]  %s11529_s29, 16, %s130_s23, [#allocation5]  }
 0x149   :  { %s149_s7 = sshll.u32 %s11472_s9, 4  ;;  %s11473_s0 = smov [#allocation12]   ;;  %s150_s7 = int_to_ptr.vmem [resolvable:$true] %s149_s7 }
 0x14a   :  { %s171_s20 = sshll.u32 %s11473_s0, 4  ;;  %s172_s20 = int_to_ptr.vmem [resolvable:$true] %s171_s20 }
 0x14d   :  { %s11122_s10 = scalar_lea.hbm %s13824_s2, 16 }
 0x14e   :  { %p11123_p8 = scmp.ne.s32.totalorder %s13824_s2, %s11122_s10  ;;  %p11126_p9 = scmp.lt.u32.totalorder %s11122_s10, %s13824_s2 }
 0x150   :  { %p11128_p10 = pnand %p11126_p9, %p11123_p8 }
 0x152   :  { %11131 = shalt.err (!%p11128_p10)
}
 0x153   :  { %s11132_s3 = scalar_lea.vmem %s150_s7, 16  ;;  %s11136_s4 = scalar_lea.vmem %s150_s7, 32 }
 0x154   :  { %p11133_p11 = scmp.ne.s32.totalorder %s150_s7, %s11132_s3  ;;  %p11137_p12 = scmp.lt.s32.totalorder %s150_s7, %s150_s7 }
 0x155   :  { %p11138_p13 = scmp.lt.s32.totalorder %s11136_s4, %s11132_s3 }
 0x157   :  { %p11139_p0 = por %p11138_p13, %p11137_p12 }
 0x159   :  { %p11140_p1 = pnand %p11139_p0, %p11133_p11 }
 0x15b   :  { %11143 = shalt.err (!%p11140_p1)
}
 0x15c   :  { %s13825_s29 = sld [smem:[#allocation63_spill]] }
 0x15d   :  { %152 = dma.hbm_to_vmem [thread:$0]  %s13824_s2, 16, %s150_s7, [#allocation8]  }
 0x162   :  { %s11144_s11 = scalar_lea.hbm %s13825_s29, 16 }
 0x163   :  { %p11145_p2 = scmp.ne.s32.totalorder %s13825_s29, %s11144_s11  ;;  %p11148_p3 = scmp.lt.u32.totalorder %s11144_s11, %s13825_s29 }
 0x165   :  { %p11150_p4 = pnand %p11148_p3, %p11145_p2 }
 0x167   :  { %11153 = shalt.err (!%p11150_p4)
}
 0x168   :  { %s11154_s15 = scalar_lea.vmem %s172_s20, 16  ;;  %s11158_s16 = scalar_lea.vmem %s172_s20, 32 }
 0x169   :  { %p11155_p5 = scmp.ne.s32.totalorder %s172_s20, %s11154_s15  ;;  %p11159_p6 = scmp.lt.s32.totalorder %s172_s20, %s172_s20 }
 0x16a   :  { %p11160_p7 = scmp.lt.s32.totalorder %s11158_s16, %s11154_s15 }
 0x16c   :  { %p11161_p8 = por %p11160_p7, %p11159_p6 }
 0x16e   :  { %p11162_p9 = pnand %p11161_p8, %p11155_p5 }
 0x170   :  { %11165 = shalt.err (!%p11162_p9)
}
 0x171   :  { %s13826_s27 = sld [smem:[#allocation65_spill]]  ;;  %s11474_s14 = smov [#allocation15]  }
 0x172   :  { %174 = dma.hbm_to_vmem [thread:$0]  %s13825_s29, 16, %s172_s20, [#allocation11]  }
 0x173   :  { %s193_s19 = sshll.u32 %s11474_s14, 4  ;;  %s11475_s12 = smov [#allocation18]   ;;  %s194_s19 = int_to_ptr.vmem [resolvable:$true] %s193_s19 }
 0x174   :  { %s214_s18 = sshll.u32 %s11475_s12, 4  ;;  %s215_s18 = int_to_ptr.vmem [resolvable:$true] %s214_s18 }
 0x177   :  { %s11166_s22 = scalar_lea.hbm %s13826_s27, 64 }
 0x178   :  { %p11167_p10 = scmp.ne.s32.totalorder %s13826_s27, %s11166_s22  ;;  %p11170_p11 = scmp.lt.u32.totalorder %s11166_s22, %s13826_s27 }
 0x17a   :  { %p11172_p12 = pnand %p11170_p11, %p11167_p10 }
 0x17c   :  { %11175 = shalt.err (!%p11172_p12)
}
 0x17d   :  { %s11176_s23 = scalar_lea.vmem %s194_s19, 64  ;;  %p11181_p0 = scmp.lt.s32.totalorder %s194_s19, %s194_s19 }
 0x17e   :  { %p11177_p13 = scmp.ne.s32.totalorder %s194_s19, %s11176_s23  ;;  %p11182_p1 = scmp.lt.s32.totalorder %s11176_s23, %s11176_s23 }
 0x180   :  { %p11183_p2 = por %p11182_p1, %p11181_p0 }
 0x182   :  { %p11184_p3 = pnand %p11183_p2, %p11177_p13 }
 0x184   :  { %11187 = shalt.err (!%p11184_p3)
}
 0x185   :  { %s13827_s30 = sld [smem:[#allocation66_spill]] }
 0x186   :  { %196 = dma.hbm_to_vmem [thread:$0]  %s13826_s27, 64, %s194_s19, [#allocation14]  }
 0x18b   :  { %s11188_s28 = scalar_lea.hbm %s13827_s30, 2048 }
 0x18c   :  { %p11189_p4 = scmp.ne.s32.totalorder %s13827_s30, %s11188_s28  ;;  %p11192_p5 = scmp.lt.u32.totalorder %s11188_s28, %s13827_s30 }
 0x18e   :  { %p11194_p6 = pnand %p11192_p5, %p11189_p4 }
 0x190   :  { %11197 = shalt.err (!%p11194_p6)
}
 0x191   :  { %s11198_s13 = scalar_lea.vmem %s215_s18, 2048  ;;  %p11203_p8 = scmp.lt.s32.totalorder %s215_s18, %s215_s18 }
 0x192   :  { %p11199_p7 = scmp.ne.s32.totalorder %s215_s18, %s11198_s13  ;;  %p11204_p9 = scmp.lt.s32.totalorder %s11198_s13, %s11198_s13 }
 0x194   :  { %p11205_p10 = por %p11204_p9, %p11203_p8 }
 0x196   :  { %p11206_p11 = pnand %p11205_p10, %p11199_p7 }
 0x198   :  { %11209 = shalt.err (!%p11206_p11)
}
 0x199   :  { %s13828_s24 = sld [smem:[#allocation67_spill]]  ;;  %s11476_s1 = smov [#allocation21]  }
 0x19a   :  { %220 = dma.hbm_to_vmem [thread:$0]  %s13827_s30, 2048, %s215_s18, [#allocation17], %s11463_s21, %s11463_s21, %s11464_s26  }
 0x19b   :  { %s237_s17 = sshll.u32 %s11476_s1, 4  ;;  %s11477_s2 = smov [#allocation24]   ;;  %s238_s17 = int_to_ptr.vmem [resolvable:$true] %s237_s17 }
 0x19c   :  { %s259_s9 = sshll.u32 %s11477_s2, 4  ;;  %s260_s9 = int_to_ptr.vmem [resolvable:$true] %s259_s9 }
 0x19f   :  { %s11210_s7 = scalar_lea.hbm %s13828_s24, 16 }
 0x1a0   :  { %p11211_p12 = scmp.ne.s32.totalorder %s13828_s24, %s11210_s7  ;;  %p11214_p13 = scmp.lt.u32.totalorder %s11210_s7, %s13828_s24 }
 0x1a2   :  { %p11216_p0 = pnand %p11214_p13, %p11211_p12 }
 0x1a4   :  { %11219 = shalt.err (!%p11216_p0)
}
 0x1a5   :  { %s11220_s0 = scalar_lea.vmem %s238_s17, 16  ;;  %s11224_s20 = scalar_lea.vmem %s238_s17, 32 }
 0x1a6   :  { %p11221_p1 = scmp.ne.s32.totalorder %s238_s17, %s11220_s0  ;;  %p11225_p2 = scmp.lt.s32.totalorder %s238_s17, %s238_s17 }
 0x1a7   :  { %p11226_p3 = scmp.lt.s32.totalorder %s11224_s20, %s11220_s0 }
 0x1a9   :  { %p11227_p4 = por %p11226_p3, %p11225_p2 }
 0x1ab   :  { %p11228_p5 = pnand %p11227_p4, %p11221_p1 }
 0x1ad   :  { %11231 = shalt.err (!%p11228_p5)
}
 0x1ae   :  { %s13829_s21 = sld [smem:[#allocation69_spill]] }
 0x1af   :  { %240 = dma.hbm_to_vmem [thread:$0]  %s13828_s24, 16, %s238_s17, [#allocation20]  }
 0x1b4   :  { %s11232_s26 = scalar_lea.hbm %s13829_s21, 64 }
 0x1b5   :  { %p11233_p6 = scmp.ne.s32.totalorder %s13829_s21, %s11232_s26  ;;  %p11236_p7 = scmp.lt.u32.totalorder %s11232_s26, %s13829_s21 }
 0x1b7   :  { %p11238_p8 = pnand %p11236_p7, %p11233_p6 }
 0x1b9   :  { %11241 = shalt.err (!%p11238_p8)
}
 0x1ba   :  { %s11242_s10 = scalar_lea.vmem %s260_s9, 64  ;;  %p11247_p10 = scmp.lt.s32.totalorder %s260_s9, %s260_s9 }
 0x1bb   :  { %p11243_p9 = scmp.ne.s32.totalorder %s260_s9, %s11242_s10  ;;  %p11248_p11 = scmp.lt.s32.totalorder %s11242_s10, %s11242_s10 }
 0x1bd   :  { %p11249_p12 = por %p11248_p11, %p11247_p10 }
 0x1bf   :  { %p11250_p13 = pnand %p11249_p12, %p11243_p9 }
 0x1c1   :  { %11253 = shalt.err (!%p11250_p13)
}
 0x1c2   :  { %s13830_s3 = sld [smem:[#allocation72_spill]]  ;;  %s11478_s4 = smov [#allocation27]  }
 0x1c3   :  { %262 = dma.hbm_to_vmem [thread:$0]  %s13829_s21, 64, %s260_s9, [#allocation23]  }
 0x1c4   :  { %s283_s29 = sshll.u32 %s11478_s4, 4  ;;  %s11479_s11 = smov [#allocation30]   ;;  %s284_s29 = int_to_ptr.vmem [resolvable:$true] %s283_s29 }
 0x1c5   :  { %s305_s15 = sshll.u32 %s11479_s11, 4  ;;  %s306_s15 = int_to_ptr.vmem [resolvable:$true] %s305_s15 }
 0x1c8   :  { %s11254_s16 = scalar_lea.hbm %s13830_s3, 32 }
 0x1c9   :  { %p11255_p0 = scmp.ne.s32.totalorder %s13830_s3, %s11254_s16  ;;  %p11258_p1 = scmp.lt.u32.totalorder %s11254_s16, %s13830_s3 }
 0x1cb   :  { %p11260_p2 = pnand %p11258_p1, %p11255_p0 }
 0x1cd   :  { %11263 = shalt.err (!%p11260_p2)
}
 0x1ce   :  { %s11264_s27 = scalar_lea.vmem %s284_s29, 32  ;;  %p11269_p4 = scmp.lt.s32.totalorder %s284_s29, %s284_s29 }
 0x1cf   :  { %p11265_p3 = scmp.ne.s32.totalorder %s284_s29, %s11264_s27  ;;  %p11270_p5 = scmp.lt.s32.totalorder %s11264_s27, %s11264_s27 }
 0x1d1   :  { %p11271_p6 = por %p11270_p5, %p11269_p4 }
 0x1d3   :  { %p11272_p7 = pnand %p11271_p6, %p11265_p3 }
 0x1d5   :  { %11275 = shalt.err (!%p11272_p7)
}
 0x1d6   :  { %s13831_s14 = sld [smem:[#allocation73_spill]] }
 0x1d7   :  { %286 = dma.hbm_to_vmem [thread:$0]  %s13830_s3, 32, %s284_s29, [#allocation26]  }
 0x1dc   :  { %s11276_s19 = scalar_lea.hbm %s13831_s14, 16 }
 0x1dd   :  { %p11277_p8 = scmp.ne.s32.totalorder %s13831_s14, %s11276_s19  ;;  %p11280_p9 = scmp.lt.u32.totalorder %s11276_s19, %s13831_s14 }
 0x1df   :  { %p11282_p10 = pnand %p11280_p9, %p11277_p8 }
 0x1e1   :  { %11285 = shalt.err (!%p11282_p10)
}
 0x1e2   :  { %s11286_s12 = scalar_lea.vmem %s306_s15, 16  ;;  %s11290_s18 = scalar_lea.vmem %s306_s15, 32 }
 0x1e3   :  { %p11287_p11 = scmp.ne.s32.totalorder %s306_s15, %s11286_s12  ;;  %p11291_p12 = scmp.lt.s32.totalorder %s306_s15, %s306_s15 }
 0x1e4   :  { %p11292_p13 = scmp.lt.s32.totalorder %s11290_s18, %s11286_s12 }
 0x1e6   :  { %p11293_p0 = por %p11292_p13, %p11291_p12 }
 0x1e8   :  { %p11294_p1 = pnand %p11293_p0, %p11287_p11 }
 0x1ea   :  { %11297 = shalt.err (!%p11294_p1)
}
 0x1eb   :  { %s13832_s22 = sld [smem:[#allocation74_spill]]  ;;  %s11480_s23 = smov [#allocation33]  }
 0x1ec   :  { %308 = dma.hbm_to_vmem [thread:$0]  %s13831_s14, 16, %s306_s15, [#allocation29]  }
 0x1ed   :  { %s325_s30 = sshll.u32 %s11480_s23, 4  ;;  %s11481_s28 = smov [#allocation36]   ;;  %s326_s30 = int_to_ptr.vmem [resolvable:$true] %s325_s30 }
 0x1ee   :  { %s347_s13 = sshll.u32 %s11481_s28, 4  ;;  %s348_s13 = int_to_ptr.vmem [resolvable:$true] %s347_s13 }
 0x1f1   :  { %s11298_s24 = scalar_lea.hbm %s13832_s22, 16 }
 0x1f2   :  { %p11299_p2 = scmp.ne.s32.totalorder %s13832_s22, %s11298_s24  ;;  %p11302_p3 = scmp.lt.u32.totalorder %s11298_s24, %s13832_s22 }
 0x1f4   :  { %p11304_p4 = pnand %p11302_p3, %p11299_p2 }
 0x1f6   :  { %11307 = shalt.err (!%p11304_p4)
}
 0x1f7   :  { %s11308_s1 = scalar_lea.vmem %s326_s30, 16  ;;  %s11312_s17 = scalar_lea.vmem %s326_s30, 32 }
 0x1f8   :  { %p11309_p5 = scmp.ne.s32.totalorder %s326_s30, %s11308_s1  ;;  %p11313_p6 = scmp.lt.s32.totalorder %s326_s30, %s326_s30 }
 0x1f9   :  { %p11314_p7 = scmp.lt.s32.totalorder %s11312_s17, %s11308_s1 }
 0x1fb   :  { %p11315_p8 = por %p11314_p7, %p11313_p6 }
 0x1fd   :  { %p11316_p9 = pnand %p11315_p8, %p11309_p5 }
 0x1ff   :  { %11319 = shalt.err (!%p11316_p9)
}
 0x200   :  { %s13833_s2 = sld [smem:[#allocation75_spill]] }
 0x201   :  { %328 = dma.hbm_to_vmem [thread:$0]  %s13832_s22, 16, %s326_s30, [#allocation32]  }
 0x206   :  { %s11320_s9 = scalar_lea.hbm %s13833_s2, 64 }
 0x207   :  { %p11321_p10 = scmp.ne.s32.totalorder %s13833_s2, %s11320_s9  ;;  %p11324_p11 = scmp.lt.u32.totalorder %s11320_s9, %s13833_s2 }
 0x209   :  { %p11326_p12 = pnand %p11324_p11, %p11321_p10 }
 0x20b   :  { %11329 = shalt.err (!%p11326_p12)
}
 0x20c   :  { %s11330_s7 = scalar_lea.vmem %s348_s13, 64  ;;  %p11335_p0 = scmp.lt.s32.totalorder %s348_s13, %s348_s13 }
 0x20d   :  { %p11331_p13 = scmp.ne.s32.totalorder %s348_s13, %s11330_s7  ;;  %p11336_p1 = scmp.lt.s32.totalorder %s11330_s7, %s11330_s7 }
 0x20f   :  { %p11337_p2 = por %p11336_p1, %p11335_p0 }
 0x211   :  { %p11338_p3 = pnand %p11337_p2, %p11331_p13 }
 0x213   :  { %11341 = shalt.err (!%p11338_p3)
}
 0x214   :  { %s13834_s0 = sld [smem:[#allocation76_spill]]  ;;  %s11482_s20 = smov [#allocation39]  }
 0x215   :  { %350 = dma.hbm_to_vmem [thread:$0]  %s13833_s2, 64, %s348_s13, [#allocation35]  }
 0x216   :  { %s369_s21 = sshll.u32 %s11482_s20, 4  ;;  %s11483_s26 = smov [#allocation42]   ;;  %s370_s21 = int_to_ptr.vmem [resolvable:$true] %s369_s21 }
 0x217   :  { %s389_s10 = sshll.u32 %s11483_s26, 4  ;;  %s390_s10 = int_to_ptr.vmem [resolvable:$true] %s389_s10 }
 0x21a   :  { %s11342_s3 = scalar_lea.hbm %s13834_s0, 16 }
 0x21b   :  { %p11343_p4 = scmp.ne.s32.totalorder %s13834_s0, %s11342_s3  ;;  %p11346_p5 = scmp.lt.u32.totalorder %s11342_s3, %s13834_s0 }
 0x21d   :  { %p11348_p6 = pnand %p11346_p5, %p11343_p4 }
 0x21f   :  { %11351 = shalt.err (!%p11348_p6)
}
 0x220   :  { %s11352_s4 = scalar_lea.vmem %s370_s21, 16  ;;  %s11356_s29 = scalar_lea.vmem %s370_s21, 32 }
 0x221   :  { %p11353_p7 = scmp.ne.s32.totalorder %s370_s21, %s11352_s4  ;;  %p11357_p8 = scmp.lt.s32.totalorder %s370_s21, %s370_s21 }
 0x222   :  { %p11358_p9 = scmp.lt.s32.totalorder %s11356_s29, %s11352_s4 }
 0x224   :  { %p11359_p10 = por %p11358_p9, %p11357_p8 }
 0x226   :  { %p11360_p11 = pnand %p11359_p10, %p11353_p7 }
 0x228   :  { %11363 = shalt.err (!%p11360_p11)
}
 0x229   :  { %372 = dma.hbm_to_vmem [thread:$0]  %s13834_s0, 16, %s370_s21, [#allocation38]  }
 0x22a   :  { %s11364_s11 = scalar_lea.hbm %s11674_s5, 16 }
 0x22b   :  { %p11365_p12 = scmp.ne.s32.totalorder %s11674_s5, %s11364_s11  ;;  %p11368_p13 = scmp.lt.u32.totalorder %s11364_s11, %s11674_s5 }
 0x22d   :  { %p11370_p0 = pnand %p11368_p13, %p11365_p12 }
 0x22f   :  { %11373 = shalt.err (!%p11370_p0)
}
 0x230   :  { %s11374_s15 = scalar_lea.vmem %s390_s10, 16  ;;  %s11378_s16 = scalar_lea.vmem %s390_s10, 32 }
 0x231   :  { %p11375_p1 = scmp.ne.s32.totalorder %s390_s10, %s11374_s15  ;;  %p11379_p2 = scmp.lt.s32.totalorder %s390_s10, %s390_s10 }
 0x232   :  { %p11380_p3 = scmp.lt.s32.totalorder %s11378_s16, %s11374_s15 }
 0x234   :  { %p11381_p4 = por %p11380_p3, %p11379_p2 }
 0x236   :  { %p11382_p5 = pnand %p11381_p4, %p11375_p1 }
 0x238   :  { %11385 = shalt.err (!%p11382_p5)
}
 0x239   :  { %392 = dma.hbm_to_vmem [thread:$0]  %s11674_s5, 16, %s390_s10, [#allocation41]  }
 0x23a   :  { %11386 = dma.done.wait [#allocation3], 16  }
 0x23b   :  { %11387 = vsyncadd [#allocation3], 4294967280 }
 0x23c   :  { %11388 = dma.done.wait [#allocation5], 32  }
 0x23d   :  { %11389 = vsyncadd [#allocation5], 4294967264 }
 0x23e   :  { %11390 = dma.done.wait [#allocation8], 32  }
 0x23f   :  { %11391 = vsyncadd [#allocation8], 4294967264 }
 0x240   :  { %11392 = dma.done.wait [#allocation11], 32  }
 0x241   :  { %11393 = vsyncadd [#allocation11], 4294967264 }
 0x242   :  { %11394 = dma.done.wait [#allocation14], 80  }
 0x243   :  { %11395 = vsyncadd [#allocation14], 4294967216 }
 0x244   :  { %11396 = dma.done.wait [#allocation17], 8192  }
 0x245   :  { %11397 = vsyncadd [#allocation17], 4294959104 }
 0x246   :  { %11398 = dma.done.wait [#allocation20], 32  }
 0x247   :  { %11399 = vsyncadd [#allocation20], 4294967264 }
 0x248   :  { %11400 = dma.done.wait [#allocation23], 80  }
 0x249   :  { %11401 = vsyncadd [#allocation23], 4294967216 }
 0x24a   :  { %11402 = dma.done.wait [#allocation26], 64  }
 0x24b   :  { %11403 = vsyncadd [#allocation26], 4294967232 }
 0x24c   :  { %11404 = dma.done.wait [#allocation29], 4112  }
 0x24d   :  { %11405 = vsyncadd [#allocation29], 4294963184 }
 0x24e   :  { %11406 = dma.done.wait [#allocation32], 32  }
 0x24f   :  { %11407 = vsyncadd [#allocation32], 4294967264 }
 0x250   :  { %11408 = dma.done.wait [#allocation35], 8256  }
 0x251   :  { %11409 = vsyncadd [#allocation35], 4294959040 }
 0x252   :  { %11410 = dma.done.wait [#allocation38], 8208  }
 0x253   :  { %11411 = vsyncadd [#allocation38], 4294959088 }
 0x254   :  { %11412 = dma.done.wait [#allocation41], 32  }
 0x255   :  { %11413 = vsyncadd [#allocation41], 4294967264  ;;  %s13835_s5 = sld [smem:[#allocation57_spill]]  ;;  %s13836_s27 = sld [smem:[#allocation58_spill]]  ;;  %vm11486_vm0 = vmmov 0   ;;  %vm1175_vm1 = vcmask 261120  }
 0x256   :  { %s13837_s14 = sld [smem:[#allocation60_spill]]  ;;  %s13838_s19 = sld [smem:[#allocation59_spill]]  ;;  %vm2183_vm4 = vcmask 1040384   ;;  %vm2185_vm6 = vcmask 1041408   ;;  %vm2187_vm8 = vcmask 1042432   ;;  %vm2462_vm9 = vcmask 1043456   ;;  %vm12387_vm10 = vmpackc.low %vm1175_vm1, %vm1175_vm1 }
 0x257   :  { %s13844_s12 = sld [smem:[#allocation62_spill]]  ;;  %s13846_s18 = sld [smem:[#allocation64_spill]]  ;;  %vm11490_vm11 = vmmov 1   ;;  %vm2434_vm13 = vcmask 93184   ;;  %vm2430_vm14 = vcmask 97280   ;;  %vm3509_vm15 = vcmask 1046528  }
 0x258   :  { %s11487_s22 = smov 64   ;;  %s11488_s23 = smov 96   ;;  %vm12398_vm12 = vmpackc.low %vm2462_vm9, %vm11490_vm11 }
 0x259   :  { %s13875_s30 = sld [smem:[#allocation68_spill]] }
 0x25b   :  { %v11813_v0 = vld [vmem:[%s13835_s5] sm:$0xff]  ;;  %v475_v1 = vld [vmem:[%s13835_s5 + $0x8] sm:$0xff]  ;;  %v520_v4 = vld [vmem:[%s13836_s27 + $0x18] sm:$0xff] }
 0x25c   :  { %476 = vadd.xlane.f32.xlu0 %v11813_v0  ;;  %478 = vadd.xlane.f32.xlu1 %v475_v1  ;;  %v518_v2 = vld [vmem:[%s13836_s27 + $0x8] sm:$0xff]  ;;  %v524_v6 = vld [vmem:[%s13836_s27 + $0x38] sm:$0xff]  ;;  %v517_v7 = vld [vmem:[%s13836_s27] sm:$0xff] }
 0x25d   :  { %v522_v3 = vld [vmem:[%s13836_s27 + $0x28] sm:$0xff]  ;;  %v521_v8 = vld [vmem:[%s13836_s27 + $0x20] sm:$0xff]  ;;  %v9363_v9 = vpack.c.bf16 %v524_v6, %v520_v4  ;;  %v519_v11 = vld [vmem:[%s13836_s27 + $0x10] sm:$0xff] }
 0x25e   :  { %v9331_v5 = vpack.c.bf16 %v522_v3, %v518_v2  ;;  %v9333_v10 = vpack.c.bf16 %v521_v8, %v517_v7  ;;  %v523_v12 = vld [vmem:[%s13836_s27 + $0x30] sm:$0xff]  ;;  %v526_v13 = vld [vmem:[%s13836_s27 + $0x48] sm:$0xff]  ;;  %v528_v16 = vld [vmem:[%s13836_s27 + $0x58] sm:$0xff] }
 0x25f   :  { %v9365_v14 = vpack.c.bf16 %v523_v12, %v519_v11  ;;  %v530_v15 = vld [vmem:[%s13836_s27 + $0x68] sm:$0xff]  ;;  %v532_v17 = vld [vmem:[%s13836_s27 + $0x78] sm:$0xff]  ;;  %9364 = vmatprep.subr.bf16.mxu1 %v9363_v9  ;;  %v525_v20 = vld [vmem:[%s13836_s27 + $0x40] sm:$0xff]  ;;  %v13722_v11 = vmov 0.0  }
 0x260   :  { %9332 = vmatprep.subr.bf16.mxu0 %v9331_v5  ;;  %v9335_v18 = vpack.c.bf16 %v530_v15, %v526_v13  ;;  %v9367_v19 = vpack.c.bf16 %v532_v17, %v528_v16  ;;  %v529_v21 = vld [vmem:[%s13836_s27 + $0x60] sm:$0xff]  ;;  %v527_v22 = vld [vmem:[%s13836_s27 + $0x50] sm:$0xff]  ;;  %v534_v25 = vld [vmem:[%s13836_s27 + $0x88] sm:$0xff]  ;;  %667 = vmatprep.mubr.f32.mxu0 %v13722_v11 }
 0x261   :  { %9334 = vmatpush1.bf16.msra.mxu0 %v9333_v10  ;;  %9366 = vmatpush1.bf16.msra.mxu1 %v9365_v14  ;;  %v9337_v23 = vpack.c.bf16 %v529_v21, %v525_v20  ;;  %v531_v24 = vld [vmem:[%s13836_s27 + $0x70] sm:$0xff]  ;;  %v538_v26 = vld [vmem:[%s13836_s27 + $0xa8] sm:$0xff]  ;;  %v536_v29 = vld [vmem:[%s13836_s27 + $0x98] sm:$0xff] }
 0x262   :  { %9336 = vmatprep.subr.bf16.mxu0 %v9335_v18  ;;  %9368 = vmatprep.subr.bf16.mxu1 %v9367_v19  ;;  %v9369_v27 = vpack.c.bf16 %v531_v24, %v527_v22  ;;  %v9339_v28 = vpack.c.bf16 %v538_v26, %v534_v25  ;;  %v540_v30 = vld [vmem:[%s13836_s27 + $0xb8] sm:$0xff]  ;;  %v533_v31 = vld [vmem:[%s13836_s27 + $0x80] sm:$0xff]  ;;  %v535_v34 = vld [vmem:[%s13836_s27 + $0x90] sm:$0xff] }
 0x263   :  { %v9371_v32 = vpack.c.bf16 %v540_v30, %v536_v29  ;;  %v537_v33 = vld [vmem:[%s13836_s27 + $0xa0] sm:$0xff]  ;;  %v539_v35 = vld [vmem:[%s13836_s27 + $0xb0] sm:$0xff]  ;;  %v542_v46 = vld [vmem:[%s13836_s27 + $0xc8] sm:$0xff]  ;;  %744 = vmatprep.mubr.f32.mxu1 %v13722_v11 }
 0x264   :  { %v9341_v36 = vpack.c.bf16 %v537_v33, %v533_v31  ;;  %v9373_v37 = vpack.c.bf16 %v539_v35, %v535_v34  ;;  %v546_v47 = vld [vmem:[%s13836_s27 + $0xe8] sm:$0xff]  ;;  %v544_v48 = vld [vmem:[%s13836_s27 + $0xd8] sm:$0xff]  ;;  %v541_v51 = vld [vmem:[%s13836_s27 + $0xc0] sm:$0xff] }
 0x265   :  { %9338 = vmatpush1.bf16.msra.mxu0 %v9337_v23  ;;  %9370 = vmatpush1.bf16.msra.mxu1 %v9369_v27  ;;  %v9343_v49 = vpack.c.bf16 %v546_v47, %v542_v46  ;;  %v548_v50 = vld [vmem:[%s13836_s27 + $0xf8] sm:$0xff]  ;;  %v545_v52 = vld [vmem:[%s13836_s27 + $0xe0] sm:$0xff]  ;;  %v543_v55 = vld [vmem:[%s13836_s27 + $0xd0] sm:$0xff] }
 0x266   :  { %9340 = vmatprep.subr.bf16.mxu0 %v9339_v28  ;;  %9372 = vmatprep.subr.bf16.mxu1 %v9371_v32  ;;  %v9375_v53 = vpack.c.bf16 %v548_v50, %v544_v48  ;;  %v9345_v54 = vpack.c.bf16 %v545_v52, %v541_v51  ;;  %v547_v56 = vld [vmem:[%s13836_s27 + $0xf0] sm:$0xff]  ;;  %v550_v58 = vld [vmem:[%s13836_s27 + $0x108] sm:$0xff]  ;;  %v552_v60 = vld [vmem:[%s13836_s27 + $0x118] sm:$0xff] }
 0x267   :  { %v9377_v57 = vpack.c.bf16 %v547_v56, %v543_v55  ;;  %v554_v59 = vld [vmem:[%s13836_s27 + $0x128] sm:$0xff]  ;;  %v556_v62 = vld [vmem:[%s13836_s27 + $0x138] sm:$0xff]  ;;  %v549_v63 = vld [vmem:[%s13836_s27 + $0x100] sm:$0xff] }
 0x268   :  { %v9347_v61 = vpack.c.bf16 %v554_v59, %v550_v58  ;;  %v9379_v2 = vpack.c.bf16 %v556_v62, %v552_v60  ;;  %v551_v4 = vld [vmem:[%s13836_s27 + $0x110] sm:$0xff]  ;;  %v558_v6 = vld [vmem:[%s13836_s27 + $0x148] sm:$0xff]  ;;  %v560_v9 = vld [vmem:[%s13836_s27 + $0x158] sm:$0xff] }
 0x269   :  { %9342 = vmatpush1.bf16.msra.mxu0 %v9341_v36  ;;  %9374 = vmatpush1.bf16.msra.mxu1 %v9373_v37  ;;  %v555_v5 = vld [vmem:[%s13836_s27 + $0x130] sm:$0xff]  ;;  %v562_v8 = vld [vmem:[%s13836_s27 + $0x168] sm:$0xff]  ;;  %v564_v10 = vld [vmem:[%s13836_s27 + $0x178] sm:$0xff] }
 0x26a   :  { %9344 = vmatprep.subr.bf16.mxu0 %v9343_v49  ;;  %9376 = vmatprep.subr.bf16.mxu1 %v9375_v53  ;;  %v9381_v7 = vpack.c.bf16 %v555_v5, %v551_v4  ;;  %v9351_v12 = vpack.c.bf16 %v562_v8, %v558_v6  ;;  %v9383_v13 = vpack.c.bf16 %v564_v10, %v560_v9  ;;  %v557_v14 = vld [vmem:[%s13836_s27 + $0x140] sm:$0xff]  ;;  %v559_v16 = vld [vmem:[%s13836_s27 + $0x150] sm:$0xff]  ;;  %v566_v19 = vld [vmem:[%s13836_s27 + $0x188] sm:$0xff] }
 0x26b   :  { %v561_v15 = vld [vmem:[%s13836_s27 + $0x160] sm:$0xff]  ;;  %v563_v18 = vld [vmem:[%s13836_s27 + $0x170] sm:$0xff]  ;;  %v570_v20 = vld [vmem:[%s13836_s27 + $0x1a8] sm:$0xff] }
 0x26c   :  { %v9353_v17 = vpack.c.bf16 %v561_v15, %v557_v14  ;;  %v9385_v21 = vpack.c.bf16 %v563_v18, %v559_v16  ;;  %v9355_v22 = vpack.c.bf16 %v570_v20, %v566_v19  ;;  %v568_v23 = vld [vmem:[%s13836_s27 + $0x198] sm:$0xff]  ;;  %v565_v25 = vld [vmem:[%s13836_s27 + $0x180] sm:$0xff]  ;;  %v567_v28 = vld [vmem:[%s13836_s27 + $0x190] sm:$0xff] }
 0x26d   :  { %9346 = vmatpush1.bf16.msra.mxu0 %v9345_v54  ;;  %9378 = vmatpush1.bf16.msra.mxu1 %v9377_v57  ;;  %v572_v24 = vld [vmem:[%s13836_s27 + $0x1b8] sm:$0xff]  ;;  %v569_v27 = vld [vmem:[%s13836_s27 + $0x1a0] sm:$0xff]  ;;  %v571_v29 = vld [vmem:[%s13836_s27 + $0x1b0] sm:$0xff] }
 0x26e   :  { %9348 = vmatprep.subr.bf16.mxu0 %v9347_v61  ;;  %9380 = vmatprep.subr.bf16.mxu1 %v9379_v2  ;;  %v9387_v26 = vpack.c.bf16 %v572_v24, %v568_v23  ;;  %v9357_v30 = vpack.c.bf16 %v569_v27, %v565_v25  ;;  %v574_v31 = vld [vmem:[%s13836_s27 + $0x1c8] sm:$0xff]  ;;  %v576_v33 = vld [vmem:[%s13836_s27 + $0x1d8] sm:$0xff]  ;;  %v9389_v34 = vpack.c.bf16 %v571_v29, %v567_v28  ;;  %v573_v37 = vld [vmem:[%s13836_s27 + $0x1c0] sm:$0xff] }
 0x26f   :  { %v578_v32 = vld [vmem:[%s13836_s27 + $0x1e8] sm:$0xff]  ;;  %v580_v36 = vld [vmem:[%s13836_s27 + $0x1f8] sm:$0xff]  ;;  %v7631_v53 = vld [vmem:[#allocation2] ss:$0 sm:$0xff] }
 0x270   :  { %v9359_v35 = vpack.c.bf16 %v578_v32, %v574_v31  ;;  %v7632_v56 = vld [vmem:[#allocation4] ss:$0 sm:$0xff]  ;;  %v831_v9 = vld [vmem:[%s13837_s14 + $0x90] sm:$0xff]  ;;  %v832_v10 = vld [vmem:[%s13837_s14 + $0x98] sm:$0xff] }
 0x271   :  { %9382 = vmatpush1.bf16.msra.mxu1 %v9381_v7  ;;  %v861_v62 = vld [vmem:[%s13837_s14 + $0x180] sm:$0xff]  ;;  %v846_v7 = vld [vmem:[%s13837_s14 + $0x108] sm:$0xff]  ;;  %v864_v14 = vld [vmem:[%s13837_s14 + $0x198] sm:$0xff] }
 0x272   :  { %9384 = vmatprep.subr.bf16.mxu1 %v9383_v13  ;;  %v813_v2 = vld [vmem:[%s13837_s14] sm:$0xff]  ;;  %v9399_v13 = vpack.c.bf16 %v832_v10, %v831_v9  ;;  %v815_v15 = vld [vmem:[%s13837_s14 + $0x10] sm:$0xff]  ;;  %v816_v16 = vld [vmem:[%s13837_s14 + $0x18] sm:$0xff] }
 0x273   :  { %v845_v6 = vld [vmem:[%s13837_s14 + $0x100] sm:$0xff]  ;;  %v9401_v18 = vpack.c.bf16 %v816_v16, %v815_v15  ;;  %v847_v19 = vld [vmem:[%s13837_s14 + $0x110] sm:$0xff]  ;;  %v848_v20 = vld [vmem:[%s13837_s14 + $0x118] sm:$0xff] }
 0x274   :  { %v9429_v8 = vpack.c.bf16 %v846_v7, %v845_v6  ;;  %v834_v23 = vld [vmem:[%s13837_s14 + $0xa8] sm:$0xff]  ;;  %v865_v24 = vld [vmem:[%s13837_s14 + $0x1a0] sm:$0xff] }
 0x275   :  { %9386 = vmatpush1.bf16.msra.mxu1 %v9385_v21  ;;  %v9433_v21 = vpack.c.bf16 %v848_v20, %v847_v19  ;;  %v817_v27 = vld [vmem:[%s13837_s14 + $0x20] sm:$0xff]  ;;  %v818_v28 = vld [vmem:[%s13837_s14 + $0x28] sm:$0xff]  ;;  %v843_v20 = vld [vmem:[%s13837_s14 + $0xf0] sm:$0xff] }
 0x276   :  { %9388 = vmatprep.subr.bf16.mxu1 %v9387_v26  ;;  %v866_v26 = vld [vmem:[%s13837_s14 + $0x1a8] sm:$0xff]  ;;  %v849_v31 = vld [vmem:[%s13837_s14 + $0x120] sm:$0xff] }
 0x277   :  { %v9435_v29 = vpack.c.bf16 %v866_v26, %v865_v24  ;;  %v850_v32 = vld [vmem:[%s13837_s14 + $0x128] sm:$0xff]  ;;  %v841_v7 = vld [vmem:[%s13837_s14 + $0xe0] sm:$0xff]  ;;  %v876_v24 = vld [vmem:[%s13837_s14 + $0x1f8] sm:$0xff] }
 0x278   :  { %v873_v9 = vld [vmem:[%s13837_s14 + $0x1e0] sm:$0xff]  ;;  %v828_v26 = vld [vmem:[%s13837_s14 + $0x78] sm:$0xff] }
 0x279   :  { %9390 = vmatpush1.bf16.msra.mxu1 %v9389_v34  ;;  %v835_v34 = vld [vmem:[%s13837_s14 + $0xb0] sm:$0xff] }
 0x2e9   :  { %v477_v38 = vpop.xlane.xlu0 %476  ;;  %v479_v39 = vpop.xlane.xlu1 %478 }
 0x2ea   :  { %v481_v40 = vmul.f32 0.0078125, %v477_v38  ;;  %v482_v41 = vmul.f32 0.0078125, %v479_v39  ;;  %v577_v38 = vld [vmem:[%s13836_s27 + $0x1e0] sm:$0xff]  ;;  %v9391_v39 = vpack.c.bf16 %v580_v36, %v576_v33  ;;  %v9437_v33 = vpack.c.bf16 %v850_v32, %v849_v31  ;;  %v867_v36 = vld [vmem:[%s13837_s14 + $0x1b0] sm:$0xff] }
 0x2eb   :  { %v583_v32 = vlaneseq }
 0x2ec   :  { %v11842_v42 = vsub.f32 %v11813_v0, %v481_v40  ;;  %v11844_v43 = vsub.f32 %v475_v1, %v482_v41  ;;  %v553_v1 = vld [vmem:[%s13836_s27 + $0x120] sm:$0xff]  ;;  %v575_v40 = vld [vmem:[%s13836_s27 + $0x1d0] sm:$0xff]  ;;  %9392 = vmatprep.subr.bf16.mxu1 %v9391_v39 }
 0x2ed   :  { %v9349_v3 = vpack.c.bf16 %v553_v1, %v549_v63  ;;  %v579_v41 = vld [vmem:[%s13836_s27 + $0x1f0] sm:$0xff]  ;;  %v862_v1 = vld [vmem:[%s13837_s14 + $0x188] sm:$0xff] }
 0x2ee   :  { %v485_v44 = vmul.f32 %v11842_v42, %v11842_v42  ;;  %v486_v45 = vmul.f32 %v11844_v43, %v11844_v43  ;;  %v9427_v4 = vpack.c.bf16 %v862_v1, %v861_v62  ;;  %v819_v39 = vld [vmem:[%s13837_s14 + $0x30] sm:$0xff]  ;;  %v872_v62 = vld [vmem:[%s13837_s14 + $0x1d8] sm:$0xff] }
 0x2ef   :  { %9350 = vmatpush1.bf16.msra.mxu0 %v9349_v3  ;;  %v814_v3 = vld [vmem:[%s13837_s14 + $0x8] sm:$0xff]  ;;  %v824_v1 = vld [vmem:[%s13837_s14 + $0x58] sm:$0xff] }
 0x2f0   :  { %487 = vadd.xlane.f32.xlu0 %v485_v44  ;;  %489 = vadd.xlane.f32.xlu1 %v486_v45  ;;  %v9361_v44 = vpack.c.bf16 %v577_v38, %v573_v37  ;;  %v9393_v45 = vpack.c.bf16 %v579_v41, %v575_v40  ;;  %v9397_v5 = vpack.c.bf16 %v814_v3, %v813_v2  ;;  %v868_v38 = vld [vmem:[%s13837_s14 + $0x1b8] sm:$0xff] }
 0x2f1   :  { %9352 = vmatprep.subr.bf16.mxu0 %v9351_v12  ;;  %v863_v12 = vld [vmem:[%s13837_s14 + $0x190] sm:$0xff]  ;;  %v820_v40 = vld [vmem:[%s13837_s14 + $0x38] sm:$0xff]  ;;  %v9439_v41 = vpack.c.bf16 %v868_v38, %v867_v36  ;;  %v581_v36 = vld [vmem:[%s13838_s19] sm:$0xf] }
 0x2f2   :  { %9394 = vmatpush1.bf16.msra.mxu1 %v9393_v45  ;;  %v851_v45 = vld [vmem:[%s13837_s14 + $0x130] sm:$0xff] }
 0x2f3   :  { %9354 = vmatpush1.bf16.msra.mxu0 %v9353_v17  ;;  %9428 = vmatprep.subr.bf16.mxu1 %v9427_v4  ;;  %v9431_v17 = vpack.c.bf16 %v864_v14, %v863_v12  ;;  %v855_v4 = vld [vmem:[%s13837_s14 + $0x150] sm:$0xff]  ;;  %v874_v12 = vld [vmem:[%s13837_s14 + $0x1e8] sm:$0xff] }
 0x2f4   :  { %9356 = vmatprep.subr.bf16.mxu0 %v9355_v22  ;;  %v833_v22 = vld [vmem:[%s13837_s14 + $0xa0] sm:$0xff]  ;;  %v826_v14 = vld [vmem:[%s13837_s14 + $0x68] sm:$0xff]  ;;  %v9451_v15 = vpack.c.bf16 %v874_v12, %v873_v9 }
 0x2f5   :  { %v9403_v25 = vpack.c.bf16 %v834_v23, %v833_v22  ;;  %v875_v22 = vld [vmem:[%s13837_s14 + $0x1f0] sm:$0xff] }
 0x2f7   :  { %9358 = vmatpush1.bf16.msra.mxu0 %v9357_v30  ;;  %v9405_v30 = vpack.c.bf16 %v818_v28, %v817_v27  ;;  %v9455_v27 = vpack.c.bf16 %v876_v24, %v875_v22 }
 0x2f8   :  { %9360 = vmatprep.subr.bf16.mxu0 %v9359_v35  ;;  %v836_v35 = vld [vmem:[%s13837_s14 + $0xb8] sm:$0xff] }
 0x2f9   :  { %v9407_v37 = vpack.c.bf16 %v836_v35, %v835_v34 }
 0x2fb   :  { %9362 = vmatpush1.bf16.msra.mxu0 %v9361_v44  ;;  %v9409_v44 = vpack.c.bf16 %v820_v40, %v819_v39 }
 0x37d   :  { %v488_v46 = vpop.xlane.xlu0 %487  ;;  %v490_v47 = vpop.xlane.xlu1 %489 }
 0x37e   :  { %v491_v48 = vmul.f32 0.0078125, %v488_v46  ;;  %v492_v49 = vmul.f32 0.0078125, %v490_v47  ;;  %v852_v46 = vld [vmem:[%s13837_s14 + $0x138] sm:$0xff] }
 0x37f   :  { %v9441_v47 = vpack.c.bf16 %v852_v46, %v851_v45 }
 0x380   :  { %v493_v50 = vadd.f32 1e-05, %v491_v48  ;;  %v494_v51 = vadd.f32 1e-05, %v492_v49  ;;  %v837_v48 = vld [vmem:[%s13837_s14 + $0xc0] sm:$0xff]  ;;  %v838_v49 = vld [vmem:[%s13837_s14 + $0xc8] sm:$0xff] }
 0x382   :  { %10552 = vrsqrt.f32 %v493_v50  ;;  %v869_v50 = vld [vmem:[%s13837_s14 + $0x1c0] sm:$0xff] }
 0x383   :  { %10554 = vrsqrt.f32 %v494_v51  ;;  %v9411_v51 = vpack.c.bf16 %v838_v49, %v837_v48 }
 0x38c   :  { %v10553_v52 = vpop.eup %10552 }
 0x38d   :  { %v10555_v54 = vpop.eup %10554  ;;  %v497_v55 = vmul.f32 %v10553_v52, %v11842_v42  ;;  %v829_v42 = vld [vmem:[%s13837_s14 + $0x80] sm:$0xff]  ;;  %v870_v52 = vld [vmem:[%s13837_s14 + $0x1c8] sm:$0xff] }
 0x38e   :  { %v498_v57 = vmul.f32 %v10555_v54, %v11844_v43  ;;  %v830_v43 = vld [vmem:[%s13837_s14 + $0x88] sm:$0xff] }
 0x38f   :  { %v506_v58 = vmul.f32 %v7631_v53, %v497_v55  ;;  %v9395_v63 = vpack.c.bf16 %v830_v43, %v829_v42  ;;  %v822_v54 = vld [vmem:[%s13837_s14 + $0x48] sm:$0xff]  ;;  %v9443_v55 = vpack.c.bf16 %v870_v52, %v869_v50  ;;  %v871_v42 = vld [vmem:[%s13837_s14 + $0x1d0] sm:$0xff] }
 0x390   :  { %v507_v59 = vmul.f32 %v7631_v53, %v498_v57  ;;  %v821_v53 = vld [vmem:[%s13837_s14 + $0x40] sm:$0xff]  ;;  %v9447_v2 = vpack.c.bf16 %v872_v62, %v871_v42 }
 0x391   :  { %v515_v60 = vadd.f32 %v7632_v56, %v506_v58  ;;  %9396 = vmatprep.subr.bf16.mxu0 %v9395_v63  ;;  %v853_v57 = vld [vmem:[%s13837_s14 + $0x140] sm:$0xff]  ;;  %v854_v58 = vld [vmem:[%s13837_s14 + $0x148] sm:$0xff]  ;;  %v823_v63 = vld [vmem:[%s13837_s14 + $0x50] sm:$0xff] }
 0x392   :  { %v516_v61 = vadd.f32 %v7632_v56, %v507_v59  ;;  %v9413_v56 = vpack.c.bf16 %v822_v54, %v821_v53  ;;  %v9445_v59 = vpack.c.bf16 %v854_v58, %v853_v57  ;;  %v9417_v3 = vpack.c.bf16 %v824_v1, %v823_v63 }
 0x393   :  { %668 = vmatmul.mubr.f32.vlgmr.msra.gmra.mrb[0].mxu0 %v515_v60  ;;  %745 = vmatmul.mubr.f32.vlgmr.msra.gmra.mrb[0].mxu1 %v515_v60  ;;  %v839_v60 = vld [vmem:[%s13837_s14 + $0xd0] sm:$0xff] }
 0x394   :  { %673 = vmatprep.mubr.f32.mxu0 %v13722_v11  ;;  %750 = vmatprep.mubr.f32.mxu1 %v13722_v11 }
 0x395   :  { %9398 = vmatpush3.bf16.msra.mxu0 %v9397_v5  ;;  %9430 = vmatpush3.bf16.msra.mxu1 %v9429_v8  ;;  %v856_v5 = vld [vmem:[%s13837_s14 + $0x158] sm:$0xff]  ;;  %v842_v8 = vld [vmem:[%s13837_s14 + $0xe8] sm:$0xff] }
 0x396   :  { %9400 = vmatprep.subr.bf16.mxu0 %v9399_v13  ;;  %9432 = vmatprep.subr.bf16.mxu1 %v9431_v17  ;;  %v9449_v6 = vpack.c.bf16 %v856_v5, %v855_v4  ;;  %v9419_v10 = vpack.c.bf16 %v842_v8, %v841_v7  ;;  %v825_v13 = vld [vmem:[%s13837_s14 + $0x60] sm:$0xff] }
 0x397   :  { %674 = vmatmul.mubr.f32.gmra.mrb[2].mxu0 %v516_v61  ;;  %751 = vmatmul.mubr.f32.gmra.mrb[2].mxu1 %v516_v61  ;;  %v840_v61 = vld [vmem:[%s13837_s14 + $0xd8] sm:$0xff]  ;;  %v9421_v16 = vpack.c.bf16 %v826_v14, %v825_v13  ;;  %v857_v17 = vld [vmem:[%s13837_s14 + $0x160] sm:$0xff] }
 0x398   :  { %v9415_v43 = vpack.c.bf16 %v840_v61, %v839_v60 }
 0x399   :  { %9402 = vmatpush3.bf16.msra.mxu0 %v9401_v18  ;;  %9434 = vmatpush3.bf16.msra.mxu1 %v9433_v21  ;;  %v858_v18 = vld [vmem:[%s13837_s14 + $0x168] sm:$0xff]  ;;  %v844_v21 = vld [vmem:[%s13837_s14 + $0xf8] sm:$0xff] }
 0x39a   :  { %9404 = vmatprep.subr.bf16.mxu0 %v9403_v25  ;;  %9436 = vmatprep.subr.bf16.mxu1 %v9435_v29  ;;  %v9453_v19 = vpack.c.bf16 %v858_v18, %v857_v17  ;;  %v9423_v23 = vpack.c.bf16 %v844_v21, %v843_v20  ;;  %v827_v25 = vld [vmem:[%s13837_s14 + $0x70] sm:$0xff] }
 0x39b   :  { %v9425_v28 = vpack.c.bf16 %v828_v26, %v827_v25  ;;  %v859_v29 = vld [vmem:[%s13837_s14 + $0x170] sm:$0xff] }
 0x39d   :  { %9406 = vmatpush3.bf16.msra.mxu0 %v9405_v30  ;;  %9438 = vmatpush3.bf16.msra.mxu1 %v9437_v33  ;;  %v860_v30 = vld [vmem:[%s13837_s14 + $0x178] sm:$0xff]  ;;  %v11960_v33 = vshrl.u32 %v583_v32, 7 }
 0x39e   :  { %9408 = vmatprep.subr.bf16.mxu0 %v9407_v37  ;;  %9440 = vmatprep.subr.bf16.mxu1 %v9439_v41  ;;  %v9457_v31 = vpack.c.bf16 %v860_v30, %v859_v29 }
 0x39f   :  { %13839 = vst [vmem:[#allocation77_spill] sm:$0xff] %v11960_v33  ;;  %v11963_v34 = vsub.s32 0, %v11960_v33  ;;  %v11966_v35 = vsub.s32 2, %v11960_v33  ;;  %v11970_v37 = vsub.s32 1, %v11960_v33  ;;  %v11973_v38 = vsub.s32 3, %v11960_v33 }
 0x3a1   :  { %9410 = vmatpush3.bf16.msra.mxu0 %v9409_v44  ;;  %9442 = vmatpush3.bf16.msra.mxu1 %v9441_v47  ;;  %13840 = vst [vmem:[#allocation78_spill] sm:$0xff] %v11963_v34  ;;  %13841 = vst [vmem:[#allocation79_spill] sm:$0xff] %v11966_v35  ;;  %v586_v39 = vrot.slane %v581_v36, %v11963_v34  ;;  %v594_v40 = vrot.slane %v581_v36, %v11966_v35 }
 0x3a2   :  { %9412 = vmatprep.subr.bf16.mxu0 %v9411_v51  ;;  %9444 = vmatprep.subr.bf16.mxu1 %v9443_v55  ;;  %13842 = vst [vmem:[#allocation80_spill] sm:$0xff] %v11970_v37  ;;  %13843 = vst [vmem:[#allocation81_spill] sm:$0xff] %v11973_v38  ;;  %v590_v41 = vrot.slane %v581_v36, %v11970_v37  ;;  %v598_v44 = vrot.slane %v581_v36, %v11973_v38 }
 0x3a5   :  { %9414 = vmatpush3.bf16.msra.mxu0 %v9413_v56  ;;  %9446 = vmatpush3.bf16.msra.mxu1 %v9445_v59 }
 0x3a6   :  { %9416 = vmatprep.subr.bf16.mxu0 %v9415_v43  ;;  %9448 = vmatprep.subr.bf16.mxu1 %v9447_v2 }
 0x3a9   :  { %9418 = vmatpush3.bf16.msra.mxu0 %v9417_v3  ;;  %9450 = vmatpush3.bf16.msra.mxu1 %v9449_v6 }
 0x3aa   :  { %9420 = vmatprep.subr.bf16.mxu0 %v9419_v10  ;;  %9452 = vmatprep.subr.bf16.mxu1 %v9451_v15 }
 0x3ad   :  { %9422 = vmatpush3.bf16.msra.mxu0 %v9421_v16  ;;  %9454 = vmatpush3.bf16.msra.mxu1 %v9453_v19 }
 0x3ae   :  { %9424 = vmatprep.subr.bf16.mxu0 %v9423_v23  ;;  %9456 = vmatprep.subr.bf16.mxu1 %v9455_v27 }
 0x3b1   :  { %9426 = vmatpush3.bf16.msra.mxu0 %v9425_v28  ;;  %9458 = vmatpush3.bf16.msra.mxu1 %v9457_v31 }
 0x466   :  { %v669_v45 = vpop.f32.mrb[0].mxu0  ;;  %v746_v46 = vpop.f32.mrb[0].mxu1 }
 0x467   :  { %v670_v47 = vadd.f32 %v669_v45, %v586_v39  ;;  %v747_v48 = vadd.f32 %v746_v46, %v594_v40  ;;  %v671_v49 = vpop.f32.mrb[1].mxu0  ;;  %v748_v50 = vpop.f32.mrb[1].mxu1  ;;  %v7641_v46 = vld [vmem:[#allocation6] ss:$0 sm:$0xff] }
 0x468   :  { %v672_v51 = vadd.f32 %v671_v49, %v590_v41  ;;  %v749_v52 = vadd.f32 %v748_v50, %v598_v44 }
 0x469   :  { %v7633_v53 = vmul.f32 -1.442695, %v670_v47  ;;  %v7635_v54 = vmul.f32 -1.442695, %v747_v48 }
 0x46a   :  { %v7634_v55 = vmul.f32 -1.442695, %v672_v51  ;;  %v7636_v56 = vmul.f32 -1.442695, %v749_v52  ;;  %v675_v57 = vpop.f32.mrb[2].mxu0  ;;  %v752_v58 = vpop.f32.mrb[2].mxu1 }
 0x46b   :  { %10556 = vpow2.f32 %v7633_v53  ;;  %v676_v59 = vadd.f32 %v675_v57, %v586_v39  ;;  %v677_v60 = vpop.f32.mrb[3].mxu0  ;;  %v753_v61 = vadd.f32 %v752_v58, %v594_v40  ;;  %v754_v42 = vpop.f32.mrb[3].mxu1 }
 0x46c   :  { %10558 = vpow2.f32 %v7635_v54  ;;  %v678_v43 = vadd.f32 %v677_v60, %v590_v41  ;;  %v755_v62 = vadd.f32 %v754_v42, %v598_v44 }
 0x46d   :  { %10560 = vpow2.f32 %v7634_v55  ;;  %v7637_v63 = vmul.f32 -1.442695, %v676_v59  ;;  %v7639_v1 = vmul.f32 -1.442695, %v753_v61 }
 0x46e   :  { %10562 = vpow2.f32 %v7636_v56  ;;  %v7638_v2 = vmul.f32 -1.442695, %v678_v43  ;;  %v7640_v3 = vmul.f32 -1.442695, %v755_v62 }
 0x46f   :  { %10564 = vpow2.f32 %v7637_v63 }
 0x470   :  { %10566 = vpow2.f32 %v7638_v2  ;;  %v1078_v2 = vld [vmem:[%s13844_s12] sm:$0xff] }
 0x471   :  { %10568 = vpow2.f32 %v7639_v1 }
 0x472   :  { %10570 = vpow2.f32 %v7640_v3  ;;  %v1079_v3 = vld [vmem:[%s13844_s12 + $0x8] sm:$0xff] }
 0x475   :  { %v10557_v4 = vpop.eup %10556 }
 0x476   :  { %v10559_v5 = vpop.eup %10558  ;;  %v781_v6 = vadd.f32 1.0, %v10557_v4  ;;  %v1080_v4 = vld [vmem:[%s13844_s12 + $0x10] sm:$0xff] }
 0x477   :  { %v10561_v7 = vpop.eup %10560  ;;  %v783_v8 = vadd.f32 1.0, %v10559_v5  ;;  %v13724_v5 = vmov 0.0|0.0  }
 0x478   :  { %v10563_v9 = vpop.eup %10562  ;;  %10572 = vrcp.f32 %v781_v6  ;;  %v782_v10 = vadd.f32 1.0, %v10561_v7  ;;  %9459 = vmatprep.subr.bf16.mxu0 %v13724_v5  ;;  %v11990_v6 = vpack.c.bf16 %v1079_v3, %v1078_v2  ;;  %9465 = vmatprep.subr.bf16.mxu1 %v13724_v5 }
 0x479   :  { %v10565_v12 = vpop.eup %10564  ;;  %10574 = vrcp.f32 %v783_v8  ;;  %v784_v13 = vadd.f32 1.0, %v10563_v9 }
 0x47a   :  { %v10567_v14 = vpop.eup %10566  ;;  %10576 = vrcp.f32 %v782_v10  ;;  %v785_v15 = vadd.f32 1.0, %v10565_v12 }
 0x47b   :  { %v10569_v16 = vpop.eup %10568  ;;  %10578 = vrcp.f32 %v784_v13  ;;  %v786_v17 = vadd.f32 1.0, %v10567_v14  ;;  %v7642_v13 = vld [vmem:[#allocation7] ss:$0 sm:$0xff] }
 0x47c   :  { %v10571_v18 = vpop.eup %10570  ;;  %10580 = vrcp.f32 %v785_v15  ;;  %v787_v19 = vadd.f32 1.0, %v10569_v16  ;;  %v7643_v15 = vld [vmem:[#allocation9] ss:$0 sm:$0xff] }
 0x47d   :  { %10582 = vrcp.f32 %v786_v17  ;;  %v788_v20 = vadd.f32 1.0, %v10571_v18 }
 0x47e   :  { %10584 = vrcp.f32 %v787_v19 }
 0x47f   :  { %10586 = vrcp.f32 %v788_v20 }
 0x482   :  { %v10573_v21 = vpop.eup %10572 }
 0x483   :  { %v10575_v22 = vpop.eup %10574  ;;  %v805_v27 = vmul.f32 %v10573_v21, %v670_v47  ;;  %v1085_v21 = vld [vmem:[%s13846_s18] sm:$0xff] }
 0x484   :  { %v10577_v23 = vpop.eup %10576  ;;  %v807_v30 = vmul.f32 %v10575_v22, %v747_v48  ;;  %v1086_v22 = vld [vmem:[%s13846_s18 + $0x8] sm:$0xff] }
 0x485   :  { %v10579_v24 = vpop.eup %10578  ;;  %v806_v25 = vmul.f32 %v10577_v23, %v672_v51  ;;  %v1087_v23 = vld [vmem:[%s13846_s18 + $0x10] sm:$0xff] }
 0x486   :  { %v10581_v26 = vpop.eup %10580  ;;  %v808_v28 = vmul.f32 %v10579_v24, %v749_v52  ;;  %v12011_v24 = vpack.c.bf16 %v1086_v22, %v1085_v21 }
 0x487   :  { %v10583_v29 = vpop.eup %10582  ;;  %948 = vmatprep.mubr.f32.mxu0 %v806_v25  ;;  %v809_v32 = vmul.f32 %v10581_v26, %v676_v59  ;;  %v1088_v25 = vld [vmem:[%s13846_s18 + $0x18] sm:$0xff] }
 0x488   :  { %v10585_v31 = vpop.eup %10584  ;;  %1023 = vmatprep.mubr.f32.mxu1 %v808_v28  ;;  %949 = vmatmul.mubr.f32.vlgmr.msra.gmra.mrb[4].mxu0 %v805_v27  ;;  %v810_v36 = vmul.f32 %v10583_v29, %v678_v43  ;;  %v12015_v27 = vpack.c.bf16 %v1088_v25, %v1087_v23  ;;  %v1089_v29 = vld [vmem:[%s13846_s18 + $0x20] sm:$0xff]  ;;  %v12205_v23 = vld [vmem:[#allocation12] sm:$0x1] }
 0x489   :  { %v10587_v39 = vpop.eup %10586  ;;  %1024 = vmatmul.mubr.f32.vlgmr.msra.gmra.mrb[4].mxu1 %v807_v30  ;;  %v811_v40 = vmul.f32 %v10585_v31, %v753_v61  ;;  %9461 = vmatpush3.bf16.msra.mxu0 %v11990_v6  ;;  %v1090_v30 = vld [vmem:[%s13846_s18 + $0x28] sm:$0xff] }
 0x48a   :  { %v812_v41 = vmul.f32 %v10587_v39, %v755_v62  ;;  %953 = vmatprep.mubr.f32.mxu0 %v810_v36  ;;  %9462 = vmatprep.subr.bf16.mxu0 %v13724_v5  ;;  %v1091_v39 = vld [vmem:[%s13846_s18 + $0x30] sm:$0xff] }
 0x48b   :  { %9467 = vmatpush3.bf16.msra.mxu1 %v12011_v24 }
 0x48c   :  { %954 = vmatmul.mubr.f32.gmra.mrb[6].mxu0 %v809_v32  ;;  %1028 = vmatprep.mubr.f32.mxu1 %v812_v41  ;;  %v12021_v32 = vpack.c.bf16 %v1090_v30, %v1089_v29 }
 0x48d   :  { %1029 = vmatmul.mubr.f32.gmra.mrb[6].mxu1 %v811_v40  ;;  %8421 = vmatprep.mubr.msk.f32.mxu0 %vm11486_vm0, %v13722_v11  ;;  %v1092_v40 = vld [vmem:[%s13846_s18 + $0x38] sm:$0xff] }
 0x48e   :  { %8456 = vmatprep.mubr.msk.f32.mxu1 %vm11486_vm0, %v13722_v11  ;;  %9468 = vmatprep.subr.bf16.mxu1 %v13724_v5  ;;  %v12030_v41 = vpack.c.bf16 %v1092_v40, %v1091_v39 }
 0x48f   :  { %9470 = vmatpush3.bf16.msra.mxu1 %v12015_v27 }
 0x490   :  { %9471 = vmatprep.subr.bf16.mxu1 %v13724_v5 }
 0x493   :  { %9473 = vmatpush3.bf16.msra.mxu1 %v12021_v32 }
 0x494   :  { %9474 = vmatprep.subr.bf16.mxu1 %v13724_v5 }
 0x497   :  { %9476 = vmatpush3.bf16.msra.mxu1 %v12030_v41 }
 0x498   :  { %9477 = vmatprep.subr.bf16.mxu1 %v13724_v5 }
 0x55b   :  { %v7795_v44 = vpop.f32.mrb[4].mxu0 }
 0x55c   :  { %v7833_v45 = vpop.f32.mrb[4].mxu1  ;;  %v7796_v47 = vpop.f32.mrb[5].mxu0 }
 0x55d   :  { %v7797_v49 = vadd.f32 %v7796_v47, %v7795_v44  ;;  %v7834_v48 = vpop.f32.mrb[5].mxu1  ;;  %v1093_v44 = vld [vmem:[%s13846_s18 + $0x40] sm:$0xff]  ;;  %v1095_v47 = vld [vmem:[%s13846_s18 + $0x50] sm:$0xff] }
 0x55e   :  { %v7835_v50 = vadd.f32 %v7834_v48, %v7833_v45  ;;  %v1094_v45 = vld [vmem:[%s13846_s18 + $0x48] sm:$0xff] }
 0x55f   :  { %v951_v51 = vadd.f32 %v7797_v49, %v7641_v46  ;;  %v7798_v52 = vpop.f32.mrb[6].mxu0  ;;  %v1096_v49 = vld [vmem:[%s13846_s18 + $0x58] sm:$0xff] }
 0x560   :  { %v7799_v53 = vpop.f32.mrb[7].mxu0  ;;  %v7836_v54 = vpop.f32.mrb[6].mxu1  ;;  %v12049_v48 = vpack.c.bf16 %v1096_v49, %v1095_v47 }
 0x561   :  { %v1026_v55 = vadd.f32 %v7835_v50, %v951_v51  ;;  %v7800_v56 = vadd.f32 %v7799_v53, %v7798_v52  ;;  %v7837_v57 = vpop.f32.mrb[7].mxu1  ;;  %v1097_v50 = vld [vmem:[%s13846_s18 + $0x60] sm:$0xff]  ;;  %v1098_v51 = vld [vmem:[%s13846_s18 + $0x68] sm:$0xff]  ;;  %v1099_v53 = vld [vmem:[%s13846_s18 + $0x70] sm:$0xff] }
 0x562   :  { %v7838_v58 = vadd.f32 %v7837_v57, %v7836_v54  ;;  %v12057_v52 = vpack.c.bf16 %v1098_v51, %v1097_v50  ;;  %v1100_v54 = vld [vmem:[%s13846_s18 + $0x78] sm:$0xff] }
 0x563   :  { %v1034_v59 = vmul.f32 0.5, %v1026_v55  ;;  %v956_v60 = vadd.f32 %v7800_v56, %v7641_v46  ;;  %v12041_v46 = vpack.c.bf16 %v1094_v45, %v1093_v44  ;;  %v12072_v55 = vpack.c.bf16 %v1100_v54, %v1099_v53  ;;  %v12078_v56 = vld [vmem:[#allocation10] sm:$0x1] }
 0x565   :  { %v11980_v61 = vadd.f32 %v1034_v59, %v11813_v0  ;;  %v11982_v42 = vadd.f32 %v7838_v58, %v956_v60  ;;  %v1081_v0 = vld [vmem:[%s13844_s12 + $0x18] sm:$0xff]  ;;  %9479 = vmatpush3.bf16.msra.mxu1 %v12041_v46 }
 0x566   :  { %v11999_v7 = vpack.c.bf16 %v1081_v0, %v1080_v4  ;;  %9480 = vmatprep.subr.bf16.mxu1 %v13724_v5 }
 0x567   :  { %13845 = vst [vmem:[#allocation82_spill] sm:$0xff] %v11980_v61  ;;  %1038 = vadd.xlane.f32.xlu0 %v11980_v61 }
 0x568   :  { %9464 = vmatpush3.bf16.msra.mxu0 %v11999_v7 }
 0x569   :  { %9489 = vmatprep.subr.bf16.mxu0 %v13724_v5  ;;  %9482 = vmatpush3.bf16.msra.mxu1 %v12049_v48 }
 0x56a   :  { %9483 = vmatprep.subr.bf16.mxu1 %v13724_v5 }
 0x56d   :  { %9485 = vmatpush3.bf16.msra.mxu1 %v12057_v52 }
 0x56e   :  { %9486 = vmatprep.subr.bf16.mxu1 %v13724_v5 }
 0x571   :  { %9488 = vmatpush3.bf16.msra.mxu1 %v12072_v55 }
 0x572   :  { %9543 = vmatprep.subr.bf16.mxu1 %v13724_v5 }
 0x5f4   :  { %v1039_v43 = vpop.xlane.xlu0 %1038 }
 0x5f5   :  { %v1042_v62 = vmul.f32 0.0078125, %v1039_v43 }
 0x5f7   :  { %v1044_v63 = vsub.f32 %v11980_v61, %v1042_v62 }
 0x5f9   :  { %v1046_v1 = vmul.f32 %v1044_v63, %v1044_v63 }
 0x5fb   :  { %1048 = vadd.xlane.f32.xlu1 %v1046_v1 }
 0x688   :  { %v1049_v8 = vpop.xlane.xlu1 %1048 }
 0x689   :  { %v1052_v9 = vmul.f32 0.0078125, %v1049_v8 }
 0x68b   :  { %v1054_v10 = vadd.f32 1e-05, %v1052_v9 }
 0x68d   :  { %10588 = vrsqrt.f32 %v1054_v10 }
 0x697   :  { %v10589_v12 = vpop.eup %10588 }
 0x698   :  { %v1058_v14 = vmul.f32 %v10589_v12, %v1044_v63 }
 0x69a   :  { %v1067_v16 = vmul.f32 %v7642_v13, %v1058_v14 }
 0x69c   :  { %v12004_v17 = vadd.f32 %v7643_v15, %v1067_v16 }
 0x69e   :  { %v1167_v18 = vrot.slane %v12004_v17, 4 }
 0x6a0   :  { %v1168_v19 = vadd.f32 %v1167_v18, %v12004_v17 }
 0x6a2   :  { %v1169_v20 = vrot.slane %v1168_v19, 2 }
 0x6a4   :  { %v1170_v26 = vadd.f32 %v1169_v20, %v1168_v19 }
 0x6a6   :  { %v1171_v28 = vrot.slane %v1170_v26, 1 }
 0x6a8   :  { %v1172_v31 = vadd.f32 %v1171_v28, %v1170_v26  ;;  %v12208_v26 = vld [vmem:[#allocation13] sm:$0x1] }
 0x6aa   :  { %v1174_v36 = vmul.f32 0.125, %v1172_v31 }
 0x6ac   :  { %1674 = vrot.lane.b32.xlu1 %v1174_v36, %s11487_s22  ;;  %1423 = vrot.lane.b32.xlu0 %v1174_v36, %s11488_s23 }
 0x6ad   :  { %8422 = vmatmul.mubr.msk.f32.vlgmr.msra.gmra.mrb[8].mxu0 %vm1175_vm1, %v1174_v36 }
 0x6ae   :  { %9491 = vmatpush3.bf16.msra.mxu0 %v12011_v24  ;;  %8491 = vmatprep.mubr.msk.f32.mxu0 %vm11486_vm0, %v13722_v11 }
 0x6af   :  { %9492 = vmatprep.subr.bf16.mxu0 %v13724_v5 }
 0x6b0   :  { %1924 = vrot.lane.b32.xlu1 %v1174_v36, %s11467_s6 }
 0x6b2   :  { %9494 = vmatpush3.bf16.msra.mxu0 %v12015_v27 }
 0x6b3   :  { %9495 = vmatprep.subr.bf16.mxu0 %v13724_v5 }
 0x6b6   :  { %9497 = vmatpush3.bf16.msra.mxu0 %v12021_v32 }
 0x6b7   :  { %9498 = vmatprep.subr.bf16.mxu0 %v13724_v5 }
 0x6ba   :  { %9500 = vmatpush3.bf16.msra.mxu0 %v12030_v41 }
 0x6bb   :  { %9501 = vmatprep.subr.bf16.mxu0 %v13724_v5 }
 0x6be   :  { %9503 = vmatpush3.bf16.msra.mxu0 %v12041_v46 }
 0x6bf   :  { %9504 = vmatprep.subr.bf16.mxu0 %v13724_v5 }
 0x6c2   :  { %9506 = vmatpush3.bf16.msra.mxu0 %v12049_v48 }
 0x6c3   :  { %9507 = vmatprep.subr.bf16.mxu0 %v13724_v5 }
 0x6c6   :  { %9509 = vmatpush3.bf16.msra.mxu0 %v12057_v52 }
 0x6c7   :  { %9510 = vmatprep.subr.bf16.mxu0 %v13724_v5 }
 0x6ca   :  { %9512 = vmatpush3.bf16.msra.mxu0 %v12072_v55 }
 0x6cb   :  { %9513 = vmatprep.subr.bf16.mxu0 %v13724_v5 }
 0x71e   :  { %v1424_v1 = vpop.permute.xlu0 %1423  ;;  %v1675_v9 = vpop.permute.xlu1 %1674 }
 0x722   :  { %v1925_v19 = vpop.permute.xlu1 %1924 }
 0x780   :  { %v1245_v57 = vpop.f32.mrb[8].mxu0 }
 0x781   :  { %v1246_v58 = vadd.f32 %v1245_v57, %v12078_v56  ;;  %v8423_v59 = vpop.f32.mrb[9].mxu0 }
 0x783   :  { %8457 = vmatmul.mubr.f32.vlgmr.msra.gmra.mrb[8].mxu1 %v1246_v58 }
 0x784   :  { %9545 = vmatpush3.bf16.msra.mxu1 %v12011_v24  ;;  %8572 = vmatprep.mubr.msk.f32.mxu1 %vm11486_vm0, %v13722_v11 }
 0x785   :  { %9546 = vmatprep.subr.bf16.mxu1 %v13724_v5 }
 0x788   :  { %9548 = vmatpush3.bf16.msra.mxu1 %v12015_v27 }
 0x789   :  { %9549 = vmatprep.subr.bf16.mxu1 %v13724_v5 }
 0x78c   :  { %9551 = vmatpush3.bf16.msra.mxu1 %v12021_v32 }
 0x78d   :  { %9552 = vmatprep.subr.bf16.mxu1 %v13724_v5 }
 0x790   :  { %9554 = vmatpush3.bf16.msra.mxu1 %v12030_v41 }
 0x791   :  { %9555 = vmatprep.subr.bf16.mxu1 %v13724_v5 }
 0x794   :  { %9557 = vmatpush3.bf16.msra.mxu1 %v12041_v46 }
 0x795   :  { %9558 = vmatprep.subr.bf16.mxu1 %v13724_v5 }
 0x798   :  { %9560 = vmatpush3.bf16.msra.mxu1 %v12049_v48 }
 0x799   :  { %9561 = vmatprep.subr.bf16.mxu1 %v13724_v5 }
 0x79c   :  { %9563 = vmatpush3.bf16.msra.mxu1 %v12057_v52 }
 0x79d   :  { %9564 = vmatprep.subr.bf16.mxu1 %v13724_v5 }
 0x7a0   :  { %9566 = vmatpush3.bf16.msra.mxu1 %v12072_v55 }
 0x7a1   :  { %9573 = vmatprep.subr.bf16.mxu1 %v13724_v5 }
 0x856   :  { %v1315_v60 = vpop.f32.mrb[8].mxu1 }
 0x857   :  { %v12099_v43 = vsub.f32 %v1246_v58, %v1315_v60  ;;  %v8458_v62 = vpop.f32.mrb[9].mxu1 }
 0x859   :  { %v1320_v63 = vmul.f32 %v12099_v43, %v12099_v43 }
 0x85b   :  { %8492 = vmatmul.mubr.f32.vlgmr.msra.gmra.mrb[10].mxu0 %v1320_v63 }
 0x85c   :  { %9515 = vmatpush3.bf16.msra.mxu0 %v11990_v6  ;;  %8502 = vmatprep.mubr.msk.f32.mxu0 %vm11486_vm0, %v13722_v11 }
 0x85d   :  { %9516 = vmatprep.subr.bf16.mxu0 %v13724_v5 }
 0x860   :  { %9518 = vmatpush3.bf16.msra.mxu0 %v11999_v7 }
 0x861   :  { %9519 = vmatprep.subr.bf16.mxu0 %v13724_v5 }
 0x863   :  { %8503 = vmatmul.mubr.msk.f32.vlgmr.msra.gmra.mrb[12].mxu0 %vm1175_vm1, %v1424_v1 }
 0x864   :  { %9521 = vmatpush3.bf16.msra.mxu0 %v12011_v24  ;;  %8537 = vmatprep.mubr.msk.f32.mxu0 %vm11486_vm0, %v13722_v11 }
 0x865   :  { %9522 = vmatprep.subr.bf16.mxu0 %v13724_v5 }
 0x868   :  { %9524 = vmatpush3.bf16.msra.mxu0 %v12015_v27 }
 0x869   :  { %9525 = vmatprep.subr.bf16.mxu0 %v13724_v5 }
 0x86c   :  { %9527 = vmatpush3.bf16.msra.mxu0 %v12021_v32 }
 0x86d   :  { %9528 = vmatprep.subr.bf16.mxu0 %v13724_v5 }
 0x870   :  { %9530 = vmatpush3.bf16.msra.mxu0 %v12030_v41 }
 0x871   :  { %9531 = vmatprep.subr.bf16.mxu0 %v13724_v5 }
 0x874   :  { %9533 = vmatpush3.bf16.msra.mxu0 %v12041_v46 }
 0x875   :  { %9534 = vmatprep.subr.bf16.mxu0 %v13724_v5 }
 0x878   :  { %9536 = vmatpush3.bf16.msra.mxu0 %v12049_v48 }
 0x879   :  { %9537 = vmatprep.subr.bf16.mxu0 %v13724_v5 }
 0x87c   :  { %9539 = vmatpush3.bf16.msra.mxu0 %v12057_v52 }
 0x87d   :  { %9540 = vmatprep.subr.bf16.mxu0 %v13724_v5 }
 0x880   :  { %9542 = vmatpush3.bf16.msra.mxu0 %v12072_v55 }
 0x881   :  { %9567 = vmatprep.subr.bf16.mxu0 %v13724_v5 }
 0x92e   :  { %v12128_v2 = vpop.f32.mrb[10].mxu0 }
 0x92f   :  { %v8493_v3 = vpop.f32.mrb[11].mxu0  ;;  %v1388_v20 = vadd.f32 1e-05, %v12128_v2 }
 0x931   :  { %10590 = vrsqrt.f32 %v1388_v20 }
 0x936   :  { %v1493_v4 = vpop.f32.mrb[12].mxu0 }
 0x937   :  { %v1494_v0 = vadd.f32 %v1493_v4, %v12078_v56  ;;  %v8504_v8 = vpop.f32.mrb[13].mxu0 }
 0x939   :  { %8538 = vmatmul.mubr.f32.vlgmr.msra.gmra.mrb[14].mxu0 %v1494_v0 }
 0x93a   :  { %9569 = vmatpush3.bf16.msra.mxu0 %v11990_v6  ;;  %8583 = vmatprep.mubr.msk.f32.mxu0 %vm11486_vm0, %v13722_v11 }
 0x93b   :  { %9570 = vmatprep.subr.bf16.mxu0 %v13724_v5  ;;  %v10591_v21 = vpop.eup %10590 }
 0x93c   :  { %v1392_v22 = vmul.f32 %v10591_v21, %v12099_v43 }
 0x93e   :  { %9572 = vmatpush3.bf16.msra.mxu0 %v11999_v7  ;;  %v1393_v25 = vmul.f32 %v1392_v22, %v12205_v23 }
 0x93f   :  { %9597 = vmatprep.subr.bf16.mxu0 %v13724_v5 }
 0x940   :  { %v12211_v28 = vadd.f32 %v1393_v25, %v12208_v26 }
 0x941   :  { %8584 = vmatmul.mubr.msk.f32.vlgmr.msra.gmra.mrb[16].mxu0 %vm1175_vm1, %v1675_v9 }
 0x942   :  { %9599 = vmatpush3.bf16.msra.mxu0 %v12011_v24  ;;  %8653 = vmatprep.mubr.msk.f32.mxu0 %vm11486_vm0, %v13722_v11  ;;  %v12214_v29 = vmul.f32 0.70710677, %v12211_v28 }
 0x943   :  { %9600 = vmatprep.subr.bf16.mxu0 %v13724_v5 }
 0x944   :  { %v1399_v30 = vand.u32 2147483647, %v12214_v29  ;;  %vm1397_vm2 = vcmp.ge.f32.partialorder %v12214_v29, 0.0 }
 0x946   :  { %9602 = vmatpush3.bf16.msra.mxu0 %v12015_v27  ;;  %v1400_v31 = vmul.f32 0.3275911, %v1399_v30  ;;  %v1413_v62 = vsub.f32 0.0, %v1399_v30 }
 0x947   :  { %9603 = vmatprep.subr.bf16.mxu0 %v13724_v5 }
 0x948   :  { %v1401_v36 = vadd.f32 1.0, %v1400_v31  ;;  %v1414_v2 = vmul.f32 %v1413_v62, %v1399_v30  ;;  %v1106_v62 = vld [vmem:[#allocation16 + $0x20] sm:$0xff] }
 0x94a   :  { %9605 = vmatpush3.bf16.msra.mxu0 %v12021_v32  ;;  %10592 = vrcp.f32 %v1401_v36  ;;  %v1415_v9 = vmul.f32 1.442695, %v1414_v2 }
 0x94b   :  { %9606 = vmatprep.subr.bf16.mxu0 %v13724_v5 }
 0x94e   :  { %9608 = vmatpush3.bf16.msra.mxu0 %v12030_v41 }
 0x94f   :  { %9609 = vmatprep.subr.bf16.mxu0 %v13724_v5 }
 0x952   :  { %9611 = vmatpush3.bf16.msra.mxu0 %v12041_v46 }
 0x953   :  { %9612 = vmatprep.subr.bf16.mxu0 %v13724_v5 }
 0x954   :  { %v10593_v45 = vpop.eup %10592 }
 0x955   :  { %v1404_v49 = vmul.f32 1.0614054, %v10593_v45 }
 0x956   :  { %9614 = vmatpush3.bf16.msra.mxu0 %v12049_v48 }
 0x957   :  { %9615 = vmatprep.subr.bf16.mxu0 %v13724_v5  ;;  %v1405_v53 = vadd.f32 -1.4531521, %v1404_v49 }
 0x959   :  { %v1406_v58 = vmul.f32 %v10593_v45, %v1405_v53  ;;  %v13726_v53 = vmov -1.0  }
 0x95a   :  { %9617 = vmatpush3.bf16.msra.mxu0 %v12057_v52 }
 0x95b   :  { %9618 = vmatprep.subr.bf16.mxu0 %v13724_v5  ;;  %v1407_v43 = vadd.f32 1.4214138, %v1406_v58  ;;  %v1398_v58 = vsel %vm1397_vm2, 1.0, %v13726_v53 }
 0x95d   :  { %v1408_v1 = vmul.f32 %v10593_v45, %v1407_v43  ;;  %v1103_v43 = vld [vmem:[#allocation16 + $0x8] sm:$0xff] }
 0x95e   :  { %9620 = vmatpush3.bf16.msra.mxu0 %v12072_v55 }
 0x95f   :  { %9627 = vmatprep.subr.bf16.mxu0 %v13724_v5  ;;  %v1409_v8 = vadd.f32 -0.28449672, %v1408_v1 }
 0xa0c   :  { %v1563_v10 = vpop.f32.mrb[14].mxu0 }
 0xa0d   :  { %v12156_v12 = vsub.f32 %v1494_v0, %v1563_v10  ;;  %v8539_v13 = vpop.f32.mrb[15].mxu0 }
 0xa0e   :  { %v1410_v13 = vmul.f32 %v10593_v45, %v1409_v8  ;;  %v1102_v8 = vld [vmem:[#allocation16] sm:$0xff] }
 0xa0f   :  { %v1568_v14 = vmul.f32 %v12156_v12, %v12156_v12 }
 0xa10   :  { %v1411_v20 = vadd.f32 0.2548296, %v1410_v13 }
 0xa11   :  { %8573 = vmatmul.mubr.f32.vlgmr.msra.gmra.mrb[10].mxu1 %v1568_v14 }
 0xa12   :  { %9575 = vmatpush3.bf16.msra.mxu1 %v12011_v24  ;;  %8618 = vmatprep.mubr.msk.f32.mxu1 %vm11486_vm0, %v13722_v11  ;;  %v1412_v30 = vmul.f32 %v10593_v45, %v1411_v20 }
 0xa13   :  { %9576 = vmatprep.subr.bf16.mxu1 %v13724_v5 }
 0xa14   :  { %v1744_v15 = vpop.f32.mrb[16].mxu0 }
 0xa15   :  { %v8585_v16 = vpop.f32.mrb[17].mxu0  ;;  %v1745_v18 = vadd.f32 %v1744_v15, %v12078_v56 }
 0xa16   :  { %9578 = vmatpush3.bf16.msra.mxu1 %v12015_v27 }
 0xa17   :  { %9579 = vmatprep.subr.bf16.mxu1 %v13724_v5 }
 0xa1a   :  { %9581 = vmatpush3.bf16.msra.mxu1 %v12021_v32 }
 0xa1b   :  { %9582 = vmatprep.subr.bf16.mxu1 %v13724_v5 }
 0xa1e   :  { %9584 = vmatpush3.bf16.msra.mxu1 %v12030_v41 }
 0xa1f   :  { %9585 = vmatprep.subr.bf16.mxu1 %v13724_v5 }
 0xa22   :  { %9587 = vmatpush3.bf16.msra.mxu1 %v12041_v46 }
 0xa23   :  { %9588 = vmatprep.subr.bf16.mxu1 %v13724_v5 }
 0xa26   :  { %9590 = vmatpush3.bf16.msra.mxu1 %v12049_v48 }
 0xa27   :  { %9591 = vmatprep.subr.bf16.mxu1 %v13724_v5 }
 0xa2a   :  { %9593 = vmatpush3.bf16.msra.mxu1 %v12057_v52 }
 0xa2b   :  { %9594 = vmatprep.subr.bf16.mxu1 %v13724_v5 }
 0xa2e   :  { %9596 = vmatpush3.bf16.msra.mxu1 %v12072_v55 }
 0xa2f   :  { %9621 = vmatprep.subr.bf16.mxu1 %v13724_v5 }
 0xa31   :  { %8619 = vmatmul.mubr.f32.vlgmr.msra.gmra.mrb[12].mxu1 %v1745_v18 }
 0xa32   :  { %9623 = vmatpush3.bf16.msra.mxu1 %v11990_v6  ;;  %8664 = vmatprep.mubr.msk.f32.mxu1 %vm11486_vm0, %v13722_v11 }
 0xa33   :  { %9624 = vmatprep.subr.bf16.mxu1 %v13724_v5 }
 0xa36   :  { %9626 = vmatpush3.bf16.msra.mxu1 %v11999_v7 }
 0xa37   :  { %9651 = vmatprep.subr.bf16.mxu1 %v13724_v5 }
 0xa39   :  { %8665 = vmatmul.mubr.msk.f32.vlgmr.msra.gmra.mrb[14].mxu1 %vm1175_vm1, %v1925_v19 }
 0xa3a   :  { %9653 = vmatpush3.bf16.msra.mxu1 %v12011_v24  ;;  %8734 = vmatprep.mubr.msk.f32.mxu1 %vm11486_vm0, %v13722_v11 }
 0xa3b   :  { %9654 = vmatprep.subr.bf16.mxu1 %v13724_v5 }
 0xa3e   :  { %9656 = vmatpush3.bf16.msra.mxu1 %v12015_v27 }
 0xa3f   :  { %9657 = vmatprep.subr.bf16.mxu1 %v13724_v5 }
 0xa42   :  { %9659 = vmatpush3.bf16.msra.mxu1 %v12021_v32 }
 0xa43   :  { %9660 = vmatprep.subr.bf16.mxu1 %v13724_v5 }
 0xa46   :  { %9662 = vmatpush3.bf16.msra.mxu1 %v12030_v41 }
 0xa47   :  { %9663 = vmatprep.subr.bf16.mxu1 %v13724_v5 }
 0xa4a   :  { %9665 = vmatpush3.bf16.msra.mxu1 %v12041_v46 }
 0xa4b   :  { %9666 = vmatprep.subr.bf16.mxu1 %v13724_v5 }
 0xa4e   :  { %9668 = vmatpush3.bf16.msra.mxu1 %v12049_v48 }
 0xa4f   :  { %9669 = vmatprep.subr.bf16.mxu1 %v13724_v5 }
 0xa52   :  { %9671 = vmatpush3.bf16.msra.mxu1 %v12057_v52 }
 0xa53   :  { %9672 = vmatprep.subr.bf16.mxu1 %v13724_v5 }
 0xa56   :  { %9674 = vmatpush3.bf16.msra.mxu1 %v12072_v55 }
 0xae4   :  { %v1635_v39 = vpop.f32.mrb[10].mxu1 }
 0xae5   :  { %v1636_v40 = vadd.f32 1e-05, %v1635_v39  ;;  %v8574_v44 = vpop.f32.mrb[11].mxu1 }
 0xae7   :  { %10594 = vrsqrt.f32 %v1636_v40 }
 0xaf1   :  { %v10595_v47 = vpop.eup %10594 }
 0xaf2   :  { %v1640_v50 = vmul.f32 %v10595_v47, %v12156_v12 }
 0xaf4   :  { %v1641_v51 = vmul.f32 %v1640_v50, %v12205_v23 }
 0xaf6   :  { %v12220_v54 = vadd.f32 %v1641_v51, %v12208_v26 }
 0xaf8   :  { %v12223_v57 = vmul.f32 0.70710677, %v12220_v54 }
 0xafa   :  { %v1647_v59 = vand.u32 2147483647, %v12223_v57  ;;  %vm1645_vm3 = vcmp.ge.f32.partialorder %v12223_v57, 0.0  ;;  %v12253_v57 = vpack.c.bf16 %v1106_v62, %v1103_v43 }
 0xafc   :  { %v1648_v60 = vmul.f32 0.3275911, %v1647_v59  ;;  %v1661_v10 = vsub.f32 0.0, %v1647_v59 }
 0xafe   :  { %v1649_v63 = vadd.f32 1.0, %v1648_v60  ;;  %v1662_v15 = vmul.f32 %v1661_v10, %v1647_v59  ;;  %v1643_v10 = vmul.f32 0.5, %v12220_v54  ;;  %v1111_v54 = vld [vmem:[#allocation16 + $0x48] sm:$0xff] }
 0xb00   :  { %10596 = vrcp.f32 %v1649_v63  ;;  %v1663_v22 = vmul.f32 1.442695, %v1662_v15  ;;  %v1646_v63 = vsel %vm1645_vm3, 1.0, %v13726_v53  ;;  %v1112_v15 = vld [vmem:[#allocation16 + $0x50] sm:$0xff] }
 0xb01   :  { %10598 = vpow2.f32 %v1415_v9  ;;  %v1105_v9 = vld [vmem:[#allocation16 + $0x18] sm:$0xff] }
 0xb02   :  { %10600 = vpow2.f32 %v1663_v22  ;;  %v12258_v20 = vpack.c.bf16 %v1105_v9, %v1102_v8  ;;  %v1108_v22 = vld [vmem:[#allocation16 + $0x30] sm:$0xff] }
 0xb04   :  { %v1814_v3 = vpop.f32.mrb[12].mxu1 }
 0xb05   :  { %v12226_v4 = vsub.f32 %v1745_v18, %v1814_v3  ;;  %v8620_v0 = vpop.f32.mrb[13].mxu1  ;;  %v12249_v3 = vld [vmem:[#allocation15] sm:$0xf] }
 0xb06   :  { %v1395_v0 = vmul.f32 0.5, %v12211_v28  ;;  %v13721_v13 = vrot.slane %v12249_v3, 1 }
 0xb07   :  { %v1819_v12 = vmul.f32 %v12226_v4, %v12226_v4 }
 0xb09   :  { %8654 = vmatmul.mubr.f32.vlgmr.msra.gmra.mrb[18].mxu0 %v1819_v12 }
 0xb0a   :  { %v10597_v14 = vpop.eup %10596  ;;  %9629 = vmatpush3.bf16.msra.mxu0 %v12011_v24  ;;  %8699 = vmatprep.mubr.msk.f32.mxu0 %vm11486_vm0, %v13722_v11 }
 0xb0b   :  { %9630 = vmatprep.subr.bf16.mxu0 %v13724_v5  ;;  %v1652_v16 = vmul.f32 1.0614054, %v10597_v14  ;;  %v10599_v39 = vpop.eup %10598 }
 0xb0c   :  { %v1994_v18 = vpop.f32.mrb[14].mxu1  ;;  %v1417_v40 = vmul.f32 %v10599_v39, %v1412_v30  ;;  %v10601_v51 = vpop.eup %10600  ;;  %v1115_v30 = vld [vmem:[#allocation16 + $0x68] sm:$0xff] }
 0xb0d   :  { %v8666_v19 = vpop.f32.mrb[15].mxu1  ;;  %v1653_v21 = vadd.f32 -1.4531521, %v1652_v16  ;;  %v12261_v28 = vadd.f32 %v1994_v18, %v12078_v56  ;;  %v12271_v56 = vpack.c.bf16 %v1111_v54, %v1108_v22  ;;  %v1138_v22 = vld [vmem:[#allocation16 + $0x120] sm:$0xff]  ;;  %v1141_v54 = vld [vmem:[#allocation16 + $0x138] sm:$0xff] }
 0xb0e   :  { %9632 = vmatpush3.bf16.msra.mxu0 %v12015_v27  ;;  %v1418_v49 = vsub.f32 1.0, %v1417_v40  ;;  %v1114_v40 = vld [vmem:[#allocation16 + $0x60] sm:$0xff] }
 0xb0f   :  { %9633 = vmatprep.subr.bf16.mxu0 %v13724_v5  ;;  %v1654_v25 = vmul.f32 %v10597_v14, %v1653_v21 }
 0xb10   :  { %v1419_v59 = vmul.f32 %v1418_v49, %v1398_v58  ;;  %v1121_v49 = vld [vmem:[#allocation16 + $0x98] sm:$0xff]  ;;  %v1120_v58 = vld [vmem:[#allocation16 + $0x90] sm:$0xff] }
 0xb11   :  { %v1655_v31 = vadd.f32 1.4214138, %v1654_v25 }
 0xb12   :  { %9635 = vmatpush3.bf16.msra.mxu0 %v12021_v32  ;;  %v1420_v1 = vadd.f32 1.0, %v1419_v59  ;;  %v1123_v59 = vld [vmem:[#allocation16 + $0xa8] sm:$0xff] }
 0xb13   :  { %9636 = vmatprep.subr.bf16.mxu0 %v13724_v5  ;;  %v1656_v36 = vmul.f32 %v10597_v14, %v1655_v31  ;;  %v1118_v31 = vld [vmem:[#allocation16 + $0x80] sm:$0xff]  ;;  %v12287_v43 = vpack.c.bf16 %v1123_v59, %v1120_v58 }
 0xb14   :  { %v1421_v16 = vmul.f32 %v1420_v1, %v1395_v0  ;;  %v12275_v18 = vpack.c.bf16 %v1118_v31, %v1115_v30  ;;  %v1129_v1 = vld [vmem:[#allocation16 + $0xd8] sm:$0xff]  ;;  %v1136_v0 = vld [vmem:[#allocation16 + $0x110] sm:$0xff]  ;;  %v12305_v31 = vpack.c.bf16 %v1141_v54, %v1138_v22 }
 0xb15   :  { %v1657_v44 = vadd.f32 -0.28449672, %v1656_v36  ;;  %v1148_v30 = vld [vmem:[#allocation16 + $0x170] sm:$0xff] }
 0xb16   :  { %9638 = vmatpush3.bf16.msra.mxu0 %v12030_v41  ;;  %v1422_v36 = vadd.f32 %v1421_v16, %v12249_v3 }
 0xb17   :  { %9639 = vmatprep.subr.bf16.mxu0 %v13724_v5  ;;  %v1658_v47 = vmul.f32 %v10597_v14, %v1657_v44  ;;  %v1117_v44 = vld [vmem:[#allocation16 + $0x78] sm:$0xff] }
 0xb19   :  { %v1659_v50 = vadd.f32 0.2548296, %v1658_v47 }
 0xb1a   :  { %9641 = vmatpush3.bf16.msra.mxu0 %v12041_v46 }
 0xb1b   :  { %9642 = vmatprep.subr.bf16.mxu0 %v13724_v5  ;;  %v1660_v45 = vmul.f32 %v10597_v14, %v1659_v50  ;;  %v1109_v14 = vld [vmem:[#allocation16 + $0x38] sm:$0xff]  ;;  %v1124_v50 = vld [vmem:[#allocation16 + $0xb0] sm:$0xff] }
 0xb1c   :  { %v12264_v21 = vpack.c.bf16 %v1112_v15, %v1109_v14  ;;  %v1139_v14 = vld [vmem:[#allocation16 + $0x128] sm:$0xff]  ;;  %v1142_v15 = vld [vmem:[#allocation16 + $0x140] sm:$0xff] }
 0xb1d   :  { %v1665_v60 = vmul.f32 %v10601_v51, %v1660_v45  ;;  %v12281_v45 = vpack.c.bf16 %v1117_v44, %v1114_v40  ;;  %v12284_v51 = vpack.c.bf16 %v1124_v50, %v1121_v49  ;;  %v1147_v40 = vld [vmem:[#allocation16 + $0x168] sm:$0xff] }
 0xb1e   :  { %9644 = vmatpush3.bf16.msra.mxu0 %v12049_v48 }
 0xb1f   :  { %9645 = vmatprep.subr.bf16.mxu0 %v13724_v5  ;;  %v1666_v29 = vsub.f32 1.0, %v1665_v60  ;;  %v1127_v60 = vld [vmem:[#allocation16 + $0xc8] sm:$0xff] }
 0xb21   :  { %v1667_v2 = vmul.f32 %v1666_v29, %v1646_v63  ;;  %v1130_v29 = vld [vmem:[#allocation16 + $0xe0] sm:$0xff] }
 0xb22   :  { %9647 = vmatpush3.bf16.msra.mxu0 %v12057_v52  ;;  %v12290_v62 = vpack.c.bf16 %v1130_v29, %v1127_v60  ;;  %v1126_v63 = vld [vmem:[#allocation16 + $0xc0] sm:$0xff] }
 0xb23   :  { %9648 = vmatprep.subr.bf16.mxu0 %v13724_v5  ;;  %v1668_v12 = vadd.f32 1.0, %v1667_v2  ;;  %v1133_v2 = vld [vmem:[#allocation16 + $0xf8] sm:$0xff]  ;;  %v12293_v8 = vpack.c.bf16 %v1129_v1, %v1126_v63 }
 0xb24   :  { %v12296_v9 = vpack.c.bf16 %v1136_v0, %v1133_v2 }
 0xb25   :  { %v1669_v19 = vmul.f32 %v1668_v12, %v1643_v10  ;;  %v1132_v10 = vld [vmem:[#allocation16 + $0xf0] sm:$0xff]  ;;  %v1135_v12 = vld [vmem:[#allocation16 + $0x108] sm:$0xff] }
 0xb26   :  { %9650 = vmatpush3.bf16.msra.mxu0 %v12072_v55  ;;  %v12299_v16 = vpack.c.bf16 %v1135_v12, %v1132_v10 }
 0xb27   :  { %9676 = vmatprep.subr.bf16.mxu0 %v12253_v57  ;;  %v1673_v25 = vadd.f32 %v13721_v13, %v1669_v19  ;;  %v12302_v19 = vpack.c.bf16 %v1142_v15, %v1139_v14 }
 0xb29   :  { %8700 = vmatmul.mubr.f32.vlgmr.msra.gmra.mrb[20].mxu0 %v12261_v28  ;;  %v2175_v39 = vrot.slane %v1673_v25, 7  ;;  %v1145_v25 = vld [vmem:[#allocation16 + $0x158] sm:$0xff] }
 0xb2a   :  { %9678 = vmatpush1.bf16.msra.mxu0 %v12258_v20  ;;  %2253 = vmatprep.mubr.f32.mxu0 %v13722_v11 }
 0xb2b   :  { %9680 = vmatprep.subr.bf16.mxu0 %v12264_v21  ;;  %v12278_v47 = vsel %vm2183_vm4, %v1422_v36, %v2175_v39  ;;  %v12308_v36 = vpack.c.bf16 %v1148_v30, %v1145_v25  ;;  %v1144_v39 = vld [vmem:[#allocation16 + $0x150] sm:$0xff] }
 0xb2c   :  { %v12311_v44 = vpack.c.bf16 %v1147_v40, %v1144_v39 }
 0xb2e   :  { %9682 = vmatpush1.bf16.msra.mxu0 %v12271_v56 }
 0xb2f   :  { %9684 = vmatprep.subr.bf16.mxu0 %v12275_v18 }
 0xb32   :  { %9686 = vmatpush1.bf16.msra.mxu0 %v12281_v45 }
 0xb33   :  { %9688 = vmatprep.subr.bf16.mxu0 %v12284_v51 }
 0xb36   :  { %9690 = vmatpush1.bf16.msra.mxu0 %v12287_v43 }
 0xb37   :  { %9692 = vmatprep.subr.bf16.mxu0 %v12290_v62 }
 0xb3a   :  { %9694 = vmatpush1.bf16.msra.mxu0 %v12293_v8 }
 0xb3b   :  { %9696 = vmatprep.subr.bf16.mxu0 %v12296_v9 }
 0xb3e   :  { %9698 = vmatpush1.bf16.msra.mxu0 %v12299_v16 }
 0xb3f   :  { %9700 = vmatprep.subr.bf16.mxu0 %v12302_v19 }
 0xb42   :  { %9702 = vmatpush1.bf16.msra.mxu0 %v12305_v31 }
 0xb43   :  { %9704 = vmatprep.subr.bf16.mxu0 %v12308_v36 }
 0xb46   :  { %9706 = vmatpush1.bf16.msra.mxu0 %v12311_v44 }
 0xb49   :  { %2254 = vmatmul.mubr.f32.vlgmr.msra.gmra.mrb[22].mxu0 %v12004_v17 }
 0xb4a   :  { %2259 = vmatprep.mubr.f32.mxu0 %v13722_v11 }
 0xbdc   :  { %v1886_v49 = vpop.f32.mrb[18].mxu0 }
 0xbdd   :  { %v1887_v50 = vadd.f32 1e-05, %v1886_v49  ;;  %v8655_v58 = vpop.f32.mrb[19].mxu0 }
 0xbdf   :  { %10602 = vrsqrt.f32 %v1887_v50 }
 0xbe9   :  { %v10603_v59 = vpop.eup %10602 }
 0xbea   :  { %v1891_v60 = vmul.f32 %v10603_v59, %v12226_v4 }
 0xbec   :  { %v1892_v29 = vmul.f32 %v1891_v60, %v12205_v23 }
 0xbee   :  { %v1893_v63 = vadd.f32 %v1892_v29, %v12208_v26 }
 0xbf0   :  { %v1895_v1 = vmul.f32 0.70710677, %v1893_v63 }
 0xbf2   :  { %v1898_v2 = vand.u32 2147483647, %v1895_v1  ;;  %vm1896_vm5 = vcmp.ge.f32.partialorder %v1895_v1, 0.0 }
 0xbf4   :  { %v1899_v0 = vmul.f32 0.3275911, %v1898_v2  ;;  %v1912_v22 = vsub.f32 0.0, %v1898_v2 }
 0xbf6   :  { %v1900_v10 = vadd.f32 1.0, %v1899_v0  ;;  %v1913_v25 = vmul.f32 %v1912_v22, %v1898_v2  ;;  %v13720_v22 = vrot.slane %v12249_v3, 2 }
 0xbf8   :  { %10604 = vrcp.f32 %v1900_v10  ;;  %v1914_v40 = vmul.f32 1.442695, %v1913_v25 }
 0xbfa   :  { %10606 = vpow2.f32 %v1914_v40 }
 0xbfc   :  { %v2064_v12 = vpop.f32.mrb[20].mxu0 }
 0xbfd   :  { %v12321_v14 = vsub.f32 %v12261_v28, %v2064_v12  ;;  %v8701_v15 = vpop.f32.mrb[21].mxu0 }
 0xbfe   :  { %v1897_v15 = vsel %vm1896_vm5, 1.0, %v13726_v53 }
 0xbff   :  { %v2069_v54 = vmul.f32 %v12321_v14, %v12321_v14 }
 0xc01   :  { %8735 = vmatmul.mubr.f32.vlgmr.msra.gmra.mrb[16].mxu1 %v2069_v54 }
 0xc02   :  { %v10605_v4 = vpop.eup %10604  ;;  %8769 = vmatprep.mubr.f32.mxu1 %v12004_v17  ;;  %v1894_v17 = vmul.f32 0.5, %v1893_v63  ;;  %v1110_v63 = vld [vmem:[#allocation16 + $0x40] sm:$0xff] }
 0xc03   :  { %v1903_v30 = vmul.f32 1.0614054, %v10605_v4 }
 0xc04   :  { %v10607_v0 = vpop.eup %10606 }
 0xc05   :  { %v1904_v39 = vadd.f32 -1.4531521, %v1903_v30 }
 0xc07   :  { %v1905_v49 = vmul.f32 %v10605_v4, %v1904_v39 }
 0xc09   :  { %v1906_v50 = vadd.f32 1.4214138, %v1905_v49  ;;  %v1104_v49 = vld [vmem:[#allocation16 + $0x10] sm:$0xff] }
 0xc0b   :  { %v1907_v58 = vmul.f32 %v10605_v4, %v1906_v50  ;;  %v1107_v50 = vld [vmem:[#allocation16 + $0x28] sm:$0xff] }
 0xc0d   :  { %v1908_v59 = vadd.f32 -0.28449672, %v1907_v58  ;;  %v12338_v58 = vpack.c.bf16 %v1107_v50, %v1104_v49  ;;  %v1143_v49 = vld [vmem:[#allocation16 + $0x148] sm:$0xff] }
 0xc0f   :  { %v1909_v28 = vmul.f32 %v10605_v4, %v1908_v59  ;;  %v1113_v59 = vld [vmem:[#allocation16 + $0x58] sm:$0xff]  ;;  %9708 = vmatprep.subr.bf16.mxu1 %v12338_v58 }
 0xc10   :  { %9710 = vmatpush3.bf16.msra.mxu1 %v12338_v58 }
 0xc11   :  { %v1910_v60 = vadd.f32 0.2548296, %v1909_v28  ;;  %v12340_v28 = vpack.c.bf16 %v1113_v59, %v1110_v63  ;;  %v1146_v63 = vld [vmem:[#allocation16 + $0x160] sm:$0xff]  ;;  %v1149_v59 = vld [vmem:[#allocation16 + $0x178] sm:$0xff] }
 0xc13   :  { %v1911_v29 = vmul.f32 %v10605_v4, %v1910_v60  ;;  %v1116_v60 = vld [vmem:[#allocation16 + $0x70] sm:$0xff]  ;;  %9712 = vmatprep.subr.bf16.mxu1 %v12340_v28 }
 0xc14   :  { %9714 = vmatpush3.bf16.msra.mxu1 %v12340_v28 }
 0xc15   :  { %v1916_v10 = vmul.f32 %v10607_v0, %v1911_v29  ;;  %v1119_v29 = vld [vmem:[#allocation16 + $0x88] sm:$0xff] }
 0xc16   :  { %v12345_v0 = vpack.c.bf16 %v1119_v29, %v1116_v60  ;;  %v12365_v60 = vpack.c.bf16 %v1149_v59, %v1146_v63 }
 0xc17   :  { %v1917_v12 = vsub.f32 1.0, %v1916_v10  ;;  %v1125_v10 = vld [vmem:[#allocation16 + $0xb8] sm:$0xff] }
 0xc18   :  { %9716 = vmatprep.subr.bf16.mxu1 %v12345_v0 }
 0xc19   :  { %v1918_v54 = vmul.f32 %v1917_v12, %v1897_v15  ;;  %v1128_v15 = vld [vmem:[#allocation16 + $0xd0] sm:$0xff]  ;;  %9718 = vmatpush3.bf16.msra.mxu1 %v12345_v0 }
 0xc1b   :  { %v1919_v2 = vadd.f32 1.0, %v1918_v54  ;;  %v1131_v54 = vld [vmem:[#allocation16 + $0xe8] sm:$0xff] }
 0xc1c   :  { %v12328_v25 = vpop.f32.mrb[22].mxu0 }
 0xc1d   :  { %v12330_v30 = vpop.f32.mrb[23].mxu0  ;;  %v1920_v39 = vmul.f32 %v1919_v2, %v1894_v17  ;;  %v12353_v17 = vpack.c.bf16 %v1131_v54, %v1128_v15  ;;  %v1134_v2 = vld [vmem:[#allocation16 + $0x100] sm:$0xff] }
 0xc1f   :  { %v1923_v40 = vadd.f32 %v13720_v22, %v1920_v39  ;;  %v1137_v39 = vld [vmem:[#allocation16 + $0x118] sm:$0xff] }
 0xc21   :  { %v2178_v4 = vrot.slane %v1923_v40, 6  ;;  %v12357_v40 = vpack.c.bf16 %v1137_v39, %v1134_v2 }
 0xc23   :  { %v12336_v1 = vsel %vm2185_vm6, %v12278_v47, %v2178_v4  ;;  %v1122_v47 = vld [vmem:[#allocation16 + $0xa0] sm:$0xff]  ;;  %v1140_v4 = vld [vmem:[#allocation16 + $0x130] sm:$0xff] }
 0xc24   :  { %v12349_v12 = vpack.c.bf16 %v1125_v10, %v1122_v47  ;;  %v12361_v50 = vpack.c.bf16 %v1143_v49, %v1140_v4 }
 0xc26   :  { %9720 = vmatprep.subr.bf16.mxu1 %v12349_v12 }
 0xc27   :  { %9722 = vmatpush3.bf16.msra.mxu1 %v12349_v12 }
 0xc28   :  { %9724 = vmatprep.subr.bf16.mxu1 %v12353_v17 }
 0xc2b   :  { %9726 = vmatpush3.bf16.msra.mxu1 %v12353_v17 }
 0xc2c   :  { %9728 = vmatprep.subr.bf16.mxu1 %v12357_v40 }
 0xc2f   :  { %9730 = vmatpush3.bf16.msra.mxu1 %v12357_v40 }
 0xc30   :  { %9732 = vmatprep.subr.bf16.mxu1 %v12361_v50 }
 0xc33   :  { %9734 = vmatpush3.bf16.msra.mxu1 %v12361_v50 }
 0xc34   :  { %9736 = vmatprep.subr.bf16.mxu1 %v12365_v60 }
 0xc37   :  { %9738 = vmatpush3.bf16.msra.mxu1 %v12365_v60 }
 0xcd4   :  { %v2136_v29 = vpop.f32.mrb[16].mxu1 }
 0xcd5   :  { %v2137_v47 = vadd.f32 1e-05, %v2136_v29  ;;  %v8736_v10 = vpop.f32.mrb[17].mxu1 }
 0xcd7   :  { %10608 = vrsqrt.f32 %v2137_v47 }
 0xce1   :  { %v10609_v15 = vpop.eup %10608 }
 0xce2   :  { %v2141_v54 = vmul.f32 %v10609_v15, %v12321_v14 }
 0xce4   :  { %v2142_v2 = vmul.f32 %v2141_v54, %v12205_v23 }
 0xce6   :  { %v2143_v39 = vadd.f32 %v2142_v2, %v12208_v26 }
 0xce8   :  { %v2145_v4 = vmul.f32 0.70710677, %v2143_v39  ;;  %v2144_v38 = vmul.f32 0.5, %v2143_v39 }
 0xcea   :  { %v2148_v49 = vand.u32 2147483647, %v2145_v4  ;;  %vm2146_vm7 = vcmp.ge.f32.partialorder %v2145_v4, 0.0 }
 0xcec   :  { %v2149_v63 = vmul.f32 0.3275911, %v2148_v49  ;;  %v2162_v22 = vsub.f32 0.0, %v2148_v49 }
 0xcee   :  { %v2150_v59 = vadd.f32 1.0, %v2149_v63  ;;  %v2163_v11 = vmul.f32 %v2162_v22, %v2148_v49  ;;  %v13847_v63 = vmov -1.0  }
 0xcf0   :  { %10610 = vrcp.f32 %v2150_v59  ;;  %v2164_v29 = vmul.f32 1.442695, %v2163_v11  ;;  %v2147_v59 = vsel %vm2146_vm7, 1.0, %v13847_v63  ;;  %vm6245_vm7 = vcmask 1044480  }
 0xcf2   :  { %10612 = vpow2.f32 %v2164_v29 }
 0xcfa   :  { %v10611_v13 = vpop.eup %10610 }
 0xcfb   :  { %v2153_v5 = vmul.f32 1.0614054, %v10611_v13 }
 0xcfc   :  { %v10613_v26 = vpop.eup %10612 }
 0xcfd   :  { %v2154_v53 = vadd.f32 -1.4531521, %v2153_v5  ;;  %v13736_v5 = vrot.slane %v12249_v3, 3 }
 0xcff   :  { %v2155_v10 = vmul.f32 %v10611_v13, %v2154_v53 }
 0xd01   :  { %v2156_v47 = vadd.f32 1.4214138, %v2155_v10 }
 0xd03   :  { %v2157_v33 = vmul.f32 %v10611_v13, %v2156_v47  ;;  %v13851_v47 = vmov 0 }
 0xd04   :  { %v13852_v47 = vsel %vm12398_vm12, 4294967295, %v13851_v47 }
 0xd05   :  { %v2158_v14 = vadd.f32 -0.28449672, %v2157_v33  ;;  %13853 = vst [vmem:[#allocation84_spill] sm:$0xff] %v13852_v47 }
 0xd07   :  { %v2159_v15 = vmul.f32 %v10611_v13, %v2158_v14 }
 0xd09   :  { %v2160_v23 = vadd.f32 0.2548296, %v2159_v15 }
 0xd0b   :  { %v2161_v54 = vmul.f32 %v10611_v13, %v2160_v23 }
 0xd0d   :  { %v2166_v2 = vmul.f32 %v10613_v26, %v2161_v54 }
 0xd0f   :  { %v2167_v37 = vsub.f32 1.0, %v2166_v2 }
 0xd11   :  { %v2168_v34 = vmul.f32 %v2167_v37, %v2147_v59 }
 0xd13   :  { %v2169_v22 = vadd.f32 1.0, %v2168_v34 }
 0xd15   :  { %v2170_v11 = vmul.f32 %v2169_v22, %v2144_v38 }
 0xd17   :  { %v2173_v53 = vadd.f32 %v13736_v5, %v2170_v11 }
 0xd19   :  { %v2181_v33 = vrot.slane %v2173_v53, 5 }
 0xd1b   :  { %v2188_v13 = vsel %vm2187_vm8, %v12336_v1, %v2181_v33  ;;  %v13848_v1 = vmov 0 }
 0xd1c   :  { %2260 = vmatmul.mubr.f32.gmra.mrb[24].mxu0 %v2188_v13  ;;  %8770 = vmatmul.mubr.f32.vlgmr.msra.gmra.mrb[18].mxu1 %v2188_v13  ;;  %v13849_v1 = vsel %vm12387_vm10, 4294967295, %v13848_v1 }
 0xd1d   :  { %8776 = vmatprep.mubr.msk.f32.mxu0 %vm1175_vm1, %v12328_v25  ;;  %13850 = vst [vmem:[#allocation83_spill] sm:$0xff] %v13849_v1 }
 0xdef   :  { %v2261_v4 = vpop.f32.mrb[24].mxu0  ;;  %v8771_v37 = vpop.f32.mrb[18].mxu1 }
 0xdf0   :  { %v2263_v39 = vpop.f32.mrb[25].mxu0  ;;  %v2332_v34 = vpop.f32.mrb[19].mxu1 }
 0xdf1   :  { %v9739_v38 = vpack.c.bf16 %v2263_v39, %v12330_v30  ;;  %v9745_v49 = vpack.c.bf16 %v8771_v37, %v2332_v34  ;;  %v12383_v29 = vpack.i.bf16 %v2263_v39, %v12330_v30  ;;  %v12391_v10 = vpack.i.bf16 %v8771_v37, %v2332_v34 }
 0xdf3   :  { %10498 = vrot.lane.b32.xlu0 %v12383_v29, %s11487_s22  ;;  %10493 = vrot.lane.b32.xlu1 %v12383_v29, %s11488_s23 }
 0xdf4   :  { %9741 = vmatprep.subr.msk.bf16.mxu0 %vm12387_vm10, %v9739_v38 }
 0xdf5   :  { %9744 = vmatpush3.bf16.xpose.msk.msra.mxu0 %vm12387_vm10, %v9739_v38 }
 0xdf6   :  { %9747 = vmatprep.subr.msk.bf16.mxu0 %vm12398_vm12, %v9745_v49 }
 0xdf7   :  { %2543 = vrot.lane.b32.xlu0 %v2261_v4, %s11488_s23  ;;  %2541 = vrot.lane.b32.xlu1 %v12328_v25, %s11488_s23 }
 0xdfb   :  { %2912 = vrot.lane.b32.xlu0 %v2261_v4, %s11487_s22  ;;  %2910 = vrot.lane.b32.xlu1 %v12328_v25, %s11487_s22 }
 0xdfc   :  { %8777 = vmatmul.mubr.msk.f32.vlgmr.msra.gmra.mrb[26].mxu0 %vm1175_vm1, %v2261_v4 }
 0xdfd   :  { %9750 = vmatpush3.bf16.msk.msra.mxu0 %vm12398_vm12, %v9745_v49 }
 0xe65   :  { %v10499_v30 = vpop.permute.xlu0 %10498  ;;  %v10494_v14 = vpop.permute.xlu1 %10493 }
 0xe66   :  { %v10501_v15 = vunpack.i.h.bf16 %v10499_v30  ;;  %v10500_v23 = vunpack.i.l.bf16 %v10499_v30  ;;  %v10496_v54 = vunpack.i.h.bf16 %v10494_v14  ;;  %v10495_v26 = vunpack.i.l.bf16 %v10494_v14 }
 0xe68   :  { %v9751_v2 = vpack.c.bf16 %v10496_v54, %v10495_v26  ;;  %v9779_v22 = vpack.c.bf16 %v10501_v15, %v10500_v23 }
 0xe69   :  { %v2542_v59 = vpop.permute.xlu1 %2541  ;;  %v2544_v11 = vpop.permute.xlu0 %2543 }
 0xe6a   :  { %9753 = vmatprep.subr.msk.bf16.mxu1 %vm12387_vm10, %v9751_v2  ;;  %8790 = vmatprep.mubr.msk.f32.mxu1 %vm1175_vm1, %v2542_v59 }
 0xe6b   :  { %9756 = vmatpush3.bf16.xpose.msk.msra.mxu1 %vm12387_vm10, %v9751_v2 }
 0xe6c   :  { %9781 = vmatprep.subr.msk.bf16.mxu1 %vm12387_vm10, %v9779_v22 }
 0xe6d   :  { %v2911_v53 = vpop.permute.xlu1 %2910  ;;  %v2913_v33 = vpop.permute.xlu0 %2912 }
 0xe72   :  { %8791 = vmatmul.mubr.msk.f32.vlgmr.msra.gmra.mrb[20].mxu1 %vm1175_vm1, %v2544_v11 }
 0xe73   :  { %9784 = vmatpush3.bf16.xpose.msk.msra.mxu1 %vm12387_vm10, %v9779_v22  ;;  %8826 = vmatprep.mubr.msk.f32.mxu1 %vm1175_vm1, %v2911_v53 }
 0xe7a   :  { %8827 = vmatmul.mubr.msk.f32.vlgmr.msra.gmra.mrb[22].mxu1 %vm1175_vm1, %v2913_v33 }
 0xecf   :  { %v8778_v13 = vpop.f32.mrb[26].mxu0 }
 0xed0   :  { %v2419_v37 = vpop.f32.mrb[27].mxu0 }
 0xed1   :  { %v2428_v54 = vmul.f32 0.17677669, %v2419_v37 }
 0xed3   :  { %v2431_v26 = vsel %vm2430_vm14, %v2428_v54, -inf }
 0xf45   :  { %v8792_v39 = vpop.f32.mrb[20].mxu1 }
 0xf46   :  { %v2623_v34 = vpop.f32.mrb[21].mxu1 }
 0xf4d   :  { %v8828_v38 = vpop.f32.mrb[22].mxu1 }
 0xf4e   :  { %v3002_v49 = vmul.f32 0.17677669, %v8828_v38  ;;  %v2992_v30 = vpop.f32.mrb[23].mxu1 }
 0xf4f   :  { %v3001_v14 = vmul.f32 0.17677669, %v2992_v30 }
 0xf50   :  { %v3006_v15 = vsel %vm2434_vm13, %v3002_v49, -inf }
 0xf51   :  { %3007 = vmax.xlane.f32.xlu0 %v3006_v15  ;;  %v3003_v23 = vsel %vm2430_vm14, %v3001_v14, -inf }
 0xf52   :  { %3004 = vmax.xlane.f32.xlu1 %v3003_v23 }
 0xf63   :  { %10503 = vrot.lane.b32.xlu1 %v12391_v10, %s11487_s22 }
 0xf67   :  { %3199 = vrot.lane.b32.xlu1 %v12328_v25, %s11467_s6 }
 0xf6b   :  { %3201 = vrot.lane.b32.xlu1 %v2261_v4, %s11467_s6 }
 0xf8f   :  { %2432 = vmax.xlane.f32.xlu1 %v2431_v26  ;;  %v2632_v26 = vmul.f32 0.17677669, %v2623_v34 }
 0xfde   :  { %v3008_v2 = vpop.xlane.xlu0 %3007 }
 0xfdf   :  { %v3010_v59 = vsub.f32 %v3002_v49, %v3008_v2  ;;  %v3005_v22 = vpop.xlane.xlu1 %3004 }
 0xfe0   :  { %v3009_v11 = vsub.f32 %v3001_v14, %v3005_v22  ;;  %v2429_v14 = vmul.f32 0.17677669, %v8778_v13  ;;  %v2634_v22 = vsel %vm2430_vm14, %v2632_v26, -inf }
 0xfe1   :  { %v3013_v53 = vmul.f32 1.442695, %v3010_v59  ;;  %v2633_v59 = vmul.f32 0.17677669, %v8792_v39 }
 0xfe2   :  { %v3011_v33 = vmul.f32 1.442695, %v3009_v11  ;;  %v2435_v2 = vsel %vm2434_vm13, %v2429_v14, -inf }
 0xfe3   :  { %10614 = vpow2.f32 %v3013_v53  ;;  %v10504_v38 = vpop.permute.xlu1 %10503  ;;  %v2637_v11 = vsel %vm2434_vm13, %v2633_v59, -inf }
 0xfe4   :  { %v10506_v30 = vunpack.i.h.bf16 %v10504_v38  ;;  %v10505_v15 = vunpack.i.l.bf16 %v10504_v38  ;;  %10616 = vpow2.f32 %v3011_v33 }
 0xfe6   :  { %v9785_v23 = vpack.c.bf16 %v10506_v30, %v10505_v15 }
 0xfe8   :  { %9787 = vmatprep.subr.msk.bf16.mxu1 %vm12398_vm12, %v9785_v23 }
 0xfe9   :  { %9790 = vmatpush3.bf16.msk.msra.mxu1 %vm12398_vm12, %v9785_v23 }
 0xfed   :  { %v10615_v25 = vpop.eup %10614 }
 0xfee   :  { %v3018_v4 = vsel %vm2434_vm13, %v10615_v25, 0.0  ;;  %v10617_v37 = vpop.eup %10616 }
 0xfef   :  { %3019 = vadd.xlane.f32.xlu0 %v3018_v4  ;;  %v3015_v49 = vsel %vm2430_vm14, %v10617_v37, 0.0  ;;  %v3200_v4 = vpop.permute.xlu1 %3199 }
 0xff3   :  { %3016 = vadd.xlane.f32.xlu0 %v3015_v49 }
0x1009   :  { %10508 = vrot.lane.b32.xlu0 %v12383_v29, %s11467_s6 }
0x1028   :  { %2436 = vmax.xlane.f32.xlu0 %v2435_v2 }
0x102c   :  { %2635 = vmax.xlane.f32.xlu0 %v2634_v22 }
0x1030   :  { %2638 = vmax.xlane.f32.xlu0 %v2637_v11 }
0x107c   :  { %v3020_v53 = vpop.xlane.xlu0 %3019 }
0x107d   :  { %10618 = vrcp.f32 %v3020_v53 }
0x1080   :  { %v3017_v33 = vpop.xlane.xlu0 %3016 }
0x1081   :  { %10620 = vrcp.f32 %v3017_v33 }
0x1084   :  { %v10509_v38 = vpop.permute.xlu0 %10508 }
0x1085   :  { %v10511_v29 = vunpack.i.h.bf16 %v10509_v38  ;;  %v10510_v13 = vunpack.i.l.bf16 %v10509_v38 }
0x1087   :  { %v10619_v34 = vpop.eup %10618  ;;  %v9799_v30 = vpack.c.bf16 %v10511_v29, %v10510_v13 }
0x1088   :  { %v3024_v15 = vmul.f32 %v10619_v34, %v10615_v25  ;;  %v3202_v25 = vpop.permute.xlu1 %3201 }
0x1089   :  { %9801 = vmatprep.subr.msk.bf16.mxu1 %vm12387_vm10, %v9799_v30 }
0x108a   :  { %7673 = vst.msk [vmem:[%s11684_s25 + $0x28] sm:$0xf] %vm2434_vm13, %v3024_v15 }
0x108b   :  { %v10621_v39 = vpop.eup %10620 }
0x108c   :  { %v3023_v23 = vmul.f32 %v10621_v39, %v10617_v37  ;;  %v2433_v2 = vpop.xlane.xlu1 %2432 }
0x108d   :  { %v2438_v22 = vsub.f32 %v2428_v54, %v2433_v2 }
0x108e   :  { %7672 = vst.msk [vmem:[%s11684_s25 + $0x20] sm:$0xff] %vm2430_vm14, %v3023_v23  ;;  %8833 = vmatprep.mubr.msk.f32.mxu1 %vm2430_vm14, %v3023_v23 }
0x108f   :  { %8834 = vmatmul.mubr.msk.f32.vlgmr.msra.gmra.mrb[24].mxu1 %vm2430_vm14, %v3024_v15  ;;  %v2440_v37 = vmul.f32 1.442695, %v2438_v22  ;;  %v10784_v22 = vld [vmem:[%s13835_s5 + $0x8] sm:$0xff] }
0x1090   :  { %9804 = vmatpush3.bf16.xpose.msk.msra.mxu1 %vm12387_vm10, %v9799_v30  ;;  %8851 = vmatprep.mubr.msk.f32.mxu1 %vm1175_vm1, %v3200_v4 }
0x1091   :  { %10622 = vpow2.f32 %v2440_v37 }
0x1097   :  { %8852 = vmatmul.mubr.msk.f32.vlgmr.msra.gmra.mrb[26].mxu1 %vm1175_vm1, %v3202_v25 }
0x10b5   :  { %v2437_v49 = vpop.xlane.xlu0 %2436 }
0x10b6   :  { %v2439_v33 = vsub.f32 %v2429_v14, %v2437_v49  ;;  %v10623_v49 = vpop.eup %10622 }
0x10b8   :  { %v2442_v30 = vmul.f32 1.442695, %v2439_v33 }
0x10b9   :  { %v2636_v11 = vpop.xlane.xlu0 %2635 }
0x10ba   :  { %v2640_v53 = vsub.f32 %v2632_v26, %v2636_v11  ;;  %v1035_v26 = vmul.f32 0.5, %v11982_v42 }
0x10bc   :  { %v2642_v34 = vmul.f32 1.442695, %v2640_v53  ;;  %v12469_v11 = vadd.f32 %v10784_v22, %v1035_v26 }
0x10bd   :  { %v2639_v38 = vpop.xlane.xlu0 %2638 }
0x10be   :  { %v2641_v15 = vsub.f32 %v2633_v59, %v2639_v38  ;;  %10624 = vpow2.f32 %v2642_v34  ;;  %v2444_v59 = vsel %vm2430_vm14, %v10623_v49, 0.0  ;;  %13854 = vst [vmem:[#allocation85_spill] sm:$0xff] %v12469_v11 }
0x10bf   :  { %10626 = vpow2.f32 %v2442_v30 }
0x10c0   :  { %v2644_v39 = vmul.f32 1.442695, %v2641_v15 }
0x10c2   :  { %10628 = vpow2.f32 %v2644_v39 }
0x10c8   :  { %v10625_v37 = vpop.eup %10624 }
0x10c9   :  { %v10627_v53 = vpop.eup %10626  ;;  %v2646_v42 = vsel %vm2430_vm14, %v10625_v37, 0.0 }
0x10ca   :  { %v2447_v33 = vsel %vm2434_vm13, %v10627_v53, 0.0 }
0x10cc   :  { %v10629_v38 = vpop.eup %10628 }
0x10cd   :  { %v2649_v34 = vsel %vm2434_vm13, %v10629_v38, 0.0 }
0x1162   :  { %v12460_v29 = vpop.f32.mrb[24].mxu1 }
0x1163   :  { %v12462_v13 = vpop.f32.mrb[25].mxu1 }
0x116a   :  { %v8853_v23 = vpop.f32.mrb[26].mxu1 }
0x116b   :  { %v3291_v4 = vmul.f32 0.17677669, %v8853_v23  ;;  %v3281_v54 = vpop.f32.mrb[27].mxu1 }
0x116c   :  { %v3290_v25 = vmul.f32 0.17677669, %v3281_v54 }
0x116d   :  { %v3295_v14 = vsel %vm2434_vm13, %v3291_v4, -inf }
0x116e   :  { %3296 = vmax.xlane.f32.xlu0 %v3295_v14  ;;  %v3292_v2 = vsel %vm2430_vm14, %v3290_v25, -inf }
0x116f   :  { %3293 = vmax.xlane.f32.xlu1 %v3292_v2 }
0x1172   :  { %2445 = vadd.xlane.f32.xlu0 %v2444_v59 }
0x1173   :  { %1040 = vadd.xlane.f32.xlu1 %v12469_v11 }
0x1176   :  { %2647 = vadd.xlane.f32.xlu0 %v2646_v42 }
0x1177   :  { %2448 = vadd.xlane.f32.xlu1 %v2447_v33 }
0x117b   :  { %2650 = vadd.xlane.f32.xlu1 %v2649_v34 }
0x118c   :  { %10513 = vrot.lane.b32.xlu0 %v12391_v10, %s11488_s23 }
0x11fb   :  { %v3297_v30 = vpop.xlane.xlu0 %3296 }
0x11fc   :  { %v3299_v15 = vsub.f32 %v3291_v4, %v3297_v30  ;;  %v3294_v39 = vpop.xlane.xlu1 %3293 }
0x11fd   :  { %v3298_v23 = vsub.f32 %v3290_v25, %v3294_v39 }
0x11fe   :  { %v3302_v54 = vmul.f32 1.442695, %v3299_v15 }
0x11ff   :  { %v3300_v26 = vmul.f32 1.442695, %v3298_v23  ;;  %v2446_v14 = vpop.xlane.xlu0 %2445 }
0x1200   :  { %10630 = vpow2.f32 %v3302_v54  ;;  %v1041_v2 = vpop.xlane.xlu1 %1040 }
0x1201   :  { %10632 = vpow2.f32 %v3300_v26  ;;  %v1043_v59 = vmul.f32 0.0078125, %v1041_v2 }
0x1202   :  { %10634 = vrcp.f32 %v2446_v14 }
0x1203   :  { %v12478_v22 = vsub.f32 %v12469_v11, %v1043_v59  ;;  %v2648_v42 = vpop.xlane.xlu0 %2647 }
0x1204   :  { %10636 = vrcp.f32 %v2648_v42  ;;  %v2449_v33 = vpop.xlane.xlu1 %2448 }
0x1205   :  { %10638 = vrcp.f32 %v2449_v33  ;;  %v1047_v4 = vmul.f32 %v12478_v22, %v12478_v22 }
0x1207   :  { %v10514_v34 = vpop.permute.xlu0 %10513  ;;  %1050 = vadd.xlane.f32.xlu1 %v1047_v4 }
0x1208   :  { %v10516_v25 = vunpack.i.h.bf16 %v10514_v34  ;;  %v10515_v30 = vunpack.i.l.bf16 %v10514_v34  ;;  %v2651_v15 = vpop.xlane.xlu1 %2650 }
0x1209   :  { %10640 = vrcp.f32 %v2651_v15  ;;  %v1156_v15 = vld [vmem:[#allocation18 + $0x30] sm:$0xff] }
0x120a   :  { %v10631_v39 = vpop.eup %10630  ;;  %v9757_v23 = vpack.c.bf16 %v10516_v25, %v10515_v30 }
0x120b   :  { %v12482_v54 = vpop.eup %10632  ;;  %v3307_v26 = vsel %vm2434_vm13, %v10631_v39, 0.0 }
0x120c   :  { %v10635_v14 = vpop.eup %10634  ;;  %9759 = vmatprep.subr.msk.bf16.mxu0 %vm12398_vm12, %v9757_v23  ;;  %3308 = vadd.xlane.f32.xlu1 %v3307_v26  ;;  %v3304_v33 = vsel %vm2430_vm14, %v12482_v54, 0.0 }
0x120d   :  { %v2452_v2 = vmul.f32 %v10635_v14, %v10623_v49  ;;  %v1151_v14 = vld [vmem:[#allocation18 + $0x8] sm:$0xff] }
0x120e   :  { %v10637_v59 = vpop.eup %10636 }
0x120f   :  { %v10639_v42 = vpop.eup %10638  ;;  %2454 = vst.msk [vmem:[%s11684_s25] sm:$0xff] %vm2430_vm14, %v2452_v2  ;;  %8783 = vmatprep.mubr.msk.f32.mxu0 %vm2430_vm14, %v2452_v2  ;;  %v2654_v4 = vmul.f32 %v10637_v59, %v10625_v37  ;;  %v1154_v37 = vld [vmem:[#allocation18 + $0x20] sm:$0xff] }
0x1210   :  { %v2453_v34 = vmul.f32 %v10639_v42, %v10627_v53  ;;  %3305 = vadd.xlane.f32.xlu1 %v3304_v33  ;;  %v1155_v53 = vld [vmem:[#allocation18 + $0x28] sm:$0xff] }
0x1211   :  { %7659 = vst.msk [vmem:[%s11684_s25 + $0x10] sm:$0xff] %vm2430_vm14, %v2654_v4  ;;  %v12505_v30 = vpack.c.bf16 %v1155_v53, %v1154_v37 }
0x1212   :  { %2455 = vst.msk [vmem:[%s11684_s25 + $0x8] sm:$0xf] %vm2434_vm13, %v2453_v34  ;;  %8784 = vmatmul.mubr.msk.f32.vlgmr.msra.gmra.mrb[28].mxu0 %vm2430_vm14, %v2453_v34 }
0x1213   :  { %v10641_v49 = vpop.eup %10640  ;;  %9762 = vmatpush3.bf16.msk.msra.mxu0 %vm12398_vm12, %v9757_v23  ;;  %8797 = vmatprep.mubr.msk.f32.mxu0 %vm2430_vm14, %v2654_v4  ;;  %13855 = vst [vmem:[#allocation86_spill] sm:$0xff] %v12505_v30  ;;  %v1157_v23 = vld [vmem:[#allocation18 + $0x38] sm:$0xff] }
0x1214   :  { %v2655_v25 = vmul.f32 %v10641_v49, %v10629_v38  ;;  %9764 = vmatprep.subr.bf16.mxu0 %v12505_v30  ;;  %v12509_v26 = vpack.c.bf16 %v1157_v23, %v1156_v15  ;;  %v1150_v38 = vld [vmem:[#allocation18] sm:$0xff] }
0x1215   :  { %v12513_v2 = vpack.c.bf16 %v1151_v14, %v1150_v38  ;;  %v10785_v14 = vld [vmem:[#allocation7] ss:$0 sm:$0xff] }
0x1216   :  { %7660 = vst.msk [vmem:[%s11684_s25 + $0x18] sm:$0xf] %vm2434_vm13, %v2655_v25  ;;  %8798 = vmatmul.mubr.msk.f32.vlgmr.msra.gmra.mrb[30].mxu0 %vm2430_vm14, %v2655_v25  ;;  %13856 = vst [vmem:[#allocation87_spill] sm:$0xff] %v12509_v26 }
0x1217   :  { %9766 = vmatpush3.bf16.msra.mxu0 %v12505_v30  ;;  %13857 = vst [vmem:[#allocation88_spill] sm:$0xff] %v12513_v2 }
0x1218   :  { %9768 = vmatprep.subr.bf16.mxu0 %v12509_v26 }
0x121b   :  { %9770 = vmatpush3.bf16.msra.mxu0 %v12509_v26 }
0x121c   :  { %9772 = vmatprep.subr.bf16.mxu0 %v12513_v2 }
0x1221   :  { %10518 = vrot.lane.b32.xlu1 %v12391_v10, %s11467_s6 }
0x1294   :  { %v1051_v10 = vpop.xlane.xlu1 %1050 }
0x1295   :  { %v1053_v59 = vmul.f32 0.0078125, %v1051_v10 }
0x1297   :  { %v1055_v42 = vadd.f32 1e-05, %v1053_v59  ;;  %v10786_v59 = vld [vmem:[#allocation9] ss:$0 sm:$0xff] }
0x1299   :  { %10642 = vrsqrt.f32 %v1055_v42  ;;  %v3309_v33 = vpop.xlane.xlu1 %3308 }
0x129a   :  { %10644 = vrcp.f32 %v3309_v33  ;;  %v13858_v33 = vmov 0.0|0.0  }
0x129d   :  { %v3306_v4 = vpop.xlane.xlu1 %3305 }
0x129e   :  { %10646 = vrcp.f32 %v3306_v4 }
0x12a1   :  { %v10519_v34 = vpop.permute.xlu1 %10518 }
0x12a2   :  { %v10521_v49 = vunpack.i.h.bf16 %v10519_v34  ;;  %v10520_v25 = vunpack.i.l.bf16 %v10519_v34  ;;  %v13859_v34 = vmov 0.0  }
0x12a3   :  { %v10643_v37 = vpop.eup %10642 }
0x12a4   :  { %v10645_v53 = vpop.eup %10644  ;;  %v1059_v15 = vmul.f32 %v10643_v37, %v12478_v22  ;;  %v9805_v23 = vpack.c.bf16 %v10521_v49, %v10520_v25 }
0x12a5   :  { %v3313_v38 = vmul.f32 %v10645_v53, %v10631_v39 }
0x12a6   :  { %v1068_v5 = vmul.f32 %v10785_v14, %v1059_v15  ;;  %9807 = vmatprep.subr.msk.bf16.mxu1 %vm12398_vm12, %v9805_v23 }
0x12a7   :  { %7684 = vst.msk [vmem:[%s11684_s25 + $0x38] sm:$0xf] %vm2434_vm13, %v3313_v38  ;;  %9810 = vmatpush3.bf16.msk.msra.mxu1 %vm12398_vm12, %v9805_v23  ;;  %v1152_v23 = vld [vmem:[#allocation18 + $0x10] sm:$0xff] }
0x12a8   :  { %v10647_v10 = vpop.eup %10646  ;;  %v12523_v42 = vadd.f32 %v10786_v59, %v1068_v5  ;;  %9819 = vmatprep.subr.bf16.mxu1 %v13858_v33 }
0x12a9   :  { %v3312_v22 = vmul.f32 %v10647_v10, %v12482_v54 }
0x12aa   :  { %v3521_v39 = vrot.slane %v12523_v42, 4 }
0x12ab   :  { %7683 = vst.msk [vmem:[%s11684_s25 + $0x30] sm:$0xff] %vm2430_vm14, %v3312_v22  ;;  %8858 = vmatprep.mubr.msk.f32.mxu1 %vm2430_vm14, %v3312_v22  ;;  %v1158_v22 = vld [vmem:[#allocation18 + $0x40] sm:$0xff] }
0x12ac   :  { %8859 = vmatmul.mubr.msk.f32.vlgmr.msra.gmra.mrb[28].mxu1 %vm2430_vm14, %v3313_v38  ;;  %v3522_v4 = vadd.f32 %v3521_v39, %v12523_v42  ;;  %v1153_v38 = vld [vmem:[#allocation18 + $0x18] sm:$0xff]  ;;  %v1159_v39 = vld [vmem:[#allocation18 + $0x48] sm:$0xff] }
0x12ad   :  { %9821 = vmatpush3.bf16.msra.mxu1 %v11990_v6  ;;  %8880 = vmatprep.mubr.msk.f32.mxu1 %vm11486_vm0, %v13859_v34  ;;  %v12561_v59 = vpack.c.bf16 %v1153_v38, %v1152_v23  ;;  %v1164_v23 = vld [vmem:[#allocation18 + $0x70] sm:$0xff]  ;;  %v1165_v38 = vld [vmem:[#allocation18 + $0x78] sm:$0xff] }
0x12ae   :  { %9822 = vmatprep.subr.bf16.mxu1 %v13858_v33  ;;  %v3523_v5 = vrot.slane %v3522_v4, 2 }
0x12af   :  { %13860 = vst [vmem:[#allocation89_spill] sm:$0xff] %v12561_v59 }
0x12b0   :  { %v3524_v49 = vadd.f32 %v3523_v5, %v3522_v4  ;;  %v12568_v4 = vpack.c.bf16 %v1159_v39, %v1158_v22  ;;  %v1160_v5 = vld [vmem:[#allocation18 + $0x50] sm:$0xff] }
0x12b1   :  { %9824 = vmatpush3.bf16.msra.mxu1 %v11999_v7  ;;  %v12610_v22 = vld [vmem:[#allocation10] sm:$0x1] }
0x12b2   :  { %v3525_v54 = vrot.slane %v3524_v49, 1  ;;  %9849 = vmatprep.subr.bf16.mxu1 %v13858_v33  ;;  %13861 = vst [vmem:[#allocation90_spill] sm:$0xff] %v12568_v4 }
0x12b4   :  { %v3526_v25 = vadd.f32 %v3525_v54, %v3524_v49  ;;  %v1161_v49 = vld [vmem:[#allocation18 + $0x58] sm:$0xff] }
0x12b5   :  { %v12572_v54 = vpack.c.bf16 %v1161_v49, %v1160_v5  ;;  %v7690_v49 = vld [vmem:[#allocation19] ss:$0 sm:$0xff] }
0x12b6   :  { %v3527_v37 = vmul.f32 0.125, %v3526_v25  ;;  %v1162_v25 = vld [vmem:[#allocation18 + $0x60] sm:$0xff] }
0x12b7   :  { %13862 = vst [vmem:[#allocation91_spill] sm:$0xff] %v12572_v54 }
0x12b8   :  { %4271 = vrot.lane.b32.xlu1 %v3527_v37, %s11467_s6  ;;  %3775 = vrot.lane.b32.xlu0 %v3527_v37, %s11488_s23 }
0x12b9   :  { %8881 = vmatmul.mubr.msk.f32.vlgmr.msra.gmra.mrb[30].mxu1 %vm1175_vm1, %v3527_v37 }
0x12ba   :  { %9851 = vmatpush3.bf16.msra.mxu1 %v12011_v24  ;;  %8950 = vmatprep.mubr.msk.f32.mxu1 %vm11486_vm0, %v13859_v34 }
0x12bb   :  { %9852 = vmatprep.subr.bf16.mxu1 %v13858_v33 }
0x12bc   :  { %4023 = vrot.lane.b32.xlu0 %v3527_v37, %s11487_s22  ;;  %v1163_v37 = vld [vmem:[#allocation18 + $0x68] sm:$0xff] }
0x12be   :  { %9854 = vmatpush3.bf16.msra.mxu1 %v12015_v27 }
0x12bf   :  { %9855 = vmatprep.subr.bf16.mxu1 %v13858_v33 }
0x12c2   :  { %9857 = vmatpush3.bf16.msra.mxu1 %v12021_v32 }
0x12c3   :  { %9858 = vmatprep.subr.bf16.mxu1 %v13858_v33 }
0x12c6   :  { %9860 = vmatpush3.bf16.msra.mxu1 %v12030_v41 }
0x12c7   :  { %9861 = vmatprep.subr.bf16.mxu1 %v13858_v33 }
0x12ca   :  { %9863 = vmatpush3.bf16.msra.mxu1 %v12041_v46 }
0x12cb   :  { %9864 = vmatprep.subr.bf16.mxu1 %v13858_v33 }
0x12ce   :  { %9866 = vmatpush3.bf16.msra.mxu1 %v12049_v48 }
0x12cf   :  { %9867 = vmatprep.subr.bf16.mxu1 %v13858_v33 }
0x12d2   :  { %9869 = vmatpush3.bf16.msra.mxu1 %v12057_v52 }
0x12d3   :  { %9870 = vmatprep.subr.bf16.mxu1 %v13858_v33 }
0x12d6   :  { %9872 = vmatpush3.bf16.msra.mxu1 %v12072_v55 }
0x12d7   :  { %9879 = vmatprep.subr.bf16.mxu1 %v13858_v33 }
0x12e5   :  { %v8785_v53 = vpop.f32.mrb[28].mxu0 }
0x12e6   :  { %v2532_v15 = vpop.f32.mrb[29].mxu0 }
0x12e9   :  { %v8799_v14 = vpop.f32.mrb[30].mxu0 }
0x12ea   :  { %v2739_v10 = vpop.f32.mrb[31].mxu0 }
0x12eb   :  { %8808 = vmatprep.mubr.msk.f32.mxu0 %vm1175_vm1, %v2739_v10 }
0x12ec   :  { %8809 = vmatmul.mubr.msk.f32.vlgmr.msra.gmra.mrb[32].mxu0 %vm1175_vm1, %v8799_v14  ;;  %v12583_v14 = vpack.c.bf16 %v1165_v38, %v1164_v23 }
0x12ed   :  { %9774 = vmatpush3.bf16.msra.mxu0 %v12513_v2  ;;  %8819 = vmatprep.mubr.msk.f32.mxu0 %vm1175_vm1, %v2532_v15  ;;  %v12579_v15 = vpack.c.bf16 %v1163_v37, %v1162_v25 }
0x12ee   :  { %9776 = vmatprep.subr.bf16.mxu0 %v12561_v59  ;;  %13864 = vst [vmem:[#allocation93_spill] sm:$0xff] %v12583_v14 }
0x12ef   :  { %13863 = vst [vmem:[#allocation92_spill] sm:$0xff] %v12579_v15 }
0x12f1   :  { %9778 = vmatpush3.bf16.msra.mxu0 %v12561_v59 }
0x12f2   :  { %9792 = vmatprep.subr.bf16.mxu0 %v12568_v4 }
0x12f4   :  { %8820 = vmatmul.mubr.msk.f32.vlgmr.msra.gmra.mrb[32].mxu0 %vm1175_vm1, %v8785_v53 }
0x12f5   :  { %9794 = vmatpush3.bf16.msra.mxu0 %v12568_v4  ;;  %8844 = vmatprep.mubr.msk.f32.mxu0 %vm1175_vm1, %v12462_v13 }
0x12f6   :  { %9796 = vmatprep.subr.bf16.mxu0 %v12572_v54 }
0x12f9   :  { %9798 = vmatpush3.bf16.msra.mxu0 %v12572_v54 }
0x12fa   :  { %9812 = vmatprep.subr.bf16.mxu0 %v12579_v15 }
0x12fc   :  { %8845 = vmatmul.mubr.msk.f32.vlgmr.msra.gmra.mrb[32].mxu0 %vm1175_vm1, %v12460_v29 }
0x12fd   :  { %9814 = vmatpush3.bf16.msra.mxu0 %v12579_v15 }
0x12fe   :  { %9816 = vmatprep.subr.bf16.mxu0 %v12583_v14 }
0x1301   :  { %9818 = vmatpush3.bf16.msra.mxu0 %v12583_v14 }
0x1302   :  { %9825 = vmatprep.subr.bf16.mxu0 %v13858_v33 }
0x132a   :  { %v3776_v5 = vpop.permute.xlu0 %3775 }
0x137f   :  { %v8860_v13 = vpop.f32.mrb[28].mxu1 }
0x1380   :  { %v3396_v53 = vpop.f32.mrb[29].mxu1 }
0x1381   :  { %8869 = vmatprep.mubr.msk.f32.mxu0 %vm1175_vm1, %v3396_v53 }
0x1382   :  { %8870 = vmatmul.mubr.msk.f32.vlgmr.msra.gmra.mrb[32].mxu0 %vm1175_vm1, %v8860_v13 }
0x1383   :  { %9827 = vmatpush3.bf16.msra.mxu0 %v12011_v24  ;;  %8915 = vmatprep.mubr.msk.f32.mxu0 %vm11486_vm0, %v13859_v34 }
0x1384   :  { %9828 = vmatprep.subr.bf16.mxu0 %v13858_v33 }
0x1387   :  { %9830 = vmatpush3.bf16.msra.mxu0 %v12015_v27 }
0x1388   :  { %9831 = vmatprep.subr.bf16.mxu0 %v13858_v33 }
0x138b   :  { %9833 = vmatpush3.bf16.msra.mxu0 %v12021_v32 }
0x138c   :  { %v3597_v29 = vpop.f32.mrb[30].mxu1  ;;  %9834 = vmatprep.subr.bf16.mxu0 %v13858_v33 }
0x138d   :  { %v8882_v10 = vpop.f32.mrb[31].mxu1  ;;  %v3598_v39 = vadd.f32 %v12610_v22, %v3597_v29 }
0x138f   :  { %9836 = vmatpush3.bf16.msra.mxu0 %v12030_v41 }
0x1390   :  { %9837 = vmatprep.subr.bf16.mxu0 %v13858_v33 }
0x1393   :  { %9839 = vmatpush3.bf16.msra.mxu0 %v12041_v46 }
0x1394   :  { %9840 = vmatprep.subr.bf16.mxu0 %v13858_v33 }
0x1397   :  { %9842 = vmatpush3.bf16.msra.mxu0 %v12049_v48 }
0x1398   :  { %9843 = vmatprep.subr.bf16.mxu0 %v13858_v33 }
0x139b   :  { %9845 = vmatpush3.bf16.msra.mxu0 %v12057_v52 }
0x139c   :  { %9846 = vmatprep.subr.bf16.mxu0 %v13858_v33 }
0x139f   :  { %9848 = vmatpush3.bf16.msra.mxu0 %v12072_v55 }
0x13a0   :  { %9873 = vmatprep.subr.bf16.mxu0 %v13858_v33 }
0x13a2   :  { %8916 = vmatmul.mubr.f32.vlgmr.msra.gmra.mrb[34].mxu0 %v3598_v39 }
0x13a3   :  { %9875 = vmatpush3.bf16.msra.mxu0 %v11990_v6  ;;  %8961 = vmatprep.mubr.msk.f32.mxu0 %vm11486_vm0, %v13859_v34 }
0x13a4   :  { %9876 = vmatprep.subr.bf16.mxu0 %v13858_v33 }
0x13a7   :  { %9878 = vmatpush3.bf16.msra.mxu0 %v11999_v7 }
0x13a8   :  { %9903 = vmatprep.subr.bf16.mxu0 %v13858_v33 }
0x13aa   :  { %8962 = vmatmul.mubr.msk.f32.vlgmr.msra.gmra.mrb[36].mxu0 %vm1175_vm1, %v3776_v5 }
0x13ab   :  { %9905 = vmatpush3.bf16.msra.mxu0 %v12011_v24  ;;  %9031 = vmatprep.mubr.msk.f32.mxu0 %vm11486_vm0, %v13859_v34 }
0x13ac   :  { %9906 = vmatprep.subr.bf16.mxu0 %v13858_v33 }
0x13af   :  { %9908 = vmatpush3.bf16.msra.mxu0 %v12015_v27 }
0x13b0   :  { %9909 = vmatprep.subr.bf16.mxu0 %v13858_v33 }
0x13b3   :  { %9911 = vmatpush3.bf16.msra.mxu0 %v12021_v32 }
0x13b4   :  { %9912 = vmatprep.subr.bf16.mxu0 %v13858_v33 }
0x13b7   :  { %9914 = vmatpush3.bf16.msra.mxu0 %v12030_v41 }
0x13b8   :  { %9915 = vmatprep.subr.bf16.mxu0 %v13858_v33 }
0x13bb   :  { %9917 = vmatpush3.bf16.msra.mxu0 %v12041_v46 }
0x13bc   :  { %9918 = vmatprep.subr.bf16.mxu0 %v13858_v33 }
0x13bf   :  { %9920 = vmatpush3.bf16.msra.mxu0 %v12049_v48 }
0x13c0   :  { %9921 = vmatprep.subr.bf16.mxu0 %v13858_v33 }
0x13c3   :  { %9923 = vmatpush3.bf16.msra.mxu0 %v12057_v52 }
0x13c4   :  { %9924 = vmatprep.subr.bf16.mxu0 %v13858_v33 }
0x13c7   :  { %9926 = vmatpush3.bf16.msra.mxu0 %v12072_v55 }
0x13c8   :  { %9933 = vmatprep.subr.bf16.mxu0 %v13858_v33 }
0x1455   :  { %v8871_v25 = vpop.f32.mrb[32].mxu0 }
0x1456   :  { %v3495_v37 = vadd.f32 %v8871_v25, %v7690_v49  ;;  %v3477_v23 = vpop.f32.mrb[33].mxu0 }
0x1457   :  { %v3494_v38 = vadd.f32 %v7690_v49, %v3477_v23 }
0x1458   :  { %v3496_v13 = vsel %vm2462_vm9, %v3495_v37, 0.0 }
0x1459   :  { %v3497_v53 = vrot.slane %v3496_v13, 4  ;;  %v3507_v29 = vrot.slane %v3494_v38, 1 }
0x145b   :  { %v3498_v10 = vadd.f32 %v3497_v53, %v3496_v13  ;;  %v3510_v5 = vsel %vm3509_vm15, %v3507_v29, 0.0 }
0x145c   :  { %v3511_v35 = vrot.slane %v3510_v5, 4 }
0x145d   :  { %v3499_v11 = vrot.slane %v3498_v10, 2 }
0x145e   :  { %v3512_v14 = vadd.f32 %v3511_v35, %v3510_v5 }
0x145f   :  { %v3500_v15 = vadd.f32 %v3499_v11, %v3498_v10 }
0x1460   :  { %v3513_v54 = vrot.slane %v3512_v14, 2 }
0x1461   :  { %v3501_v4 = vrot.slane %v3500_v15, 1 }
0x1462   :  { %v3514_v59 = vadd.f32 %v3513_v54, %v3512_v14 }
0x1463   :  { %v3502_v2 = vadd.f32 %v3501_v4, %v3500_v15 }
0x1464   :  { %v3515_v26 = vrot.slane %v3514_v59, 1 }
0x1465   :  { %v3504_v25 = vmul.f32 0.25, %v3502_v2  ;;  %v4024_v2 = vpop.permute.xlu0 %4023 }
0x1466   :  { %v3516_v30 = vadd.f32 %v3515_v26, %v3514_v59 }
0x1467   :  { %v3505_v49 = vadd.f32 %v3504_v25, %v3494_v38  ;;  %v4272_v25 = vpop.permute.xlu1 %4271 }
0x1468   :  { %v3518_v23 = vmul.f32 0.14285715, %v3516_v30 }
0x146a   :  { %v3519_v37 = vadd.f32 %v3518_v23, %v3505_v49  ;;  %v12741_v23 = vld [vmem:[#allocation12] sm:$0x1] }
0x146c   :  { %v12642_v61 = vsel %vm2183_vm4, %v3519_v37, %v3494_v38 }
0x146d   :  { %13865 = vst [vmem:[#allocation94_spill] sm:$0xff] %v12642_v61 }
0x1475   :  { %v3667_v13 = vpop.f32.mrb[34].mxu0 }
0x1476   :  { %v12644_v53 = vsub.f32 %v3598_v39, %v3667_v13  ;;  %v8917_v29 = vpop.f32.mrb[35].mxu0  ;;  %v12744_v13 = vld [vmem:[#allocation13] sm:$0x1] }
0x1478   :  { %v3672_v35 = vmul.f32 %v12644_v53, %v12644_v53 }
0x147a   :  { %8951 = vmatmul.mubr.f32.vlgmr.msra.gmra.mrb[32].mxu1 %v3672_v35 }
0x147b   :  { %9881 = vmatpush3.bf16.msra.mxu1 %v12011_v24  ;;  %8996 = vmatprep.mubr.msk.f32.mxu1 %vm11486_vm0, %v13859_v34 }
0x147c   :  { %9882 = vmatprep.subr.bf16.mxu1 %v13858_v33 }
0x147d   :  { %v3845_v11 = vpop.f32.mrb[36].mxu0 }
0x147e   :  { %v8963_v30 = vpop.f32.mrb[37].mxu0  ;;  %v3846_v26 = vadd.f32 %v12610_v22, %v3845_v11 }
0x147f   :  { %9884 = vmatpush3.bf16.msra.mxu1 %v12015_v27 }
0x1480   :  { %9885 = vmatprep.subr.bf16.mxu1 %v13858_v33 }
0x1483   :  { %9887 = vmatpush3.bf16.msra.mxu1 %v12021_v32 }
0x1484   :  { %9888 = vmatprep.subr.bf16.mxu1 %v13858_v33 }
0x1487   :  { %9890 = vmatpush3.bf16.msra.mxu1 %v12030_v41 }
0x1488   :  { %9891 = vmatprep.subr.bf16.mxu1 %v13858_v33 }
0x148b   :  { %9893 = vmatpush3.bf16.msra.mxu1 %v12041_v46 }
0x148c   :  { %9894 = vmatprep.subr.bf16.mxu1 %v13858_v33 }
0x148f   :  { %9896 = vmatpush3.bf16.msra.mxu1 %v12049_v48 }
0x1490   :  { %9897 = vmatprep.subr.bf16.mxu1 %v13858_v33 }
0x1493   :  { %9899 = vmatpush3.bf16.msra.mxu1 %v12057_v52 }
0x1494   :  { %9900 = vmatprep.subr.bf16.mxu1 %v13858_v33 }
0x1497   :  { %9902 = vmatpush3.bf16.msra.mxu1 %v12072_v55 }
0x1498   :  { %9927 = vmatprep.subr.bf16.mxu1 %v13858_v33 }
0x149a   :  { %8997 = vmatmul.mubr.f32.vlgmr.msra.gmra.mrb[34].mxu1 %v3846_v26 }
0x149b   :  { %9929 = vmatpush3.bf16.msra.mxu1 %v11990_v6  ;;  %9042 = vmatprep.mubr.msk.f32.mxu1 %vm11486_vm0, %v13859_v34 }
0x149c   :  { %9930 = vmatprep.subr.bf16.mxu1 %v13858_v33 }
0x149f   :  { %9932 = vmatpush3.bf16.msra.mxu1 %v11999_v7 }
0x14a0   :  { %9957 = vmatprep.subr.bf16.mxu1 %v13858_v33 }
0x14a2   :  { %9043 = vmatmul.mubr.msk.f32.vlgmr.msra.gmra.mrb[36].mxu1 %vm1175_vm1, %v4024_v2 }
0x14a3   :  { %9959 = vmatpush3.bf16.msra.mxu1 %v12011_v24  ;;  %9112 = vmatprep.mubr.msk.f32.mxu1 %vm11486_vm0, %v13859_v34 }
0x14a4   :  { %9960 = vmatprep.subr.bf16.mxu1 %v13858_v33 }
0x14a7   :  { %9962 = vmatpush3.bf16.msra.mxu1 %v12015_v27 }
0x14a8   :  { %9963 = vmatprep.subr.bf16.mxu1 %v13858_v33 }
0x14ab   :  { %9965 = vmatpush3.bf16.msra.mxu1 %v12021_v32 }
0x14ac   :  { %9966 = vmatprep.subr.bf16.mxu1 %v13858_v33 }
0x14af   :  { %9968 = vmatpush3.bf16.msra.mxu1 %v12030_v41 }
0x14b0   :  { %9969 = vmatprep.subr.bf16.mxu1 %v13858_v33 }
0x14b3   :  { %9971 = vmatpush3.bf16.msra.mxu1 %v12041_v46 }
0x14b4   :  { %9972 = vmatprep.subr.bf16.mxu1 %v13858_v33 }
0x14b7   :  { %9974 = vmatpush3.bf16.msra.mxu1 %v12049_v48 }
0x14b8   :  { %9975 = vmatprep.subr.bf16.mxu1 %v13858_v33 }
0x14bb   :  { %9977 = vmatpush3.bf16.msra.mxu1 %v12057_v52 }
0x14bc   :  { %9978 = vmatprep.subr.bf16.mxu1 %v13858_v33 }
0x14bf   :  { %9980 = vmatpush3.bf16.msra.mxu1 %v12072_v55 }
0x14c0   :  { %9987 = vmatprep.subr.bf16.mxu1 %v13858_v33 }
0x154d   :  { %v3739_v59 = vpop.f32.mrb[32].mxu1 }
0x154e   :  { %v8952_v4 = vpop.f32.mrb[33].mxu1 }
0x156d   :  { %v3915_v54 = vpop.f32.mrb[34].mxu1 }
0x156e   :  { %v12692_v15 = vsub.f32 %v3846_v26, %v3915_v54  ;;  %v8998_v14 = vpop.f32.mrb[35].mxu1 }
0x1570   :  { %v3920_v39 = vmul.f32 %v12692_v15, %v12692_v15 }
0x1572   :  { %9032 = vmatmul.mubr.f32.vlgmr.msra.gmra.mrb[38].mxu0 %v3920_v39 }
0x1573   :  { %9935 = vmatpush3.bf16.msra.mxu0 %v12011_v24  ;;  %9077 = vmatprep.mubr.msk.f32.mxu0 %vm11486_vm0, %v13859_v34 }
0x1574   :  { %9936 = vmatprep.subr.bf16.mxu0 %v13858_v33 }
0x1575   :  { %v4093_v38 = vpop.f32.mrb[36].mxu1 }
0x1576   :  { %v9044_v10 = vpop.f32.mrb[37].mxu1  ;;  %v4094_v5 = vadd.f32 %v12610_v22, %v4093_v38 }
0x1577   :  { %9938 = vmatpush3.bf16.msra.mxu0 %v12015_v27 }
0x1578   :  { %9939 = vmatprep.subr.bf16.mxu0 %v13858_v33 }
0x157b   :  { %9941 = vmatpush3.bf16.msra.mxu0 %v12021_v32 }
0x157c   :  { %9942 = vmatprep.subr.bf16.mxu0 %v13858_v33 }
0x157f   :  { %9944 = vmatpush3.bf16.msra.mxu0 %v12030_v41 }
0x1580   :  { %9945 = vmatprep.subr.bf16.mxu0 %v13858_v33 }
0x1583   :  { %9947 = vmatpush3.bf16.msra.mxu0 %v12041_v46 }
0x1584   :  { %9948 = vmatprep.subr.bf16.mxu0 %v13858_v33 }
0x1587   :  { %9950 = vmatpush3.bf16.msra.mxu0 %v12049_v48 }
0x1588   :  { %9951 = vmatprep.subr.bf16.mxu0 %v13858_v33 }
0x158b   :  { %9953 = vmatpush3.bf16.msra.mxu0 %v12057_v52 }
0x158c   :  { %9954 = vmatprep.subr.bf16.mxu0 %v13858_v33 }
0x158f   :  { %9956 = vmatpush3.bf16.msra.mxu0 %v12072_v55 }
0x1590   :  { %9981 = vmatprep.subr.bf16.mxu0 %v13858_v33 }
0x1592   :  { %9078 = vmatmul.mubr.f32.vlgmr.msra.gmra.mrb[40].mxu0 %v4094_v5 }
0x1593   :  { %9983 = vmatpush3.bf16.msra.mxu0 %v11990_v6  ;;  %9123 = vmatprep.mubr.msk.f32.mxu0 %vm11486_vm0, %v13859_v34  ;;  %v3740_v6 = vadd.f32 1e-05, %v3739_v59 }
0x1594   :  { %9984 = vmatprep.subr.bf16.mxu0 %v13858_v33 }
0x1595   :  { %10648 = vrsqrt.f32 %v3740_v6 }
0x1597   :  { %9986 = vmatpush3.bf16.msra.mxu0 %v11999_v7 }
0x1598   :  { %10011 = vmatprep.subr.bf16.mxu0 %v13858_v33 }
0x159a   :  { %9124 = vmatmul.mubr.msk.f32.vlgmr.msra.gmra.mrb[42].mxu0 %vm1175_vm1, %v4272_v25 }
0x159b   :  { %10013 = vmatpush3.bf16.msra.mxu0 %v12011_v24  ;;  %9193 = vmatprep.mubr.msk.f32.mxu0 %vm11486_vm0, %v13859_v34 }
0x159c   :  { %10014 = vmatprep.subr.bf16.mxu0 %v13858_v33 }
0x159f   :  { %10016 = vmatpush3.bf16.msra.mxu0 %v12015_v27  ;;  %v10649_v7 = vpop.eup %10648 }
0x15a0   :  { %10017 = vmatprep.subr.bf16.mxu0 %v13858_v33  ;;  %v3744_v49 = vmul.f32 %v10649_v7, %v12644_v53 }
0x15a2   :  { %v3745_v37 = vmul.f32 %v12741_v23, %v3744_v49 }
0x15a3   :  { %10019 = vmatpush3.bf16.msra.mxu0 %v12021_v32 }
0x15a4   :  { %10020 = vmatprep.subr.bf16.mxu0 %v13858_v33  ;;  %v12747_v29 = vadd.f32 %v12744_v13, %v3745_v37 }
0x15a6   :  { %v12750_v35 = vmul.f32 0.70710677, %v12747_v29 }
0x15a7   :  { %10022 = vmatpush3.bf16.msra.mxu0 %v12030_v41 }
0x15a8   :  { %10023 = vmatprep.subr.bf16.mxu0 %v13858_v33  ;;  %v3751_v11 = vand.u32 2147483647, %v12750_v35 }
0x15aa   :  { %v3752_v30 = vmul.f32 0.3275911, %v3751_v11 }
0x15ab   :  { %10025 = vmatpush3.bf16.msra.mxu0 %v12041_v46 }
0x15ac   :  { %10026 = vmatprep.subr.bf16.mxu0 %v13858_v33  ;;  %v3753_v26 = vadd.f32 1.0, %v3752_v30 }
0x15ae   :  { %10650 = vrcp.f32 %v3753_v26  ;;  %v3765_v26 = vsub.f32 0.0, %v3751_v11 }
0x15af   :  { %10028 = vmatpush3.bf16.msra.mxu0 %v12049_v48 }
0x15b0   :  { %10029 = vmatprep.subr.bf16.mxu0 %v13858_v33 }
0x15b3   :  { %10031 = vmatpush3.bf16.msra.mxu0 %v12057_v52 }
0x15b4   :  { %10032 = vmatprep.subr.bf16.mxu0 %v13858_v33 }
0x15b7   :  { %10034 = vmatpush3.bf16.msra.mxu0 %v12072_v55 }
0x15b8   :  { %10068 = vmatprep.subr.bf16.mxu0 %v12338_v58  ;;  %v10651_v4 = vpop.eup %10650 }
0x15b9   :  { %v3756_v14 = vmul.f32 1.0614054, %v10651_v4 }
0x15bb   :  { %v3757_v10 = vadd.f32 -1.4531521, %v3756_v14 }
0x15bd   :  { %v3758_v7 = vmul.f32 %v10651_v4, %v3757_v10 }
0x15bf   :  { %v3759_v30 = vadd.f32 1.4214138, %v3758_v7 }
0x1645   :  { %v3987_v2 = vpop.f32.mrb[38].mxu0 }
0x1646   :  { %v3988_v59 = vadd.f32 1e-05, %v3987_v2  ;;  %v9033_v53 = vpop.f32.mrb[39].mxu0 }
0x1647   :  { %v3766_v53 = vmul.f32 %v3765_v26, %v3751_v11 }
0x1648   :  { %10652 = vrsqrt.f32 %v3988_v59  ;;  %v3760_v59 = vmul.f32 %v10651_v4, %v3759_v30 }
0x1649   :  { %v3767_v14 = vmul.f32 1.442695, %v3766_v53 }
0x1652   :  { %v10653_v54 = vpop.eup %10652 }
0x1653   :  { %v3992_v39 = vmul.f32 %v10653_v54, %v12692_v15  ;;  %v3761_v54 = vadd.f32 -0.28449672, %v3760_v59 }
0x1655   :  { %v3993_v38 = vmul.f32 %v12741_v23, %v3992_v39  ;;  %v3762_v10 = vmul.f32 %v10651_v4, %v3761_v54 }
0x1657   :  { %v12756_v25 = vadd.f32 %v12744_v13, %v3993_v38 }
0x1659   :  { %v3996_v6 = vmul.f32 0.70710677, %v12756_v25 }
0x165b   :  { %v3999_v49 = vand.u32 2147483647, %v3996_v6  ;;  %vm3997_vm2 = vcmp.ge.f32.partialorder %v3996_v6, 0.0 }
0x165d   :  { %v4000_v37 = vmul.f32 0.3275911, %v3999_v49  ;;  %v4013_v39 = vsub.f32 0.0, %v3999_v49 }
0x165f   :  { %v4001_v2 = vadd.f32 1.0, %v4000_v37  ;;  %v4014_v7 = vmul.f32 %v4013_v39, %v3999_v49  ;;  %v3763_v37 = vadd.f32 0.2548296, %v3762_v10 }
0x1661   :  { %10654 = vrcp.f32 %v4001_v2  ;;  %v4015_v26 = vmul.f32 1.442695, %v4014_v7  ;;  %v3764_v59 = vmul.f32 %v10651_v4, %v3763_v37 }
0x1662   :  { %10656 = vpow2.f32 %v3767_v14 }
0x1663   :  { %10658 = vpow2.f32 %v4015_v26  ;;  %v13866_v26 = vrot.slane %v12249_v3, 1 }
0x1665   :  { %v4163_v61 = vpop.f32.mrb[40].mxu0 }
0x1666   :  { %v12759_v47 = vsub.f32 %v4094_v5, %v4163_v61  ;;  %v9079_v15 = vpop.f32.mrb[41].mxu0 }
0x1668   :  { %v4168_v38 = vmul.f32 %v12759_v47, %v12759_v47 }
0x166a   :  { %9113 = vmatmul.mubr.f32.vlgmr.msra.gmra.mrb[38].mxu1 %v4168_v38 }
0x166b   :  { %v10655_v1 = vpop.eup %10654  ;;  %9989 = vmatpush3.bf16.msra.mxu1 %v12011_v24  ;;  %9158 = vmatprep.mubr.msk.f32.mxu1 %vm11486_vm0, %v13859_v34  ;;  %vm3749_vm0 = vcmp.ge.f32.partialorder %v12750_v35, 0.0  ;;  %v3998_v35 = vsel %vm3997_vm2, 1.0, %v13847_v63 }
0x166c   :  { %9990 = vmatprep.subr.bf16.mxu1 %v13858_v33  ;;  %v4004_v61 = vmul.f32 1.0614054, %v10655_v1  ;;  %v10657_v53 = vpop.eup %10656  ;;  %v3750_v38 = vsel %vm3749_vm0, 1.0, %v13847_v63 }
0x166d   :  { %v4341_v5 = vpop.f32.mrb[42].mxu0  ;;  %v3769_v15 = vmul.f32 %v10657_v53, %v3764_v59  ;;  %v10659_v4 = vpop.eup %10658 }
0x166e   :  { %v9125_v11 = vpop.f32.mrb[43].mxu0  ;;  %v4005_v30 = vadd.f32 -1.4531521, %v4004_v61 }
0x166f   :  { %9992 = vmatpush3.bf16.msra.mxu1 %v12015_v27  ;;  %v3770_v27 = vsub.f32 1.0, %v3769_v15 }
0x1670   :  { %9993 = vmatprep.subr.bf16.mxu1 %v13858_v33  ;;  %v4006_v2 = vmul.f32 %v10655_v1, %v4005_v30 }
0x1671   :  { %v3771_v10 = vmul.f32 %v3770_v27, %v3750_v38 }
0x1672   :  { %v4007_v49 = vadd.f32 1.4214138, %v4006_v2 }
0x1673   :  { %9995 = vmatpush3.bf16.msra.mxu1 %v12021_v32  ;;  %v3772_v61 = vadd.f32 1.0, %v3771_v10 }
0x1674   :  { %9996 = vmatprep.subr.bf16.mxu1 %v13858_v33  ;;  %v4008_v24 = vmul.f32 %v10655_v1, %v4007_v49 }
0x1676   :  { %v4009_v54 = vadd.f32 -0.28449672, %v4008_v24 }
0x1677   :  { %9998 = vmatpush3.bf16.msra.mxu1 %v12030_v41 }
0x1678   :  { %9999 = vmatprep.subr.bf16.mxu1 %v13858_v33  ;;  %v4010_v14 = vmul.f32 %v10655_v1, %v4009_v54 }
0x167a   :  { %v4011_v39 = vadd.f32 0.2548296, %v4010_v14 }
0x167b   :  { %10001 = vmatpush3.bf16.msra.mxu1 %v12041_v46  ;;  %v3747_v46 = vmul.f32 0.5, %v12747_v29 }
0x167c   :  { %10002 = vmatprep.subr.bf16.mxu1 %v13858_v33  ;;  %v4012_v32 = vmul.f32 %v10655_v1, %v4011_v39  ;;  %v3995_v1 = vmul.f32 0.5, %v12756_v25 }
0x167d   :  { %v3773_v6 = vmul.f32 %v3772_v61, %v3747_v46 }
0x167e   :  { %v4017_v7 = vmul.f32 %v10659_v4, %v4012_v32 }
0x167f   :  { %10004 = vmatpush3.bf16.msra.mxu1 %v12049_v48  ;;  %v4342_v48 = vadd.f32 %v12610_v22, %v4341_v5 }
0x1680   :  { %10005 = vmatprep.subr.bf16.mxu1 %v13858_v33  ;;  %v4018_v41 = vsub.f32 1.0, %v4017_v7 }
0x1682   :  { %v4019_v11 = vmul.f32 %v4018_v41, %v3998_v35 }
0x1683   :  { %10007 = vmatpush3.bf16.msra.mxu1 %v12057_v52  ;;  %v10790_v52 = vld [vmem:[#allocation15] sm:$0xf] }
0x1684   :  { %10008 = vmatprep.subr.bf16.mxu1 %v13858_v33  ;;  %v4020_v37 = vadd.f32 1.0, %v4019_v11  ;;  %v3774_v59 = vadd.f32 %v10790_v52, %v3773_v6 }
0x1686   :  { %v4021_v30 = vmul.f32 %v4020_v37, %v3995_v1 }
0x1687   :  { %10010 = vmatpush3.bf16.msra.mxu1 %v12072_v55 }
0x1688   :  { %10036 = vmatprep.subr.bf16.mxu1 %v12253_v57  ;;  %v4022_v2 = vadd.f32 %v4021_v30, %v13866_v26 }
0x168a   :  { %9159 = vmatmul.mubr.f32.vlgmr.msra.gmra.mrb[40].mxu1 %v4342_v48  ;;  %v4520_v33 = vrot.slane %v4022_v2, 7 }
0x168b   :  { %10038 = vmatpush1.bf16.msra.mxu1 %v12258_v20  ;;  %4595 = vmatprep.mubr.f32.mxu1 %v13859_v34 }
0x168c   :  { %10040 = vmatprep.subr.bf16.mxu1 %v12264_v21  ;;  %v12793_v29 = vsel %vm2183_vm4, %v3774_v59, %v4520_v33 }
0x168f   :  { %10042 = vmatpush1.bf16.msra.mxu1 %v12271_v56 }
0x1690   :  { %10044 = vmatprep.subr.bf16.mxu1 %v12275_v18 }
0x1693   :  { %10046 = vmatpush1.bf16.msra.mxu1 %v12281_v45 }
0x1694   :  { %10048 = vmatprep.subr.bf16.mxu1 %v12284_v51 }
0x1697   :  { %10050 = vmatpush1.bf16.msra.mxu1 %v12287_v43 }
0x1698   :  { %10052 = vmatprep.subr.bf16.mxu1 %v12290_v62 }
0x169b   :  { %10054 = vmatpush1.bf16.msra.mxu1 %v12293_v8 }
0x169c   :  { %10056 = vmatprep.subr.bf16.mxu1 %v12296_v9 }
0x169f   :  { %10058 = vmatpush1.bf16.msra.mxu1 %v12299_v16 }
0x16a0   :  { %10060 = vmatprep.subr.bf16.mxu1 %v12302_v19 }
0x16a3   :  { %10062 = vmatpush1.bf16.msra.mxu1 %v12305_v31 }
0x16a4   :  { %10064 = vmatprep.subr.bf16.mxu1 %v12308_v36 }
0x16a7   :  { %10066 = vmatpush1.bf16.msra.mxu1 %v12311_v44 }
0x16aa   :  { %4596 = vmatmul.mubr.f32.vlgmr.msra.gmra.mrb[42].mxu1 %v12523_v42 }
0x16ab   :  { %4601 = vmatprep.mubr.f32.mxu1 %v13859_v34 }
0x173d   :  { %v4235_v55 = vpop.f32.mrb[38].mxu1 }
0x173e   :  { %v4236_v57 = vadd.f32 1e-05, %v4235_v55  ;;  %v9114_v20 = vpop.f32.mrb[39].mxu1 }
0x1740   :  { %10660 = vrsqrt.f32 %v4236_v57 }
0x174a   :  { %v10661_v21 = vpop.eup %10660 }
0x174b   :  { %v4240_v56 = vmul.f32 %v10661_v21, %v12759_v47 }
0x174d   :  { %v4241_v18 = vmul.f32 %v12741_v23, %v4240_v56 }
0x174f   :  { %v4242_v45 = vadd.f32 %v12744_v13, %v4241_v18 }
0x1751   :  { %v4244_v51 = vmul.f32 0.70710677, %v4242_v45  ;;  %v4243_v39 = vmul.f32 0.5, %v4242_v45 }
0x1753   :  { %v4247_v43 = vand.u32 2147483647, %v4244_v51  ;;  %vm4245_vm3 = vcmp.ge.f32.partialorder %v4244_v51, 0.0 }
0x1754   :  { %v4246_v27 = vsel %vm4245_vm3, 1.0, %v13847_v63 }
0x1755   :  { %v4248_v62 = vmul.f32 0.3275911, %v4247_v43  ;;  %v4261_v31 = vsub.f32 0.0, %v4247_v43 }
0x1757   :  { %v4249_v8 = vadd.f32 1.0, %v4248_v62  ;;  %v4262_v47 = vmul.f32 %v4261_v31, %v4247_v43 }
0x1759   :  { %10662 = vrcp.f32 %v4249_v8  ;;  %v4263_v5 = vmul.f32 1.442695, %v4262_v47 }
0x175b   :  { %10664 = vpow2.f32 %v4263_v5 }
0x175d   :  { %v4411_v9 = vpop.f32.mrb[40].mxu1 }
0x175e   :  { %v4415_v16 = vsub.f32 %v4342_v48, %v4411_v9  ;;  %v9160_v19 = vpop.f32.mrb[41].mxu1 }
0x175f   :  { %v13868_v19 = vrot.slane %v12249_v3, 3 }
0x1760   :  { %v4416_v36 = vmul.f32 %v4415_v16, %v4415_v16 }
0x1762   :  { %9194 = vmatmul.mubr.f32.vlgmr.msra.gmra.mrb[44].mxu0 %v4416_v36 }
0x1763   :  { %v10663_v44 = vpop.eup %10662  ;;  %9228 = vmatprep.mubr.f32.mxu0 %v12523_v42  ;;  %10070 = vmatpush3.bf16.msra.mxu0 %v12338_v58 }
0x1764   :  { %10072 = vmatprep.subr.bf16.mxu0 %v12340_v28  ;;  %v4252_v22 = vmul.f32 1.0614054, %v10663_v44 }
0x1765   :  { %v10665_v54 = vpop.eup %10664 }
0x1766   :  { %v4253_v25 = vadd.f32 -1.4531521, %v4252_v22 }
0x1767   :  { %10074 = vmatpush3.bf16.msra.mxu0 %v12340_v28 }
0x1768   :  { %10076 = vmatprep.subr.bf16.mxu0 %v12345_v0  ;;  %v4254_v49 = vmul.f32 %v10663_v44, %v4253_v25 }
0x176a   :  { %v4255_v24 = vadd.f32 1.4214138, %v4254_v49 }
0x176b   :  { %10078 = vmatpush3.bf16.msra.mxu0 %v12345_v0 }
0x176c   :  { %10080 = vmatprep.subr.bf16.mxu0 %v12349_v12  ;;  %v4256_v42 = vmul.f32 %v10663_v44, %v4255_v24 }
0x176e   :  { %v4257_v53 = vadd.f32 -0.28449672, %v4256_v42 }
0x176f   :  { %10082 = vmatpush3.bf16.msra.mxu0 %v12349_v12 }
0x1770   :  { %10084 = vmatprep.subr.bf16.mxu0 %v12353_v17  ;;  %v4258_v58 = vmul.f32 %v10663_v44, %v4257_v53  ;;  %v5915_v53 = vld [vmem:[%s13875_s30 + $0xa8] sm:$0xff] }
0x1772   :  { %v4259_v15 = vadd.f32 0.2548296, %v4258_v58 }
0x1773   :  { %10086 = vmatpush3.bf16.msra.mxu0 %v12353_v17 }
0x1774   :  { %10088 = vmatprep.subr.bf16.mxu0 %v12357_v40  ;;  %v4260_v28 = vmul.f32 %v10663_v44, %v4259_v15 }
0x1776   :  { %v4265_v14 = vmul.f32 %v10665_v54, %v4260_v28 }
0x1777   :  { %10090 = vmatpush3.bf16.msra.mxu0 %v12357_v40  ;;  %v13867_v40 = vrot.slane %v12249_v3, 2 }
0x1778   :  { %10092 = vmatprep.subr.bf16.mxu0 %v12361_v50  ;;  %v4266_v0 = vsub.f32 1.0, %v4265_v14 }
0x177a   :  { %v4267_v12 = vmul.f32 %v4266_v0, %v4246_v27 }
0x177b   :  { %10094 = vmatpush3.bf16.msra.mxu0 %v12361_v50 }
0x177c   :  { %10096 = vmatprep.subr.bf16.mxu0 %v12365_v60  ;;  %v4268_v17 = vadd.f32 1.0, %v4267_v12 }
0x177d   :  { %v12829_v32 = vpop.f32.mrb[42].mxu1 }
0x177e   :  { %v4599_v4 = vpop.f32.mrb[43].mxu1  ;;  %v4269_v38 = vmul.f32 %v4268_v17, %v4243_v39 }
0x177f   :  { %10098 = vmatpush3.bf16.msra.mxu0 %v12365_v60 }
0x1780   :  { %v4270_v10 = vadd.f32 %v4269_v38, %v13867_v40 }
0x1782   :  { %v4523_v7 = vrot.slane %v4270_v10, 6 }
0x1784   :  { %v4529_v41 = vsel %vm2185_vm6, %v12793_v29, %v4523_v7 }
0x1835   :  { %v4483_v35 = vpop.f32.mrb[44].mxu0 }
0x1836   :  { %v4484_v61 = vadd.f32 1e-05, %v4483_v35  ;;  %v9195_v50 = vpop.f32.mrb[45].mxu0 }
0x1838   :  { %10666 = vrsqrt.f32 %v4484_v61 }
0x1842   :  { %v10667_v11 = vpop.eup %10666 }
0x1843   :  { %v4488_v46 = vmul.f32 %v10667_v11, %v4415_v16 }
0x1845   :  { %v4489_v1 = vmul.f32 %v12741_v23, %v4488_v46 }
0x1847   :  { %v4490_v37 = vadd.f32 %v12744_v13, %v4489_v1 }
0x1849   :  { %v4492_v6 = vmul.f32 0.70710677, %v4490_v37  ;;  %v4491_v8 = vmul.f32 0.5, %v4490_v37 }
0x184b   :  { %v4495_v30 = vand.u32 2147483647, %v4492_v6  ;;  %vm4493_vm5 = vcmp.ge.f32.partialorder %v4492_v6, 0.0 }
0x184c   :  { %v4494_v43 = vsel %vm4493_vm5, 1.0, %v13847_v63 }
0x184d   :  { %v4496_v60 = vmul.f32 0.3275911, %v4495_v30  ;;  %v4509_v26 = vsub.f32 0.0, %v4495_v30 }
0x184f   :  { %v4497_v48 = vadd.f32 1.0, %v4496_v60  ;;  %v4510_v52 = vmul.f32 %v4509_v26, %v4495_v30 }
0x1851   :  { %10668 = vrcp.f32 %v4497_v48  ;;  %v4511_v29 = vmul.f32 1.442695, %v4510_v52 }
0x1853   :  { %10670 = vpow2.f32 %v4511_v29 }
0x185b   :  { %v10669_v2 = vpop.eup %10668 }
0x185c   :  { %v4500_v59 = vmul.f32 1.0614054, %v10669_v2 }
0x185d   :  { %v10671_v13 = vpop.eup %10670 }
0x185e   :  { %v4501_v33 = vadd.f32 -1.4531521, %v4500_v59 }
0x1860   :  { %v4502_v55 = vmul.f32 %v10669_v2, %v4501_v33 }
0x1862   :  { %v4503_v57 = vadd.f32 1.4214138, %v4502_v55 }
0x1864   :  { %v4504_v20 = vmul.f32 %v10669_v2, %v4503_v57 }
0x1866   :  { %v4505_v21 = vadd.f32 -0.28449672, %v4504_v20 }
0x1868   :  { %v4506_v56 = vmul.f32 %v10669_v2, %v4505_v21 }
0x186a   :  { %v4507_v23 = vadd.f32 0.2548296, %v4506_v56 }
0x186c   :  { %v4508_v18 = vmul.f32 %v10669_v2, %v4507_v23 }
0x186e   :  { %v4513_v45 = vmul.f32 %v10671_v13, %v4508_v18 }
0x1870   :  { %v4514_v51 = vsub.f32 1.0, %v4513_v45 }
0x1872   :  { %v4515_v62 = vmul.f32 %v4514_v51, %v4494_v43 }
0x1874   :  { %v4516_v9 = vadd.f32 1.0, %v4515_v62 }
0x1876   :  { %v4517_v16 = vmul.f32 %v4516_v9, %v4491_v8 }
0x1878   :  { %v4518_v31 = vadd.f32 %v4517_v16, %v13868_v19 }
0x187a   :  { %v4526_v36 = vrot.slane %v4518_v31, 5 }
0x187c   :  { %v4530_v44 = vsel %vm2187_vm8, %v4529_v41, %v4526_v36 }
0x187d   :  { %4602 = vmatmul.mubr.f32.gmra.mrb[44].mxu1 %v4530_v44  ;;  %9229 = vmatmul.mubr.f32.vlgmr.msra.gmra.mrb[46].mxu0 %v4530_v44 }
0x187e   :  { %9235 = vmatprep.mubr.msk.f32.mxu1 %vm1175_vm1, %v12829_v32 }
0x1950   :  { %v4603_v47 = vpop.f32.mrb[44].mxu1  ;;  %v9230_v22 = vpop.f32.mrb[46].mxu0 }
0x1951   :  { %v4605_v25 = vpop.f32.mrb[45].mxu1  ;;  %v4674_v5 = vpop.f32.mrb[47].mxu0 }
0x1952   :  { %v10099_v63 = vpack.c.bf16 %v4605_v25, %v4599_v4  ;;  %v10105_v49 = vpack.c.bf16 %v9230_v22, %v4674_v5  ;;  %v10527_v24 = vpack.i.bf16 %v4605_v25, %v4599_v4  ;;  %v12844_v42 = vpack.i.bf16 %v9230_v22, %v4674_v5 }
0x1954   :  { %10528 = vrot.lane.b32.xlu1 %v10527_v24, %s11487_s22  ;;  %10523 = vrot.lane.b32.xlu0 %v10527_v24, %s11488_s23 }
0x1955   :  { %10101 = vmatprep.subr.msk.bf16.mxu1 %vm12387_vm10, %v10099_v63  ;;  %10107 = vmatprep.subr.msk.bf16.mxu0 %vm12398_vm12, %v10105_v49 }
0x1956   :  { %10104 = vmatpush3.bf16.xpose.msk.msra.mxu1 %vm12387_vm10, %v10099_v63  ;;  %10110 = vmatpush3.bf16.msk.msra.mxu0 %vm12398_vm12, %v10105_v49 }
0x1958   :  { %4883 = vrot.lane.b32.xlu1 %v4603_v47, %s11488_s23  ;;  %4881 = vrot.lane.b32.xlu0 %v12829_v32, %s11488_s23 }
0x195c   :  { %5252 = vrot.lane.b32.xlu1 %v4603_v47, %s11487_s22  ;;  %5250 = vrot.lane.b32.xlu0 %v12829_v32, %s11487_s22 }
0x195d   :  { %9236 = vmatmul.mubr.msk.f32.vlgmr.msra.gmra.mrb[46].mxu1 %vm1175_vm1, %v4603_v47 }
0x19c6   :  { %v10529_v58 = vpop.permute.xlu1 %10528  ;;  %v10524_v15 = vpop.permute.xlu0 %10523 }
0x19c7   :  { %v10531_v28 = vunpack.i.h.bf16 %v10529_v58  ;;  %v10530_v54 = vunpack.i.l.bf16 %v10529_v58  ;;  %v10526_v14 = vunpack.i.h.bf16 %v10524_v15  ;;  %v10525_v0 = vunpack.i.l.bf16 %v10524_v15 }
0x19c9   :  { %v10111_v27 = vpack.c.bf16 %v10526_v14, %v10525_v0  ;;  %v10139_v39 = vpack.c.bf16 %v10531_v28, %v10530_v54 }
0x19ca   :  { %v4882_v12 = vpop.permute.xlu0 %4881  ;;  %v4884_v17 = vpop.permute.xlu1 %4883 }
0x19cb   :  { %10113 = vmatprep.subr.msk.bf16.mxu1 %vm12387_vm10, %v10111_v27  ;;  %9249 = vmatprep.mubr.msk.f32.mxu1 %vm1175_vm1, %v4882_v12 }
0x19cc   :  { %10116 = vmatpush3.bf16.xpose.msk.msra.mxu1 %vm12387_vm10, %v10111_v27 }
0x19cd   :  { %10141 = vmatprep.subr.msk.bf16.mxu1 %vm12387_vm10, %v10139_v39 }
0x19ce   :  { %v5251_v4 = vpop.permute.xlu0 %5250  ;;  %v5253_v38 = vpop.permute.xlu1 %5252 }
0x19d3   :  { %9250 = vmatmul.mubr.msk.f32.vlgmr.msra.gmra.mrb[48].mxu1 %vm1175_vm1, %v4884_v17 }
0x19d4   :  { %10144 = vmatpush3.bf16.xpose.msk.msra.mxu1 %vm12387_vm10, %v10139_v39  ;;  %9285 = vmatprep.mubr.msk.f32.mxu1 %vm1175_vm1, %v5251_v4 }
0x19db   :  { %9286 = vmatmul.mubr.msk.f32.vlgmr.msra.gmra.mrb[50].mxu1 %vm1175_vm1, %v5253_v38 }
0x1a30   :  { %v9237_v40 = vpop.f32.mrb[46].mxu1 }
0x1a31   :  { %v4761_v10 = vpop.f32.mrb[47].mxu1  ;;  %v4771_v37 = vmul.f32 0.17677669, %v9237_v40 }
0x1a32   :  { %v4770_v55 = vmul.f32 0.17677669, %v4761_v10 }
0x1a33   :  { %v4775_v6 = vsel %vm2434_vm13, %v4771_v37, -inf }
0x1a34   :  { %v4772_v20 = vsel %vm2430_vm14, %v4770_v55, -inf }
0x1aa6   :  { %v9251_v7 = vpop.f32.mrb[48].mxu1 }
0x1aa7   :  { %v4963_v41 = vpop.f32.mrb[49].mxu1  ;;  %v4973_v21 = vmul.f32 0.17677669, %v9251_v7 }
0x1aa8   :  { %v4972_v57 = vmul.f32 0.17677669, %v4963_v41 }
0x1aa9   :  { %v4977_v23 = vsel %vm2434_vm13, %v4973_v21, -inf }
0x1aaa   :  { %v4974_v56 = vsel %vm2430_vm14, %v4972_v57, -inf }
0x1aae   :  { %v9287_v35 = vpop.f32.mrb[50].mxu1 }
0x1aaf   :  { %v5342_v61 = vmul.f32 0.17677669, %v9287_v35  ;;  %v5332_v50 = vpop.f32.mrb[51].mxu1 }
0x1ab0   :  { %v5341_v11 = vmul.f32 0.17677669, %v5332_v50 }
0x1ab1   :  { %v5346_v46 = vsel %vm2434_vm13, %v5342_v61, -inf }
0x1ab2   :  { %5347 = vmax.xlane.f32.xlu1 %v5346_v46  ;;  %v5343_v1 = vsel %vm2430_vm14, %v5341_v11, -inf }
0x1ab3   :  { %5344 = vmax.xlane.f32.xlu0 %v5343_v1 }
0x1ac3   :  { %10538 = vrot.lane.b32.xlu1 %v10527_v24, %s11467_s6 }
0x1ac7   :  { %5539 = vrot.lane.b32.xlu1 %v12829_v32, %s11467_s6 }
0x1acb   :  { %5541 = vrot.lane.b32.xlu1 %v4603_v47, %s11467_s6 }
0x1aef   :  { %4776 = vmax.xlane.f32.xlu1 %v4775_v6  ;;  %v13871_v6 = vld [vmem:[#allocation82_spill] sm:$0xff] }
0x1b3f   :  { %v5348_v30 = vpop.xlane.xlu1 %5347 }
0x1b40   :  { %v5350_v60 = vsub.f32 %v5342_v61, %v5348_v30  ;;  %v5345_v48 = vpop.xlane.xlu0 %5344  ;;  %v13872_v30 = vld [vmem:[#allocation94_spill] sm:$0xff] }
0x1b41   :  { %v5349_v26 = vsub.f32 %v5341_v11, %v5345_v48 }
0x1b42   :  { %v5353_v2 = vmul.f32 1.442695, %v5350_v60  ;;  %v12919_v60 = vadd.f32 %v13872_v30, %v13871_v6  ;;  %v5910_v6 = vld [vmem:[%s13875_s30 + $0x80] sm:$0xff] }
0x1b43   :  { %v5351_v52 = vmul.f32 1.442695, %v5349_v26  ;;  %v10539_v45 = vpop.permute.xlu1 %10538  ;;  %v5914_v30 = vld [vmem:[%s13875_s30 + $0xa0] sm:$0xff] }
0x1b44   :  { %10672 = vpow2.f32 %v5353_v2  ;;  %v10541_v43 = vunpack.i.h.bf16 %v10539_v45  ;;  %v10540_v62 = vunpack.i.l.bf16 %v10539_v45  ;;  %13873 = vst [vmem:[#allocation83_spill] sm:$0xff] %v12919_v60 }
0x1b45   :  { %10674 = vpow2.f32 %v5351_v52 }
0x1b46   :  { %v10159_v36 = vpack.c.bf16 %v10541_v43, %v10540_v62 }
0x1b47   :  { %v5540_v22 = vpop.permute.xlu1 %5539 }
0x1b4b   :  { %v5542_v25 = vpop.permute.xlu1 %5541 }
0x1b4e   :  { %v10673_v59 = vpop.eup %10672 }
0x1b4f   :  { %v5358_v33 = vsel %vm2434_vm13, %v10673_v59, 0.0  ;;  %v10675_v29 = vpop.eup %10674 }
0x1b50   :  { %5359 = vadd.xlane.f32.xlu0 %v5358_v33  ;;  %v5355_v32 = vsel %vm2430_vm14, %v10675_v29, 0.0 }
0x1b54   :  { %5356 = vadd.xlane.f32.xlu0 %v5355_v32 }
0x1b6a   :  { %10533 = vrot.lane.b32.xlu0 %v12844_v42, %s11487_s22 }
0x1b7c   :  { %v4777_v49 = vpop.xlane.xlu1 %4776 }
0x1b7d   :  { %v4779_v24 = vsub.f32 %v4771_v37, %v4777_v49 }
0x1b7f   :  { %v4782_v54 = vmul.f32 1.442695, %v4779_v24 }
0x1b89   :  { %4773 = vmax.xlane.f32.xlu0 %v4772_v20 }
0x1b8d   :  { %4975 = vmax.xlane.f32.xlu0 %v4974_v56 }
0x1b91   :  { %4978 = vmax.xlane.f32.xlu0 %v4977_v23 }
0x1bdd   :  { %v5360_v18 = vpop.xlane.xlu0 %5359 }
0x1bde   :  { %10676 = vrcp.f32 %v5360_v18 }
0x1be1   :  { %v5357_v13 = vpop.xlane.xlu0 %5356 }
0x1be2   :  { %10678 = vrcp.f32 %v5357_v13 }
0x1be3   :  { %10680 = vpow2.f32 %v4782_v54  ;;  %v5899_v54 = vld [vmem:[%s13875_s30 + $0x28] sm:$0xff] }
0x1be5   :  { %v10534_v51 = vpop.permute.xlu0 %10533 }
0x1be6   :  { %v10536_v8 = vunpack.i.h.bf16 %v10534_v51  ;;  %v10535_v9 = vunpack.i.l.bf16 %v10534_v51 }
0x1be8   :  { %v10677_v16 = vpop.eup %10676  ;;  %v10145_v19 = vpack.c.bf16 %v10536_v8, %v10535_v9 }
0x1be9   :  { %v5364_v31 = vmul.f32 %v10677_v16, %v10673_v59 }
0x1bea   :  { %10147 = vmatprep.subr.msk.bf16.mxu1 %vm12398_vm12, %v10145_v19 }
0x1beb   :  { %7722 = vst.msk [vmem:[%s11684_s25 + $0x68] sm:$0xf] %vm2434_vm13, %v5364_v31  ;;  %10150 = vmatpush3.bf16.msk.msra.mxu1 %vm12398_vm12, %v10145_v19 }
0x1bec   :  { %v10679_v44 = vpop.eup %10678  ;;  %10161 = vmatprep.subr.msk.bf16.mxu1 %vm12387_vm10, %v10159_v36 }
0x1bed   :  { %v5363_v47 = vmul.f32 %v10679_v44, %v10675_v29  ;;  %v10681_v7 = vpop.eup %10680  ;;  %v13874_v44 = vld [vmem:[#allocation86_spill] sm:$0xff] }
0x1bee   :  { %v4787_v61 = vsel %vm2434_vm13, %v10681_v7, 0.0 }
0x1bef   :  { %7721 = vst.msk [vmem:[%s11684_s25 + $0x60] sm:$0xff] %vm2430_vm14, %v5363_v47  ;;  %9292 = vmatprep.mubr.msk.f32.mxu1 %vm2430_vm14, %v5363_v47  ;;  %v13876_v47 = vld [vmem:[#allocation87_spill] sm:$0xff] }
0x1bf0   :  { %9293 = vmatmul.mubr.msk.f32.vlgmr.msra.gmra.mrb[52].mxu1 %vm2430_vm14, %v5364_v31 }
0x1bf1   :  { %9310 = vmatprep.mubr.msk.f32.mxu1 %vm1175_vm1, %v5540_v22  ;;  %v13877_v22 = vld [vmem:[#allocation88_spill] sm:$0xff] }
0x1bf4   :  { %10164 = vmatpush3.bf16.xpose.msk.msra.mxu1 %vm12387_vm10, %v10159_v36 }
0x1bfb   :  { %9311 = vmatmul.mubr.msk.f32.vlgmr.msra.gmra.mrb[54].mxu1 %vm1175_vm1, %v5542_v25 }
0x1c16   :  { %v4774_v5 = vpop.xlane.xlu0 %4773 }
0x1c17   :  { %v4778_v58 = vsub.f32 %v4770_v55, %v4774_v5 }
0x1c19   :  { %v4780_v27 = vmul.f32 1.442695, %v4778_v58 }
0x1c1a   :  { %v4976_v63 = vpop.xlane.xlu0 %4975 }
0x1c1b   :  { %v4980_v12 = vsub.f32 %v4972_v57, %v4976_v63  ;;  %10682 = vpow2.f32 %v4780_v27 }
0x1c1d   :  { %v4982_v39 = vmul.f32 1.442695, %v4980_v12 }
0x1c1e   :  { %v4979_v15 = vpop.xlane.xlu0 %4978 }
0x1c1f   :  { %v4981_v14 = vsub.f32 %v4973_v21, %v4979_v15 }
0x1c21   :  { %v4984_v3 = vmul.f32 1.442695, %v4981_v14 }
0x1c23   :  { %10684 = vpow2.f32 %v4984_v3 }
0x1c24   :  { %10686 = vpow2.f32 %v4982_v39 }
0x1c25   :  { %v10683_v35 = vpop.eup %10682 }
0x1c26   :  { %v4784_v11 = vsel %vm2430_vm14, %v10683_v35, 0.0 }
0x1c2d   :  { %v10685_v50 = vpop.eup %10684 }
0x1c2e   :  { %v10687_v46 = vpop.eup %10686  ;;  %v4989_v1 = vsel %vm2434_vm13, %v10685_v50, 0.0 }
0x1c2f   :  { %v4986_v37 = vsel %vm2430_vm14, %v10687_v46, 0.0 }
0x1cc3   :  { %v12905_v28 = vpop.f32.mrb[52].mxu1 }
0x1cc4   :  { %v12907_v0 = vpop.f32.mrb[53].mxu1 }
0x1cce   :  { %v9312_v17 = vpop.f32.mrb[54].mxu1 }
0x1ccf   :  { %v5631_v4 = vmul.f32 0.17677669, %v9312_v17  ;;  %v5621_v38 = vpop.f32.mrb[55].mxu1 }
0x1cd0   :  { %v5630_v40 = vmul.f32 0.17677669, %v5621_v38  ;;  %v5898_v38 = vld [vmem:[%s13875_s30 + $0x20] sm:$0xff] }
0x1cd1   :  { %v5635_v10 = vsel %vm2434_vm13, %v5631_v4, -inf }
0x1cd2   :  { %5636 = vmax.xlane.f32.xlu1 %v5635_v10  ;;  %v5632_v41 = vsel %vm2430_vm14, %v5630_v40, -inf  ;;  %v5907_v10 = vld [vmem:[%s13875_s30 + $0x68] sm:$0xff] }
0x1cd3   :  { %5633 = vmax.xlane.f32.xlu0 %v5632_v41 }
0x1cd6   :  { %4788 = vadd.xlane.f32.xlu1 %v4787_v61 }
0x1cd7   :  { %4785 = vadd.xlane.f32.xlu0 %v4784_v11  ;;  %v5906_v11 = vld [vmem:[%s13875_s30 + $0x60] sm:$0xff] }
0x1cda   :  { %4990 = vadd.xlane.f32.xlu1 %v4989_v1 }
0x1cdb   :  { %4987 = vadd.xlane.f32.xlu0 %v4986_v37 }
0x1cf1   :  { %10543 = vrot.lane.b32.xlu0 %v12844_v42, %s11488_s23 }
0x1d10   :  { %5854 = vadd.xlane.f32.xlu0 %v12919_v60 }
0x1d5f   :  { %v5637_v48 = vpop.xlane.xlu1 %5636 }
0x1d60   :  { %v5639_v26 = vsub.f32 %v5631_v4, %v5637_v48  ;;  %v5634_v2 = vpop.xlane.xlu0 %5633  ;;  %v5894_v4 = vld [vmem:[%s13875_s30] sm:$0xff]  ;;  %v5919_v48 = vld [vmem:[%s13875_s30 + $0xc8] sm:$0xff] }
0x1d61   :  { %v5638_v52 = vsub.f32 %v5630_v40, %v5634_v2  ;;  %v5903_v40 = vld [vmem:[%s13875_s30 + $0x48] sm:$0xff]  ;;  %v10189_v2 = vpack.c.bf16 %v5914_v30, %v5910_v6  ;;  %v5904_v6 = vld [vmem:[%s13875_s30 + $0x50] sm:$0xff] }
0x1d62   :  { %v5642_v59 = vmul.f32 1.442695, %v5639_v26  ;;  %v10183_v61 = vpack.c.bf16 %v5907_v10, %v5903_v40  ;;  %v5923_v26 = vld [vmem:[%s13875_s30 + $0xe8] sm:$0xff]  ;;  %v13879_v40 = vld [vmem:[#allocation90_spill] sm:$0xff]  ;;  %v5908_v30 = vld [vmem:[%s13875_s30 + $0x70] sm:$0xff] }
0x1d63   :  { %v5640_v33 = vmul.f32 1.442695, %v5638_v52  ;;  %v4789_v29 = vpop.xlane.xlu1 %4788  ;;  %v10191_v52 = vpack.c.bf16 %v5923_v26, %v5919_v48  ;;  %v13881_v10 = vld [vmem:[#allocation92_spill] sm:$0xff]  ;;  %v5913_v48 = vld [vmem:[%s13875_s30 + $0x98] sm:$0xff] }
0x1d64   :  { %10688 = vpow2.f32 %v5642_v59  ;;  %v4786_v32 = vpop.xlane.xlu0 %4785  ;;  %v5918_v59 = vld [vmem:[%s13875_s30 + $0xc0] sm:$0xff]  ;;  %v5917_v26 = vld [vmem:[%s13875_s30 + $0xb8] sm:$0xff] }
0x1d65   :  { %10690 = vpow2.f32 %v5640_v33  ;;  %v5922_v33 = vld [vmem:[%s13875_s30 + $0xe0] sm:$0xff] }
0x1d66   :  { %10692 = vrcp.f32 %v4789_v29  ;;  %v5927_v29 = vld [vmem:[%s13875_s30 + $0x108] sm:$0xff] }
0x1d67   :  { %10694 = vrcp.f32 %v4786_v32  ;;  %v4991_v55 = vpop.xlane.xlu1 %4990  ;;  %v5931_v32 = vld [vmem:[%s13875_s30 + $0x128] sm:$0xff] }
0x1d68   :  { %10696 = vrcp.f32 %v4991_v55  ;;  %v4988_v57 = vpop.xlane.xlu0 %4987  ;;  %v10193_v55 = vpack.c.bf16 %v5922_v33, %v5918_v59  ;;  %v5912_v59 = vld [vmem:[%s13875_s30 + $0x90] sm:$0xff] }
0x1d69   :  { %10698 = vrcp.f32 %v4988_v57  ;;  %v10195_v57 = vpack.c.bf16 %v5931_v32, %v5927_v29  ;;  %v5916_v33 = vld [vmem:[%s13875_s30 + $0xb0] sm:$0xff]  ;;  %v5921_v29 = vld [vmem:[%s13875_s30 + $0xd8] sm:$0xff] }
0x1d6a   :  { %v5925_v32 = vld [vmem:[%s13875_s30 + $0xf8] sm:$0xff] }
0x1d6c   :  { %v10544_v20 = vpop.permute.xlu0 %10543 }
0x1d6d   :  { %v10546_v21 = vunpack.i.h.bf16 %v10544_v20  ;;  %v10545_v56 = vunpack.i.l.bf16 %v10544_v20  ;;  %v5926_v20 = vld [vmem:[%s13875_s30 + $0x100] sm:$0xff] }
0x1d6e   :  { %v10689_v23 = vpop.eup %10688 }
0x1d6f   :  { %v10691_v18 = vpop.eup %10690  ;;  %v10117_v13 = vpack.c.bf16 %v10546_v21, %v10545_v56  ;;  %v5647_v45 = vsel %vm2434_vm13, %v10689_v23, 0.0  ;;  %v5930_v21 = vld [vmem:[%s13875_s30 + $0x120] sm:$0xff]  ;;  %v5935_v56 = vld [vmem:[%s13875_s30 + $0x148] sm:$0xff] }
0x1d70   :  { %v10693_v51 = vpop.eup %10692  ;;  %5648 = vadd.xlane.f32.xlu1 %v5647_v45  ;;  %v5644_v31 = vsel %vm2430_vm14, %v10691_v18, 0.0  ;;  %v5934_v45 = vld [vmem:[%s13875_s30 + $0x140] sm:$0xff] }
0x1d71   :  { %v10695_v43 = vpop.eup %10694  ;;  %v4793_v62 = vmul.f32 %v10693_v51, %v10681_v7  ;;  %10119 = vmatprep.subr.msk.bf16.mxu0 %vm12398_vm12, %v10117_v13  ;;  %v5938_v51 = vld [vmem:[%s13875_s30 + $0x160] sm:$0xff] }
0x1d72   :  { %v10697_v8 = vpop.eup %10696  ;;  %v4792_v9 = vmul.f32 %v10695_v43, %v10683_v35  ;;  %v10181_v35 = vpack.c.bf16 %v5898_v38, %v5894_v4  ;;  %v5943_v43 = vld [vmem:[%s13875_s30 + $0x188] sm:$0xff] }
0x1d73   :  { %v10699_v16 = vpop.eup %10698  ;;  %7700 = vst.msk [vmem:[%s11684_s25 + $0x48] sm:$0xf] %vm2434_vm13, %v4793_v62  ;;  %v4995_v19 = vmul.f32 %v10697_v8, %v10685_v50  ;;  %v5902_v50 = vld [vmem:[%s13875_s30 + $0x40] sm:$0xff]  ;;  %v10201_v8 = vpack.c.bf16 %v5938_v51, %v5934_v45  ;;  %v5928_v45 = vld [vmem:[%s13875_s30 + $0x110] sm:$0xff] }
0x1d74   :  { %7699 = vst.msk [vmem:[%s11684_s25 + $0x40] sm:$0xff] %vm2430_vm14, %v4792_v9  ;;  %9242 = vmatprep.mubr.msk.f32.mxu0 %vm2430_vm14, %v4792_v9  ;;  %5645 = vadd.xlane.f32.xlu1 %v5644_v31  ;;  %v4994_v36 = vmul.f32 %v10699_v16, %v10687_v46  ;;  %v5911_v46 = vld [vmem:[%s13875_s30 + $0x88] sm:$0xff]  ;;  %v10185_v1 = vpack.c.bf16 %v5906_v11, %v5902_v50  ;;  %v5942_v16 = vld [vmem:[%s13875_s30 + $0x180] sm:$0xff]  ;;  %v5900_v50 = vld [vmem:[%s13875_s30 + $0x30] sm:$0xff] }
0x1d75   :  { %7709 = vst.msk [vmem:[%s11684_s25 + $0x58] sm:$0xf] %vm2434_vm13, %v4995_v19  ;;  %9243 = vmatmul.mubr.msk.f32.vlgmr.msra.gmra.mrb[48].mxu0 %vm2430_vm14, %v4793_v62  ;;  %v10187_v37 = vpack.c.bf16 %v5915_v53, %v5911_v46  ;;  %v5947_v62 = vld [vmem:[%s13875_s30 + $0x1a8] sm:$0xff]  ;;  %v5905_v11 = vld [vmem:[%s13875_s30 + $0x58] sm:$0xff]  ;;  %v5932_v51 = vld [vmem:[%s13875_s30 + $0x130] sm:$0xff] }
0x1d76   :  { %10122 = vmatpush3.bf16.msk.msra.mxu0 %vm12398_vm12, %v10117_v13  ;;  %7708 = vst.msk [vmem:[%s11684_s25 + $0x50] sm:$0xff] %vm2430_vm14, %v4994_v36  ;;  %9256 = vmatprep.mubr.msk.f32.mxu0 %vm2430_vm14, %v4994_v36  ;;  %v10203_v9 = vpack.c.bf16 %v5947_v62, %v5943_v43  ;;  %v5951_v31 = vld [vmem:[%s13875_s30 + $0x1c8] sm:$0xff]  ;;  %v5909_v46 = vld [vmem:[%s13875_s30 + $0x78] sm:$0xff] }
0x1d77   :  { %10124 = vmatprep.subr.bf16.mxu0 %v13874_v44  ;;  %v5955_v36 = vld [vmem:[%s13875_s30 + $0x1e8] sm:$0xff]  ;;  %v5937_v43 = vld [vmem:[%s13875_s30 + $0x158] sm:$0xff] }
0x1d78   :  { %v5941_v62 = vld [vmem:[%s13875_s30 + $0x178] sm:$0xff] }
0x1d79   :  { %9257 = vmatmul.mubr.msk.f32.vlgmr.msra.gmra.mrb[50].mxu0 %vm2430_vm14, %v4995_v19  ;;  %v5946_v19 = vld [vmem:[%s13875_s30 + $0x1a0] sm:$0xff] }
0x1d7a   :  { %10126 = vmatpush3.bf16.msra.mxu0 %v13874_v44  ;;  %v10205_v44 = vpack.c.bf16 %v5946_v19, %v5942_v16  ;;  %v5936_v16 = vld [vmem:[%s13875_s30 + $0x150] sm:$0xff] }
0x1d7b   :  { %10128 = vmatprep.subr.bf16.mxu0 %v13876_v47  ;;  %v5940_v19 = vld [vmem:[%s13875_s30 + $0x170] sm:$0xff] }
0x1d7e   :  { %10130 = vmatpush3.bf16.msra.mxu0 %v13876_v47  ;;  %v10207_v47 = vpack.c.bf16 %v5955_v36, %v5951_v31  ;;  %v5945_v31 = vld [vmem:[%s13875_s30 + $0x198] sm:$0xff] }
0x1d7f   :  { %10132 = vmatprep.subr.bf16.mxu0 %v13877_v22  ;;  %v5949_v36 = vld [vmem:[%s13875_s30 + $0x1b8] sm:$0xff] }
0x1d85   :  { %10548 = vrot.lane.b32.xlu1 %v12844_v42, %s11467_s6  ;;  %v5895_v42 = vld [vmem:[%s13875_s30 + $0x8] sm:$0xff]  ;;  %s13999_s6 = sld [smem:[#allocation71_spill]] }
0x1d86   :  { %v10179_v39 = vpack.c.bf16 %v5899_v54, %v5895_v42  ;;  %v12995_v54 = vld [vmem:[#allocation21] ss:$0 sm:$0xff] }
0x1d9d   :  { %v5855_v25 = vpop.xlane.xlu0 %5854 }
0x1d9e   :  { %v5858_v5 = vmul.f32 0.0078125, %v5855_v25  ;;  %v5950_v25 = vld [vmem:[%s13875_s30 + $0x1c0] sm:$0xff] }
0x1da0   :  { %v12948_v63 = vsub.f32 %v12919_v60, %v5858_v5  ;;  %v5954_v5 = vld [vmem:[%s13875_s30 + $0x1e0] sm:$0xff] }
0x1da2   :  { %v5862_v49 = vmul.f32 %v12948_v63, %v12948_v63 }
0x1da4   :  { %5864 = vadd.xlane.f32.xlu0 %v5862_v49  ;;  %v10209_v49 = vpack.c.bf16 %v5954_v5, %v5950_v25  ;;  %v5944_v25 = vld [vmem:[%s13875_s30 + $0x190] sm:$0xff] }
0x1da5   :  { %v5948_v5 = vld [vmem:[%s13875_s30 + $0x1b0] sm:$0xff] }
0x1dfd   :  { %v5649_v24 = vpop.xlane.xlu1 %5648 }
0x1dfe   :  { %10700 = vrcp.f32 %v5649_v24 }
0x1e01   :  { %v5646_v58 = vpop.xlane.xlu1 %5645 }
0x1e02   :  { %10702 = vrcp.f32 %v5646_v58 }
0x1e05   :  { %v10549_v15 = vpop.permute.xlu1 %10548 }
0x1e06   :  { %v10551_v14 = vunpack.i.h.bf16 %v10549_v15  ;;  %v10550_v27 = vunpack.i.l.bf16 %v10549_v15 }
0x1e08   :  { %v10701_v12 = vpop.eup %10700  ;;  %v10165_v3 = vpack.c.bf16 %v10551_v14, %v10550_v27  ;;  %v12998_v27 = vld [vmem:[#allocation22] ss:$0 sm:$0xff] }
0x1e09   :  { %v5653_v17 = vmul.f32 %v10701_v12, %v10689_v23  ;;  %v5939_v23 = vld [vmem:[%s13875_s30 + $0x168] sm:$0xff] }
0x1e0a   :  { %10167 = vmatprep.subr.msk.bf16.mxu1 %vm12398_vm12, %v10165_v3  ;;  %v10199_v13 = vpack.c.bf16 %v5939_v23, %v5935_v56  ;;  %v5929_v56 = vld [vmem:[%s13875_s30 + $0x118] sm:$0xff] }
0x1e0b   :  { %7733 = vst.msk [vmem:[%s11684_s25 + $0x78] sm:$0xf] %vm2434_vm13, %v5653_v17  ;;  %10170 = vmatpush3.bf16.msk.msra.mxu1 %vm12398_vm12, %v10165_v3  ;;  %v5933_v23 = vld [vmem:[%s13875_s30 + $0x138] sm:$0xff] }
0x1e0c   :  { %v10703_v7 = vpop.eup %10702  ;;  %10180 = vmatprep.subr.bf16.mxu1 %v10179_v39 }
0x1e0d   :  { %v5652_v41 = vmul.f32 %v10703_v7, %v10691_v18  ;;  %v10197_v18 = vpack.c.bf16 %v5930_v21, %v5926_v20  ;;  %v13882_v7 = vld [vmem:[#allocation93_spill] sm:$0xff] }
0x1e0e   :  { %v5920_v20 = vld [vmem:[%s13875_s30 + $0xd0] sm:$0xff] }
0x1e0f   :  { %7732 = vst.msk [vmem:[%s11684_s25 + $0x70] sm:$0xff] %vm2430_vm14, %v5652_v41  ;;  %9317 = vmatprep.mubr.msk.f32.mxu1 %vm2430_vm14, %v5652_v41  ;;  %v5897_v41 = vld [vmem:[%s13875_s30 + $0x18] sm:$0xff]  ;;  %v5924_v21 = vld [vmem:[%s13875_s30 + $0xf0] sm:$0xff]  ;;  %s13889_s25 = sld [smem:[#allocation70_spill]] }
0x1e10   :  { %9318 = vmatmul.mubr.msk.f32.vlgmr.msra.gmra.mrb[56].mxu1 %vm2430_vm14, %v5653_v17 }
0x1e11   :  { %10182 = vmatpush1.bf16.msra.mxu1 %v10181_v35  ;;  %6044 = vmatprep.mubr.f32.mxu1 %v13859_v34 }
0x1e12   :  { %10184 = vmatprep.subr.bf16.mxu1 %v10183_v61  ;;  %v5896_v61 = vld [vmem:[%s13875_s30 + $0x10] sm:$0xff] }
0x1e13   :  { %v10213_v53 = vpack.c.bf16 %v5900_v50, %v5896_v61 }
0x1e15   :  { %10186 = vmatpush1.bf16.msra.mxu1 %v10185_v1 }
0x1e16   :  { %10188 = vmatprep.subr.bf16.mxu1 %v10187_v37  ;;  %v10215_v37 = vpack.c.bf16 %v5909_v46, %v5905_v11 }
0x1e19   :  { %10190 = vmatpush1.bf16.msra.mxu1 %v10189_v2  ;;  %v10217_v2 = vpack.c.bf16 %v5908_v30, %v5904_v6 }
0x1e1a   :  { %10192 = vmatprep.subr.bf16.mxu1 %v10191_v52  ;;  %v10219_v52 = vpack.c.bf16 %v5917_v26, %v5913_v48 }
0x1e1d   :  { %10194 = vmatpush1.bf16.msra.mxu1 %v10193_v55  ;;  %v10221_v55 = vpack.c.bf16 %v5916_v33, %v5912_v59  ;;  %v13883_v59 = vld [vmem:[#allocation85_spill] sm:$0xff] }
0x1e1e   :  { %10196 = vmatprep.subr.bf16.mxu1 %v10195_v57  ;;  %v10223_v57 = vpack.c.bf16 %v5925_v32, %v5921_v29  ;;  %v5958_v29 = vld [vmem:[#allocation24] sm:$0xf]  ;;  %v13885_v32 = vld [vmem:[#allocation79_spill] sm:$0xff] }
0x1e21   :  { %10198 = vmatpush1.bf16.msra.mxu1 %v10197_v18  ;;  %v10225_v18 = vpack.c.bf16 %v5924_v21, %v5920_v20 }
0x1e22   :  { %10200 = vmatprep.subr.bf16.mxu1 %v10199_v13  ;;  %v10227_v13 = vpack.c.bf16 %v5933_v23, %v5929_v56 }
0x1e25   :  { %10202 = vmatpush1.bf16.msra.mxu1 %v10201_v8  ;;  %v10229_v8 = vpack.c.bf16 %v5932_v51, %v5928_v45 }
0x1e26   :  { %10204 = vmatprep.subr.bf16.mxu1 %v10203_v9  ;;  %v10231_v9 = vpack.c.bf16 %v5941_v62, %v5937_v43 }
0x1e29   :  { %10206 = vmatpush1.bf16.msra.mxu1 %v10205_v44  ;;  %v10233_v44 = vpack.c.bf16 %v5940_v19, %v5936_v16  ;;  %v13888_v19 = vld [vmem:[#allocation80_spill] sm:$0xff] }
0x1e2a   :  { %10208 = vmatprep.subr.bf16.mxu1 %v10207_v47  ;;  %v10235_v47 = vpack.c.bf16 %v5949_v36, %v5945_v31  ;;  %v13081_v31 = vrot.slane %v5958_v29, %v13888_v19 }
0x1e2d   :  { %10210 = vmatpush1.bf16.msra.mxu1 %v10209_v49  ;;  %v5953_v49 = vld [vmem:[%s13875_s30 + $0x1d8] sm:$0xff] }
0x1e31   :  { %v5865_v24 = vpop.xlane.xlu0 %5864 }
0x1e32   :  { %v5868_v58 = vmul.f32 0.0078125, %v5865_v24  ;;  %v5957_v24 = vld [vmem:[%s13875_s30 + $0x1f8] sm:$0xff] }
0x1e34   :  { %v5870_v15 = vadd.f32 1e-05, %v5868_v58  ;;  %v10237_v58 = vpack.c.bf16 %v5948_v5, %v5944_v25 }
0x1e36   :  { %10704 = vrsqrt.f32 %v5870_v15  ;;  %v10239_v15 = vpack.c.bf16 %v5957_v24, %v5953_v49 }
0x1e40   :  { %v10705_v42 = vpop.eup %10704 }
0x1e41   :  { %v5874_v14 = vmul.f32 %v10705_v42, %v12948_v63  ;;  %v13878_v63 = vld [vmem:[#allocation89_spill] sm:$0xff] }
0x1e42   :  { %v5952_v42 = vld [vmem:[%s13875_s30 + $0x1d0] sm:$0xff] }
0x1e43   :  { %v5883_v12 = vmul.f32 %v12995_v54, %v5874_v14  ;;  %v5956_v14 = vld [vmem:[%s13875_s30 + $0x1f0] sm:$0xff] }
0x1e45   :  { %v13002_v3 = vadd.f32 %v12998_v27, %v5883_v12  ;;  %v10241_v12 = vpack.c.bf16 %v5956_v14, %v5952_v42 }
0x1e47   :  { %6045 = vmatmul.mubr.f32.vlgmr.msra.gmra.mrb[58].mxu1 %v13002_v3 }
0x1e48   :  { %v9244_v39 = vpop.f32.mrb[48].mxu0  ;;  %6050 = vmatprep.mubr.f32.mxu1 %v13859_v34 }
0x1e49   :  { %v4872_v17 = vpop.f32.mrb[49].mxu0 }
0x1e4c   :  { %v9258_v4 = vpop.f32.mrb[50].mxu0 }
0x1e4d   :  { %v5079_v38 = vpop.f32.mrb[51].mxu0 }
0x1e4e   :  { %9267 = vmatprep.mubr.msk.f32.mxu0 %vm1175_vm1, %v5079_v38  ;;  %v10791_v38 = vld [vmem:[#allocation19] ss:$0 sm:$0xff] }
0x1e4f   :  { %9268 = vmatmul.mubr.msk.f32.vlgmr.msra.gmra.mrb[52].mxu0 %vm1175_vm1, %v9258_v4 }
0x1e50   :  { %10134 = vmatpush3.bf16.msra.mxu0 %v13877_v22  ;;  %9278 = vmatprep.mubr.msk.f32.mxu0 %vm1175_vm1, %v4872_v17  ;;  %v13880_v22 = vld [vmem:[#allocation91_spill] sm:$0xff] }
0x1e51   :  { %10136 = vmatprep.subr.bf16.mxu0 %v13878_v63 }
0x1e54   :  { %10138 = vmatpush3.bf16.msra.mxu0 %v13878_v63 }
0x1e55   :  { %10152 = vmatprep.subr.bf16.mxu0 %v13879_v40 }
0x1e57   :  { %9279 = vmatmul.mubr.msk.f32.vlgmr.msra.gmra.mrb[52].mxu0 %vm1175_vm1, %v9244_v39 }
0x1e58   :  { %10154 = vmatpush3.bf16.msra.mxu0 %v13879_v40  ;;  %9303 = vmatprep.mubr.msk.f32.mxu0 %vm1175_vm1, %v12907_v0  ;;  %v5901_v0 = vld [vmem:[%s13875_s30 + $0x38] sm:$0xff] }
0x1e59   :  { %10156 = vmatprep.subr.bf16.mxu0 %v13880_v22  ;;  %v10211_v35 = vpack.c.bf16 %v5901_v0, %v5897_v41 }
0x1e5c   :  { %10158 = vmatpush3.bf16.msra.mxu0 %v13880_v22 }
0x1e5d   :  { %10172 = vmatprep.subr.bf16.mxu0 %v13881_v10 }
0x1e5f   :  { %9304 = vmatmul.mubr.msk.f32.vlgmr.msra.gmra.mrb[52].mxu0 %vm1175_vm1, %v12905_v28 }
0x1e60   :  { %10174 = vmatpush3.bf16.msra.mxu0 %v13881_v10 }
0x1e61   :  { %10176 = vmatprep.subr.bf16.mxu0 %v13882_v7 }
0x1e64   :  { %10178 = vmatpush3.bf16.msra.mxu0 %v13882_v7 }
0x1e65   :  { %10212 = vmatprep.subr.bf16.mxu0 %v10211_v35 }
0x1ee3   :  { %v9319_v28 = vpop.f32.mrb[56].mxu1 }
0x1ee4   :  { %v5736_v1 = vpop.f32.mrb[57].mxu1 }
0x1ee5   :  { %9328 = vmatprep.mubr.msk.f32.mxu0 %vm1175_vm1, %v5736_v1 }
0x1ee6   :  { %9329 = vmatmul.mubr.msk.f32.vlgmr.msra.gmra.mrb[52].mxu0 %vm1175_vm1, %v9319_v28  ;;  %vm6218_vm1 = vcmask 1045504  }
0x1ee7   :  { %10214 = vmatpush1.bf16.msra.mxu0 %v10213_v53  ;;  %6121 = vmatprep.mubr.f32.mxu0 %v13859_v34 }
0x1ee8   :  { %10216 = vmatprep.subr.bf16.mxu0 %v10215_v37 }
0x1eeb   :  { %10218 = vmatpush1.bf16.msra.mxu0 %v10217_v2 }
0x1eec   :  { %10220 = vmatprep.subr.bf16.mxu0 %v10219_v52 }
0x1eef   :  { %10222 = vmatpush1.bf16.msra.mxu0 %v10221_v55  ;;  %v13070_v55 = vrot.slane %v5958_v29, %v13885_v32 }
0x1ef0   :  { %10224 = vmatprep.subr.bf16.mxu0 %v10223_v57  ;;  %v13886_v57 = vld [vmem:[#allocation81_spill] sm:$0xff] }
0x1ef1   :  { %v13073_v20 = vrot.slane %v5958_v29, %v13886_v57 }
0x1ef3   :  { %10226 = vmatpush1.bf16.msra.mxu0 %v10225_v18 }
0x1ef4   :  { %10228 = vmatprep.subr.bf16.mxu0 %v10227_v13 }
0x1ef7   :  { %10230 = vmatpush1.bf16.msra.mxu0 %v10229_v8 }
0x1ef8   :  { %10232 = vmatprep.subr.bf16.mxu0 %v10231_v9  ;;  %v13887_v9 = vld [vmem:[#allocation78_spill] sm:$0xff] }
0x1ef9   :  { %v13078_v16 = vrot.slane %v5958_v29, %v13887_v9 }
0x1efb   :  { %10234 = vmatpush1.bf16.msra.mxu0 %v10233_v44 }
0x1efc   :  { %10236 = vmatprep.subr.bf16.mxu0 %v10235_v47 }
0x1eff   :  { %10238 = vmatpush1.bf16.msra.mxu0 %v10237_v58 }
0x1f00   :  { %10240 = vmatprep.subr.bf16.mxu0 %v10239_v15 }
0x1f03   :  { %10242 = vmatpush1.bf16.msra.mxu0 %v10241_v12 }
0x1f06   :  { %6122 = vmatmul.mubr.f32.vlgmr.msra.gmra.mrb[54].mxu0 %v13002_v3 }
0x1f07   :  { %6127 = vmatprep.mubr.f32.mxu0 %v13859_v34 }
0x1f1a   :  { %v6046_v39 = vpop.f32.mrb[58].mxu1 }
0x1f1b   :  { %v6048_v17 = vpop.f32.mrb[59].mxu1  ;;  %v6047_v36 = vadd.f32 %v6046_v39, %v13078_v16 }
0x1f1c   :  { %v6049_v47 = vadd.f32 %v6048_v17, %v13081_v31 }
0x1fb9   :  { %v9330_v4 = vpop.f32.mrb[52].mxu0 }
0x1fba   :  { %v5829_v63 = vadd.f32 %v10791_v38, %v9330_v4  ;;  %v5817_v40 = vpop.f32.mrb[53].mxu0 }
0x1fbb   :  { %v5828_v22 = vadd.f32 %v10791_v38, %v5817_v40  ;;  %v6867_v40 = vld [vmem:[#allocation28 + $0x80] sm:$0xff] }
0x1fbc   :  { %v5830_v10 = vsel %vm2462_vm9, %v5829_v63, 0.0 }
0x1fbd   :  { %v5831_v7 = vrot.slane %v5830_v10, 4  ;;  %v5840_v41 = vrot.slane %v5828_v22, 1 }
0x1fbf   :  { %v5832_v0 = vadd.f32 %v5831_v7, %v5830_v10  ;;  %v5842_v35 = vsel %vm3509_vm15, %v5840_v41, 0.0  ;;  %v6851_v10 = vld [vmem:[#allocation28] sm:$0xff]  ;;  %v6852_v41 = vld [vmem:[#allocation28 + $0x8] sm:$0xff] }
0x1fc0   :  { %v5843_v61 = vrot.slane %v5842_v35, 4 }
0x1fc1   :  { %v5833_v50 = vrot.slane %v5832_v0, 2 }
0x1fc2   :  { %v5844_v11 = vadd.f32 %v5843_v61, %v5842_v35  ;;  %v6870_v35 = vld [vmem:[#allocation28 + $0x98] sm:$0xff]  ;;  %v10245_v61 = vpack.c.bf16 %v6852_v41, %v6851_v10 }
0x1fc3   :  { %v5834_v3 = vadd.f32 %v5833_v50, %v5832_v0  ;;  %v6869_v0 = vld [vmem:[#allocation28 + $0x90] sm:$0xff] }
0x1fc4   :  { %v5845_v46 = vrot.slane %v5844_v11, 2  ;;  %v10247_v50 = vpack.c.bf16 %v6870_v35, %v6869_v0 }
0x1fc5   :  { %v5835_v28 = vrot.slane %v5834_v3, 1 }
0x1fc6   :  { %v5846_v53 = vadd.f32 %v5845_v46, %v5844_v11  ;;  %v6853_v11 = vld [vmem:[#allocation28 + $0x10] sm:$0xff]  ;;  %v6871_v46 = vld [vmem:[#allocation28 + $0xa0] sm:$0xff] }
0x1fc7   :  { %v5836_v1 = vadd.f32 %v5835_v28, %v5834_v3  ;;  %v6854_v3 = vld [vmem:[#allocation28 + $0x18] sm:$0xff] }
0x1fc8   :  { %v5847_v37 = vrot.slane %v5846_v53, 1 }
0x1fc9   :  { %v5837_v6 = vmul.f32 0.25, %v5836_v1  ;;  %v6856_v1 = vld [vmem:[#allocation28 + $0x28] sm:$0xff] }
0x1fca   :  { %v5848_v30 = vadd.f32 %v5847_v37, %v5846_v53  ;;  %v6855_v53 = vld [vmem:[#allocation28 + $0x20] sm:$0xff]  ;;  %v6873_v37 = vld [vmem:[#allocation28 + $0xb0] sm:$0xff] }
0x1fcb   :  { %v5838_v48 = vadd.f32 %v5837_v6, %v5828_v22  ;;  %v6874_v6 = vld [vmem:[#allocation28 + $0xb8] sm:$0xff] }
0x1fcc   :  { %v5849_v26 = vmul.f32 0.14285715, %v5848_v30  ;;  %v10253_v30 = vpack.c.bf16 %v6856_v1, %v6855_v53 }
0x1fce   :  { %v5850_v2 = vadd.f32 %v5849_v26, %v5838_v48  ;;  %v10255_v48 = vpack.c.bf16 %v6874_v6, %v6873_v37  ;;  %v6857_v26 = vld [vmem:[#allocation28 + $0x30] sm:$0xff] }
0x1fd0   :  { %v5851_v52 = vsel %vm2183_vm4, %v5850_v2, %v5828_v22  ;;  %v6868_v22 = vld [vmem:[#allocation28 + $0x88] sm:$0xff]  ;;  %v6858_v2 = vld [vmem:[#allocation28 + $0x38] sm:$0xff] }
0x1fd1   :  { %v13066_v33 = vadd.f32 %v5851_v52, %v13883_v59  ;;  %v10243_v7 = vpack.c.bf16 %v6868_v22, %v6867_v40  ;;  %v6875_v52 = vld [vmem:[#allocation28 + $0xc0] sm:$0xff]  ;;  %v6876_v59 = vld [vmem:[#allocation28 + $0xc8] sm:$0xff]  ;;  %v10257_v29 = vpack.c.bf16 %v6858_v2, %v6857_v26 }
0x1fd3   :  { %13884 = vst [vmem:[#allocation84_spill] sm:$0xff] %v13066_v33  ;;  %5856 = vadd.xlane.f32.xlu1 %v13066_v33  ;;  %10244 = vmatprep.subr.bf16.mxu1 %v10243_v7 }
0x1fd4   :  { %10246 = vmatpush3.bf16.msra.mxu1 %v10245_v61 }
0x1fd5   :  { %10248 = vmatprep.subr.bf16.mxu1 %v10247_v50 }
0x1fd9   :  { %v6123_v21 = vpop.f32.mrb[54].mxu0 }
0x1fda   :  { %v6124_v56 = vadd.f32 %v6123_v21, %v13070_v55  ;;  %v6125_v23 = vpop.f32.mrb[55].mxu0  ;;  %v10259_v21 = vpack.c.bf16 %v6876_v59, %v6875_v52 }
0x1fdb   :  { %v6126_v18 = vadd.f32 %v6125_v23, %v13073_v20  ;;  %v6860_v23 = vld [vmem:[#allocation28 + $0x48] sm:$0xff] }
0x1fdc   :  { %v7741_v13 = vmul.f32 -1.442695, %v6124_v56  ;;  %v6859_v56 = vld [vmem:[#allocation28 + $0x40] sm:$0xff] }
0x1fdd   :  { %v7742_v45 = vmul.f32 -1.442695, %v6126_v18  ;;  %v6877_v18 = vld [vmem:[#allocation28 + $0xd0] sm:$0xff] }
0x1fde   :  { %10706 = vpow2.f32 %v7741_v13  ;;  %v6878_v13 = vld [vmem:[#allocation28 + $0xd8] sm:$0xff] }
0x1fdf   :  { %10708 = vpow2.f32 %v7742_v45  ;;  %v10261_v45 = vpack.c.bf16 %v6860_v23, %v6859_v56 }
0x1fe8   :  { %v10707_v51 = vpop.eup %10706 }
0x1fe9   :  { %v10709_v43 = vpop.eup %10708  ;;  %v6146_v62 = vadd.f32 1.0, %v10707_v51  ;;  %v10263_v51 = vpack.c.bf16 %v6878_v13, %v6877_v18 }
0x1fea   :  { %v6147_v8 = vadd.f32 1.0, %v10709_v43  ;;  %v6861_v43 = vld [vmem:[#allocation28 + $0x50] sm:$0xff] }
0x1feb   :  { %10710 = vrcp.f32 %v6146_v62  ;;  %v6862_v62 = vld [vmem:[#allocation28 + $0x58] sm:$0xff] }
0x1fec   :  { %10712 = vrcp.f32 %v6147_v8  ;;  %v6879_v8 = vld [vmem:[#allocation28 + $0xe0] sm:$0xff] }
0x1ff5   :  { %v10711_v44 = vpop.eup %10710 }
0x1ff6   :  { %v10713_v25 = vpop.eup %10712  ;;  %v13085_v5 = vmul.f32 %v10711_v44, %v6047_v36  ;;  %v6880_v36 = vld [vmem:[#allocation28 + $0xe8] sm:$0xff]  ;;  %v10265_v44 = vpack.c.bf16 %v6862_v62, %v6861_v43  ;;  %v13175_v62 = vld [vmem:[%s13889_s25 + $0x18] sm:$0xff] }
0x1ff7   :  { %v13087_v49 = vmul.f32 %v10713_v25, %v6049_v47  ;;  %v10267_v47 = vpack.c.bf16 %v6880_v36, %v6879_v8  ;;  %v6863_v25 = vld [vmem:[#allocation28 + $0x60] sm:$0xff]  ;;  %v13172_v43 = vld [vmem:[%s13889_s25 + $0x10] sm:$0xff] }
0x2060   :  { %v5857_v24 = vpop.xlane.xlu1 %5856 }
0x2061   :  { %v5859_v58 = vmul.f32 0.0078125, %v5857_v24  ;;  %v6864_v24 = vld [vmem:[#allocation28 + $0x68] sm:$0xff] }
0x2063   :  { %v5861_v15 = vsub.f32 %v13066_v33, %v5859_v58  ;;  %v6881_v58 = vld [vmem:[#allocation28 + $0xf0] sm:$0xff] }
0x2065   :  { %v5863_v42 = vmul.f32 %v5861_v15, %v5861_v15 }
0x2067   :  { %5866 = vadd.xlane.f32.xlu0 %v5863_v42  ;;  %v10269_v42 = vpack.c.bf16 %v6864_v24, %v6863_v25 }
0x20f4   :  { %v5867_v14 = vpop.xlane.xlu0 %5866 }
0x20f5   :  { %v5869_v12 = vmul.f32 0.0078125, %v5867_v14 }
0x20f7   :  { %v5871_v4 = vadd.f32 1e-05, %v5869_v12  ;;  %v6865_v12 = vld [vmem:[#allocation28 + $0x70] sm:$0xff] }
0x20f9   :  { %10714 = vrsqrt.f32 %v5871_v4  ;;  %v6866_v4 = vld [vmem:[#allocation28 + $0x78] sm:$0xff] }
0x2103   :  { %v10715_v38 = vpop.eup %10714 }
0x2104   :  { %v5875_v39 = vmul.f32 %v10715_v38, %v5861_v15  ;;  %v6882_v15 = vld [vmem:[#allocation28 + $0xf8] sm:$0xff]  ;;  %v10273_v38 = vpack.c.bf16 %v6866_v4, %v6865_v12 }
0x2105   :  { %v10271_v14 = vpack.c.bf16 %v6882_v15, %v6881_v58 }
0x2106   :  { %v5884_v63 = vmul.f32 %v12995_v54, %v5875_v39  ;;  %v6872_v54 = vld [vmem:[#allocation28 + $0xa8] sm:$0xff]  ;;  %v6162_v39 = vld [vmem:[%s13889_s25] sm:$0xff] }
0x2107   :  { %v10251_v28 = vpack.c.bf16 %v6872_v54, %v6871_v46  ;;  %v13099_v22 = vrot.slane %v6162_v39, %v13885_v32  ;;  %v13102_v10 = vrot.slane %v6162_v39, %v13886_v57  ;;  %v13105_v7 = vrot.slane %v6162_v39, %v13888_v19 }
0x2108   :  { %v5893_v17 = vadd.f32 %v12998_v27, %v5884_v63  ;;  %v10249_v27 = vpack.c.bf16 %v6854_v3, %v6853_v11  ;;  %v6163_v63 = vld [vmem:[%s13889_s25 + $0x8] sm:$0xff]  ;;  %v6169_v54 = vrot.slane %v6162_v39, %v13887_v9 }
0x2109   :  { %v13108_v41 = vrot.slane %v6163_v63, %v13885_v32  ;;  %v13111_v0 = vrot.slane %v6163_v63, %v13888_v19  ;;  %v13120_v50 = vmul.f32 0.0, %v13105_v7  ;;  %v13123_v11 = vmul.f32 0.0, %v13099_v22 }
0x210a   :  { %6051 = vmatmul.mubr.f32.gmra.mrb[60].mxu1 %v5893_v17  ;;  %6128 = vmatmul.mubr.f32.gmra.mrb[56].mxu0 %v5893_v17  ;;  %v13890_v17 = vld [vmem:[#allocation77_spill] sm:$0xff]  ;;  %v13126_v3 = vrot.slane %v6163_v63, %v13886_v57  ;;  %v13129_v46 = vmul.f32 0.0, %v13102_v10  ;;  %v6173_v6 = vrot.slane %v6163_v63, %v13887_v9  ;;  %v6212_v36 = vmul.f32 %v13099_v22, %v13085_v5 }
0x210b   :  { %7159 = vmatprep.mubr.f32.mxu0 %v13859_v34  ;;  %10250 = vmatpush3.bf16.msra.mxu1 %v10249_v27  ;;  %v13096_v40 = vsub.s32 4, %v13890_v17  ;;  %v13117_v61 = vsub.s32 5, %v13890_v17  ;;  %13891 = vst [vmem:[#allocation82_spill] sm:$0xff] %v13120_v50  ;;  %13892 = vst [vmem:[#allocation94_spill] sm:$0xff] %v13123_v11  ;;  %v6186_v27 = vmul.f32 %v13105_v7, %v13085_v5  ;;  %v13138_v53 = vmul.f32 0.0, %v13111_v0 }
0x210c   :  { %10252 = vmatprep.subr.bf16.mxu1 %v10251_v28  ;;  %13893 = vst [vmem:[#allocation86_spill] sm:$0xff] %v13129_v46  ;;  %v6187_v1 = vmul.f32 %v13111_v0, %v13087_v49  ;;  %v13143_v37 = vmul.f32 0.0, %v13108_v41  ;;  %v13762_v2 = vrot.slane %v13120_v50, 1  ;;  %v13770_v52 = vrot.slane %v13123_v11, 2 }
0x210d   :  { %v13114_v35 = vrot.slane %v6162_v39, %v13096_v40  ;;  %v13135_v28 = vrot.slane %v6163_v63, %v13096_v40  ;;  %13895 = vst [vmem:[#allocation88_spill] sm:$0xff] %v13138_v53  ;;  %v13153_v26 = vrot.slane %v6163_v63, %v13117_v61  ;;  %v13158_v59 = vmul.f32 0.0, %v13126_v3 }
0x210e   :  { %13896 = vst [vmem:[#allocation89_spill] sm:$0xff] %v13143_v37  ;;  %v6193_v56 = vrot.slane %v6186_v27, 1  ;;  %v13167_v18 = vsub.s32 6, %v13890_v17  ;;  %v13761_v13 = vrot.slane %v13138_v53, 1  ;;  %v13177_v8 = vmul.f32 0.0, %v6173_v6 }
0x210f   :  { %10254 = vmatpush3.bf16.msra.mxu1 %v10253_v30  ;;  %13894 = vst [vmem:[#allocation87_spill] sm:$0xff] %v13135_v28  ;;  %v13147_v30 = vmul.f32 0.0, %v13114_v35  ;;  %13899 = vst [vmem:[#allocation92_spill] sm:$0xff] %v13153_v26  ;;  %v13164_v23 = vmul.f32 0.0, %v13135_v28  ;;  %v6213_v25 = vmul.f32 %v13108_v41, %v13087_v49  ;;  %v6220_v27 = vrot.slane %v6212_v36, 2 }
0x2110   :  { %10256 = vmatprep.subr.bf16.mxu1 %v10255_v48  ;;  %v13150_v48 = vrot.slane %v6162_v39, %v13117_v61  ;;  %13900 = vst [vmem:[#allocation93_spill] sm:$0xff] %v13158_v59  ;;  %13903 = vst [vmem:[#allocation95_spill] sm:$0xff] %v13177_v8  ;;  %v6194_v15 = vsel %vm3509_vm15, %v13762_v2, %v6193_v56  ;;  %v13199_v12 = vrot.slane %v6162_v39, %v13167_v18 }
0x2111   :  { %13897 = vst [vmem:[#allocation90_spill] sm:$0xff] %v13147_v30  ;;  %13902 = vst [vmem:[#allocation77_spill] sm:$0xff] %v13164_v23  ;;  %v6240_v2 = vmul.f32 %v13126_v3, %v13087_v49  ;;  %v6221_v36 = vsel %vm6218_vm1, %v13770_v52, %v6220_v27  ;;  %v13913_v33 = vrot.slane %v13143_v37, 2  ;;  %v13266_v27 = vrot.slane %v13175_v62, %v13885_v32 }
0x2112   :  { %13898 = vst [vmem:[#allocation91_spill] sm:$0xff] %v13150_v48  ;;  %v13230_v24 = vmul.f32 0.0, %v13199_v12  ;;  %v13919_v37 = vrot.slane %v13158_v59, 3  ;;  %v6293_v53 = vmul.f32 %v13153_v26, %v13087_v49  ;;  %v6318_v59 = vmul.f32 %v13199_v12, %v13085_v5 }
0x2113   :  { %10258 = vmatpush3.bf16.msra.mxu1 %v10257_v29  ;;  %v6267_v29 = vmul.f32 %v13135_v28, %v13087_v49  ;;  %13915 = vst [vmem:[#allocation106_spill] sm:$0xff] %v13266_v27  ;;  %v13300_v50 = vmul.f32 0.0, %v13266_v27 }
0x2114   :  { %10260 = vmatprep.subr.bf16.mxu1 %v10259_v21  ;;  %v13161_v21 = vmul.f32 0.0, %v6169_v54  ;;  %v13213_v54 = vrot.slane %v13175_v62, %v13887_v9  ;;  %13908 = vst [vmem:[#allocation100_spill] sm:$0xff] %v13230_v24 }
0x2116   :  { %13901 = vst [vmem:[#allocation85_spill] sm:$0xff] %v13161_v21  ;;  %13907 = vst [vmem:[#allocation99_spill] sm:$0xff] %v13213_v54 }
0x2117   :  { %10262 = vmatpush3.bf16.msra.mxu1 %v10261_v45  ;;  %v6196_v45 = vrot.slane %v6187_v1, 1  ;;  %v6239_v1 = vmul.f32 %v13102_v10, %v13085_v5 }
0x2118   :  { %10264 = vmatprep.subr.bf16.mxu1 %v10263_v51 }
0x2119   :  { %v6197_v4 = vsel %vm3509_vm15, %v13761_v13, %v6196_v45  ;;  %v6200_v45 = vadd.f32 %v6194_v15, %v13161_v21  ;;  %v6223_v13 = vrot.slane %v6213_v25, 2  ;;  %v6266_v25 = vmul.f32 %v13114_v35, %v13085_v5 }
0x211a   :  { %v6201_v58 = vadd.f32 %v6197_v4, %v13177_v8  ;;  %v13247_v4 = vrot.slane %v13172_v43, %v13885_v32  ;;  %v6247_v6 = vrot.slane %v6239_v1, 3  ;;  %v13270_v1 = vrot.slane %v13172_v43, %v13886_v57 }
0x211b   :  { %10266 = vmatpush3.bf16.msra.mxu1 %v10265_v44  ;;  %v13182_v44 = vmul.f32 0.0, %v13150_v48  ;;  %v6224_v60 = vsel %vm6218_vm1, %v13913_v33, %v6223_v13  ;;  %v6227_v34 = vadd.f32 %v6221_v36, %v6200_v45  ;;  %v6273_v52 = vrot.slane %v6266_v25, 4 }
0x211c   :  { %10268 = vmatprep.subr.bf16.mxu1 %v10267_v47  ;;  %v13185_v47 = vsub.s32 7, %v13890_v17  ;;  %v13209_v17 = vrot.slane %v13172_v43, %v13887_v9  ;;  %13911 = vst [vmem:[#allocation103_spill] sm:$0xff] %v13247_v4  ;;  %v6228_v8 = vadd.f32 %v6224_v60, %v6201_v58  ;;  %13916 = vst [vmem:[#allocation107_spill] sm:$0xff] %v13270_v1  ;;  %v13918_v60 = vrot.slane %v13129_v46, 3 }
0x211d   :  { %13904 = vst [vmem:[#allocation96_spill] sm:$0xff] %v13182_v44  ;;  %v6276_v58 = vrot.slane %v6267_v29, 4  ;;  %v6292_v45 = vmul.f32 %v13150_v48, %v13085_v5  ;;  %v13921_v46 = vrot.slane %v13164_v23, 4 }
0x211e   :  { %13906 = vst [vmem:[#allocation98_spill] sm:$0xff] %v13209_v17  ;;  %v13219_v56 = vrot.slane %v6162_v39, %v13185_v47  ;;  %v13234_v39 = vrot.slane %v13172_v43, %v13888_v19  ;;  %v6248_v13 = vsel %vm6245_vm7, %v13918_v60, %v6247_v6 }
0x211f   :  { %10270 = vmatpush3.bf16.msra.mxu1 %v10269_v42  ;;  %v13225_v42 = vrot.slane %v6163_v63, %v13185_v47  ;;  %v6254_v21 = vadd.f32 %v6248_v13, %v6227_v34  ;;  %v13920_v34 = vrot.slane %v13147_v30, 4 }
0x2120   :  { %10272 = vmatprep.subr.bf16.mxu1 %v10271_v14  ;;  %v13196_v14 = vmul.f32 0.0, %v13153_v26  ;;  %v13255_v51 = vmul.f32 0.0, %v13219_v56  ;;  %v13274_v33 = vmul.f32 0.0, %v13234_v39 }
0x2121   :  { %v13261_v9 = vmul.f32 0.0, %v13225_v42 }
0x2122   :  { %13905 = vst [vmem:[#allocation97_spill] sm:$0xff] %v13196_v14  ;;  %13912 = vst [vmem:[#allocation104_spill] sm:$0xff] %v13255_v51 }
0x2123   :  { %10274 = vmatpush3.bf16.msra.mxu1 %v10273_v38  ;;  %v13205_v38 = vrot.slane %v6163_v63, %v13167_v18  ;;  %v13243_v63 = vrot.slane %v13175_v62, %v13888_v19  ;;  %v6250_v19 = vrot.slane %v6240_v2, 3  ;;  %13914 = vst [vmem:[#allocation105_spill] sm:$0xff] %v13261_v9  ;;  %13917 = vst [vmem:[#allocation108_spill] sm:$0xff] %v13274_v33  ;;  %v13277_v2 = vmul.f32 0.0, %v13247_v4 }
0x2125   :  { %v13239_v15 = vmul.f32 0.0, %v13205_v38  ;;  %13910 = vst [vmem:[#allocation102_spill] sm:$0xff] %v13243_v63  ;;  %v6251_v32 = vsel %vm6245_vm7, %v13919_v37, %v6250_v19  ;;  %v13297_v36 = vmul.f32 0.0, %v13243_v63  ;;  %v6274_v37 = vsel %vm2462_vm9, %v13920_v34, %v6273_v52 }
0x2126   :  { %v6255_v48 = vadd.f32 %v6251_v32, %v6228_v8  ;;  %v6277_v32 = vsel %vm2462_vm9, %v13921_v46, %v6276_v58  ;;  %v6299_v8 = vrot.slane %v6292_v45, 5  ;;  %v6280_v28 = vadd.f32 %v6274_v37, %v6254_v21 }
0x2127   :  { %13909 = vst [vmem:[#allocation101_spill] sm:$0xff] %v13239_v15  ;;  %v13317_v34 = vrot.slane %v13175_v62, %v13886_v57  ;;  %v13324_v46 = vrot.slane %v13172_v43, %v13096_v40  ;;  %v13332_v21 = vrot.slane %v13172_v43, %v13117_v61  ;;  %v6325_v45 = vrot.slane %v6318_v59, 6 }
0x2128   :  { %v6281_v52 = vadd.f32 %v6277_v32, %v6255_v48  ;;  %v13926_v48 = vrot.slane %v13182_v44, 5  ;;  %v13928_v37 = vrot.slane %v13196_v14, 5  ;;  %v13351_v59 = vrot.slane %v13172_v43, %v13167_v18 }
0x2129   :  { %13922 = vst [vmem:[#allocation109_spill] sm:$0xff] %v13317_v34  ;;  %13923 = vst [vmem:[#allocation110_spill] sm:$0xff] %v13324_v46 }
0x212a   :  { %13925 = vst [vmem:[#allocation112_spill] sm:$0xff] %v13332_v21  ;;  %v6300_v58 = vsel %vm2187_vm8, %v13926_v48, %v6299_v8  ;;  %13929 = vst [vmem:[#allocation114_spill] sm:$0xff] %v13351_v59  ;;  %v13932_v48 = vrot.slane %v13239_v15, 6 }
0x21dd   :  { %v13285_v11 = vpop.f32.mrb[60].mxu1  ;;  %v6129_v25 = vpop.f32.mrb[56].mxu0 }
0x21de   :  { %v6130_v29 = vadd.f32 %v6129_v25, %v13070_v55  ;;  %v13294_v6 = vpop.f32.mrb[61].mxu1  ;;  %v6131_v60 = vpop.f32.mrb[57].mxu0  ;;  %v6345_v55 = vmul.f32 %v13225_v42, %v13087_v49 }
0x21df   :  { %v6132_v19 = vadd.f32 %v6131_v60, %v13073_v20  ;;  %v6302_v20 = vrot.slane %v6293_v53, 5  ;;  %v6319_v60 = vmul.f32 %v13205_v38, %v13087_v49  ;;  %v13328_v53 = vrot.slane %v13175_v62, %v13096_v40 }
0x21e0   :  { %v7743_v25 = vmul.f32 -1.442695, %v6130_v29  ;;  %v13320_v29 = vmul.f32 0.0, %v13270_v1  ;;  %v6354_v14 = vrot.slane %v6345_v55, 7  ;;  %v13395_v55 = vrot.slane %v13175_v62, %v13185_v47 }
0x21e1   :  { %v7744_v26 = vmul.f32 -1.442695, %v6132_v19  ;;  %13924 = vst [vmem:[#allocation111_spill] sm:$0xff] %v13328_v53  ;;  %v13341_v19 = vrot.slane %v13175_v62, %v13117_v61  ;;  %v6303_v40 = vsel %vm2187_vm8, %v13928_v37, %v6302_v20  ;;  %v6328_v32 = vrot.slane %v6319_v60, 6 }
0x21e2   :  { %10716 = vpow2.f32 %v7743_v25  ;;  %v6306_v25 = vadd.f32 %v6300_v58, %v6280_v28  ;;  %v6307_v13 = vadd.f32 %v6303_v40, %v6281_v52  ;;  %v13355_v61 = vrot.slane %v13175_v62, %v13167_v18 }
0x21e3   :  { %10718 = vpow2.f32 %v7744_v26  ;;  %v6344_v26 = vmul.f32 %v13219_v56, %v13085_v5  ;;  %13927 = vst [vmem:[#allocation113_spill] sm:$0xff] %v13341_v19  ;;  %v13359_v20 = vmul.f32 0.0, %v13317_v34  ;;  %v13362_v28 = vmul.f32 0.0, %v13324_v46 }
0x21e4   :  { %13930 = vst [vmem:[#allocation115_spill] sm:$0xff] %v13355_v61  ;;  %v13365_v60 = vmul.f32 0.0, %v13332_v21  ;;  %v13931_v52 = vrot.slane %v13230_v24, 6  ;;  %v13371_v40 = vmul.f32 0.0, %v13328_v53  ;;  %v13374_v18 = vmul.f32 0.0, %v13341_v19 }
0x21e5   :  { %v6351_v37 = vrot.slane %v6344_v26, 7  ;;  %v6329_v8 = vsel %vm2185_vm6, %v13932_v48, %v6328_v32  ;;  %v13381_v24 = vmul.f32 0.0, %v13351_v59  ;;  %v13388_v26 = vrot.slane %v13172_v43, %v13185_v47 }
0x21e6   :  { %v6326_v58 = vsel %vm2185_vm6, %v13931_v52, %v6325_v45  ;;  %v6333_v23 = vadd.f32 %v6329_v8, %v6307_v13  ;;  %v13384_v45 = vmul.f32 0.0, %v13355_v61  ;;  %v13933_v32 = vrot.slane %v13255_v51, 7 }
0x21e7   :  { %v6332_v57 = vadd.f32 %v6326_v58, %v6306_v25  ;;  %v6380_v48 = vmul.f32 %v13234_v39, %v13085_v5  ;;  %v13934_v25 = vrot.slane %v13261_v9, 7  ;;  %v6381_v47 = vmul.f32 %v13243_v63, %v13087_v49 }
0x21e8   :  { %v6352_v8 = vsel %vm2183_vm4, %v13933_v32, %v6351_v37  ;;  %v6368_v58 = vmul.f32 %v13209_v17, %v13085_v5  ;;  %v6459_v37 = vmul.f32 %v13328_v53, %v13087_v49 }
0x21e9   :  { %v6355_v44 = vsel %vm2183_vm4, %v13934_v25, %v6354_v14  ;;  %v6358_v62 = vadd.f32 %v6352_v8, %v6332_v57  ;;  %v6406_v14 = vmul.f32 %v13247_v4, %v13085_v5  ;;  %v6388_v57 = vrot.slane %v6380_v48, 1 }
0x21ea   :  { %v6359_v30 = vadd.f32 %v6355_v44, %v6333_v23  ;;  %v6432_v23 = vmul.f32 %v13270_v1, %v13085_v5  ;;  %v6391_v25 = vrot.slane %v6381_v47, 1  ;;  %v6458_v8 = vmul.f32 %v13324_v46, %v13085_v5 }
0x21eb   :  { %v6370_v44 = vadd.f32 %v6368_v58, %v6358_v62  ;;  %v13430_v48 = vmul.f32 0.0, %v13388_v26  ;;  %v6485_v58 = vmul.f32 %v13341_v19, %v13087_v49  ;;  %v6510_v62 = vmul.f32 %v13351_v59, %v13085_v5 }
0x21ec   :  { %v10717_v13 = vpop.eup %10716  ;;  %v6511_v47 = vmul.f32 %v13355_v61, %v13087_v49  ;;  %v6440_v46 = vrot.slane %v6432_v23, 3  ;;  %v6466_v59 = vrot.slane %v6458_v8, 4  ;;  %v6469_v1 = vrot.slane %v6459_v37, 4 }
0x21ed   :  { %v10719_v52 = vpop.eup %10718  ;;  %v6148_v15 = vadd.f32 1.0, %v10717_v13  ;;  %v6369_v13 = vmul.f32 %v13213_v54, %v13087_v49  ;;  %v13936_v54 = vrot.slane %v13297_v36, 1  ;;  %v6495_v4 = vrot.slane %v6485_v58, 5 }
0x21ee   :  { %v6149_v51 = vadd.f32 1.0, %v10719_v52  ;;  %v6407_v52 = vmul.f32 %v13266_v27, %v13087_v49  ;;  %v6545_v27 = vrot.slane %v13430_v48, 7  ;;  %v6518_v63 = vrot.slane %v6510_v62, 6 }
0x21ef   :  { %10720 = vrcp.f32 %v6148_v15  ;;  %v6433_v15 = vmul.f32 %v13317_v34, %v13087_v49  ;;  %v6371_v32 = vadd.f32 %v6369_v13, %v6359_v30  ;;  %v13439_v30 = vmul.f32 0.0, %v13395_v55 }
0x21f0   :  { %10722 = vrcp.f32 %v6149_v51  ;;  %v6484_v51 = vmul.f32 %v13332_v21, %v13085_v5  ;;  %v13935_v13 = vrot.slane %v13274_v33, 1  ;;  %v6414_v21 = vrot.slane %v6406_v14, 2 }
0x21f1   :  { %v6417_v53 = vrot.slane %v6407_v52, 2  ;;  %v6393_v19 = vsel %vm3509_vm15, %v6391_v25, %v13936_v54  ;;  %v6443_v9 = vrot.slane %v6433_v15, 3  ;;  %v6521_v33 = vrot.slane %v6511_v47, 6 }
0x21f2   :  { %v6390_v43 = vsel %vm3509_vm15, %v6388_v57, %v13935_v13  ;;  %v6397_v34 = vadd.f32 %v6393_v19, %v6371_v32  ;;  %v6492_v61 = vrot.slane %v6484_v51, 5  ;;  %v6548_v57 = vrot.slane %v13439_v30, 7 }
0x21f3   :  { %v6396_v17 = vadd.f32 %v6390_v43, %v6370_v44  ;;  %v6053_v14 = vadd.f32 %v13285_v11, %v13078_v16  ;;  %v13937_v52 = vrot.slane %v13277_v2, 2  ;;  %v13938_v43 = vrot.slane %v13300_v50, 2 }
0x21f4   :  { %v13939_v37 = vrot.slane %v13320_v29, 3  ;;  %v6055_v44 = vadd.f32 %v13294_v6, %v13081_v31  ;;  %v13940_v15 = vrot.slane %v13359_v20, 3  ;;  %v13941_v11 = vrot.slane %v13362_v28, 4 }
0x21f5   :  { %v6416_v54 = vsel %vm6218_vm1, %v6414_v21, %v13937_v52  ;;  %v6419_v19 = vsel %vm6218_vm1, %v6417_v53, %v13938_v43  ;;  %v13942_v58 = vrot.slane %v13371_v40, 4  ;;  %v13943_v62 = vrot.slane %v13365_v60, 5 }
0x21f6   :  { %v6442_v32 = vsel %vm6245_vm7, %v6440_v46, %v13939_v37  ;;  %v6422_v25 = vadd.f32 %v6416_v54, %v6396_v17  ;;  %v6445_v16 = vsel %vm6245_vm7, %v6443_v9, %v13940_v15  ;;  %v6468_v21 = vsel %vm2462_vm9, %v6466_v59, %v13941_v11 }
0x21f7   :  { %v6423_v53 = vadd.f32 %v6419_v19, %v6397_v34  ;;  %v6471_v46 = vsel %vm2462_vm9, %v6469_v1, %v13942_v58  ;;  %v13476_v31 = vsel %vm2187_vm8, %v6492_v61, %v13943_v62  ;;  %v13944_v9 = vrot.slane %v13374_v18, 5  ;;  %v13952_v62 = vld [vmem:[#allocation85_spill] sm:$0xff] }
0x21f8   :  { %v13945_v59 = vrot.slane %v13381_v24, 6  ;;  %v13946_v47 = vrot.slane %v13384_v45, 6  ;;  %v6448_v43 = vadd.f32 %v6442_v32, %v6422_v25  ;;  %v13950_v25 = vld [vmem:[#allocation88_spill] sm:$0xff] }
0x21f9   :  { %v10721_v23 = vpop.eup %10720  ;;  %v13483_v6 = vsel %vm2187_vm8, %v6495_v4, %v13944_v9  ;;  %v13953_v9 = vld [vmem:[#allocation94_spill] sm:$0xff] }
0x21fa   :  { %v10723_v8 = vpop.eup %10722  ;;  %v13468_v51 = vmul.f32 %v10721_v23, %v6053_v14  ;;  %v13488_v34 = vsel %vm2185_vm6, %v6518_v63, %v13945_v59  ;;  %v13493_v1 = vsel %vm2185_vm6, %v6521_v33, %v13946_v47  ;;  %v6449_v23 = vadd.f32 %v6445_v16, %v6423_v53  ;;  %v13956_v16 = vld [vmem:[#allocation86_spill] sm:$0xff] }
0x21fb   :  { %v13478_v17 = vmul.f32 %v10723_v8, %v6055_v44  ;;  %v13948_v44 = vld [vmem:[#allocation82_spill] sm:$0xff]  ;;  %v13951_v8 = vrot.slane %v13950_v25, 1  ;;  %v13954_v59 = vrot.slane %v13953_v9, 2  ;;  %v13957_v53 = vrot.slane %v13956_v16, 3 }
0x21fc   :  { %v6554_v61 = vmul.f32 %v13105_v7, %v13468_v51  ;;  %v6566_v13 = vmul.f32 %v13099_v22, %v13468_v51  ;;  %v6578_v4 = vmul.f32 %v13102_v10, %v13468_v51  ;;  %v6590_v14 = vmul.f32 %v13114_v35, %v13468_v51  ;;  %v13947_v7 = vld [vmem:[#allocation87_spill] sm:$0xff] }
0x21fd   :  { %v6555_v63 = vmul.f32 %v13111_v0, %v13478_v17  ;;  %v6567_v52 = vmul.f32 %v13108_v41, %v13478_v17  ;;  %v6579_v33 = vmul.f32 %v13126_v3, %v13478_v17  ;;  %v6591_v54 = vmul.f32 %v13947_v7, %v13478_v17  ;;  %v13960_v7 = vld [vmem:[#allocation89_spill] sm:$0xff] }
0x21fe   :  { %v6558_v22 = vrot.slane %v6554_v61, 1  ;;  %v6570_v19 = vrot.slane %v6566_v13, 2  ;;  %v6582_v37 = vrot.slane %v6578_v4, 3  ;;  %v13513_v10 = vmul.f32 %v13388_v26, %v13085_v5  ;;  %v13955_v61 = vld [vmem:[#allocation95_spill] sm:$0xff] }
0x21ff   :  { %v13517_v0 = vmul.f32 %v13395_v55, %v13087_v49  ;;  %v6560_v35 = vrot.slane %v6555_v63, 1  ;;  %v6572_v41 = vrot.slane %v6567_v52, 2  ;;  %v13949_v3 = vrot.slane %v13948_v44, 1  ;;  %v13958_v63 = vld [vmem:[#allocation91_spill] sm:$0xff]  ;;  %v13959_v52 = vld [vmem:[#allocation92_spill] sm:$0xff] }
0x2200   :  { %v6584_v11 = vrot.slane %v6579_v33, 3  ;;  %v6594_v32 = vrot.slane %v6590_v14, 4  ;;  %v6571_v49 = vsel %vm6218_vm1, %v13954_v59, %v6570_v19  ;;  %v6596_v47 = vrot.slane %v6591_v54, 4 }
0x2201   :  { %v6559_v15 = vsel %vm3509_vm15, %v13949_v3, %v6558_v22  ;;  %v6561_v58 = vsel %vm3509_vm15, %v13951_v8, %v6560_v35  ;;  %v6583_v4 = vsel %vm6245_vm7, %v13957_v53, %v6582_v37  ;;  %v6602_v14 = vmul.f32 %v13958_v63, %v13468_v51  ;;  %v13966_v53 = vld [vmem:[#allocation77_spill] sm:$0xff] }
0x2202   :  { %v6564_v5 = vadd.f32 %v6559_v15, %v13952_v62  ;;  %v6565_v13 = vadd.f32 %v6561_v58, %v13955_v61  ;;  %v6603_v33 = vmul.f32 %v13959_v52, %v13478_v17  ;;  %v13961_v22 = vrot.slane %v13960_v7, 2  ;;  %v13962_v58 = vld [vmem:[#allocation93_spill] sm:$0xff] }
0x2203   :  { %v6614_v54 = vmul.f32 %v13199_v12, %v13468_v51  ;;  %v6615_v19 = vmul.f32 %v13205_v38, %v13478_v17  ;;  %v6606_v15 = vrot.slane %v6602_v14, 5  ;;  %v6626_v25 = vmul.f32 %v13219_v56, %v13468_v51  ;;  %v13970_v52 = vld [vmem:[#allocation97_spill] sm:$0xff] }
0x2204   :  { %v6573_v35 = vsel %vm6218_vm1, %v13961_v22, %v6572_v41  ;;  %v6576_v44 = vadd.f32 %v6571_v49, %v6564_v5  ;;  %v6608_v37 = vrot.slane %v6603_v33, 5  ;;  %v6474_v8 = vadd.f32 %v6468_v21, %v6448_v43  ;;  %v13964_v49 = vld [vmem:[#allocation90_spill] sm:$0xff] }
0x2205   :  { %v6577_v3 = vadd.f32 %v6573_v35, %v6565_v13  ;;  %v13963_v62 = vrot.slane %v13962_v58, 3  ;;  %v6627_v41 = vmul.f32 %v13225_v42, %v13478_v17  ;;  %v6544_v12 = vrot.slane %v13513_v10, 7 }
0x2206   :  { %v6588_v59 = vadd.f32 %v6583_v4, %v6576_v44  ;;  %v13965_v38 = vrot.slane %v13964_v49, 4  ;;  %v6618_v13 = vrot.slane %v6614_v54, 6  ;;  %v6475_v16 = vadd.f32 %v6471_v46, %v6449_v23  ;;  %v13968_v4 = vld [vmem:[#allocation96_spill] sm:$0xff]  ;;  %v13972_v23 = vld [vmem:[#allocation102_spill] sm:$0xff] }
0x2207   :  { %v6585_v9 = vsel %vm6245_vm7, %v13963_v62, %v6584_v11  ;;  %v13967_v56 = vrot.slane %v13966_v53, 4  ;;  %v6620_v63 = vrot.slane %v6615_v19, 6  ;;  %v13969_v14 = vrot.slane %v13968_v4, 5  ;;  %v13973_v54 = vld [vmem:[#allocation100_spill] sm:$0xff]  ;;  %v13976_v62 = vld [vmem:[#allocation106_spill] sm:$0xff] }
0x2208   :  { %v6589_v5 = vadd.f32 %v6585_v9, %v6577_v3  ;;  %v6595_v61 = vsel %vm2462_vm9, %v13965_v38, %v6594_v32  ;;  %v13971_v33 = vrot.slane %v13970_v52, 5  ;;  %v6630_v22 = vrot.slane %v6626_v25, 7  ;;  %v13977_v9 = vld [vmem:[#allocation101_spill] sm:$0xff] }
0x2209   :  { %v6597_v21 = vsel %vm2462_vm9, %v13967_v56, %v6596_v47  ;;  %v6600_v43 = vadd.f32 %v6595_v61, %v6588_v59  ;;  %v6607_v42 = vsel %vm2187_vm8, %v13969_v14, %v6606_v15  ;;  %v6632_v32 = vrot.slane %v6627_v41, 7  ;;  %v13975_v15 = vld [vmem:[#allocation103_spill] sm:$0xff]  ;;  %v13980_v61 = vld [vmem:[#allocation104_spill] sm:$0xff] }
0x220a   :  { %v6601_v11 = vadd.f32 %v6597_v21, %v6589_v5  ;;  %v6609_v7 = vsel %vm2187_vm8, %v13971_v33, %v6608_v37  ;;  %v6642_v46 = vmul.f32 %v13234_v39, %v13468_v51  ;;  %v6643_v47 = vmul.f32 %v13972_v23, %v13478_v17  ;;  %v13979_v5 = vld [vmem:[#allocation107_spill] sm:$0xff]  ;;  %v13982_v21 = vld [vmem:[#allocation109_spill] sm:$0xff] }
0x220b   :  { %v6612_v35 = vadd.f32 %v6607_v42, %v6600_v43  ;;  %v13974_v19 = vrot.slane %v13973_v54, 6  ;;  %v6654_v58 = vmul.f32 %v13975_v15, %v13468_v51  ;;  %v6655_v37 = vmul.f32 %v13976_v62, %v13478_v17  ;;  %v13986_v33 = vld [vmem:[#allocation99_spill] sm:$0xff]  ;;  %v13989_v15 = vld [vmem:[#allocation108_spill] sm:$0xff] }
0x220c   :  { %v6613_v44 = vadd.f32 %v6609_v7, %v6601_v11  ;;  %v6500_v25 = vadd.f32 %v13476_v31, %v6474_v8  ;;  %v13978_v59 = vrot.slane %v13977_v9, 6  ;;  %v6666_v49 = vmul.f32 %v13979_v5, %v13468_v51  ;;  %v13983_v11 = vld [vmem:[#allocation105_spill] sm:$0xff] }
0x220d   :  { %v6619_v3 = vsel %vm2185_vm6, %v13974_v19, %v6618_v13  ;;  %v13981_v53 = vrot.slane %v13980_v61, 7  ;;  %v6646_v56 = vrot.slane %v6642_v46, 1  ;;  %v6667_v43 = vmul.f32 %v13982_v21, %v13478_v17  ;;  %v13988_v19 = vld [vmem:[#allocation111_spill] sm:$0xff]  ;;  %v13995_v21 = vld [vmem:[#allocation114_spill] sm:$0xff] }
0x220e   :  { %v6621_v39 = vsel %vm2185_vm6, %v13978_v59, %v6620_v63  ;;  %v6624_v41 = vadd.f32 %v6619_v3, %v6612_v35  ;;  %v13984_v4 = vrot.slane %v13983_v11, 7  ;;  %v13985_v63 = vld [vmem:[#allocation98_spill] sm:$0xff]  ;;  %v6648_v42 = vrot.slane %v6643_v47, 1  ;;  %v13991_v59 = vld [vmem:[#allocation112_spill] sm:$0xff] }
0x220f   :  { %v6625_v38 = vadd.f32 %v6621_v39, %v6613_v44  ;;  %v6631_v13 = vsel %vm2183_vm4, %v13981_v53, %v6630_v22  ;;  %v6638_v14 = vmul.f32 %v13985_v63, %v13468_v51  ;;  %v6639_v7 = vmul.f32 %v13986_v33, %v13478_v17  ;;  %v13987_v44 = vld [vmem:[#allocation110_spill] sm:$0xff] }
0x2210   :  { %v6633_v31 = vsel %vm2183_vm4, %v13984_v4, %v6632_v32  ;;  %v6636_v8 = vadd.f32 %v6631_v13, %v6624_v41  ;;  %v6658_v35 = vrot.slane %v6654_v58, 2  ;;  %v6660_v23 = vrot.slane %v6655_v37, 2  ;;  %v13997_v4 = vld [vmem:[#allocation115_spill] sm:$0xff] }
0x2211   :  { %v6637_v52 = vadd.f32 %v6633_v31, %v6625_v38  ;;  %v6670_v46 = vrot.slane %v6666_v49, 3  ;;  %v6678_v54 = vmul.f32 %v13987_v44, %v13468_v51  ;;  %v6679_v3 = vmul.f32 %v13988_v19, %v13478_v17  ;;  %v13993_v49 = vld [vmem:[#allocation113_spill] sm:$0xff] }
0x2212   :  { %v6640_v22 = vadd.f32 %v6638_v14, %v6636_v8  ;;  %v13990_v62 = vrot.slane %v13989_v15, 1  ;;  %v6672_v47 = vrot.slane %v6667_v43, 3  ;;  %v6690_v39 = vmul.f32 %v13991_v59, %v13468_v51 }
0x2213   :  { %v6641_v32 = vadd.f32 %v6639_v7, %v6637_v52  ;;  %v6501_v58 = vadd.f32 %v13483_v6, %v6475_v16  ;;  %v13992_v37 = vrot.slane %v13297_v36, 1  ;;  %v6691_v38 = vmul.f32 %v13993_v49, %v13478_v17 }
0x2214   :  { %v6647_v9 = vsel %vm3509_vm15, %v6646_v56, %v13990_v62  ;;  %v13994_v53 = vrot.slane %v13277_v2, 2  ;;  %v6682_v56 = vrot.slane %v6678_v54, 4  ;;  %v6702_v43 = vmul.f32 %v13995_v21, %v13468_v51 }
0x2215   :  { %v6649_v41 = vsel %vm3509_vm15, %v6648_v42, %v13992_v37  ;;  %v6652_v5 = vadd.f32 %v6647_v9, %v6640_v22  ;;  %v13996_v11 = vrot.slane %v13300_v50, 2  ;;  %v6684_v16 = vrot.slane %v6679_v3, 4 }
0x2216   :  { %v6653_v61 = vadd.f32 %v6649_v41, %v6641_v32  ;;  %v6659_v13 = vsel %vm6218_vm1, %v6658_v35, %v13994_v53  ;;  %v6703_v31 = vmul.f32 %v13997_v4, %v13478_v17  ;;  %v13998_v63 = vrot.slane %v13320_v29, 3 }
0x2217   :  { %v6661_v6 = vsel %vm6218_vm1, %v6660_v23, %v13996_v11  ;;  %v6664_v36 = vadd.f32 %v6659_v13, %v6652_v5  ;;  %v14000_v14 = vrot.slane %v13359_v20, 3  ;;  %v6694_v52 = vrot.slane %v6690_v39, 5 }
0x2218   :  { %v6665_v8 = vadd.f32 %v6661_v6, %v6653_v61  ;;  %v6671_v2 = vsel %vm6245_vm7, %v6670_v46, %v13998_v63  ;;  %v6696_v50 = vrot.slane %v6691_v38, 5  ;;  %v6714_v7 = vmul.f32 %v13388_v26, %v13468_v51  ;;  %v6726_v26 = vld [vmem:[%s13999_s6] sm:$0x3] }
0x2219   :  { %v6673_v42 = vsel %vm6245_vm7, %v6672_v47, %v14000_v14  ;;  %v6676_v33 = vadd.f32 %v6671_v2, %v6664_v36  ;;  %v6715_v35 = vmul.f32 %v13395_v55, %v13478_v17  ;;  %v6547_v23 = vrot.slane %v13517_v0, 7  ;;  %v14006_v47 = vld [vmem:[#allocation78_spill] sm:$0xff] }
0x221a   :  { %v6677_v22 = vadd.f32 %v6673_v42, %v6665_v8  ;;  %v14001_v29 = vrot.slane %v13362_v28, 4  ;;  %v6706_v44 = vrot.slane %v6702_v43, 6  ;;  %v6526_v20 = vadd.f32 %v13488_v34, %v6500_v25 }
0x221b   :  { %v14002_v54 = vrot.slane %v13371_v40, 4  ;;  %v6708_v32 = vrot.slane %v6703_v31, 6  ;;  %v6527_v51 = vadd.f32 %v13493_v1, %v6501_v58  ;;  %v14003_v17 = vrot.slane %v13365_v60, 5 }
0x221c   :  { %v6683_v46 = vsel %vm2462_vm9, %v6682_v56, %v14001_v29  ;;  %v6718_v28 = vrot.slane %v6714_v7, 7  ;;  %v14004_v15 = vrot.slane %v13374_v18, 5  ;;  %v6720_v25 = vrot.slane %v6715_v35, 7 }
0x221d   :  { %v6685_v19 = vsel %vm2462_vm9, %v6684_v16, %v14002_v54  ;;  %v6688_v3 = vadd.f32 %v6683_v46, %v6676_v33  ;;  %v6695_v0 = vsel %vm2187_vm8, %v6694_v52, %v14003_v17  ;;  %v6546_v40 = vsel %vm2183_vm4, %v6544_v12, %v6545_v27  ;;  %v14008_v12 = vld [vmem:[#allocation80_spill] sm:$0xff] }
0x221e   :  { %v6689_v55 = vadd.f32 %v6685_v19, %v6677_v22  ;;  %v6697_v62 = vsel %vm2187_vm8, %v6696_v50, %v14004_v15  ;;  %v14005_v1 = vrot.slane %v13381_v24, 6  ;;  %v6731_v59 = vrot.slane %v6726_v26, %v14006_v47 }
0x221f   :  { %v6700_v34 = vadd.f32 %v6695_v0, %v6688_v3  ;;  %v6549_v18 = vsel %vm2183_vm4, %v6547_v23, %v6548_v57  ;;  %v6552_v39 = vadd.f32 %v6546_v40, %v6526_v20  ;;  %v14007_v58 = vrot.slane %v13384_v45, 6 }
0x2220   :  { %v6701_v9 = vadd.f32 %v6697_v62, %v6689_v55  ;;  %v6707_v60 = vsel %vm2185_vm6, %v6706_v44, %v14005_v1  ;;  %v6553_v10 = vadd.f32 %v6549_v18, %v6527_v51  ;;  %v6719_v24 = vsel %vm2183_vm4, %v6718_v28, %v6545_v27  ;;  %v6807_v1 = vld [vmem:[#allocation27] sm:$0x3] }
0x2221   :  { %v6709_v37 = vsel %vm2185_vm6, %v6708_v32, %v14007_v58  ;;  %v6712_v41 = vadd.f32 %v6707_v60, %v6700_v34  ;;  %v6735_v49 = vrot.slane %v6726_v26, %v14008_v12  ;;  %v6721_v38 = vsel %vm2183_vm4, %v6720_v25, %v6548_v57 }
0x2222   :  { %v6713_v5 = vadd.f32 %v6709_v37, %v6701_v9  ;;  %v6738_v13 = vadd.f32 %v6731_v59, %v6552_v39  ;;  %v6791_v9 = vld [vmem:[#allocation25] sm:$0x3]  ;;  %v6812_v37 = vrot.slane %v6807_v1, %v14006_v47 }
0x2223   :  { %v6724_v61 = vadd.f32 %v6719_v24, %v6712_v41  ;;  %v6739_v45 = vadd.f32 %v6735_v49, %v6553_v10  ;;  %v6796_v60 = vrot.slane %v6791_v9, %v14006_v47  ;;  %v6800_v18 = vrot.slane %v6791_v9, %v14008_v12 }
0x2224   :  { %v6725_v53 = vadd.f32 %v6721_v38, %v6713_v5  ;;  %v6816_v5 = vrot.slane %v6807_v1, %v14008_v12  ;;  %v7011_v1 = vld [vmem:[#allocation34 + $0x10] sm:$0xff] }
0x2225   :  { %v6740_v56 = vadd.f32 %v6731_v59, %v6724_v61 }
0x2226   :  { %v6741_v21 = vadd.f32 %v6735_v49, %v6725_v53 }
0x2227   :  { %v6742_v43 = vadd.f32 %v6740_v56, %v6738_v13 }
0x2228   :  { %v6749_v11 = vadd.f32 %v6741_v21, %v6739_v45 }
0x2229   :  { %v6743_v6 = vrot.slane %v6742_v43, 4 }
0x222a   :  { %v6750_v36 = vrot.slane %v6749_v11, 4 }
0x222b   :  { %v6744_v16 = vadd.f32 %v6743_v6, %v6742_v43 }
0x222c   :  { %v6751_v48 = vadd.f32 %v6750_v36, %v6749_v11 }
0x222d   :  { %v6745_v4 = vrot.slane %v6744_v16, 2 }
0x222e   :  { %v6752_v27 = vrot.slane %v6751_v48, 2 }
0x222f   :  { %v6746_v31 = vadd.f32 %v6745_v4, %v6744_v16 }
0x2230   :  { %v6753_v8 = vadd.f32 %v6752_v27, %v6751_v48 }
0x2231   :  { %v6747_v63 = vrot.slane %v6746_v31, 1 }
0x2232   :  { %v6754_v30 = vrot.slane %v6753_v8, 1 }
0x2233   :  { %v6748_v2 = vadd.f32 %v6747_v63, %v6746_v31 }
0x2234   :  { %v6755_v57 = vadd.f32 %v6754_v30, %v6753_v8 }
0x2235   :  { %v6757_v14 = vmul.f32 0.0625, %v6748_v2 }
0x2236   :  { %v6758_v42 = vmul.f32 0.0625, %v6755_v57 }
0x2237   :  { %v6759_v52 = vsub.f32 %v6738_v13, %v6757_v14  ;;  %v6761_v33 = vsub.f32 %v6740_v56, %v6757_v14 }
0x2238   :  { %v6760_v50 = vsub.f32 %v6739_v45, %v6758_v42  ;;  %v6762_v7 = vsub.f32 %v6741_v21, %v6758_v42 }
0x2239   :  { %v6763_v35 = vmul.f32 %v6759_v52, %v6759_v52  ;;  %v6765_v23 = vmul.f32 %v6761_v33, %v6761_v33 }
0x223a   :  { %v6764_v22 = vmul.f32 %v6760_v50, %v6760_v50  ;;  %v6766_v29 = vmul.f32 %v6762_v7, %v6762_v7 }
0x223b   :  { %v6767_v46 = vadd.f32 %v6765_v23, %v6763_v35  ;;  %v14009_v35 = vmov 0.0  }
0x223c   :  { %v6774_v44 = vadd.f32 %v6766_v29, %v6764_v22 }
0x223d   :  { %v6768_v20 = vrot.slane %v6767_v46, 4 }
0x223e   :  { %v6775_v54 = vrot.slane %v6774_v44, 4 }
0x223f   :  { %v6769_v19 = vadd.f32 %v6768_v20, %v6767_v46  ;;  %v7749_v46 = vld [vmem:[#allocation30] ss:$0 sm:$0xff] }
0x2240   :  { %v6776_v3 = vadd.f32 %v6775_v54, %v6774_v44  ;;  %v14010_v44 = vld [vmem:[#allocation83_spill] sm:$0xff] }
0x2241   :  { %v6770_v32 = vrot.slane %v6769_v19, 2 }
0x2242   :  { %v6777_v26 = vrot.slane %v6776_v3, 2 }
0x2243   :  { %v6771_v51 = vadd.f32 %v6770_v32, %v6769_v19 }
0x2244   :  { %v6778_v55 = vadd.f32 %v6777_v26, %v6776_v3  ;;  %v14011_v26 = vld [vmem:[#allocation84_spill] sm:$0xff] }
0x2245   :  { %v6772_v17 = vrot.slane %v6771_v51, 1 }
0x2246   :  { %v6779_v0 = vrot.slane %v6778_v55, 1 }
0x2247   :  { %v6773_v28 = vadd.f32 %v6772_v17, %v6771_v51  ;;  %v7010_v17 = vld [vmem:[#allocation34 + $0x8] sm:$0xff] }
0x2248   :  { %v6780_v15 = vadd.f32 %v6779_v0, %v6778_v55  ;;  %v7014_v0 = vld [vmem:[#allocation34 + $0x28] sm:$0xff] }
0x2249   :  { %v6781_v62 = vmul.f32 0.0625, %v6773_v28  ;;  %v7012_v28 = vld [vmem:[#allocation34 + $0x18] sm:$0xff] }
0x224a   :  { %v6782_v34 = vmul.f32 0.0625, %v6780_v15  ;;  %v10275_v15 = vpack.c.bf16 %v7014_v0, %v7010_v17  ;;  %v7048_v17 = vld [vmem:[#allocation34 + $0x138] sm:$0xff] }
0x224b   :  { %v6783_v25 = vadd.f32 1e-05, %v6781_v62  ;;  %v7016_v62 = vld [vmem:[#allocation34 + $0x38] sm:$0xff] }
0x224c   :  { %v6784_v40 = vadd.f32 1e-05, %v6782_v34  ;;  %v7009_v34 = vld [vmem:[#allocation34] sm:$0xff]  ;;  %10276 = vmatprep.subr.bf16.mxu0 %v10275_v15 }
0x224d   :  { %10724 = vrsqrt.f32 %v6783_v25  ;;  %v7013_v25 = vld [vmem:[#allocation34 + $0x20] sm:$0xff] }
0x224e   :  { %10726 = vrsqrt.f32 %v6784_v40  ;;  %v10307_v40 = vpack.c.bf16 %v7016_v62, %v7012_v28  ;;  %v10277_v9 = vpack.c.bf16 %v7013_v25, %v7009_v34  ;;  %v7041_v15 = vld [vmem:[#allocation34 + $0x100] sm:$0xff]  ;;  %v7043_v34 = vld [vmem:[#allocation34 + $0x110] sm:$0xff] }
0x224f   :  { %v7045_v62 = vld [vmem:[#allocation34 + $0x120] sm:$0xff] }
0x2250   :  { %10308 = vmatprep.subr.bf16.mxu1 %v10307_v40  ;;  %10278 = vmatpush1.bf16.msra.mxu0 %v10277_v9  ;;  %v10293_v25 = vpack.c.bf16 %v7045_v62, %v7041_v15  ;;  %v7047_v40 = vld [vmem:[#allocation34 + $0x130] sm:$0xff]  ;;  %v7050_v9 = vld [vmem:[#allocation34 + $0x148] sm:$0xff] }
0x2251   :  { %v7321_v62 = vld [vmem:[#allocation37 + $0x80] sm:$0xff] }
0x2257   :  { %v10725_v59 = vpop.eup %10724 }
0x2258   :  { %v10727_v39 = vpop.eup %10726  ;;  %v6787_v58 = vmul.f32 %v10725_v59, %v6759_v52  ;;  %v6789_v41 = vmul.f32 %v10725_v59, %v6761_v33  ;;  %v7018_v59 = vld [vmem:[#allocation34 + $0x48] sm:$0xff] }
0x2259   :  { %v6788_v10 = vmul.f32 %v10727_v39, %v6760_v50  ;;  %v6790_v24 = vmul.f32 %v10727_v39, %v6762_v7  ;;  %v7022_v39 = vld [vmem:[#allocation34 + $0x68] sm:$0xff] }
0x225a   :  { %v6803_v49 = vmul.f32 %v6796_v60, %v6787_v58  ;;  %v6805_v38 = vmul.f32 %v6796_v60, %v6789_v41  ;;  %v7015_v60 = vld [vmem:[#allocation34 + $0x30] sm:$0xff]  ;;  %v7020_v58 = vld [vmem:[#allocation34 + $0x58] sm:$0xff]  ;;  %v10279_v41 = vpack.c.bf16 %v7022_v39, %v7018_v59 }
0x225b   :  { %v6804_v61 = vmul.f32 %v6800_v18, %v6788_v10  ;;  %v6806_v53 = vmul.f32 %v6800_v18, %v6790_v24  ;;  %v10309_v18 = vpack.c.bf16 %v7015_v60, %v7011_v1  ;;  %v7021_v24 = vld [vmem:[#allocation34 + $0x60] sm:$0xff]  ;;  %v7054_v1 = vld [vmem:[#allocation34 + $0x168] sm:$0xff]  ;;  %v10325_v60 = vpack.c.bf16 %v7047_v40, %v7043_v34  ;;  %v7056_v39 = vld [vmem:[#allocation34 + $0x178] sm:$0xff] }
0x225c   :  { %v6819_v13 = vadd.f32 %v6812_v37, %v6803_v49  ;;  %v6821_v56 = vadd.f32 %v6812_v37, %v6805_v38  ;;  %v7024_v37 = vld [vmem:[#allocation34 + $0x78] sm:$0xff]  ;;  %v7019_v49 = vld [vmem:[#allocation34 + $0x50] sm:$0xff]  ;;  %10280 = vmatprep.subr.bf16.mxu0 %v10279_v41  ;;  %v10295_v59 = vpack.c.bf16 %v7054_v1, %v7050_v9  ;;  %v7053_v41 = vld [vmem:[#allocation34 + $0x160] sm:$0xff] }
0x225d   :  { %v6820_v45 = vadd.f32 %v6816_v5, %v6804_v61  ;;  %v6822_v21 = vadd.f32 %v6816_v5, %v6806_v53  ;;  %v10311_v10 = vpack.c.bf16 %v7024_v37, %v7020_v58  ;;  %v7017_v5 = vld [vmem:[#allocation34 + $0x40] sm:$0xff]  ;;  %v7023_v61 = vld [vmem:[#allocation34 + $0x70] sm:$0xff]  ;;  %v7026_v53 = vld [vmem:[#allocation34 + $0x88] sm:$0xff] }
0x225e   :  { %v7745_v43 = vmul.f32 -1.442695, %v6819_v13  ;;  %v7747_v36 = vmul.f32 -1.442695, %v6821_v56  ;;  %v10281_v38 = vpack.c.bf16 %v7021_v24, %v7017_v5  ;;  %v7049_v58 = vld [vmem:[#allocation34 + $0x140] sm:$0xff]  ;;  %v7055_v5 = vld [vmem:[#allocation34 + $0x170] sm:$0xff] }
0x225f   :  { %v7746_v11 = vmul.f32 -1.442695, %v6820_v45  ;;  %v7748_v6 = vmul.f32 -1.442695, %v6822_v21  ;;  %v10297_v24 = vpack.c.bf16 %v7053_v41, %v7049_v58  ;;  %v7322_v34 = vld [vmem:[#allocation37 + $0x88] sm:$0xff]  ;;  %v7305_v9 = vld [vmem:[#allocation37] sm:$0xff] }
0x2260   :  { %10728 = vpow2.f32 %v7745_v43  ;;  %v7032_v43 = vld [vmem:[#allocation34 + $0xb8] sm:$0xff]  ;;  %10282 = vmatpush1.bf16.msra.mxu0 %v10281_v38  ;;  %v7062_v38 = vld [vmem:[#allocation34 + $0x1a8] sm:$0xff] }
0x2261   :  { %10730 = vpow2.f32 %v7746_v11  ;;  %v7025_v11 = vld [vmem:[#allocation34 + $0x80] sm:$0xff]  ;;  %v7354_v40 = vld [vmem:[#allocation37 + $0x188] sm:$0xff]  ;;  %v7323_v58 = vld [vmem:[#allocation37 + $0x90] sm:$0xff] }
0x2262   :  { %10732 = vpow2.f32 %v7748_v6  ;;  %v7306_v1 = vld [vmem:[#allocation37 + $0x8] sm:$0xff] }
0x2263   :  { %10734 = vpow2.f32 %v7747_v36  ;;  %v7029_v36 = vld [vmem:[#allocation34 + $0xa0] sm:$0xff] }
0x226a   :  { %v10729_v16 = vpop.eup %10728 }
0x226b   :  { %v10731_v48 = vpop.eup %10730  ;;  %v6835_v4 = vadd.f32 1.0, %v10729_v16  ;;  %v7027_v16 = vld [vmem:[#allocation34 + $0x90] sm:$0xff] }
0x226c   :  { %v10733_v27 = vpop.eup %10732  ;;  %v6836_v31 = vadd.f32 1.0, %v10731_v48  ;;  %v7031_v48 = vld [vmem:[#allocation34 + $0xb0] sm:$0xff] }
0x226d   :  { %v10735_v8 = vpop.eup %10734  ;;  %10736 = vrcp.f32 %v6835_v4  ;;  %v6838_v63 = vadd.f32 1.0, %v10733_v27  ;;  %v10285_v4 = vpack.c.bf16 %v7029_v36, %v7025_v11  ;;  %v10317_v27 = vpack.c.bf16 %v7031_v48, %v7027_v16  ;;  %v7059_v11 = vld [vmem:[#allocation34 + $0x190] sm:$0xff]  ;;  %v7066_v36 = vld [vmem:[#allocation34 + $0x1c8] sm:$0xff]  ;;  %v7068_v48 = vld [vmem:[#allocation34 + $0x1d8] sm:$0xff] }
0x226e   :  { %10738 = vrcp.f32 %v6836_v31  ;;  %v6837_v30 = vadd.f32 1.0, %v10735_v8  ;;  %v7070_v16 = vld [vmem:[#allocation34 + $0x1e8] sm:$0xff] }
0x226f   :  { %10740 = vrcp.f32 %v6838_v63 }
0x2270   :  { %10742 = vrcp.f32 %v6837_v30 }
0x2277   :  { %v10737_v2 = vpop.eup %10736 }
0x2278   :  { %v10739_v57 = vpop.eup %10738  ;;  %v6847_v52 = vmul.f32 %v10737_v2, %v6819_v13  ;;  %v7030_v13 = vld [vmem:[#allocation34 + $0xa8] sm:$0xff] }
0x2279   :  { %v10741_v14 = vpop.eup %10740  ;;  %v6848_v42 = vmul.f32 %v10739_v57, %v6820_v45  ;;  %v10283_v45 = vpack.c.bf16 %v7030_v13, %v7026_v53 }
0x227a   :  { %v10743_v33 = vpop.eup %10742  ;;  %v6850_v50 = vmul.f32 %v10741_v14, %v6822_v21  ;;  %v7028_v21 = vld [vmem:[#allocation34 + $0x98] sm:$0xff] }
0x227b   :  { %6947 = vmatprep.mubr.f32.mxu1 %v6848_v42  ;;  %v6849_v7 = vmul.f32 %v10743_v33, %v6821_v56  ;;  %v10313_v56 = vpack.c.bf16 %v7023_v61, %v7019_v49  ;;  %v10315_v6 = vpack.c.bf16 %v7032_v43, %v7028_v21  ;;  %10284 = vmatprep.subr.bf16.mxu0 %v10283_v45  ;;  %v7038_v33 = vld [vmem:[#allocation34 + $0xe8] sm:$0xff]  ;;  %v7060_v61 = vld [vmem:[#allocation34 + $0x198] sm:$0xff]  ;;  %v7057_v45 = vld [vmem:[#allocation34 + $0x180] sm:$0xff] }
0x227c   :  { %6948 = vmatmul.mubr.f32.vlgmr.msra.gmra.mrb[62].mxu1 %v6847_v52  ;;  %10286 = vmatpush1.bf16.msra.mxu0 %v10285_v4  ;;  %v7034_v52 = vld [vmem:[#allocation34 + $0xc8] sm:$0xff]  ;;  %v7061_v21 = vld [vmem:[#allocation34 + $0x1a0] sm:$0xff]  ;;  %v7072_v4 = vld [vmem:[#allocation34 + $0x1f8] sm:$0xff] }
0x227d   :  { %6952 = vmatprep.mubr.f32.mxu1 %v6850_v50  ;;  %10310 = vmatpush1.bf16.msra.mxu1 %v10309_v18  ;;  %v7036_v50 = vld [vmem:[#allocation34 + $0xd8] sm:$0xff]  ;;  %v7058_v49 = vld [vmem:[#allocation34 + $0x188] sm:$0xff] }
0x227e   :  { %10312 = vmatprep.subr.bf16.mxu1 %v10311_v10  ;;  %v7052_v18 = vld [vmem:[#allocation34 + $0x158] sm:$0xff]  ;;  %v7051_v10 = vld [vmem:[#allocation34 + $0x150] sm:$0xff]  ;;  %v10299_v13 = vpack.c.bf16 %v7062_v38, %v7058_v49 }
0x227f   :  { %v10327_v37 = vpack.c.bf16 %v7056_v39, %v7052_v18  ;;  %v10329_v53 = vpack.c.bf16 %v7055_v5, %v7051_v10  ;;  %v7338_v18 = vld [vmem:[#allocation37 + $0x108] sm:$0xff]  ;;  %v7356_v10 = vld [vmem:[#allocation37 + $0x198] sm:$0xff]  ;;  %v7307_v5 = vld [vmem:[#allocation37 + $0x10] sm:$0xff] }
0x2280   :  { %6953 = vmatmul.mubr.f32.gmra.mrb[64].mxu1 %v6849_v7  ;;  %v10287_v7 = vpack.c.bf16 %v7038_v33, %v7034_v52  ;;  %v7071_v52 = vld [vmem:[#allocation34 + $0x1f0] sm:$0xff] }
0x2281   :  { %7236 = vmatprep.mubr.f32.mxu1 %v14009_v35  ;;  %10314 = vmatpush1.bf16.msra.mxu1 %v10313_v56  ;;  %v7064_v56 = vld [vmem:[#allocation34 + $0x1b8] sm:$0xff] }
0x2282   :  { %10316 = vmatprep.subr.bf16.mxu1 %v10315_v6  ;;  %10288 = vmatprep.subr.bf16.mxu0 %v10287_v7  ;;  %v10331_v43 = vpack.c.bf16 %v7064_v56, %v7060_v61  ;;  %v7063_v6 = vld [vmem:[#allocation34 + $0x1b0] sm:$0xff]  ;;  %v7325_v56 = vld [vmem:[#allocation37 + $0xa0] sm:$0xff] }
0x2283   :  { %v7339_v61 = vld [vmem:[#allocation37 + $0x110] sm:$0xff] }
0x2285   :  { %10318 = vmatpush1.bf16.msra.mxu1 %v10317_v27  ;;  %v10301_v27 = vpack.c.bf16 %v7061_v21, %v7057_v45  ;;  %v7326_v45 = vld [vmem:[#allocation37 + $0xa8] sm:$0xff]  ;;  %v7357_v21 = vld [vmem:[#allocation37 + $0x1a0] sm:$0xff] }
0x234f   :  { %v8331_v23 = vpop.f32.mrb[62].mxu1 }
0x2350   :  { %v8332_v22 = vpop.f32.mrb[63].mxu1 }
0x2351   :  { %v8333_v29 = vadd.f32 %v8332_v22, %v8331_v23  ;;  %v7040_v23 = vld [vmem:[#allocation34 + $0xf8] sm:$0xff]  ;;  %v7033_v22 = vld [vmem:[#allocation34 + $0xc0] sm:$0xff] }
0x2353   :  { %v6958_v20 = vadd.f32 %v8333_v29, %v14010_v44  ;;  %v8334_v54 = vpop.f32.mrb[64].mxu1  ;;  %v7037_v29 = vld [vmem:[#allocation34 + $0xe0] sm:$0xff] }
0x2354   :  { %v8335_v19 = vpop.f32.mrb[65].mxu1  ;;  %v10289_v44 = vpack.c.bf16 %v7037_v29, %v7033_v22 }
0x2355   :  { %v8336_v3 = vadd.f32 %v8335_v19, %v8334_v54  ;;  %v13672_v32 = vadd.f32 %v7749_v46, %v6958_v20  ;;  %v7035_v20 = vld [vmem:[#allocation34 + $0xd0] sm:$0xff]  ;;  %v7042_v19 = vld [vmem:[#allocation34 + $0x108] sm:$0xff] }
0x2356   :  { %v7039_v54 = vld [vmem:[#allocation34 + $0xf0] sm:$0xff]  ;;  %10290 = vmatpush1.bf16.msra.mxu0 %v10289_v44 }
0x2357   :  { %v6959_v51 = vadd.f32 %v8336_v3, %v14011_v26  ;;  %6969 = vadd.xlane.f32.xlu0 %v13672_v32  ;;  %v10321_v3 = vpack.c.bf16 %v7039_v54, %v7035_v20  ;;  %v7046_v26 = vld [vmem:[#allocation34 + $0x128] sm:$0xff]  ;;  %v7750_v54 = vld [vmem:[#allocation31] ss:$0 sm:$0xff] }
0x2358   :  { %v10291_v0 = vpack.c.bf16 %v7046_v26, %v7042_v19 }
0x2359   :  { %v13676_v55 = vadd.f32 %v7749_v46, %v6959_v51  ;;  %v10319_v46 = vpack.c.bf16 %v7040_v23, %v7036_v50  ;;  %v7044_v51 = vld [vmem:[#allocation34 + $0x118] sm:$0xff] }
0x235a   :  { %v10323_v28 = vpack.c.bf16 %v7048_v17, %v7044_v51  ;;  %10292 = vmatprep.subr.bf16.mxu0 %v10291_v0 }
0x235b   :  { %6971 = vadd.xlane.f32.xlu1 %v13676_v55  ;;  %10320 = vmatprep.subr.bf16.mxu1 %v10319_v46 }
0x235c   :  { %10322 = vmatpush1.bf16.msra.mxu1 %v10321_v3  ;;  %10294 = vmatpush1.bf16.msra.mxu0 %v10293_v25  ;;  %v7751_v3 = vld [vmem:[#allocation33] ss:$0 sm:$0xff]  ;;  %v7353_v25 = vld [vmem:[#allocation37 + $0x180] sm:$0xff] }
0x235d   :  { %10324 = vmatprep.subr.bf16.mxu1 %v10323_v28  ;;  %10296 = vmatprep.subr.bf16.mxu0 %v10295_v59  ;;  %v10341_v59 = vpack.c.bf16 %v7306_v1, %v7305_v9  ;;  %v7315_v9 = vld [vmem:[#allocation37 + $0x50] sm:$0xff] }
0x2360   :  { %10326 = vmatpush1.bf16.msra.mxu1 %v10325_v60  ;;  %10298 = vmatpush1.bf16.msra.mxu0 %v10297_v24  ;;  %v10371_v60 = vpack.c.bf16 %v7354_v40, %v7353_v25  ;;  %v7308_v24 = vld [vmem:[#allocation37 + $0x18] sm:$0xff] }
0x2361   :  { %10328 = vmatprep.subr.bf16.mxu1 %v10327_v37  ;;  %10300 = vmatprep.subr.bf16.mxu0 %v10299_v13  ;;  %v7355_v37 = vld [vmem:[#allocation37 + $0x190] sm:$0xff]  ;;  %v10345_v38 = vpack.c.bf16 %v7308_v24, %v7307_v5  ;;  %v7364_v40 = vld [vmem:[#allocation37 + $0x1d8] sm:$0xff]  ;;  %v7317_v5 = vld [vmem:[#allocation37 + $0x60] sm:$0xff] }
0x2362   :  { %v10375_v49 = vpack.c.bf16 %v7356_v10, %v7355_v37  ;;  %v7366_v10 = vld [vmem:[#allocation37 + $0x1e8] sm:$0xff] }
0x2363   :  { %v7318_v24 = vld [vmem:[#allocation37 + $0x68] sm:$0xff] }
0x2364   :  { %10330 = vmatpush1.bf16.msra.mxu1 %v10329_v53  ;;  %10302 = vmatpush1.bf16.msra.mxu0 %v10301_v27  ;;  %v7340_v53 = vld [vmem:[#allocation37 + $0x118] sm:$0xff]  ;;  %v7342_v27 = vld [vmem:[#allocation37 + $0x128] sm:$0xff] }
0x2365   :  { %10332 = vmatprep.subr.bf16.mxu1 %v10331_v43  ;;  %v10377_v13 = vpack.c.bf16 %v7340_v53, %v7339_v61  ;;  %v10347_v43 = vpack.c.bf16 %v7326_v45, %v7325_v56  ;;  %v7350_v61 = vld [vmem:[#allocation37 + $0x168] sm:$0xff]  ;;  %v7335_v53 = vld [vmem:[#allocation37 + $0xf0] sm:$0xff]  ;;  %v7368_v45 = vld [vmem:[#allocation37 + $0x1f8] sm:$0xff] }
0x2366   :  { %v7367_v56 = vld [vmem:[#allocation37 + $0x1f0] sm:$0xff] }
0x23e4   :  { %v6970_v31 = vpop.xlane.xlu0 %6969 }
0x23e5   :  { %v6973_v8 = vmul.f32 0.0078125, %v6970_v31  ;;  %v10333_v31 = vpack.c.bf16 %v7063_v6, %v7059_v11  ;;  %v7358_v11 = vld [vmem:[#allocation37 + $0x1a8] sm:$0xff]  ;;  %v7309_v6 = vld [vmem:[#allocation37 + $0x20] sm:$0xff] }
0x23e7   :  { %v13680_v63 = vsub.f32 %v13672_v32, %v6973_v8  ;;  %v10303_v8 = vpack.c.bf16 %v7070_v16, %v7066_v36  ;;  %10334 = vmatpush1.bf16.msra.mxu1 %v10333_v31  ;;  %v7310_v36 = vld [vmem:[#allocation37 + $0x28] sm:$0xff]  ;;  %v10379_v16 = vpack.c.bf16 %v7358_v11, %v7357_v21  ;;  %v10365_v21 = vpack.c.bf16 %v7318_v24, %v7317_v5 }
0x23e8   :  { %v6972_v30 = vpop.xlane.xlu1 %6971 }
0x23e9   :  { %v6974_v2 = vmul.f32 0.0078125, %v6972_v30  ;;  %v6977_v57 = vmul.f32 %v13680_v63, %v13680_v63  ;;  %v7065_v30 = vld [vmem:[#allocation34 + $0x1c0] sm:$0xff]  ;;  %10304 = vmatprep.subr.bf16.mxu0 %v10303_v8  ;;  %v7327_v8 = vld [vmem:[#allocation37 + $0xb0] sm:$0xff] }
0x23eb   :  { %v13685_v14 = vsub.f32 %v13676_v55, %v6974_v2  ;;  %6979 = vadd.xlane.f32.xlu0 %v6977_v57  ;;  %v7069_v2 = vld [vmem:[#allocation34 + $0x1e0] sm:$0xff]  ;;  %v10335_v57 = vpack.c.bf16 %v7072_v4, %v7068_v48  ;;  %v10349_v48 = vpack.c.bf16 %v7310_v36, %v7309_v6  ;;  %v7319_v6 = vld [vmem:[#allocation37 + $0x70] sm:$0xff] }
0x23ec   :  { %v10305_v33 = vpack.c.bf16 %v7069_v2, %v7065_v30  ;;  %v7341_v4 = vld [vmem:[#allocation37 + $0x120] sm:$0xff]  ;;  %v7328_v30 = vld [vmem:[#allocation37 + $0xb8] sm:$0xff]  ;;  %v7359_v2 = vld [vmem:[#allocation37 + $0x1b0] sm:$0xff] }
0x23ed   :  { %v6978_v42 = vmul.f32 %v13685_v14, %v13685_v14  ;;  %10336 = vmatprep.subr.bf16.mxu1 %v10335_v57  ;;  %v10381_v31 = vpack.c.bf16 %v7342_v27, %v7341_v4  ;;  %v10351_v57 = vpack.c.bf16 %v7328_v30, %v7327_v8  ;;  %v7320_v36 = vld [vmem:[#allocation37 + $0x78] sm:$0xff] }
0x23ee   :  { %10306 = vmatpush1.bf16.msra.mxu0 %v10305_v33  ;;  %v7312_v33 = vld [vmem:[#allocation37 + $0x38] sm:$0xff]  ;;  %v10369_v27 = vpack.c.bf16 %v7320_v36, %v7319_v6 }
0x23ef   :  { %6981 = vadd.xlane.f32.xlu1 %v6978_v42  ;;  %v7067_v42 = vld [vmem:[#allocation34 + $0x1d0] sm:$0xff]  ;;  %v7352_v4 = vld [vmem:[#allocation37 + $0x178] sm:$0xff] }
0x23f0   :  { %v10337_v50 = vpack.c.bf16 %v7071_v52, %v7067_v42  ;;  %v7360_v42 = vld [vmem:[#allocation37 + $0x1b8] sm:$0xff]  ;;  %v7311_v52 = vld [vmem:[#allocation37 + $0x30] sm:$0xff] }
0x23f1   :  { %v7073_v8 = vld [vmem:[#allocation36] sm:$0xf] }
0x23f2   :  { %10338 = vmatpush1.bf16.msra.mxu1 %v10337_v50  ;;  %v10383_v50 = vpack.c.bf16 %v7360_v42, %v7359_v2  ;;  %v7078_v30 = vrot.slane %v7073_v8, %v14006_v47  ;;  %v14012_v2 = vld [vmem:[#allocation79_spill] sm:$0xff]  ;;  %v7082_v42 = vrot.slane %v7073_v8, %v14008_v12 }
0x23f3   :  { %10372 = vmatprep.subr.bf16.mxu1 %v10371_v60  ;;  %v7316_v60 = vld [vmem:[#allocation37 + $0x58] sm:$0xff] }
0x2478   :  { %v6980_v7 = vpop.xlane.xlu0 %6979 }
0x2479   :  { %v6983_v23 = vmul.f32 0.0078125, %v6980_v7  ;;  %v10353_v7 = vpack.c.bf16 %v7312_v33, %v7311_v52  ;;  %v14013_v52 = vld [vmem:[#allocation81_spill] sm:$0xff] }
0x247a   :  { %v7090_v33 = vrot.slane %v7073_v8, %v14013_v52 }
0x247b   :  { %v6985_v22 = vadd.f32 1e-05, %v6983_v23  ;;  %v7343_v23 = vld [vmem:[#allocation37 + $0x130] sm:$0xff] }
0x247c   :  { %v6982_v29 = vpop.xlane.xlu1 %6981 }
0x247d   :  { %10744 = vrsqrt.f32 %v6985_v22  ;;  %v6984_v46 = vmul.f32 0.0078125, %v6982_v29  ;;  %v7344_v22 = vld [vmem:[#allocation37 + $0x138] sm:$0xff]  ;;  %v7329_v29 = vld [vmem:[#allocation37 + $0xc0] sm:$0xff] }
0x247f   :  { %v6986_v44 = vadd.f32 1e-05, %v6984_v46  ;;  %v10385_v46 = vpack.c.bf16 %v7344_v22, %v7343_v23 }
0x2481   :  { %10746 = vrsqrt.f32 %v6986_v44  ;;  %v7330_v44 = vld [vmem:[#allocation37 + $0xc8] sm:$0xff] }
0x2487   :  { %v10745_v20 = vpop.eup %10744 }
0x2488   :  { %v6989_v19 = vmul.f32 %v10745_v20, %v13680_v63  ;;  %v10339_v63 = vpack.c.bf16 %v7322_v34, %v7321_v62  ;;  %v7361_v20 = vld [vmem:[#allocation37 + $0x1c0] sm:$0xff]  ;;  %v7332_v62 = vld [vmem:[#allocation37 + $0xd8] sm:$0xff] }
0x248a   :  { %v6998_v26 = vmul.f32 %v7750_v54, %v6989_v19  ;;  %10340 = vmatprep.subr.bf16.mxu0 %v10339_v63  ;;  %v10355_v19 = vpack.c.bf16 %v7330_v44, %v7329_v29  ;;  %v7363_v63 = vld [vmem:[#allocation37 + $0x1d0] sm:$0xff] }
0x248b   :  { %v10747_v51 = vpop.eup %10746  ;;  %v10391_v1 = vpack.c.bf16 %v7364_v40, %v7363_v63 }
0x248c   :  { %v7007_v17 = vadd.f32 %v7751_v3, %v6998_v26  ;;  %v6990_v0 = vmul.f32 %v10747_v51, %v13685_v14  ;;  %v7337_v14 = vld [vmem:[#allocation37 + $0x100] sm:$0xff]  ;;  %v7314_v51 = vld [vmem:[#allocation37 + $0x48] sm:$0xff] }
0x248d   :  { %v10373_v39 = vpack.c.bf16 %v7338_v18, %v7337_v14  ;;  %v7313_v26 = vld [vmem:[#allocation37 + $0x40] sm:$0xff]  ;;  %v7348_v14 = vld [vmem:[#allocation37 + $0x158] sm:$0xff]  ;;  %v10361_v18 = vpack.c.bf16 %v7316_v60, %v7315_v9 }
0x248e   :  { %7160 = vmatmul.mubr.f32.vlgmr.msra.gmra.mrb[58].mxu0 %v7007_v17  ;;  %7237 = vmatmul.mubr.f32.vlgmr.msra.gmra.mrb[66].mxu1 %v7007_v17  ;;  %v6999_v28 = vmul.f32 %v7750_v54, %v6990_v0  ;;  %v7362_v54 = vld [vmem:[#allocation37 + $0x1c8] sm:$0xff]  ;;  %v7345_v17 = vld [vmem:[#allocation37 + $0x140] sm:$0xff]  ;;  %v10357_v0 = vpack.c.bf16 %v7314_v51, %v7313_v26 }
0x248f   :  { %7165 = vmatprep.mubr.f32.mxu0 %v14009_v35  ;;  %7242 = vmatprep.mubr.f32.mxu1 %v14009_v35  ;;  %v7324_v35 = vld [vmem:[#allocation37 + $0x98] sm:$0xff] }
0x2490   :  { %v7008_v15 = vadd.f32 %v7751_v3, %v6999_v28  ;;  %10342 = vmatpush3.bf16.msra.mxu0 %v10341_v59  ;;  %10374 = vmatpush3.bf16.msra.mxu1 %v10373_v39  ;;  %v10343_v41 = vpack.c.bf16 %v7324_v35, %v7323_v58  ;;  %v10387_v3 = vpack.c.bf16 %v7362_v54, %v7361_v20  ;;  %v7346_v28 = vld [vmem:[#allocation37 + $0x148] sm:$0xff]  ;;  %v7347_v59 = vld [vmem:[#allocation37 + $0x150] sm:$0xff]  ;;  %v7333_v39 = vld [vmem:[#allocation37 + $0xe0] sm:$0xff] }
0x2491   :  { %10376 = vmatprep.subr.bf16.mxu1 %v10375_v49  ;;  %v10389_v34 = vpack.c.bf16 %v7346_v28, %v7345_v17  ;;  %v7334_v58 = vld [vmem:[#allocation37 + $0xe8] sm:$0xff]  ;;  %v7365_v35 = vld [vmem:[#allocation37 + $0x1e0] sm:$0xff]  ;;  %v10393_v37 = vpack.c.bf16 %v7348_v14, %v7347_v59 }
0x2492   :  { %7166 = vmatmul.mubr.f32.gmra.mrb[60].mxu0 %v7008_v15  ;;  %7243 = vmatmul.mubr.f32.gmra.mrb[68].mxu1 %v7008_v15  ;;  %v7331_v15 = vld [vmem:[#allocation37 + $0xd0] sm:$0xff]  ;;  %v10395_v49 = vpack.c.bf16 %v7366_v10, %v7365_v35 }
0x2493   :  { %10344 = vmatprep.subr.bf16.mxu0 %v10343_v41  ;;  %v10359_v25 = vpack.c.bf16 %v7332_v62, %v7331_v15  ;;  %v10363_v41 = vpack.c.bf16 %v7334_v58, %v7333_v39 }
0x2494   :  { %10346 = vmatpush3.bf16.msra.mxu0 %v10345_v38  ;;  %10378 = vmatpush3.bf16.msra.mxu1 %v10377_v13  ;;  %v7349_v38 = vld [vmem:[#allocation37 + $0x160] sm:$0xff]  ;;  %v7336_v13 = vld [vmem:[#allocation37 + $0xf8] sm:$0xff] }
0x2495   :  { %10348 = vmatprep.subr.bf16.mxu0 %v10347_v43  ;;  %10380 = vmatprep.subr.bf16.mxu1 %v10379_v16  ;;  %v10397_v43 = vpack.c.bf16 %v7350_v61, %v7349_v38  ;;  %v10367_v11 = vpack.c.bf16 %v7336_v13, %v7335_v53  ;;  %v10399_v16 = vpack.c.bf16 %v7368_v45, %v7367_v56 }
0x2498   :  { %10350 = vmatpush3.bf16.msra.mxu0 %v10349_v48  ;;  %10382 = vmatpush3.bf16.msra.mxu1 %v10381_v31  ;;  %v7351_v48 = vld [vmem:[#allocation37 + $0x170] sm:$0xff] }
0x2499   :  { %10352 = vmatprep.subr.bf16.mxu0 %v10351_v57  ;;  %10384 = vmatprep.subr.bf16.mxu1 %v10383_v50  ;;  %v10401_v31 = vpack.c.bf16 %v7352_v4, %v7351_v48  ;;  %v7086_v57 = vrot.slane %v7073_v8, %v14012_v2 }
0x249c   :  { %10354 = vmatpush3.bf16.msra.mxu0 %v10353_v7  ;;  %10386 = vmatpush3.bf16.msra.mxu1 %v10385_v46 }
0x249d   :  { %10356 = vmatprep.subr.bf16.mxu0 %v10355_v19  ;;  %10388 = vmatprep.subr.bf16.mxu1 %v10387_v3 }
0x24a0   :  { %10358 = vmatpush3.bf16.msra.mxu0 %v10357_v0  ;;  %10390 = vmatpush3.bf16.msra.mxu1 %v10389_v34 }
0x24a1   :  { %10360 = vmatprep.subr.bf16.mxu0 %v10359_v25  ;;  %10392 = vmatprep.subr.bf16.mxu1 %v10391_v1 }
0x24a4   :  { %10362 = vmatpush3.bf16.msra.mxu0 %v10361_v18  ;;  %10394 = vmatpush3.bf16.msra.mxu1 %v10393_v37 }
0x24a5   :  { %10364 = vmatprep.subr.bf16.mxu0 %v10363_v41  ;;  %10396 = vmatprep.subr.bf16.mxu1 %v10395_v49 }
0x24a8   :  { %10366 = vmatpush3.bf16.msra.mxu0 %v10365_v21  ;;  %10398 = vmatpush3.bf16.msra.mxu1 %v10397_v43 }
0x24a9   :  { %10368 = vmatprep.subr.bf16.mxu0 %v10367_v11  ;;  %10400 = vmatprep.subr.bf16.mxu1 %v10399_v16 }
0x24ac   :  { %10370 = vmatpush3.bf16.msra.mxu0 %v10369_v27  ;;  %10402 = vmatpush3.bf16.msra.mxu1 %v10401_v31 }
0x2561   :  { %v7161_v50 = vpop.f32.mrb[58].mxu0  ;;  %v7238_v7 = vpop.f32.mrb[66].mxu1 }
0x2562   :  { %v7162_v23 = vadd.f32 %v7161_v50, %v7078_v30  ;;  %v7239_v22 = vadd.f32 %v7238_v7, %v7086_v57  ;;  %v7163_v29 = vpop.f32.mrb[59].mxu0  ;;  %v7240_v46 = vpop.f32.mrb[67].mxu1 }
0x2563   :  { %v7164_v44 = vadd.f32 %v7163_v29, %v7082_v42  ;;  %v7241_v20 = vadd.f32 %v7240_v46, %v7090_v33 }
0x2564   :  { %v7752_v54 = vmul.f32 -1.442695, %v7162_v23  ;;  %v7754_v19 = vmul.f32 -1.442695, %v7239_v22 }
0x2565   :  { %v7753_v3 = vmul.f32 -1.442695, %v7164_v44  ;;  %v7755_v26 = vmul.f32 -1.442695, %v7241_v20  ;;  %v7167_v51 = vpop.f32.mrb[60].mxu0  ;;  %v7244_v47 = vpop.f32.mrb[68].mxu1 }
0x2566   :  { %10748 = vpow2.f32 %v7752_v54  ;;  %v7168_v17 = vadd.f32 %v7167_v51, %v7078_v30  ;;  %v7245_v0 = vadd.f32 %v7244_v47, %v7086_v57  ;;  %v7169_v12 = vpop.f32.mrb[61].mxu0  ;;  %v7246_v28 = vpop.f32.mrb[69].mxu1  ;;  %v7760_v57 = vld [vmem:[#allocation39] ss:$0 sm:$0xff] }
0x2567   :  { %10750 = vpow2.f32 %v7754_v19  ;;  %v7170_v15 = vadd.f32 %v7169_v12, %v7082_v42  ;;  %v7247_v62 = vadd.f32 %v7246_v28, %v7090_v33 }
0x2568   :  { %10752 = vpow2.f32 %v7753_v3  ;;  %v7756_v34 = vmul.f32 -1.442695, %v7168_v17  ;;  %v7758_v25 = vmul.f32 -1.442695, %v7245_v0 }
0x2569   :  { %10754 = vpow2.f32 %v7755_v26  ;;  %v7757_v63 = vmul.f32 -1.442695, %v7170_v15  ;;  %v7759_v40 = vmul.f32 -1.442695, %v7247_v62 }
0x256a   :  { %10756 = vpow2.f32 %v7756_v34 }
0x256b   :  { %10758 = vpow2.f32 %v7758_v25 }
0x256c   :  { %10760 = vpow2.f32 %v7757_v63 }
0x256d   :  { %10762 = vpow2.f32 %v7759_v40 }
0x2570   :  { %v10749_v9 = vpop.eup %10748 }
0x2571   :  { %v10751_v1 = vpop.eup %10750  ;;  %v7273_v60 = vadd.f32 1.0, %v10749_v9 }
0x2572   :  { %v10753_v59 = vpop.eup %10752  ;;  %v7275_v14 = vadd.f32 1.0, %v10751_v1 }
0x2573   :  { %v10755_v18 = vpop.eup %10754  ;;  %10764 = vrcp.f32 %v7273_v60  ;;  %v7274_v39 = vadd.f32 1.0, %v10753_v59 }
0x2574   :  { %v10757_v58 = vpop.eup %10756  ;;  %10766 = vrcp.f32 %v7275_v14  ;;  %v7276_v35 = vadd.f32 1.0, %v10755_v18  ;;  %v7761_v14 = vld [vmem:[#allocation40] ss:$0 sm:$0xff] }
0x2575   :  { %v10759_v37 = vpop.eup %10758  ;;  %10768 = vrcp.f32 %v7274_v39  ;;  %v7277_v41 = vadd.f32 1.0, %v10757_v58  ;;  %v7762_v39 = vld [vmem:[#allocation42] ss:$0 sm:$0xff] }
0x2576   :  { %v10761_v10 = vpop.eup %10760  ;;  %10770 = vrcp.f32 %v7276_v35  ;;  %v7279_v5 = vadd.f32 1.0, %v10759_v37 }
0x2577   :  { %v10763_v24 = vpop.eup %10762  ;;  %10772 = vrcp.f32 %v7277_v41  ;;  %v7278_v49 = vadd.f32 1.0, %v10761_v10 }
0x2578   :  { %10774 = vrcp.f32 %v7279_v5  ;;  %v7280_v38 = vadd.f32 1.0, %v10763_v24 }
0x2579   :  { %10776 = vrcp.f32 %v7278_v49 }
0x257a   :  { %10778 = vrcp.f32 %v7280_v38 }
0x257d   :  { %v10765_v61 = vpop.eup %10764 }
0x257e   :  { %v10767_v53 = vpop.eup %10766  ;;  %v7297_v43 = vmul.f32 %v10765_v61, %v7162_v23 }
0x257f   :  { %v10769_v13 = vpop.eup %10768  ;;  %v7299_v36 = vmul.f32 %v10767_v53, %v7239_v22 }
0x2580   :  { %v10771_v56 = vpop.eup %10770  ;;  %v7298_v45 = vmul.f32 %v10769_v13, %v7164_v44 }
0x2581   :  { %v10773_v21 = vpop.eup %10772  ;;  %v7300_v11 = vmul.f32 %v10771_v56, %v7241_v20 }
0x2582   :  { %v10775_v6 = vpop.eup %10774  ;;  %7440 = vmatprep.mubr.f32.mxu0 %v7298_v45  ;;  %v7301_v27 = vmul.f32 %v10773_v21, %v7168_v17 }
0x2583   :  { %v10777_v16 = vpop.eup %10776  ;;  %7515 = vmatprep.mubr.f32.mxu1 %v7300_v11  ;;  %7441 = vmatmul.mubr.f32.vlgmr.msra.gmra.mrb[62].mxu0 %v7297_v43  ;;  %v7303_v8 = vmul.f32 %v10775_v6, %v7245_v0 }
0x2584   :  { %v10779_v48 = vpop.eup %10778  ;;  %v7302_v4 = vmul.f32 %v10777_v16, %v7170_v15  ;;  %7516 = vmatmul.mubr.f32.vlgmr.msra.gmra.mrb[70].mxu1 %v7299_v36 }
0x2585   :  { %v7304_v31 = vmul.f32 %v10779_v48, %v7247_v62 }
0x2586   :  { %7445 = vmatprep.mubr.f32.mxu0 %v7302_v4 }
0x2587   :  { %7520 = vmatprep.mubr.f32.mxu1 %v7304_v31  ;;  %7446 = vmatmul.mubr.f32.gmra.mrb[64].mxu0 %v7301_v27 }
0x2588   :  { %7521 = vmatmul.mubr.f32.gmra.mrb[72].mxu1 %v7303_v8 }
0x2656   :  { %v8369_v30 = vpop.f32.mrb[62].mxu0 }
0x2657   :  { %v8407_v2 = vpop.f32.mrb[70].mxu1  ;;  %v8370_v42 = vpop.f32.mrb[63].mxu0 }
0x2658   :  { %v8371_v52 = vadd.f32 %v8370_v42, %v8369_v30  ;;  %v8408_v33 = vpop.f32.mrb[71].mxu1 }
0x2659   :  { %v8409_v50 = vadd.f32 %v8408_v33, %v8407_v2 }
0x265a   :  { %v7443_v7 = vadd.f32 %v8371_v52, %v7760_v57  ;;  %v8372_v23 = vpop.f32.mrb[64].mxu0 }
0x265b   :  { %v8410_v22 = vpop.f32.mrb[72].mxu1  ;;  %v8373_v29 = vpop.f32.mrb[65].mxu0 }
0x265c   :  { %v7518_v46 = vadd.f32 %v8409_v50, %v7443_v7  ;;  %v8374_v44 = vadd.f32 %v8373_v29, %v8372_v23  ;;  %v8411_v20 = vpop.f32.mrb[73].mxu1 }
0x265d   :  { %v8412_v54 = vadd.f32 %v8411_v20, %v8410_v22 }
0x265e   :  { %v7526_v19 = vmul.f32 0.5, %v7518_v46  ;;  %v7448_v3 = vadd.f32 %v8374_v44, %v7760_v57 }
0x2660   :  { %v7523_v26 = vadd.f32 %v8412_v54, %v7448_v3  ;;  %v7528_v51 = vadd.f32 %v7526_v19, %v13672_v32 }
0x2662   :  { %v7527_v47 = vmul.f32 0.5, %v7523_v26  ;;  %7530 = vadd.xlane.f32.xlu0 %v7528_v51 }
0x2664   :  { %v7529_v17 = vadd.f32 %v7527_v47, %v13676_v55 }
0x2666   :  { %7532 = vadd.xlane.f32.xlu1 %v7529_v17 }
0x26ef   :  { %v7531_v0 = vpop.xlane.xlu0 %7530 }
0x26f0   :  { %v7534_v12 = vmul.f32 0.0078125, %v7531_v0 }
0x26f2   :  { %v7536_v28 = vsub.f32 %v7528_v51, %v7534_v12 }
0x26f3   :  { %v7533_v15 = vpop.xlane.xlu1 %7532 }
0x26f4   :  { %v7535_v62 = vmul.f32 0.0078125, %v7533_v15  ;;  %v7538_v34 = vmul.f32 %v7536_v28, %v7536_v28 }
0x26f6   :  { %v7537_v25 = vsub.f32 %v7529_v17, %v7535_v62  ;;  %7540 = vadd.xlane.f32.xlu0 %v7538_v34 }
0x26f8   :  { %v7539_v63 = vmul.f32 %v7537_v25, %v7537_v25 }
0x26fa   :  { %7542 = vadd.xlane.f32.xlu1 %v7539_v63 }
0x2783   :  { %v7541_v40 = vpop.xlane.xlu0 %7540 }
0x2784   :  { %v7544_v9 = vmul.f32 0.0078125, %v7541_v40 }
0x2786   :  { %v7546_v1 = vadd.f32 1e-05, %v7544_v9 }
0x2787   :  { %v7543_v32 = vpop.xlane.xlu1 %7542 }
0x2788   :  { %10780 = vrsqrt.f32 %v7546_v1  ;;  %v7545_v60 = vmul.f32 0.0078125, %v7543_v32 }
0x278a   :  { %v7547_v55 = vadd.f32 1e-05, %v7545_v60 }
0x278c   :  { %10782 = vrsqrt.f32 %v7547_v55 }
0x2792   :  { %v10781_v59 = vpop.eup %10780 }
0x2793   :  { %v7550_v18 = vmul.f32 %v10781_v59, %v7536_v28 }
0x2795   :  { %v7559_v58 = vmul.f32 %v7761_v14, %v7550_v18 }
0x2796   :  { %v10783_v35 = vpop.eup %10782 }
0x2797   :  { %v7568_v37 = vadd.f32 %v7762_v39, %v7559_v58  ;;  %v7551_v41 = vmul.f32 %v10783_v35, %v7537_v25 }
0x2799   :  { %7570 = vst [vmem:[%s11679_s8] sm:$0xff] %v7568_v37  ;;  %v7560_v10 = vmul.f32 %v7761_v14, %v7551_v41 }
0x279b   :  { %v7569_v5 = vadd.f32 %v7762_v39, %v7560_v10 }
0x279d   :  { %7571 = vst [vmem:[%s11679_s8 + $0x8] sm:$0xff] %v7569_v5 }
0x279e   :  { %7580 = vsyncpa [#allocation3], 1 }
0x279f   :  { %7581 = vsyncpa [#allocation5], 1 }
0x27a0   :  { %7582 = vsyncpa [#allocation8], 1 }
0x27a1   :  { %7583 = vsyncpa [#allocation11], 1 }
0x27a2   :  { %7584 = vsyncpa [#allocation14], 1 }
0x27a3   :  { %7585 = vsyncpa [#allocation17], 1 }
0x27a4   :  { %7586 = vsyncpa [#allocation20], 1 }
0x27a5   :  { %7587 = vsyncpa [#allocation23], 1 }
0x27a6   :  { %7588 = vsyncpa [#allocation26], 1 }
0x27a7   :  { %7589 = vsyncpa [#allocation29], 1 }
0x27a8   :  { %7590 = vsyncpa [#allocation32], 1 }
0x27a9   :  { %7591 = vsyncpa [#allocation35], 1 }
0x27aa   :  { %7592 = vsyncpa [#allocation38], 1 }
0x27ab   :  { %7593 = vsyncpa [#allocation41], 1 }

</bundles_post_ra>
